<compile_context>
chip_gen: v7x
topology: tpu7x:2x2x1
jax: 0.10.0
libtpu: 0.0.40
codegen_flags: <defaults>
</compile_context>

<pallas_src>
import numpy as np
import jax
import jax.numpy as jnp
from jax.experimental import pallas as pl
from jax.experimental.pallas import tpu as pltpu

jax.config.update("jax_default_matmul_precision", "highest")

# ---------------- configuration (small shapes consistent with the module) --------------
DIM = 32          # embedding dim
NUM_HEADS = 4
H_RATIO = 0.5
KSIZE = 3
SR = 2            # sr_ratio (pool kernel / upsample factor)
B = 2
H = W = 8
N = H * W         # sequence length (perfect square)
H_DIM = int(DIM * H_RATIO)
L_DIM = DIM - H_DIM
DH = L_DIM // NUM_HEADS
HS, WS = H // SR, W // SR
NS = HS * WS
SCALE = DIM ** (-0.5)
EPS = 1e-5
PAD = 2 * W       # sublane-aligned zero padding (>= W+1) for the dwconv scratch


# ---------------- bilinear interpolation matrix (PyTorch align_corners=False) ----------
def bilinear_matrix(out_size, in_size):
    scale = in_size / out_size
    M = np.zeros((out_size, in_size), np.float32)
    for i in range(out_size):
        src = max((i + 0.5) * scale - 0.5, 0.0)
        i0 = min(int(np.floor(src)), in_size - 1)
        i1 = min(i0 + 1, in_size - 1)
        lam = src - i0
        M[i, i0] += 1.0 - lam
        M[i, i1] += lam
    return M


def pool_corner_matrix():
    """(SR*SR*NS, N) 0/1 matrix: rows [j*NS:(j+1)*NS] pick corner j of each SRxSR window."""
    S = np.zeros((SR * SR * NS, N), np.float32)
    corners = [(a, b) for a in range(SR) for b in range(SR)]
    for j, (di, dj) in enumerate(corners):
        for ho in range(HS):
            for wo in range(WS):
                S[j * NS + ho * WS + wo, (SR * ho + di) * W + (SR * wo + dj)] = 1.0
    return S


# ---------------- in-kernel GELU --------------------------------------------------------
def _gelu_tpu(x):
    # TODO(synk): PyTorch nn.GELU() is exact-erf; tanh approximation (max abs err ~5e-4)
    # is used since it lowers to a single EUP op and is well within the 1e-2 tolerance.
    return 0.5 * x * (1.0 + jnp.tanh(0.7978845608028654 * (x + 0.044715 * x * x * x)))


# ---------------- fused Pallas kernel ----------------------------------------------------
def _lea_fused_kernel(x_ref, Wv_ref, w1_ref, b1_ref, w2_ref, b2_ref,
                      W3_ref, b3_ref, wv_ref, bv_ref, Wp_ref, bp_ref,
                      Ut_ref, Uup_ref, Spool_ref, o_ref, xpad_ref):
    f32 = jnp.float32
    x = x_ref[0]                                             # (N, DIM)
    x_high_in = x[:, :H_DIM]                                 # x_low split is unused upstream

    # proj_v (qkv_bias=False)
    v_seq = jnp.dot(x_high_in, Wv_ref[...], preferred_element_type=f32)   # (N, L_DIM)

    # zero the padded scratch once; its data region is fully rewritten by each dwconv call
    xpad_ref[...] = jnp.zeros((N + 2 * PAD, L_DIM), f32)

    # w-coordinate masks that kill image-row wraparound for horizontal taps
    w_idx = jax.lax.broadcasted_iota(jnp.int32, (N, L_DIM), 0) % W
    not_left_edge = w_idx > 0            # neighbor at w-1 is valid
    not_right_edge = w_idx < (W - 1)     # neighbor at w+1 is valid

    def dwconv_bn(xin, w9_ref, bias_ref, act_in):
        xv = _gelu_tpu(xin) if act_in else xin               # gelu(0)==0 keeps padding valid
        xpad_ref[pl.ds(PAD, N), :] = xv
        w9 = w9_ref[...]                                     # (9, L_DIM), BN scale folded in
        acc = jnp.zeros((N, L_DIM), f32)
        for a in (-1, 0, 1):
            for bb in (-1, 0, 1):
                tap = (a + 1) * KSIZE + (bb + 1)
                sh = xpad_ref[pl.ds(PAD + a * W + bb, N), :]
                if bb == -1:
                    sh = jnp.where(not_left_edge, sh, 0.0)
                elif bb == 1:
                    sh = jnp.where(not_right_edge, sh, 0.0)
                acc = acc + sh * w9[tap:tap + 1, :]
        return acc + bias_ref[...]                           # (1, L_DIM) folded BN shift

    Spool = Spool_ref[...]                                   # (SR*SR*NS, N)

    def pool_2x2(t):
        p = jnp.dot(Spool, t, preferred_element_type=f32)    # (SR*SR*NS, L_DIM)
        corners = [p[j * NS:(j + 1) * NS, :] for j in range(SR * SR)]
        s = corners[0]
        mx = corners[0]
        for c in corners[1:]:
            s = s + c
            mx = jnp.maximum(mx, c)
        return s * (1.0 / (SR * SR)), mx

    c1 = dwconv_bn(v_seq, w1_ref, b1_ref, act_in=False)      # conv1 + bn1
    q_avg, q_max = pool_2x2(c1)                              # (NS, L_DIM) each
    c2 = dwconv_bn(c1, w2_ref, b2_ref, act_in=True)          # gelu -> conv2 + bn2
    k_avg, k_max = pool_2x2(c2)

    # conv3 (1x1) + bn3 + gelu  -> high-frequency branch output
    x_high_seq = _gelu_tpu(
        jnp.dot(c2, W3_ref[...], preferred_element_type=f32) + b3_ref[...])   # (N, H_DIM)

    # pooled attention (per head, unrolled): softmax(upsample(q k^T) * scale) @ v
    Ut = Ut_ref[...]                                         # (NS, N)  key-upsample^T
    head_out = []
    for h in range(NUM_HEADS):
        c0 = h * DH
        q_h = jnp.concatenate([q_avg[:, c0:c0 + DH], q_max[:, c0:c0 + DH]], axis=-1)
        k_h = jnp.concatenate([k_avg[:, c0:c0 + DH], k_max[:, c0:c0 + DH]], axis=-1)
        v_h = v_seq[:, c0:c0 + DH]                           # (N, DH)
        s = jax.lax.dot_general(q_h, k_h, (((1,), (1,)), ((), ())),
                                preferred_element_type=f32)  # (NS, NS), no transpose op
        a = jnp.dot(s, Ut, preferred_element_type=f32) * SCALE       # (NS, N)
        a = a - jnp.max(a, axis=-1, keepdims=True)
        p = jnp.exp(a)
        p = p / jnp.sum(p, axis=-1, keepdims=True)
        head_out.append(jnp.dot(p, v_h, preferred_element_type=f32))  # (NS, DH)
    x_low_small = jnp.concatenate(head_out, axis=-1)         # (NS, L_DIM)

    # bilinear v_upsample as one matmul, then v_conv + v_bn
    x_low_up = jnp.dot(Uup_ref[...], x_low_small, preferred_element_type=f32)  # (N, L_DIM)
    x_low_seq = dwconv_bn(x_low_up, wv_ref, bv_ref, act_in=False)

    # concat + final projection (attn_drop / proj_drop are identity, p=0)
    xcat = jnp.concatenate([x_high_seq, x_low_seq], axis=-1)  # (N, DIM)
    o_ref[0] = jnp.dot(xcat, Wp_ref[...], preferred_element_type=f32) + bp_ref[...]


def lea_forward_pallas(x, P):
    Bq = x.shape[0]

    def const_spec(arr):
        return pl.BlockSpec(arr.shape, lambda b: (0,) * arr.ndim)

    weights = [P["Wv_t"], P["w1_9"], P["b1"], P["w2_9"], P["b2"], P["W3_t"], P["b3"],
               P["wv_9"], P["bv"], P["Wp_t"], P["bp"], P["U_t"], P["U_up"], P["Spool"]]
    return pl.pallas_call(
        _lea_fused_kernel,
        grid=(Bq,),
        in_specs=[pl.BlockSpec((1, N, DIM), lambda b: (b, 0, 0))]
                 + [const_spec(w) for w in weights],
        out_specs=pl.BlockSpec((1, N, DIM), lambda b: (b, 0, 0)),
        out_shape=jax.ShapeDtypeStruct((Bq, N, DIM), jnp.float32),
        scratch_shapes=[pltpu.VMEM((N + 2 * PAD, L_DIM), jnp.float32)],
        compiler_params=pltpu.CompilerParams(dimension_semantics=("parallel",)),
    )(x, *weights)


# ---------------- parameters (deterministic, synthetic) ---------------------------------
def init_params(key):
    ks = jax.random.split(key, 12)

    def nrm(k, shape, s=0.2):
        return s * jax.random.normal(k, shape, jnp.float32)

    def bn(k, c):
        a, b_, c_, d = jax.random.split(k, 4)
        gamma = 1.0 + 0.1 * jax.random.normal(a, (c,), jnp.float32)
        beta = 0.1 * jax.random.normal(b_, (c,), jnp.float32)
        mean = 0.1 * jax.random.normal(c_, (c,), jnp.float32)
        var = 1.0 + 0.1 * jax.random.uniform(d, (c,), jnp.float32)
        return gamma, beta, mean, var

    return dict(
        Wv=nrm(ks[0], (L_DIM, H_DIM)),              # proj_v.weight (out,in), qkv_bias=False
        w1=nrm(ks[1], (KSIZE, KSIZE, L_DIM)), bn1=bn(ks[2], L_DIM),
        w2=nrm(ks[3], (KSIZE, KSIZE, L_DIM)), bn2=bn(ks[4], L_DIM),
        W3=nrm(ks[5], (H_DIM, L_DIM)), b3=nrm(ks[6], (H_DIM,)), bn3=bn(ks[7], H_DIM),
        wv=nrm(ks[8], (KSIZE, KSIZE, L_DIM)), vbn=bn(ks[9], L_DIM),
        Wp=nrm(ks[10], (DIM, DIM)), bp=nrm(ks[11], (DIM,)),
    )


def fold_params(R):
    def fold_bn(p):
        g, b, m, v = p
        s = g / jnp.sqrt(v + EPS)
        return s, b - m * s

    s1, t1 = fold_bn(R["bn1"])
    s2, t2 = fold_bn(R["bn2"])
    s3, t3 = fold_bn(R["bn3"])
    sv, tv = fold_bn(R["vbn"])
    U = np.kron(bilinear_matrix(H, HS), bilinear_matrix(W, WS)).astype(np.float32)  # (N, NS)
    return dict(
        Wv_t=R["Wv"].T,
        w1_9=R["w1"].reshape(KSIZE * KSIZE, L_DIM) * s1[None, :], b1=t1.reshape(1, L_DIM),
        w2_9=R["w2"].reshape(KSIZE * KSIZE, L_DIM) * s2[None, :], b2=t2.reshape(1, L_DIM),
        W3_t=(R["W3"] * s3[:, None]).T, b3=(R["b3"] * s3 + t3).reshape(1, H_DIM),
        wv_9=R["wv"].reshape(KSIZE * KSIZE, L_DIM) * sv[None, :], bv=tv.reshape(1, L_DIM),
        Wp_t=R["Wp"].T, bp=R["bp"].reshape(1, DIM),
        U_t=jnp.asarray(U.T), U_up=jnp.asarray(U),
        Spool=jnp.asarray(pool_corner_matrix()),
    )


# ---------------- pure-JAX reference (independent check) --------------------------------
def forward_ref(x, R):
    Bq = x.shape[0]

    def dwconv(t, w33c):
        return jax.lax.conv_general_dilated(
            t, w33c[:, :, None, :], (1, 1), "SAME",
            dimension_numbers=("NHWC", "HWIO", "NHWC"),
            feature_group_count=t.shape[-1])

    def bn_apply(t, p):
        g, b, m, v = p
        return (t - m) * (g / jnp.sqrt(v + EPS)) + b

    def gelu(t):
        return 0.5 * t * (1.0 + jax.scipy.special.erf(t * 0.7071067811865476))

    def avgp(t):
        s = jax.lax.reduce_window(t, 0.0, jax.lax.add, (1, SR, SR, 1), (1, SR, SR, 1), "VALID")
        return s / float(SR * SR)

    def maxp(t):
        return jax.lax.reduce_window(t, -jnp.inf, jax.lax.max, (1, SR, SR, 1), (1, SR, SR, 1), "VALID")

    x_high = x[..., :H_DIM]
    v_seq = jnp.einsum("bnk,ck->bnc", x_high, R["Wv"])
    xh = v_seq.reshape(Bq, H, W, L_DIM)
    c1 = bn_apply(dwconv(xh, R["w1"]), R["bn1"])
    q1, q2 = avgp(c1), maxp(c1)
    c2 = bn_apply(dwconv(gelu(c1), R["w2"]), R["bn2"])
    k1, k2 = avgp(c2), maxp(c2)
    c3 = gelu(bn_apply(jnp.einsum("bhwk,ck->bhwc", c2, R["W3"]) + R["b3"], R["bn3"]))
    x_high_seq = c3.reshape(Bq, N, H_DIM)

    def heads(p):
        return p.reshape(Bq, NS, NUM_HEADS, DH).transpose(0, 2, 1, 3)

    q = jnp.concatenate([heads(q1), heads(q2)], axis=-1)
    k = jnp.concatenate([heads(k1), heads(k2)], axis=-1)
    vv = v_seq.reshape(Bq, N, NUM_HEADS, DH).transpose(0, 2, 1, 3)

    Wr = jnp.asarray(bilinear_matrix(H, HS))
    Wc = jnp.asarray(bilinear_matrix(W, WS))
    U = jnp.asarray(np.kron(bilinear_matrix(H, HS), bilinear_matrix(W, WS)))
    s = jnp.einsum("bhid,bhjd->bhij", q, k)
    attn = jax.nn.softmax(jnp.einsum("bhij,nj->bhin", s, U) * SCALE, axis=-1)
    xl = jnp.einsum("bhin,bhnd->bhid", attn, vv)
    xl = xl.reshape(Bq, NUM_HEADS, HS, WS, DH).transpose(0, 2, 3, 1, 4).reshape(Bq, HS, WS, L_DIM)
    xl = jnp.einsum("hp,wq,bpqc->bhwc", Wr, Wc, xl)
    xl = bn_apply(dwconv(xl, R["wv"]), R["vbn"])
    x_low_seq = xl.reshape(Bq, N, L_DIM)

    xcat = jnp.concatenate([x_high_seq, x_low_seq], axis=-1)
    return jnp.einsum("bnk,ck->bnc", xcat, R["Wp"]) + R["bp"]


# ---------------- main -------------------------------------------------------------------
if __name__ == "__main__":
    key = jax.random.PRNGKey(0)
    kx, kp = jax.random.split(key)
    x = jax.random.normal(kx, (B, N, DIM), jnp.float32)

    R = init_params(kp)
    P = fold_params(R)

    out = jax.jit(lea_forward_pallas)(x, P)
    out = jax.block_until_ready(out)

    ref = jax.jit(forward_ref)(x, R)
    ref = jax.block_until_ready(ref)

    assert out.shape == (B, N, DIM)
    assert bool(jnp.all(jnp.isfinite(out)))
    assert np.allclose(np.asarray(out), np.asarray(ref), atol=1e-2, rtol=1e-2)
    print("KERNEL_OK")
</pallas_src>

<mosaic_0001>
module attributes {stable_mosaic.version = 11 : i64} {
  func.func @_lea_fused_kernel(%arg0: i32, %arg1: memref<1x64x32xf32, #tpu.memory_space<vmem>>, %arg2: memref<16x16xf32, #tpu.memory_space<vmem>>, %arg3: memref<9x16xf32, #tpu.memory_space<vmem>>, %arg4: memref<1x16xf32, #tpu.memory_space<vmem>>, %arg5: memref<9x16xf32, #tpu.memory_space<vmem>>, %arg6: memref<1x16xf32, #tpu.memory_space<vmem>>, %arg7: memref<16x16xf32, #tpu.memory_space<vmem>>, %arg8: memref<1x16xf32, #tpu.memory_space<vmem>>, %arg9: memref<9x16xf32, #tpu.memory_space<vmem>>, %arg10: memref<1x16xf32, #tpu.memory_space<vmem>>, %arg11: memref<32x32xf32, #tpu.memory_space<vmem>>, %arg12: memref<1x32xf32, #tpu.memory_space<vmem>>, %arg13: memref<16x64xf32, #tpu.memory_space<vmem>>, %arg14: memref<64x16xf32, #tpu.memory_space<vmem>>, %arg15: memref<64x64xf32, #tpu.memory_space<vmem>>, %arg16: memref<1x64x32xf32, #tpu.memory_space<vmem>>, %arg17: memref<96x16xf32, #tpu.memory_space<vmem>>) attributes {dimension_semantics = [#tpu.dimension_semantics<parallel>], iteration_bounds = array<i64: 2>, scalar_prefetch = 0 : i64, scratch_operands = 1 : i64, tpu.core_type = #tpu.core_type<tc>, window_params = [{transform_indices = @transform_0, window_bounds = array<i64: 1, 64, 32>}, {pipeline_mode = #tpu.pipeline_mode<synchronous>, transform_indices = @transform_1, window_bounds = array<i64: 16, 16>}, {pipeline_mode = #tpu.pipeline_mode<synchronous>, transform_indices = @transform_2, window_bounds = array<i64: 9, 16>}, {pipeline_mode = #tpu.pipeline_mode<synchronous>, transform_indices = @transform_3, window_bounds = array<i64: 1, 16>}, {pipeline_mode = #tpu.pipeline_mode<synchronous>, transform_indices = @transform_4, window_bounds = array<i64: 9, 16>}, {pipeline_mode = #tpu.pipeline_mode<synchronous>, transform_indices = @transform_5, window_bounds = array<i64: 1, 16>}, {pipeline_mode = #tpu.pipeline_mode<synchronous>, transform_indices = @transform_6, window_bounds = array<i64: 16, 16>}, {pipeline_mode = #tpu.pipeline_mode<synchronous>, transform_indices = @transform_7, window_bounds = array<i64: 1, 16>}, {pipeline_mode = #tpu.pipeline_mode<synchronous>, transform_indices = @transform_8, window_bounds = array<i64: 9, 16>}, {pipeline_mode = #tpu.pipeline_mode<synchronous>, transform_indices = @transform_9, window_bounds = array<i64: 1, 16>}, {pipeline_mode = #tpu.pipeline_mode<synchronous>, transform_indices = @transform_10, window_bounds = array<i64: 32, 32>}, {pipeline_mode = #tpu.pipeline_mode<synchronous>, transform_indices = @transform_11, window_bounds = array<i64: 1, 32>}, {pipeline_mode = #tpu.pipeline_mode<synchronous>, transform_indices = @transform_12, window_bounds = array<i64: 16, 64>}, {pipeline_mode = #tpu.pipeline_mode<synchronous>, transform_indices = @transform_13, window_bounds = array<i64: 64, 16>}, {pipeline_mode = #tpu.pipeline_mode<synchronous>, transform_indices = @transform_14, window_bounds = array<i64: 64, 64>}, {transform_indices = @transform_15, window_bounds = array<i64: 1, 64, 32>}]} {
    %c0 = arith.constant 0 : index
    %c0_0 = arith.constant 0 : index
    %c0_1 = arith.constant 0 : index
    %0 = vector.load %arg1[%c0, %c0_0, %c0_1] : memref<1x64x32xf32, #tpu.memory_space<vmem>>, vector<1x64x32xf32>
    %1 = vector.shape_cast %0 : vector<1x64x32xf32> to vector<64x32xf32>
    %2 = vector.extract_strided_slice %1 {offsets = [0, 0], sizes = [64, 16], strides = [1, 1]} : vector<64x32xf32> to vector<64x16xf32>
    %c0_2 = arith.constant 0 : index
    %c0_3 = arith.constant 0 : index
    %3 = vector.load %arg2[%c0_2, %c0_3] : memref<16x16xf32, #tpu.memory_space<vmem>>, vector<16x16xf32>
    %cst = arith.constant dense<0.000000e+00> : vector<64x16xf32>
    %4 = tpu.matmul %2, %3, %cst {dimension_numbers = #tpu.dot_dimension_numbers<[1], [0], [0], [1], [0, 0, 1, 1], [], []>, precision = #tpu.contract_precision<fp32>} : vector<64x16xf32>, vector<16x16xf32>, vector<64x16xf32> -> vector<64x16xf32>
    %cst_4 = arith.constant 0.000000e+00 : f32
    %5 = vector.broadcast %cst_4 : f32 to vector<96x16xf32>
    %c0_5 = arith.constant 0 : index
    %c0_6 = arith.constant 0 : index
    %6 = vector.load %arg17[%c0_5, %c0_6] : memref<96x16xf32, #tpu.memory_space<vmem>>, vector<96x16xf32>
    tpu.vector_store %arg17[%c0_5, %c0_6], %5 {strides = array<i32>} : memref<96x16xf32, #tpu.memory_space<vmem>>, vector<96x16xf32>,
    %7 = tpu.iota {dimensions = array<i32: 0>} : vector<64x16xi32>
    %c8_i32 = arith.constant 8 : i32
    %c0_i32 = arith.constant 0 : i32
    %8 = arith.cmpi eq, %c8_i32, %c0_i32 : i32
    %c1_i32 = arith.constant 1 : i32
    %9 = arith.select %8, %c1_i32, %c8_i32 : i32
    %10 = vector.broadcast %9 : i32 to vector<64x16xi32>
    %11 = arith.remsi %7, %10 : vector<64x16xi32>
    %c0_i32_7 = arith.constant 0 : i32
    %12 = vector.broadcast %c0_i32_7 : i32 to vector<64x16xi32>
    %13 = arith.cmpi ne, %11, %12 : vector<64x16xi32>
    %c0_i32_8 = arith.constant 0 : i32
    %14 = vector.broadcast %c0_i32_8 : i32 to vector<64x16xi32>
    %15 = arith.cmpi slt, %11, %14 : vector<64x16xi32>
    %c0_i32_9 = arith.constant 0 : i32
    %16 = arith.cmpi slt, %9, %c0_i32_9 : i32
    %17 = vector.broadcast %16 : i1 to vector<64x16xi1>
    %18 = vector.broadcast %17 : vector<64x16xi1> to vector<64x16xi1>
    %19 = arith.xori %15, %18 : vector<64x16xi1>
    %20 = arith.andi %19, %13 : vector<64x16xi1>
    %21 = vector.broadcast %9 : i32 to vector<64x16xi32>
    %22 = arith.addi %11, %21 : vector<64x16xi32>
    %23 = arith.select %20, %22, %11 : vector<64x16xi1>, vector<64x16xi32>
    %c0_i32_10 = arith.constant 0 : i32
    %24 = vector.broadcast %c0_i32_10 : i32 to vector<64x16xi32>
    %25 = arith.cmpi sgt, %23, %24 : vector<64x16xi32>
    %c7_i32 = arith.constant 7 : i32
    %26 = vector.broadcast %c7_i32 : i32 to vector<64x16xi32>
    %27 = arith.cmpi slt, %23, %26 : vector<64x16xi32>
    %c0_11 = arith.constant 0 : index
    %c0_12 = arith.constant 0 : index
    %28 = vector.load %arg15[%c0_11, %c0_12] : memref<64x64xf32, #tpu.memory_space<vmem>>, vector<64x64xf32>
    %c16 = arith.constant 16 : index
    %c0_13 = arith.constant 0 : index
    %29 = vector.load %arg17[%c16, %c0_13] : memref<96x16xf32, #tpu.memory_space<vmem>>, vector<64x16xf32>
    tpu.vector_store %arg17[%c16, %c0_13], %4 {strides = array<i32>} : memref<96x16xf32, #tpu.memory_space<vmem>>, vector<64x16xf32>,
    %c0_14 = arith.constant 0 : index
    %c0_15 = arith.constant 0 : index
    %30 = vector.load %arg3[%c0_14, %c0_15] : memref<9x16xf32, #tpu.memory_space<vmem>>, vector<9x16xf32>
    %cst_16 = arith.constant 0.000000e+00 : f32
    %31 = vector.broadcast %cst_16 : f32 to vector<64x16xf32>
    %c7 = arith.constant 7 : index
    %c0_17 = arith.constant 0 : index
    %32 = vector.load %arg17[%c7, %c0_17] : memref<96x16xf32, #tpu.memory_space<vmem>>, vector<64x16xf32>
    %cst_18 = arith.constant 0.000000e+00 : f32
    %33 = vector.broadcast %cst_18 : f32 to vector<64x16xf32>
    %34 = arith.select %25, %32, %33 : vector<64x16xi1>, vector<64x16xf32>
    %35 = vector.extract_strided_slice %30 {offsets = [0, 0], sizes = [1, 16], strides = [1, 1]} : vector<9x16xf32> to vector<1x16xf32>
    %36 = vector.broadcast %35 : vector<1x16xf32> to vector<64x16xf32>
    %37 = arith.mulf %34, %36 : vector<64x16xf32>
    %38 = arith.addf %31, %37 : vector<64x16xf32>
    %c8 = arith.constant 8 : index
    %c0_19 = arith.constant 0 : index
    %39 = vector.load %arg17[%c8, %c0_19] : memref<96x16xf32, #tpu.memory_space<vmem>>, vector<64x16xf32>
    %40 = vector.extract_strided_slice %30 {offsets = [1, 0], sizes = [1, 16], strides = [1, 1]} : vector<9x16xf32> to vector<1x16xf32>
    %41 = vector.broadcast %40 : vector<1x16xf32> to vector<64x16xf32>
    %42 = arith.mulf %39, %41 : vector<64x16xf32>
    %43 = arith.addf %38, %42 : vector<64x16xf32>
    %c9 = arith.constant 9 : index
    %c0_20 = arith.constant 0 : index
    %44 = vector.load %arg17[%c9, %c0_20] : memref<96x16xf32, #tpu.memory_space<vmem>>, vector<64x16xf32>
    %cst_21 = arith.constant 0.000000e+00 : f32
    %45 = vector.broadcast %cst_21 : f32 to vector<64x16xf32>
    %46 = arith.select %27, %44, %45 : vector<64x16xi1>, vector<64x16xf32>
    %47 = vector.extract_strided_slice %30 {offsets = [2, 0], sizes = [1, 16], strides = [1, 1]} : vector<9x16xf32> to vector<1x16xf32>
    %48 = vector.broadcast %47 : vector<1x16xf32> to vector<64x16xf32>
    %49 = arith.mulf %46, %48 : vector<64x16xf32>
    %50 = arith.addf %43, %49 : vector<64x16xf32>
    %c15 = arith.constant 15 : index
    %c0_22 = arith.constant 0 : index
    %51 = vector.load %arg17[%c15, %c0_22] : memref<96x16xf32, #tpu.memory_space<vmem>>, vector<64x16xf32>
    %cst_23 = arith.constant 0.000000e+00 : f32
    %52 = vector.broadcast %cst_23 : f32 to vector<64x16xf32>
    %53 = arith.select %25, %51, %52 : vector<64x16xi1>, vector<64x16xf32>
    %54 = vector.extract_strided_slice %30 {offsets = [3, 0], sizes = [1, 16], strides = [1, 1]} : vector<9x16xf32> to vector<1x16xf32>
    %55 = vector.broadcast %54 : vector<1x16xf32> to vector<64x16xf32>
    %56 = arith.mulf %53, %55 : vector<64x16xf32>
    %57 = arith.addf %50, %56 : vector<64x16xf32>
    %c16_24 = arith.constant 16 : index
    %c0_25 = arith.constant 0 : index
    %58 = vector.load %arg17[%c16_24, %c0_25] : memref<96x16xf32, #tpu.memory_space<vmem>>, vector<64x16xf32>
    %59 = vector.extract_strided_slice %30 {offsets = [4, 0], sizes = [1, 16], strides = [1, 1]} : vector<9x16xf32> to vector<1x16xf32>
    %60 = vector.broadcast %59 : vector<1x16xf32> to vector<64x16xf32>
    %61 = arith.mulf %58, %60 : vector<64x16xf32>
    %62 = arith.addf %57, %61 : vector<64x16xf32>
    %c17 = arith.constant 17 : index
    %c0_26 = arith.constant 0 : index
    %63 = vector.load %arg17[%c17, %c0_26] : memref<96x16xf32, #tpu.memory_space<vmem>>, vector<64x16xf32>
    %cst_27 = arith.constant 0.000000e+00 : f32
    %64 = vector.broadcast %cst_27 : f32 to vector<64x16xf32>
    %65 = arith.select %27, %63, %64 : vector<64x16xi1>, vector<64x16xf32>
    %66 = vector.extract_strided_slice %30 {offsets = [5, 0], sizes = [1, 16], strides = [1, 1]} : vector<9x16xf32> to vector<1x16xf32>
    %67 = vector.broadcast %66 : vector<1x16xf32> to vector<64x16xf32>
    %68 = arith.mulf %65, %67 : vector<64x16xf32>
    %69 = arith.addf %62, %68 : vector<64x16xf32>
    %c23 = arith.constant 23 : index
    %c0_28 = arith.constant 0 : index
    %70 = vector.load %arg17[%c23, %c0_28] : memref<96x16xf32, #tpu.memory_space<vmem>>, vector<64x16xf32>
    %cst_29 = arith.constant 0.000000e+00 : f32
    %71 = vector.broadcast %cst_29 : f32 to vector<64x16xf32>
    %72 = arith.select %25, %70, %71 : vector<64x16xi1>, vector<64x16xf32>
    %73 = vector.extract_strided_slice %30 {offsets = [6, 0], sizes = [1, 16], strides = [1, 1]} : vector<9x16xf32> to vector<1x16xf32>
    %74 = vector.broadcast %73 : vector<1x16xf32> to vector<64x16xf32>
    %75 = arith.mulf %72, %74 : vector<64x16xf32>
    %76 = arith.addf %69, %75 : vector<64x16xf32>
    %c24 = arith.constant 24 : index
    %c0_30 = arith.constant 0 : index
    %77 = vector.load %arg17[%c24, %c0_30] : memref<96x16xf32, #tpu.memory_space<vmem>>, vector<64x16xf32>
    %78 = vector.extract_strided_slice %30 {offsets = [7, 0], sizes = [1, 16], strides = [1, 1]} : vector<9x16xf32> to vector<1x16xf32>
    %79 = vector.broadcast %78 : vector<1x16xf32> to vector<64x16xf32>
    %80 = arith.mulf %77, %79 : vector<64x16xf32>
    %81 = arith.addf %76, %80 : vector<64x16xf32>
    %c25 = arith.constant 25 : index
    %c0_31 = arith.constant 0 : index
    %82 = vector.load %arg17[%c25, %c0_31] : memref<96x16xf32, #tpu.memory_space<vmem>>, vector<64x16xf32>
    %cst_32 = arith.constant 0.000000e+00 : f32
    %83 = vector.broadcast %cst_32 : f32 to vector<64x16xf32>
    %84 = arith.select %27, %82, %83 : vector<64x16xi1>, vector<64x16xf32>
    %85 = vector.extract_strided_slice %30 {offsets = [8, 0], sizes = [1, 16], strides = [1, 1]} : vector<9x16xf32> to vector<1x16xf32>
    %86 = vector.broadcast %85 : vector<1x16xf32> to vector<64x16xf32>
    %87 = arith.mulf %84, %86 : vector<64x16xf32>
    %88 = arith.addf %81, %87 : vector<64x16xf32>
    %c0_33 = arith.constant 0 : index
    %c0_34 = arith.constant 0 : index
    %89 = vector.load %arg4[%c0_33, %c0_34] : memref<1x16xf32, #tpu.memory_space<vmem>>, vector<1x16xf32>
    %90 = vector.broadcast %89 : vector<1x16xf32> to vector<64x16xf32>
    %91 = arith.addf %88, %90 : vector<64x16xf32>
    %cst_35 = arith.constant dense<0.000000e+00> : vector<64x16xf32>
    %92 = tpu.matmul %28, %91, %cst_35 {dimension_numbers = #tpu.dot_dimension_numbers<[1], [0], [0], [1], [0, 0, 1, 1], [], []>, precision = #tpu.contract_precision<fp32>} : vector<64x64xf32>, vector<64x16xf32>, vector<64x16xf32> -> vector<64x16xf32>
    %93 = vector.extract_strided_slice %92 {offsets = [0, 0], sizes = [16, 16], strides = [1, 1]} : vector<64x16xf32> to vector<16x16xf32>
    %94 = vector.extract_strided_slice %92 {offsets = [16, 0], sizes = [16, 16], strides = [1, 1]} : vector<64x16xf32> to vector<16x16xf32>
    %95 = vector.extract_strided_slice %92 {offsets = [32, 0], sizes = [16, 16], strides = [1, 1]} : vector<64x16xf32> to vector<16x16xf32>
    %96 = vector.extract_strided_slice %92 {offsets = [48, 0], sizes = [16, 16], strides = [1, 1]} : vector<64x16xf32> to vector<16x16xf32>
    %97 = arith.addf %93, %94 : vector<16x16xf32>
    %98 = arith.maximumf %93, %94 : vector<16x16xf32>
    %99 = arith.addf %97, %95 : vector<16x16xf32>
    %100 = arith.maximumf %98, %95 : vector<16x16xf32>
    %101 = arith.addf %99, %96 : vector<16x16xf32>
    %102 = arith.maximumf %100, %96 : vector<16x16xf32>
    %cst_36 = arith.constant 2.500000e-01 : f32
    %103 = vector.broadcast %cst_36 : f32 to vector<16x16xf32>
    %104 = arith.mulf %101, %103 : vector<16x16xf32>
    %cst_37 = arith.constant 5.000000e-01 : f32
    %105 = vector.broadcast %cst_37 : f32 to vector<64x16xf32>
    %106 = arith.mulf %105, %91 : vector<64x16xf32>
    %cst_38 = arith.constant 4.471500e-02 : f32
    %107 = vector.broadcast %cst_38 : f32 to vector<64x16xf32>
    %108 = arith.mulf %107, %91 : vector<64x16xf32>
    %109 = arith.mulf %108, %91 : vector<64x16xf32>
    %110 = arith.mulf %109, %91 : vector<64x16xf32>
    %111 = arith.addf %91, %110 : vector<64x16xf32>
    %cst_39 = arith.constant 0.797884583 : f32
    %112 = vector.broadcast %cst_39 : f32 to vector<64x16xf32>
    %113 = arith.mulf %112, %111 : vector<64x16xf32>
    %114 = math.tanh %113 : vector<64x16xf32>
    %cst_40 = arith.constant 1.000000e+00 : f32
    %115 = vector.broadcast %cst_40 : f32 to vector<64x16xf32>
    %116 = arith.addf %115, %114 : vector<64x16xf32>
    %117 = arith.mulf %106, %116 : vector<64x16xf32>
    %c16_41 = arith.constant 16 : index
    %c0_42 = arith.constant 0 : index
    %118 = vector.load %arg17[%c16_41, %c0_42] : memref<96x16xf32, #tpu.memory_space<vmem>>, vector<64x16xf32>
    tpu.vector_store %arg17[%c16_41, %c0_42], %117 {strides = array<i32>} : memref<96x16xf32, #tpu.memory_space<vmem>>, vector<64x16xf32>,
    %c0_43 = arith.constant 0 : index
    %c0_44 = arith.constant 0 : index
    %119 = vector.load %arg5[%c0_43, %c0_44] : memref<9x16xf32, #tpu.memory_space<vmem>>, vector<9x16xf32>
    %cst_45 = arith.constant 0.000000e+00 : f32
    %120 = vector.broadcast %cst_45 : f32 to vector<64x16xf32>
    %c7_46 = arith.constant 7 : index
    %c0_47 = arith.constant 0 : index
    %121 = vector.load %arg17[%c7_46, %c0_47] : memref<96x16xf32, #tpu.memory_space<vmem>>, vector<64x16xf32>
    %cst_48 = arith.constant 0.000000e+00 : f32
    %122 = vector.broadcast %cst_48 : f32 to vector<64x16xf32>
    %123 = arith.select %25, %121, %122 : vector<64x16xi1>, vector<64x16xf32>
    %124 = vector.extract_strided_slice %119 {offsets = [0, 0], sizes = [1, 16], strides = [1, 1]} : vector<9x16xf32> to vector<1x16xf32>
    %125 = vector.broadcast %124 : vector<1x16xf32> to vector<64x16xf32>
    %126 = arith.mulf %123, %125 : vector<64x16xf32>
    %127 = arith.addf %120, %126 : vector<64x16xf32>
    %c8_49 = arith.constant 8 : index
    %c0_50 = arith.constant 0 : index
    %128 = vector.load %arg17[%c8_49, %c0_50] : memref<96x16xf32, #tpu.memory_space<vmem>>, vector<64x16xf32>
    %129 = vector.extract_strided_slice %119 {offsets = [1, 0], sizes = [1, 16], strides = [1, 1]} : vector<9x16xf32> to vector<1x16xf32>
    %130 = vector.broadcast %129 : vector<1x16xf32> to vector<64x16xf32>
    %131 = arith.mulf %128, %130 : vector<64x16xf32>
    %132 = arith.addf %127, %131 : vector<64x16xf32>
    %c9_51 = arith.constant 9 : index
    %c0_52 = arith.constant 0 : index
    %133 = vector.load %arg17[%c9_51, %c0_52] : memref<96x16xf32, #tpu.memory_space<vmem>>, vector<64x16xf32>
    %cst_53 = arith.constant 0.000000e+00 : f32
    %134 = vector.broadcast %cst_53 : f32 to vector<64x16xf32>
    %135 = arith.select %27, %133, %134 : vector<64x16xi1>, vector<64x16xf32>
    %136 = vector.extract_strided_slice %119 {offsets = [2, 0], sizes = [1, 16], strides = [1, 1]} : vector<9x16xf32> to vector<1x16xf32>
    %137 = vector.broadcast %136 : vector<1x16xf32> to vector<64x16xf32>
    %138 = arith.mulf %135, %137 : vector<64x16xf32>
    %139 = arith.addf %132, %138 : vector<64x16xf32>
    %c15_54 = arith.constant 15 : index
    %c0_55 = arith.constant 0 : index
    %140 = vector.load %arg17[%c15_54, %c0_55] : memref<96x16xf32, #tpu.memory_space<vmem>>, vector<64x16xf32>
    %cst_56 = arith.constant 0.000000e+00 : f32
    %141 = vector.broadcast %cst_56 : f32 to vector<64x16xf32>
    %142 = arith.select %25, %140, %141 : vector<64x16xi1>, vector<64x16xf32>
    %143 = vector.extract_strided_slice %119 {offsets = [3, 0], sizes = [1, 16], strides = [1, 1]} : vector<9x16xf32> to vector<1x16xf32>
    %144 = vector.broadcast %143 : vector<1x16xf32> to vector<64x16xf32>
    %145 = arith.mulf %142, %144 : vector<64x16xf32>
    %146 = arith.addf %139, %145 : vector<64x16xf32>
    %c16_57 = arith.constant 16 : index
    %c0_58 = arith.constant 0 : index
    %147 = vector.load %arg17[%c16_57, %c0_58] : memref<96x16xf32, #tpu.memory_space<vmem>>, vector<64x16xf32>
    %148 = vector.extract_strided_slice %119 {offsets = [4, 0], sizes = [1, 16], strides = [1, 1]} : vector<9x16xf32> to vector<1x16xf32>
    %149 = vector.broadcast %148 : vector<1x16xf32> to vector<64x16xf32>
    %150 = arith.mulf %147, %149 : vector<64x16xf32>
    %151 = arith.addf %146, %150 : vector<64x16xf32>
    %c17_59 = arith.constant 17 : index
    %c0_60 = arith.constant 0 : index
    %152 = vector.load %arg17[%c17_59, %c0_60] : memref<96x16xf32, #tpu.memory_space<vmem>>, vector<64x16xf32>
    %cst_61 = arith.constant 0.000000e+00 : f32
    %153 = vector.broadcast %cst_61 : f32 to vector<64x16xf32>
    %154 = arith.select %27, %152, %153 : vector<64x16xi1>, vector<64x16xf32>
    %155 = vector.extract_strided_slice %119 {offsets = [5, 0], sizes = [1, 16], strides = [1, 1]} : vector<9x16xf32> to vector<1x16xf32>
    %156 = vector.broadcast %155 : vector<1x16xf32> to vector<64x16xf32>
    %157 = arith.mulf %154, %156 : vector<64x16xf32>
    %158 = arith.addf %151, %157 : vector<64x16xf32>
    %c23_62 = arith.constant 23 : index
    %c0_63 = arith.constant 0 : index
    %159 = vector.load %arg17[%c23_62, %c0_63] : memref<96x16xf32, #tpu.memory_space<vmem>>, vector<64x16xf32>
    %cst_64 = arith.constant 0.000000e+00 : f32
    %160 = vector.broadcast %cst_64 : f32 to vector<64x16xf32>
    %161 = arith.select %25, %159, %160 : vector<64x16xi1>, vector<64x16xf32>
    %162 = vector.extract_strided_slice %119 {offsets = [6, 0], sizes = [1, 16], strides = [1, 1]} : vector<9x16xf32> to vector<1x16xf32>
    %163 = vector.broadcast %162 : vector<1x16xf32> to vector<64x16xf32>
    %164 = arith.mulf %161, %163 : vector<64x16xf32>
    %165 = arith.addf %158, %164 : vector<64x16xf32>
    %c24_65 = arith.constant 24 : index
    %c0_66 = arith.constant 0 : index
    %166 = vector.load %arg17[%c24_65, %c0_66] : memref<96x16xf32, #tpu.memory_space<vmem>>, vector<64x16xf32>
    %167 = vector.extract_strided_slice %119 {offsets = [7, 0], sizes = [1, 16], strides = [1, 1]} : vector<9x16xf32> to vector<1x16xf32>
    %168 = vector.broadcast %167 : vector<1x16xf32> to vector<64x16xf32>
    %169 = arith.mulf %166, %168 : vector<64x16xf32>
    %170 = arith.addf %165, %169 : vector<64x16xf32>
    %c25_67 = arith.constant 25 : index
    %c0_68 = arith.constant 0 : index
    %171 = vector.load %arg17[%c25_67, %c0_68] : memref<96x16xf32, #tpu.memory_space<vmem>>, vector<64x16xf32>
    %cst_69 = arith.constant 0.000000e+00 : f32
    %172 = vector.broadcast %cst_69 : f32 to vector<64x16xf32>
    %173 = arith.select %27, %171, %172 : vector<64x16xi1>, vector<64x16xf32>
    %174 = vector.extract_strided_slice %119 {offsets = [8, 0], sizes = [1, 16], strides = [1, 1]} : vector<9x16xf32> to vector<1x16xf32>
    %175 = vector.broadcast %174 : vector<1x16xf32> to vector<64x16xf32>
    %176 = arith.mulf %173, %175 : vector<64x16xf32>
    %177 = arith.addf %170, %176 : vector<64x16xf32>
    %c0_70 = arith.constant 0 : index
    %c0_71 = arith.constant 0 : index
    %178 = vector.load %arg6[%c0_70, %c0_71] : memref<1x16xf32, #tpu.memory_space<vmem>>, vector<1x16xf32>
    %179 = vector.broadcast %178 : vector<1x16xf32> to vector<64x16xf32>
    %180 = arith.addf %177, %179 : vector<64x16xf32>
    %cst_72 = arith.constant dense<0.000000e+00> : vector<64x16xf32>
    %181 = tpu.matmul %28, %180, %cst_72 {dimension_numbers = #tpu.dot_dimension_numbers<[1], [0], [0], [1], [0, 0, 1, 1], [], []>, precision = #tpu.contract_precision<fp32>} : vector<64x64xf32>, vector<64x16xf32>, vector<64x16xf32> -> vector<64x16xf32>
    %182 = vector.extract_strided_slice %181 {offsets = [0, 0], sizes = [16, 16], strides = [1, 1]} : vector<64x16xf32> to vector<16x16xf32>
    %183 = vector.extract_strided_slice %181 {offsets = [16, 0], sizes = [16, 16], strides = [1, 1]} : vector<64x16xf32> to vector<16x16xf32>
    %184 = vector.extract_strided_slice %181 {offsets = [32, 0], sizes = [16, 16], strides = [1, 1]} : vector<64x16xf32> to vector<16x16xf32>
    %185 = vector.extract_strided_slice %181 {offsets = [48, 0], sizes = [16, 16], strides = [1, 1]} : vector<64x16xf32> to vector<16x16xf32>
    %186 = arith.addf %182, %183 : vector<16x16xf32>
    %187 = arith.maximumf %182, %183 : vector<16x16xf32>
    %188 = arith.addf %186, %184 : vector<16x16xf32>
    %189 = arith.maximumf %187, %184 : vector<16x16xf32>
    %190 = arith.addf %188, %185 : vector<16x16xf32>
    %191 = arith.maximumf %189, %185 : vector<16x16xf32>
    %cst_73 = arith.constant 2.500000e-01 : f32
    %192 = vector.broadcast %cst_73 : f32 to vector<16x16xf32>
    %193 = arith.mulf %190, %192 : vector<16x16xf32>
    %c0_74 = arith.constant 0 : index
    %c0_75 = arith.constant 0 : index
    %194 = vector.load %arg7[%c0_74, %c0_75] : memref<16x16xf32, #tpu.memory_space<vmem>>, vector<16x16xf32>
    %cst_76 = arith.constant dense<0.000000e+00> : vector<64x16xf32>
    %195 = tpu.matmul %180, %194, %cst_76 {dimension_numbers = #tpu.dot_dimension_numbers<[1], [0], [0], [1], [0, 0, 1, 1], [], []>, precision = #tpu.contract_precision<fp32>} : vector<64x16xf32>, vector<16x16xf32>, vector<64x16xf32> -> vector<64x16xf32>
    %c0_77 = arith.constant 0 : index
    %c0_78 = arith.constant 0 : index
    %196 = vector.load %arg8[%c0_77, %c0_78] : memref<1x16xf32, #tpu.memory_space<vmem>>, vector<1x16xf32>
    %197 = vector.broadcast %196 : vector<1x16xf32> to vector<64x16xf32>
    %198 = arith.addf %195, %197 : vector<64x16xf32>
    %cst_79 = arith.constant 5.000000e-01 : f32
    %199 = vector.broadcast %cst_79 : f32 to vector<64x16xf32>
    %200 = arith.mulf %199, %198 : vector<64x16xf32>
    %cst_80 = arith.constant 4.471500e-02 : f32
    %201 = vector.broadcast %cst_80 : f32 to vector<64x16xf32>
    %202 = arith.mulf %201, %198 : vector<64x16xf32>
    %203 = arith.mulf %202, %198 : vector<64x16xf32>
    %204 = arith.mulf %203, %198 : vector<64x16xf32>
    %205 = arith.addf %198, %204 : vector<64x16xf32>
    %cst_81 = arith.constant 0.797884583 : f32
    %206 = vector.broadcast %cst_81 : f32 to vector<64x16xf32>
    %207 = arith.mulf %206, %205 : vector<64x16xf32>
    %208 = math.tanh %207 : vector<64x16xf32>
    %cst_82 = arith.constant 1.000000e+00 : f32
    %209 = vector.broadcast %cst_82 : f32 to vector<64x16xf32>
    %210 = arith.addf %209, %208 : vector<64x16xf32>
    %211 = arith.mulf %200, %210 : vector<64x16xf32>
    %c0_83 = arith.constant 0 : index
    %c0_84 = arith.constant 0 : index
    %212 = vector.load %arg13[%c0_83, %c0_84] : memref<16x64xf32, #tpu.memory_space<vmem>>, vector<16x64xf32>
    %213 = vector.extract_strided_slice %104 {offsets = [0, 0], sizes = [16, 4], strides = [1, 1]} : vector<16x16xf32> to vector<16x4xf32>
    %214 = vector.extract_strided_slice %102 {offsets = [0, 0], sizes = [16, 4], strides = [1, 1]} : vector<16x16xf32> to vector<16x4xf32>
    %215 = tpu.concatenate %213, %214 in 1 : vector<16x4xf32>, vector<16x4xf32> -> vector<16x8xf32>
    %216 = vector.extract_strided_slice %193 {offsets = [0, 0], sizes = [16, 4], strides = [1, 1]} : vector<16x16xf32> to vector<16x4xf32>
    %217 = vector.extract_strided_slice %191 {offsets = [0, 0], sizes = [16, 4], strides = [1, 1]} : vector<16x16xf32> to vector<16x4xf32>
    %218 = tpu.concatenate %216, %217 in 1 : vector<16x4xf32>, vector<16x4xf32> -> vector<16x8xf32>
    %219 = vector.extract_strided_slice %4 {offsets = [0, 0], sizes = [64, 4], strides = [1, 1]} : vector<64x16xf32> to vector<64x4xf32>
    %cst_85 = arith.constant dense<0.000000e+00> : vector<16x16xf32>
    %220 = tpu.matmul %215, %218, %cst_85 {dimension_numbers = #tpu.dot_dimension_numbers<[1], [1], [0], [0], [0, 0, 1, 0], [], []>, precision = #tpu.contract_precision<fp32>} : vector<16x8xf32>, vector<16x8xf32>, vector<16x16xf32> -> vector<16x16xf32>
    %cst_86 = arith.constant dense<0.000000e+00> : vector<16x64xf32>
    %221 = tpu.matmul %220, %212, %cst_86 {dimension_numbers = #tpu.dot_dimension_numbers<[1], [0], [0], [1], [0, 0, 1, 1], [], []>, precision = #tpu.contract_precision<fp32>} : vector<16x16xf32>, vector<16x64xf32>, vector<16x64xf32> -> vector<16x64xf32>
    %cst_87 = arith.constant 0.176776692 : f32
    %222 = vector.broadcast %cst_87 : f32 to vector<16x64xf32>
    %223 = arith.mulf %221, %222 : vector<16x64xf32>
    %cst_88 = arith.constant dense<0xFF800000> : vector<16xf32>
    %224 = vector.multi_reduction <maximumf>, %223, %cst_88 [1] : vector<16x64xf32> to vector<16xf32>
    %225 = vector.shape_cast %224 : vector<16xf32> to vector<16x1xf32>
    %226 = vector.broadcast %225 : vector<16x1xf32> to vector<16x64xf32>
    %227 = arith.subf %223, %226 : vector<16x64xf32>
    %228 = math.exp %227 : vector<16x64xf32>
    %cst_89 = arith.constant dense<0.000000e+00> : vector<16xf32>
    %229 = vector.multi_reduction <add>, %228, %cst_89 [1] : vector<16x64xf32> to vector<16xf32>
    %230 = vector.shape_cast %229 : vector<16xf32> to vector<16x1xf32>
    %231 = vector.broadcast %230 : vector<16x1xf32> to vector<16x64xf32>
    %232 = arith.divf %228, %231 : vector<16x64xf32>
    %cst_90 = arith.constant dense<0.000000e+00> : vector<16x4xf32>
    %233 = tpu.matmul %232, %219, %cst_90 {dimension_numbers = #tpu.dot_dimension_numbers<[1], [0], [0], [1], [0, 0, 1, 1], [], []>, precision = #tpu.contract_precision<fp32>} : vector<16x64xf32>, vector<64x4xf32>, vector<16x4xf32> -> vector<16x4xf32>
    %234 = vector.extract_strided_slice %104 {offsets = [0, 4], sizes = [16, 4], strides = [1, 1]} : vector<16x16xf32> to vector<16x4xf32>
    %235 = vector.extract_strided_slice %102 {offsets = [0, 4], sizes = [16, 4], strides = [1, 1]} : vector<16x16xf32> to vector<16x4xf32>
    %236 = tpu.concatenate %234, %235 in 1 : vector<16x4xf32>, vector<16x4xf32> -> vector<16x8xf32>
    %237 = vector.extract_strided_slice %193 {offsets = [0, 4], sizes = [16, 4], strides = [1, 1]} : vector<16x16xf32> to vector<16x4xf32>
    %238 = vector.extract_strided_slice %191 {offsets = [0, 4], sizes = [16, 4], strides = [1, 1]} : vector<16x16xf32> to vector<16x4xf32>
    %239 = tpu.concatenate %237, %238 in 1 : vector<16x4xf32>, vector<16x4xf32> -> vector<16x8xf32>
    %240 = vector.extract_strided_slice %4 {offsets = [0, 4], sizes = [64, 4], strides = [1, 1]} : vector<64x16xf32> to vector<64x4xf32>
    %cst_91 = arith.constant dense<0.000000e+00> : vector<16x16xf32>
    %241 = tpu.matmul %236, %239, %cst_91 {dimension_numbers = #tpu.dot_dimension_numbers<[1], [1], [0], [0], [0, 0, 1, 0], [], []>, precision = #tpu.contract_precision<fp32>} : vector<16x8xf32>, vector<16x8xf32>, vector<16x16xf32> -> vector<16x16xf32>
    %cst_92 = arith.constant dense<0.000000e+00> : vector<16x64xf32>
    %242 = tpu.matmul %241, %212, %cst_92 {dimension_numbers = #tpu.dot_dimension_numbers<[1], [0], [0], [1], [0, 0, 1, 1], [], []>, precision = #tpu.contract_precision<fp32>} : vector<16x16xf32>, vector<16x64xf32>, vector<16x64xf32> -> vector<16x64xf32>
    %cst_93 = arith.constant 0.176776692 : f32
    %243 = vector.broadcast %cst_93 : f32 to vector<16x64xf32>
    %244 = arith.mulf %242, %243 : vector<16x64xf32>
    %cst_94 = arith.constant dense<0xFF800000> : vector<16xf32>
    %245 = vector.multi_reduction <maximumf>, %244, %cst_94 [1] : vector<16x64xf32> to vector<16xf32>
    %246 = vector.shape_cast %245 : vector<16xf32> to vector<16x1xf32>
    %247 = vector.broadcast %246 : vector<16x1xf32> to vector<16x64xf32>
    %248 = arith.subf %244, %247 : vector<16x64xf32>
    %249 = math.exp %248 : vector<16x64xf32>
    %cst_95 = arith.constant dense<0.000000e+00> : vector<16xf32>
    %250 = vector.multi_reduction <add>, %249, %cst_95 [1] : vector<16x64xf32> to vector<16xf32>
    %251 = vector.shape_cast %250 : vector<16xf32> to vector<16x1xf32>
    %252 = vector.broadcast %251 : vector<16x1xf32> to vector<16x64xf32>
    %253 = arith.divf %249, %252 : vector<16x64xf32>
    %cst_96 = arith.constant dense<0.000000e+00> : vector<16x4xf32>
    %254 = tpu.matmul %253, %240, %cst_96 {dimension_numbers = #tpu.dot_dimension_numbers<[1], [0], [0], [1], [0, 0, 1, 1], [], []>, precision = #tpu.contract_precision<fp32>} : vector<16x64xf32>, vector<64x4xf32>, vector<16x4xf32> -> vector<16x4xf32>
    %255 = vector.extract_strided_slice %104 {offsets = [0, 8], sizes = [16, 4], strides = [1, 1]} : vector<16x16xf32> to vector<16x4xf32>
    %256 = vector.extract_strided_slice %102 {offsets = [0, 8], sizes = [16, 4], strides = [1, 1]} : vector<16x16xf32> to vector<16x4xf32>
    %257 = tpu.concatenate %255, %256 in 1 : vector<16x4xf32>, vector<16x4xf32> -> vector<16x8xf32>
    %258 = vector.extract_strided_slice %193 {offsets = [0, 8], sizes = [16, 4], strides = [1, 1]} : vector<16x16xf32> to vector<16x4xf32>
    %259 = vector.extract_strided_slice %191 {offsets = [0, 8], sizes = [16, 4], strides = [1, 1]} : vector<16x16xf32> to vector<16x4xf32>
    %260 = tpu.concatenate %258, %259 in 1 : vector<16x4xf32>, vector<16x4xf32> -> vector<16x8xf32>
    %261 = vector.extract_strided_slice %4 {offsets = [0, 8], sizes = [64, 4], strides = [1, 1]} : vector<64x16xf32> to vector<64x4xf32>
    %cst_97 = arith.constant dense<0.000000e+00> : vector<16x16xf32>
    %262 = tpu.matmul %257, %260, %cst_97 {dimension_numbers = #tpu.dot_dimension_numbers<[1], [1], [0], [0], [0, 0, 1, 0], [], []>, precision = #tpu.contract_precision<fp32>} : vector<16x8xf32>, vector<16x8xf32>, vector<16x16xf32> -> vector<16x16xf32>
    %cst_98 = arith.constant dense<0.000000e+00> : vector<16x64xf32>
    %263 = tpu.matmul %262, %212, %cst_98 {dimension_numbers = #tpu.dot_dimension_numbers<[1], [0], [0], [1], [0, 0, 1, 1], [], []>, precision = #tpu.contract_precision<fp32>} : vector<16x16xf32>, vector<16x64xf32>, vector<16x64xf32> -> vector<16x64xf32>
    %cst_99 = arith.constant 0.176776692 : f32
    %264 = vector.broadcast %cst_99 : f32 to vector<16x64xf32>
    %265 = arith.mulf %263, %264 : vector<16x64xf32>
    %cst_100 = arith.constant dense<0xFF800000> : vector<16xf32>
    %266 = vector.multi_reduction <maximumf>, %265, %cst_100 [1] : vector<16x64xf32> to vector<16xf32>
    %267 = vector.shape_cast %266 : vector<16xf32> to vector<16x1xf32>
    %268 = vector.broadcast %267 : vector<16x1xf32> to vector<16x64xf32>
    %269 = arith.subf %265, %268 : vector<16x64xf32>
    %270 = math.exp %269 : vector<16x64xf32>
    %cst_101 = arith.constant dense<0.000000e+00> : vector<16xf32>
    %271 = vector.multi_reduction <add>, %270, %cst_101 [1] : vector<16x64xf32> to vector<16xf32>
    %272 = vector.shape_cast %271 : vector<16xf32> to vector<16x1xf32>
    %273 = vector.broadcast %272 : vector<16x1xf32> to vector<16x64xf32>
    %274 = arith.divf %270, %273 : vector<16x64xf32>
    %cst_102 = arith.constant dense<0.000000e+00> : vector<16x4xf32>
    %275 = tpu.matmul %274, %261, %cst_102 {dimension_numbers = #tpu.dot_dimension_numbers<[1], [0], [0], [1], [0, 0, 1, 1], [], []>, precision = #tpu.contract_precision<fp32>} : vector<16x64xf32>, vector<64x4xf32>, vector<16x4xf32> -> vector<16x4xf32>
    %276 = vector.extract_strided_slice %104 {offsets = [0, 12], sizes = [16, 4], strides = [1, 1]} : vector<16x16xf32> to vector<16x4xf32>
    %277 = vector.extract_strided_slice %102 {offsets = [0, 12], sizes = [16, 4], strides = [1, 1]} : vector<16x16xf32> to vector<16x4xf32>
    %278 = tpu.concatenate %276, %277 in 1 : vector<16x4xf32>, vector<16x4xf32> -> vector<16x8xf32>
    %279 = vector.extract_strided_slice %193 {offsets = [0, 12], sizes = [16, 4], strides = [1, 1]} : vector<16x16xf32> to vector<16x4xf32>
    %280 = vector.extract_strided_slice %191 {offsets = [0, 12], sizes = [16, 4], strides = [1, 1]} : vector<16x16xf32> to vector<16x4xf32>
    %281 = tpu.concatenate %279, %280 in 1 : vector<16x4xf32>, vector<16x4xf32> -> vector<16x8xf32>
    %282 = vector.extract_strided_slice %4 {offsets = [0, 12], sizes = [64, 4], strides = [1, 1]} : vector<64x16xf32> to vector<64x4xf32>
    %cst_103 = arith.constant dense<0.000000e+00> : vector<16x16xf32>
    %283 = tpu.matmul %278, %281, %cst_103 {dimension_numbers = #tpu.dot_dimension_numbers<[1], [1], [0], [0], [0, 0, 1, 0], [], []>, precision = #tpu.contract_precision<fp32>} : vector<16x8xf32>, vector<16x8xf32>, vector<16x16xf32> -> vector<16x16xf32>
    %cst_104 = arith.constant dense<0.000000e+00> : vector<16x64xf32>
    %284 = tpu.matmul %283, %212, %cst_104 {dimension_numbers = #tpu.dot_dimension_numbers<[1], [0], [0], [1], [0, 0, 1, 1], [], []>, precision = #tpu.contract_precision<fp32>} : vector<16x16xf32>, vector<16x64xf32>, vector<16x64xf32> -> vector<16x64xf32>
    %cst_105 = arith.constant 0.176776692 : f32
    %285 = vector.broadcast %cst_105 : f32 to vector<16x64xf32>
    %286 = arith.mulf %284, %285 : vector<16x64xf32>
    %cst_106 = arith.constant dense<0xFF800000> : vector<16xf32>
    %287 = vector.multi_reduction <maximumf>, %286, %cst_106 [1] : vector<16x64xf32> to vector<16xf32>
    %288 = vector.shape_cast %287 : vector<16xf32> to vector<16x1xf32>
    %289 = vector.broadcast %288 : vector<16x1xf32> to vector<16x64xf32>
    %290 = arith.subf %286, %289 : vector<16x64xf32>
    %291 = math.exp %290 : vector<16x64xf32>
    %cst_107 = arith.constant dense<0.000000e+00> : vector<16xf32>
    %292 = vector.multi_reduction <add>, %291, %cst_107 [1] : vector<16x64xf32> to vector<16xf32>
    %293 = vector.shape_cast %292 : vector<16xf32> to vector<16x1xf32>
    %294 = vector.broadcast %293 : vector<16x1xf32> to vector<16x64xf32>
    %295 = arith.divf %291, %294 : vector<16x64xf32>
    %cst_108 = arith.constant dense<0.000000e+00> : vector<16x4xf32>
    %296 = tpu.matmul %295, %282, %cst_108 {dimension_numbers = #tpu.dot_dimension_numbers<[1], [0], [0], [1], [0, 0, 1, 1], [], []>, precision = #tpu.contract_precision<fp32>} : vector<16x64xf32>, vector<64x4xf32>, vector<16x4xf32> -> vector<16x4xf32>
    %297 = tpu.concatenate %233, %254, %275, %296 in 1 : vector<16x4xf32>, vector<16x4xf32>, vector<16x4xf32>, vector<16x4xf32> -> vector<16x16xf32>
    %c0_109 = arith.constant 0 : index
    %c0_110 = arith.constant 0 : index
    %298 = vector.load %arg14[%c0_109, %c0_110] : memref<64x16xf32, #tpu.memory_space<vmem>>, vector<64x16xf32>
    %cst_111 = arith.constant dense<0.000000e+00> : vector<64x16xf32>
    %299 = tpu.matmul %298, %297, %cst_111 {dimension_numbers = #tpu.dot_dimension_numbers<[1], [0], [0], [1], [0, 0, 1, 1], [], []>, precision = #tpu.contract_precision<fp32>} : vector<64x16xf32>, vector<16x16xf32>, vector<64x16xf32> -> vector<64x16xf32>
    %c16_112 = arith.constant 16 : index
    %c0_113 = arith.constant 0 : index
    %300 = vector.load %arg17[%c16_112, %c0_113] : memref<96x16xf32, #tpu.memory_space<vmem>>, vector<64x16xf32>
    tpu.vector_store %arg17[%c16_112, %c0_113], %299 {strides = array<i32>} : memref<96x16xf32, #tpu.memory_space<vmem>>, vector<64x16xf32>,
    %c0_114 = arith.constant 0 : index
    %c0_115 = arith.constant 0 : index
    %301 = vector.load %arg9[%c0_114, %c0_115] : memref<9x16xf32, #tpu.memory_space<vmem>>, vector<9x16xf32>
    %cst_116 = arith.constant 0.000000e+00 : f32
    %302 = vector.broadcast %cst_116 : f32 to vector<64x16xf32>
    %c7_117 = arith.constant 7 : index
    %c0_118 = arith.constant 0 : index
    %303 = vector.load %arg17[%c7_117, %c0_118] : memref<96x16xf32, #tpu.memory_space<vmem>>, vector<64x16xf32>
    %cst_119 = arith.constant 0.000000e+00 : f32
    %304 = vector.broadcast %cst_119 : f32 to vector<64x16xf32>
    %305 = arith.select %25, %303, %304 : vector<64x16xi1>, vector<64x16xf32>
    %306 = vector.extract_strided_slice %301 {offsets = [0, 0], sizes = [1, 16], strides = [1, 1]} : vector<9x16xf32> to vector<1x16xf32>
    %307 = vector.broadcast %306 : vector<1x16xf32> to vector<64x16xf32>
    %308 = arith.mulf %305, %307 : vector<64x16xf32>
    %309 = arith.addf %302, %308 : vector<64x16xf32>
    %c8_120 = arith.constant 8 : index
    %c0_121 = arith.constant 0 : index
    %310 = vector.load %arg17[%c8_120, %c0_121] : memref<96x16xf32, #tpu.memory_space<vmem>>, vector<64x16xf32>
    %311 = vector.extract_strided_slice %301 {offsets = [1, 0], sizes = [1, 16], strides = [1, 1]} : vector<9x16xf32> to vector<1x16xf32>
    %312 = vector.broadcast %311 : vector<1x16xf32> to vector<64x16xf32>
    %313 = arith.mulf %310, %312 : vector<64x16xf32>
    %314 = arith.addf %309, %313 : vector<64x16xf32>
    %c9_122 = arith.constant 9 : index
    %c0_123 = arith.constant 0 : index
    %315 = vector.load %arg17[%c9_122, %c0_123] : memref<96x16xf32, #tpu.memory_space<vmem>>, vector<64x16xf32>
    %cst_124 = arith.constant 0.000000e+00 : f32
    %316 = vector.broadcast %cst_124 : f32 to vector<64x16xf32>
    %317 = arith.select %27, %315, %316 : vector<64x16xi1>, vector<64x16xf32>
    %318 = vector.extract_strided_slice %301 {offsets = [2, 0], sizes = [1, 16], strides = [1, 1]} : vector<9x16xf32> to vector<1x16xf32>
    %319 = vector.broadcast %318 : vector<1x16xf32> to vector<64x16xf32>
    %320 = arith.mulf %317, %319 : vector<64x16xf32>
    %321 = arith.addf %314, %320 : vector<64x16xf32>
    %c15_125 = arith.constant 15 : index
    %c0_126 = arith.constant 0 : index
    %322 = vector.load %arg17[%c15_125, %c0_126] : memref<96x16xf32, #tpu.memory_space<vmem>>, vector<64x16xf32>
    %cst_127 = arith.constant 0.000000e+00 : f32
    %323 = vector.broadcast %cst_127 : f32 to vector<64x16xf32>
    %324 = arith.select %25, %322, %323 : vector<64x16xi1>, vector<64x16xf32>
    %325 = vector.extract_strided_slice %301 {offsets = [3, 0], sizes = [1, 16], strides = [1, 1]} : vector<9x16xf32> to vector<1x16xf32>
    %326 = vector.broadcast %325 : vector<1x16xf32> to vector<64x16xf32>
    %327 = arith.mulf %324, %326 : vector<64x16xf32>
    %328 = arith.addf %321, %327 : vector<64x16xf32>
    %c16_128 = arith.constant 16 : index
    %c0_129 = arith.constant 0 : index
    %329 = vector.load %arg17[%c16_128, %c0_129] : memref<96x16xf32, #tpu.memory_space<vmem>>, vector<64x16xf32>
    %330 = vector.extract_strided_slice %301 {offsets = [4, 0], sizes = [1, 16], strides = [1, 1]} : vector<9x16xf32> to vector<1x16xf32>
    %331 = vector.broadcast %330 : vector<1x16xf32> to vector<64x16xf32>
    %332 = arith.mulf %329, %331 : vector<64x16xf32>
    %333 = arith.addf %328, %332 : vector<64x16xf32>
    %c17_130 = arith.constant 17 : index
    %c0_131 = arith.constant 0 : index
    %334 = vector.load %arg17[%c17_130, %c0_131] : memref<96x16xf32, #tpu.memory_space<vmem>>, vector<64x16xf32>
    %cst_132 = arith.constant 0.000000e+00 : f32
    %335 = vector.broadcast %cst_132 : f32 to vector<64x16xf32>
    %336 = arith.select %27, %334, %335 : vector<64x16xi1>, vector<64x16xf32>
    %337 = vector.extract_strided_slice %301 {offsets = [5, 0], sizes = [1, 16], strides = [1, 1]} : vector<9x16xf32> to vector<1x16xf32>
    %338 = vector.broadcast %337 : vector<1x16xf32> to vector<64x16xf32>
    %339 = arith.mulf %336, %338 : vector<64x16xf32>
    %340 = arith.addf %333, %339 : vector<64x16xf32>
    %c23_133 = arith.constant 23 : index
    %c0_134 = arith.constant 0 : index
    %341 = vector.load %arg17[%c23_133, %c0_134] : memref<96x16xf32, #tpu.memory_space<vmem>>, vector<64x16xf32>
    %cst_135 = arith.constant 0.000000e+00 : f32
    %342 = vector.broadcast %cst_135 : f32 to vector<64x16xf32>
    %343 = arith.select %25, %341, %342 : vector<64x16xi1>, vector<64x16xf32>
    %344 = vector.extract_strided_slice %301 {offsets = [6, 0], sizes = [1, 16], strides = [1, 1]} : vector<9x16xf32> to vector<1x16xf32>
    %345 = vector.broadcast %344 : vector<1x16xf32> to vector<64x16xf32>
    %346 = arith.mulf %343, %345 : vector<64x16xf32>
    %347 = arith.addf %340, %346 : vector<64x16xf32>
    %c24_136 = arith.constant 24 : index
    %c0_137 = arith.constant 0 : index
    %348 = vector.load %arg17[%c24_136, %c0_137] : memref<96x16xf32, #tpu.memory_space<vmem>>, vector<64x16xf32>
    %349 = vector.extract_strided_slice %301 {offsets = [7, 0], sizes = [1, 16], strides = [1, 1]} : vector<9x16xf32> to vector<1x16xf32>
    %350 = vector.broadcast %349 : vector<1x16xf32> to vector<64x16xf32>
    %351 = arith.mulf %348, %350 : vector<64x16xf32>
    %352 = arith.addf %347, %351 : vector<64x16xf32>
    %c25_138 = arith.constant 25 : index
    %c0_139 = arith.constant 0 : index
    %353 = vector.load %arg17[%c25_138, %c0_139] : memref<96x16xf32, #tpu.memory_space<vmem>>, vector<64x16xf32>
    %cst_140 = arith.constant 0.000000e+00 : f32
    %354 = vector.broadcast %cst_140 : f32 to vector<64x16xf32>
    %355 = arith.select %27, %353, %354 : vector<64x16xi1>, vector<64x16xf32>
    %356 = vector.extract_strided_slice %301 {offsets = [8, 0], sizes = [1, 16], strides = [1, 1]} : vector<9x16xf32> to vector<1x16xf32>
    %357 = vector.broadcast %356 : vector<1x16xf32> to vector<64x16xf32>
    %358 = arith.mulf %355, %357 : vector<64x16xf32>
    %359 = arith.addf %352, %358 : vector<64x16xf32>
    %c0_141 = arith.constant 0 : index
    %c0_142 = arith.constant 0 : index
    %360 = vector.load %arg10[%c0_141, %c0_142] : memref<1x16xf32, #tpu.memory_space<vmem>>, vector<1x16xf32>
    %361 = vector.broadcast %360 : vector<1x16xf32> to vector<64x16xf32>
    %362 = arith.addf %359, %361 : vector<64x16xf32>
    %363 = tpu.concatenate %211, %362 in 1 : vector<64x16xf32>, vector<64x16xf32> -> vector<64x32xf32>
    %c0_143 = arith.constant 0 : index
    %c0_144 = arith.constant 0 : index
    %364 = vector.load %arg11[%c0_143, %c0_144] : memref<32x32xf32, #tpu.memory_space<vmem>>, vector<32x32xf32>
    %cst_145 = arith.constant dense<0.000000e+00> : vector<64x32xf32>
    %365 = tpu.matmul %363, %364, %cst_145 {dimension_numbers = #tpu.dot_dimension_numbers<[1], [0], [0], [1], [0, 0, 1, 1], [], []>, precision = #tpu.contract_precision<fp32>} : vector<64x32xf32>, vector<32x32xf32>, vector<64x32xf32> -> vector<64x32xf32>
    %c0_146 = arith.constant 0 : index
    %c0_147 = arith.constant 0 : index
    %366 = vector.load %arg12[%c0_146, %c0_147] : memref<1x32xf32, #tpu.memory_space<vmem>>, vector<1x32xf32>
    %367 = vector.broadcast %366 : vector<1x32xf32> to vector<64x32xf32>
    %368 = arith.addf %365, %367 : vector<64x32xf32>
    %c0_148 = arith.constant 0 : index
    %c0_149 = arith.constant 0 : index
    %c0_150 = arith.constant 0 : index
    %369 = vector.load %arg16[%c0_148, %c0_149, %c0_150] : memref<1x64x32xf32, #tpu.memory_space<vmem>>, vector<1x64x32xf32>
    %370 = vector.shape_cast %369 : vector<1x64x32xf32> to vector<64x32xf32>
    %371 = vector.shape_cast %368 : vector<64x32xf32> to vector<1x64x32xf32>
    tpu.vector_store %arg16[%c0_148, %c0_149, %c0_150], %371 {strides = array<i32>} : memref<1x64x32xf32, #tpu.memory_space<vmem>>, vector<1x64x32xf32>,
    return
  }
  func.func @transform_0(%arg0: i32) -> (i32, i32, i32) {
    %c0_i32 = arith.constant 0 : i32
    %c0_i32_0 = arith.constant 0 : i32
    %c0_i32_1 = arith.constant 0 : i32
    return %arg0, %c0_i32, %c0_i32_0 : i32, i32, i32
  }
  func.func @transform_1(%arg0: i32) -> (i32, i32) {
    %c0_i32 = arith.constant 0 : i32
    %c0_i32_0 = arith.constant 0 : i32
    %c0_i32_1 = arith.constant 0 : i32
    return %c0_i32, %c0_i32_0 : i32, i32
  }
  func.func @transform_2(%arg0: i32) -> (i32, i32) {
    %c0_i32 = arith.constant 0 : i32
    %c0_i32_0 = arith.constant 0 : i32
    %c0_i32_1 = arith.constant 0 : i32
    return %c0_i32, %c0_i32_0 : i32, i32
  }
  func.func @transform_3(%arg0: i32) -> (i32, i32) {
    %c0_i32 = arith.constant 0 : i32
    %c0_i32_0 = arith.constant 0 : i32
    %c0_i32_1 = arith.constant 0 : i32
    return %c0_i32, %c0_i32_0 : i32, i32
  }
  func.func @transform_4(%arg0: i32) -> (i32, i32) {
    %c0_i32 = arith.constant 0 : i32
    %c0_i32_0 = arith.constant 0 : i32
    %c0_i32_1 = arith.constant 0 : i32
    return %c0_i32, %c0_i32_0 : i32, i32
  }
  func.func @transform_5(%arg0: i32) -> (i32, i32) {
    %c0_i32 = arith.constant 0 : i32
    %c0_i32_0 = arith.constant 0 : i32
    %c0_i32_1 = arith.constant 0 : i32
    return %c0_i32, %c0_i32_0 : i32, i32
  }
  func.func @transform_6(%arg0: i32) -> (i32, i32) {
    %c0_i32 = arith.constant 0 : i32
    %c0_i32_0 = arith.constant 0 : i32
    %c0_i32_1 = arith.constant 0 : i32
    return %c0_i32, %c0_i32_0 : i32, i32
  }
  func.func @transform_7(%arg0: i32) -> (i32, i32) {
    %c0_i32 = arith.constant 0 : i32
    %c0_i32_0 = arith.constant 0 : i32
    %c0_i32_1 = arith.constant 0 : i32
    return %c0_i32, %c0_i32_0 : i32, i32
  }
  func.func @transform_8(%arg0: i32) -> (i32, i32) {
    %c0_i32 = arith.constant 0 : i32
    %c0_i32_0 = arith.constant 0 : i32
    %c0_i32_1 = arith.constant 0 : i32
    return %c0_i32, %c0_i32_0 : i32, i32
  }
  func.func @transform_9(%arg0: i32) -> (i32, i32) {
    %c0_i32 = arith.constant 0 : i32
    %c0_i32_0 = arith.constant 0 : i32
    %c0_i32_1 = arith.constant 0 : i32
    return %c0_i32, %c0_i32_0 : i32, i32
  }
  func.func @transform_10(%arg0: i32) -> (i32, i32) {
    %c0_i32 = arith.constant 0 : i32
    %c0_i32_0 = arith.constant 0 : i32
    %c0_i32_1 = arith.constant 0 : i32
    return %c0_i32, %c0_i32_0 : i32, i32
  }
  func.func @transform_11(%arg0: i32) -> (i32, i32) {
    %c0_i32 = arith.constant 0 : i32
    %c0_i32_0 = arith.constant 0 : i32
    %c0_i32_1 = arith.constant 0 : i32
    return %c0_i32, %c0_i32_0 : i32, i32
  }
  func.func @transform_12(%arg0: i32) -> (i32, i32) {
    %c0_i32 = arith.constant 0 : i32
    %c0_i32_0 = arith.constant 0 : i32
    %c0_i32_1 = arith.constant 0 : i32
    return %c0_i32, %c0_i32_0 : i32, i32
  }
  func.func @transform_13(%arg0: i32) -> (i32, i32) {
    %c0_i32 = arith.constant 0 : i32
    %c0_i32_0 = arith.constant 0 : i32
    %c0_i32_1 = arith.constant 0 : i32
    return %c0_i32, %c0_i32_0 : i32, i32
  }
  func.func @transform_14(%arg0: i32) -> (i32, i32) {
    %c0_i32 = arith.constant 0 : i32
    %c0_i32_0 = arith.constant 0 : i32
    %c0_i32_1 = arith.constant 0 : i32
    return %c0_i32, %c0_i32_0 : i32, i32
  }
  func.func @transform_15(%arg0: i32) -> (i32, i32, i32) {
    %c0_i32 = arith.constant 0 : i32
    %c0_i32_0 = arith.constant 0 : i32
    %c0_i32_1 = arith.constant 0 : i32
    return %arg0, %c0_i32, %c0_i32_0 : i32, i32, i32
  }
}

</mosaic_0001>

<bundles_post_ra>
// kernel: lea_forward_pallas.1
= control target key start
LH: loop header
LB: loop body
LE: loop exit
PB: predicated region body
PF: predicated region fallthrough
CT: control target
= control target key end

     0   :  { %s17276_s18 = smov 0   ;;  %s20590_s0 = inlined_call_operand.vmem [shape: f32[2,64,32], index: 0, kind: input, shape index: {}]   ;;  %s20591_s1 = inlined_call_operand.vmem [shape: f32[16,16], index: 1, kind: input, shape index: {}]   ;;  %s20592_s2 = inlined_call_operand.vmem [shape: f32[9,16], index: 2, kind: input, shape index: {}]   ;;  %s20593_s3 = inlined_call_operand.vmem [shape: f32[1,16], index: 3, kind: input, shape index: {}]   ;;  %s20594_s4 = inlined_call_operand.vmem [shape: f32[9,16], index: 4, kind: input, shape index: {}]   ;;  %s20595_s5 = inlined_call_operand.vmem [shape: f32[1,16], index: 5, kind: input, shape index: {}]   ;;  %s20596_s6 = inlined_call_operand.vmem [shape: f32[16,16], index: 6, kind: input, shape index: {}]   ;;  %s20597_s7 = inlined_call_operand.vmem [shape: f32[1,16], index: 7, kind: input, shape index: {}]   ;;  %s20598_s8 = inlined_call_operand.vmem [shape: f32[9,16], index: 8, kind: input, shape index: {}]   ;;  %s20599_s9 = inlined_call_operand.vmem [shape: f32[1,16], index: 9, kind: input, shape index: {}]   ;;  %s20600_s10 = inlined_call_operand.vmem [shape: f32[32,32], index: 10, kind: input, shape index: {}]   ;;  %s20601_s11 = inlined_call_operand.vmem [shape: f32[1,32], index: 11, kind: input, shape index: {}]   ;;  %s20602_s12 = inlined_call_operand.vmem [shape: f32[16,64], index: 12, kind: input, shape index: {}]   ;;  %s20603_s13 = inlined_call_operand.vmem [shape: f32[64,16], index: 13, kind: input, shape index: {}]   ;;  %s20604_s14 = inlined_call_operand.vmem [shape: f32[64,64], index: 14, kind: input, shape index: {}]   ;;  %s20605_s15 = inlined_call_operand.vmem [shape: f32[2,64,32], index: 15, kind: output, shape index: {}]  }
   0x1 LB: > { %s13402_s19 = sadd.s32 4294967295, %s17186_s18   ;;  %p13406_p0 = scmp.ge.s32.totalorder %s17186_s18, 1  ;;  %s17186_s18 = sphi %s17276_s18, %s25_s18  }
   0x2   : > { %p437_p1 = scmp.lt.s32.totalorder %s17186_s18, 3 }
   0x4   : > { %p438_p2 = pnand %p13406_p0, %p437_p1 }
   0x6   : > { %441 = sbr.rel (%p438_p2) target bundleno = 3913 (0xf49), region = 80 }
   0xd   : > { %v503_v0 = vld [vmem:[%s20591_s1] sm:$0xff]  ;;  %v504_v1 = vld [vmem:[%s20591_s1 + $0x8] sm:$0xff]  ;;  %p485_p3 = scmp.lt.s32.totalorder %s13402_s19, 1  ;;  %vm20717_vm0 = vcmask 130048   ;;  %vm20716_vm1 = vcmask 523264   ;;  %s17189_s23 = smov 4  }
   0xe   : > { %v531_v2 = vand.u32 4294901760, %v503_v0  ;;  %v534_v3 = vand.u32 4294901760, %v504_v1  ;;  %s17190_s25 = smov 124   ;;  %s17191_s30 = smov 120  }
   0xf   : > { %s21198_s19 = smov (!%p485_p3, %s13402_s19), 1  ;;  %s17192_s16 = smov 116  }
  0x10   : > { %v17292_v4 = vpack.c.bf16 %v534_v3, %v531_v2  ;;  %v17294_v5 = vsub.f32 %v503_v0, %v531_v2  ;;  %v17296_v6 = vsub.f32 %v504_v1, %v534_v3  ;;  %s13421_s24 = sshll.u32 %s21198_s19, 6  ;;  %s17193_s17 = smov 8  }
  0x11   : > { %s17305_s27 = scalar_lea.vmem %s20590_s0, %s13421_s24  ;;  %s17194_s22 = smov 12  }
  0x12   : > { %15848 = vmatprep.subr.bf16.mxu0 %v17292_v4  ;;  %15836 = vmatprep.subr.bf16.mxu1 %v17292_v4  ;;  %v680_v7 = vand.u32 4294901760, %v17294_v5  ;;  %v495_v8 = vld [vmem:[%s17305_s27] sm:$0xff]  ;;  %v496_v9 = vld [vmem:[%s17305_s27 + $0x8] sm:$0xff]  ;;  %v497_v10 = vld [vmem:[%s17305_s27 + $0x10] sm:$0xff]  ;;  %v687_v11 = vand.u32 4294901760, %v17296_v6  ;;  %v15843_v60 = vpack.c.bf16 %v17296_v6, %v17294_v5 }
  0x13   : > { %15850 = vmatpush3.bf16.msra.mxu0 %v17292_v4  ;;  %15838 = vmatpush3.bf16.msra.mxu1 %v17292_v4  ;;  %v507_v12 = vsel %vm20717_vm0, %v495_v8, 0  ;;  %v510_v13 = vsel %vm20717_vm0, %v496_v9, 0  ;;  %v513_v14 = vsel %vm20717_vm0, %v497_v10, 0  ;;  %v498_v15 = vld [vmem:[%s17305_s27 + $0x18] sm:$0xff]  ;;  %v499_v16 = vld [vmem:[%s17305_s27 + $0x20] sm:$0xff]  ;;  %v500_v17 = vld [vmem:[%s17305_s27 + $0x28] sm:$0xff] }
  0x14   : > { %v681_v18 = vsub.f32 %v17294_v5, %v680_v7  ;;  %v17322_v19 = vand.u32 4294901760, %v507_v12  ;;  %v17324_v20 = vand.u32 4294901760, %v510_v13  ;;  %v17326_v21 = vand.u32 4294901760, %v513_v14  ;;  %v501_v23 = vld [vmem:[%s17305_s27 + $0x30] sm:$0xff]  ;;  %v502_v52 = vld [vmem:[%s17305_s27 + $0x38] sm:$0xff]  ;;  %v1423_v9 = vld [vmem:[%s20604_s14] sm:$0xff] }
  0x15   : > { %v516_v22 = vsel %vm20717_vm0, %v498_v15, 0  ;;  %v519_v25 = vsel %vm20717_vm0, %v499_v16, 0  ;;  %v522_v26 = vsel %vm20717_vm0, %v500_v17, 0  ;;  %v688_v34 = vsub.f32 %v17296_v6, %v687_v11 }
  0x16   : > { %v17330_v24 = vand.u32 4294901760, %v516_v22  ;;  %v682_v27 = vand.u32 4294901760, %v681_v18  ;;  %v17335_v28 = vsub.f32 %v507_v12, %v17322_v19  ;;  %v17338_v29 = vsub.f32 %v510_v13, %v17324_v20 }
  0x17   : > { %v17341_v30 = vsub.f32 %v513_v14, %v17326_v21  ;;  %v17343_v31 = vand.u32 4294901760, %v519_v25  ;;  %v17348_v33 = vand.u32 4294901760, %v522_v26  ;;  %v525_v35 = vsel %vm20717_vm0, %v501_v23, 0  ;;  %v1424_v23 = vld [vmem:[%s20604_s14 + $0x8] sm:$0xff] }
  0x18   : > { %v17346_v32 = vsub.f32 %v516_v22, %v17330_v24  ;;  %v599_v36 = vand.u32 4294901760, %v17335_v28  ;;  %v609_v37 = vand.u32 4294901760, %v17338_v29  ;;  %v689_v42 = vand.u32 4294901760, %v688_v34  ;;  %v1430_v34 = vld [vmem:[%s20604_s14 + $0x38] sm:$0xff] }
  0x19   : > { %v619_v38 = vand.u32 4294901760, %v17341_v30  ;;  %v17356_v39 = vsub.f32 %v519_v25, %v17343_v31  ;;  %v17360_v41 = vsub.f32 %v522_v26, %v17348_v33  ;;  %v17362_v43 = vand.u32 4294901760, %v525_v35  ;;  %v1426_v25 = vld [vmem:[%s20604_s14 + $0x18] sm:$0xff] }
  0x1a   : > { %v629_v40 = vand.u32 4294901760, %v17346_v32  ;;  %14351 = vmatprep.mubr.f32.mxu0 %v599_v36  ;;  %v600_v44 = vsub.f32 %v17335_v28, %v599_v36  ;;  %v610_v45 = vsub.f32 %v17338_v29, %v609_v37  ;;  %v15839_v50 = vpack.c.bf16 %v689_v42, %v682_v27 }
  0x1b   : > { %v620_v46 = vsub.f32 %v17341_v30, %v619_v38  ;;  %v639_v47 = vand.u32 4294901760, %v17356_v39  ;;  %14352 = vmatmul.mubr.f32.vlgmr.msra.gmra.mrb[0].mxu0 %v609_v37  ;;  %v649_v49 = vand.u32 4294901760, %v17360_v41  ;;  %v17371_v51 = vsub.f32 %v525_v35, %v17362_v43 }
  0x1c   : > { %v630_v48 = vsub.f32 %v17346_v32, %v629_v40  ;;  %v601_v53 = vand.u32 4294901760, %v600_v44  ;;  %14354 = vmatprep.mubr.f32.mxu0 %v619_v38  ;;  %v611_v54 = vand.u32 4294901760, %v610_v45  ;;  %15840 = vmatprep.subr.bf16.mxu1 %v15839_v50  ;;  %v15851_v58 = vpack.c.bf16 %v687_v11, %v680_v7 }
  0x1d   : > { %v621_v55 = vand.u32 4294901760, %v620_v46  ;;  %v640_v56 = vsub.f32 %v17356_v39, %v639_v47  ;;  %v659_v57 = vand.u32 4294901760, %v17371_v51  ;;  %v528_v59 = vsel %vm20717_vm0, %v502_v52, 0 }
  0x1e   : > { %14303 = vmatprep.mubr.f32.mxu1 %v601_v53  ;;  %v631_v61 = vand.u32 4294901760, %v630_v48  ;;  %v650_v62 = vsub.f32 %v17360_v41, %v649_v49  ;;  %v667_v63 = vand.u32 4294901760, %v528_v59  ;;  %15852 = vmatprep.subr.bf16.mxu0 %v15851_v58  ;;  %v1716_v10 = vsel %vm20716_vm1, %v1423_v9, 0 }
  0x1f   : > { %14304 = vmatmul.mubr.f32.vlgmr.msra.gmra.mrb[0].mxu1 %v611_v54  ;;  %14355 = vmatmul.mubr.f32.gmra.mrb[2].mxu0 %v629_v40  ;;  %v641_v0 = vand.u32 4294901760, %v640_v56  ;;  %v660_v1 = vsub.f32 %v17371_v51, %v659_v57  ;;  %v17427_v11 = vand.u32 4294901760, %v1716_v10  ;;  %v1302_v16 = vlaneseq }
  0x20   : > { %14306 = vmatprep.mubr.f32.mxu1 %v621_v55  ;;  %14357 = vmatprep.mubr.f32.mxu0 %v639_v47  ;;  %v668_v2 = vsub.f32 %v528_v59, %v667_v63  ;;  %v651_v3 = vand.u32 4294901760, %v650_v62  ;;  %v20809_v27 = vmov 0  ;;  %v1719_v37 = vsel %vm20716_vm1, %v1424_v23, 0 }
  0x21   : > { %15842 = vmatpush3.bf16.msra.mxu1 %v15839_v50  ;;  %15854 = vmatpush3.bf16.msra.mxu0 %v15851_v58  ;;  %v661_v6 = vand.u32 4294901760, %v660_v1  ;;  %20803 = vst [vmem:[#allocation3_spill] sm:$0xff] %v17427_v11  ;;  %v17430_v12 = vsub.f32 %v1716_v10, %v17427_v11  ;;  %v17437_v17 = vshrl.u32 %v1302_v16, 7  ;;  %v1737_v47 = vsel %vm20716_vm1, %v1430_v34, 0 }
  0x22   : > { %15844 = vmatprep.subr.bf16.mxu1 %v15843_v60  ;;  %v669_v5 = vand.u32 4294901760, %v668_v2  ;;  %15856 = vmatprep.subr.bf16.mxu0 %v17292_v4  ;;  %v17535_v59 = vand.u32 4294901760, %v1737_v47 }
  0x23   : > { %14307 = vmatmul.mubr.f32.gmra.mrb[2].mxu1 %v631_v61  ;;  %14358 = vmatmul.mubr.f32.gmra.mrb[4].mxu0 %v649_v49  ;;  %20804 = vst [vmem:[#allocation4_spill] sm:$0xff] %v17430_v12  ;;  %v17433_v13 = vand.u32 4294901760, %v17430_v12  ;;  %v1315_v18 = vand.u32 7, %v17437_v17  ;;  %v17449_v22 = vsub.s32 0, %v17437_v17  ;;  %v17461_v26 = vsub.s32 4, %v17437_v17 }
  0x24   : > { %14309 = vmatprep.mubr.f32.mxu1 %v641_v0  ;;  %14360 = vmatprep.mubr.f32.mxu0 %v659_v57  ;;  %v670_v7 = vsub.f32 %v668_v2, %v669_v5  ;;  %v17508_v45 = vsub.s32 2, %v17437_v17  ;;  %v17511_v46 = vsub.s32 3, %v17437_v17  ;;  %v17515_v49 = vand.u32 4294901760, %v1719_v37  ;;  %20820 = vst [vmem:[#allocation18_spill] sm:$0xff] %v17535_v59 }
  0x25   : > { %20805 = vst [vmem:[#allocation5_spill] sm:$0xff] %v17433_v13  ;;  %v1815_v14 = vsub.f32 %v17430_v12, %v17433_v13  ;;  %20807 = vst [vmem:[#allocation7_spill] sm:$0xff] %v17449_v22  ;;  %vm17465_vm2 = vcmp.gt.s32.totalorder %v1315_v18, 0  ;;  %v17530_v57 = vadd.s32 24, %v17437_v17  ;;  %v17533_v58 = vadd.s32 56, %v17437_v17 }
  0x26   : > { %v671_v8 = vand.u32 4294901760, %v670_v7  ;;  %20808 = vst [vmem:[#allocation8_spill] sm:$0xff] %v17461_v26  ;;  %v20810_v27 = vsel %vm17465_vm2, 4294967295, %v20809_v27  ;;  %20812 = vst [vmem:[#allocation10_spill] sm:$0xff] %v17508_v45  ;;  %v17550_v1 = vsub.s32 7, %v17437_v17  ;;  %v17578_v16 = vsub.f32 %v1737_v47, %v17535_v59 }
  0x27   : > { %14310 = vmatmul.mubr.f32.gmra.mrb[4].mxu1 %v651_v3  ;;  %14361 = vmatmul.mubr.f32.gmra.mrb[6].mxu0 %v669_v5  ;;  %v1816_v15 = vand.u32 4294901760, %v1815_v14  ;;  %20811 = vst [vmem:[#allocation9_spill] sm:$0xff] %v20810_v27  ;;  %20813 = vst [vmem:[#allocation11_spill] sm:$0xff] %v17511_v46  ;;  %v17574_v14 = vadd.s32 40, %v17437_v17  ;;  %v17582_v23 = vadd.s32 48, %v17437_v17  ;;  %vm17627_vm4 = vcmp.lt.s32.totalorder %v1315_v18, 7 }
  0x28   : > { %14312 = vmatprep.mubr.f32.mxu1 %v661_v6  ;;  %14367 = vmatprep.mubr.f32.mxu0 %v17322_v19  ;;  %20814 = vst [vmem:[#allocation12_spill] sm:$0xff] %v17515_v49  ;;  %20821 = vst [vmem:[#allocation19_spill] sm:$0xff] %v17550_v1  ;;  %v20853_v18 = vmov 0 }
  0x29   : > { %20828 = vst [vmem:[#allocation26_spill] sm:$0xff] %v17578_v16 }
  0x2b   : > { %14313 = vmatmul.mubr.f32.gmra.mrb[6].mxu1 %v671_v8  ;;  %14368 = vmatmul.mubr.f32.vlgmr.msra.gmra.mrb[0].mxu0 %v17324_v20 }
  0x2c   : > { %14319 = vmatprep.mubr.f32.mxu1 %v17322_v19  ;;  %14370 = vmatprep.mubr.f32.mxu0 %v17326_v21 }
  0x2d   : > { %15858 = vmatpush3.bf16.msra.mxu0 %v17292_v4  ;;  %v17188_v4 = vmov 0.0  }
  0x2e   : > { %1290 = vst.msk [vmem:[#allocation2] sm:$0xff] %vm20717_vm0, %v17188_v4  ;;  %1293 = vst.msk [vmem:[#allocation2 + $0x18] sm:$0xff] %vm20717_vm0, %v17188_v4 }
  0x2f   : > { %14320 = vmatmul.mubr.f32.vlgmr.msra.gmra.mrb[0].mxu1 %v17324_v20  ;;  %14371 = vmatmul.mubr.f32.gmra.mrb[2].mxu0 %v17330_v24  ;;  %1291 = vst.msk [vmem:[#allocation2 + $0x8] sm:$0xff] %vm20717_vm0, %v17188_v4  ;;  %1292 = vst.msk [vmem:[#allocation2 + $0x10] sm:$0xff] %vm20717_vm0, %v17188_v4 }
  0x30   : > { %14322 = vmatprep.mubr.f32.mxu1 %v17326_v21  ;;  %14373 = vmatprep.mubr.f32.mxu0 %v17343_v31  ;;  %1294 = vst.msk [vmem:[#allocation2 + $0x20] sm:$0xff] %vm20717_vm0, %v17188_v4  ;;  %1295 = vst.msk [vmem:[#allocation2 + $0x28] sm:$0xff] %vm20717_vm0, %v17188_v4 }
  0x31   : > { %15846 = vmatpush3.bf16.msra.mxu1 %v15843_v60  ;;  %1296 = vst.msk [vmem:[#allocation2 + $0x30] sm:$0xff] %vm20717_vm0, %v17188_v4  ;;  %1297 = vst.msk [vmem:[#allocation2 + $0x38] sm:$0xff] %vm20717_vm0, %v17188_v4  ;;  %v20848_v60 = vmov 0 }
  0x32   : > { %1298 = vst.msk [vmem:[#allocation2 + $0x40] sm:$0xff] %vm20717_vm0, %v17188_v4  ;;  %1299 = vst.msk [vmem:[#allocation2 + $0x48] sm:$0xff] %vm20717_vm0, %v17188_v4 }
  0x33   : > { %14323 = vmatmul.mubr.f32.gmra.mrb[2].mxu1 %v17330_v24  ;;  %14374 = vmatmul.mubr.f32.gmra.mrb[4].mxu0 %v17348_v33  ;;  %1300 = vst.msk [vmem:[#allocation2 + $0x50] sm:$0xff] %vm20717_vm0, %v17188_v4  ;;  %1301 = vst.msk [vmem:[#allocation2 + $0x58] sm:$0xff] %vm20717_vm0, %v17188_v4 }
  0x34   : > { %14325 = vmatprep.mubr.f32.mxu1 %v17343_v31  ;;  %14376 = vmatprep.mubr.f32.mxu0 %v17362_v43 }
  0x36   : > { %v1477_v36 = vld [vmem:[#allocation2 + $0x8] sm:$0xff] }
  0x37   : > { %14326 = vmatmul.mubr.f32.gmra.mrb[4].mxu1 %v17348_v33  ;;  %14377 = vmatmul.mubr.f32.gmra.mrb[6].mxu0 %v667_v63 }
  0x38   : > { %14328 = vmatprep.mubr.f32.mxu1 %v17362_v43  ;;  %14383 = vmatprep.mubr.f32.mxu0 %v17322_v19  ;;  %v17441_v19 = vsub.s32 1, %v17437_v17 }
  0x3a   : > { %20806 = vst [vmem:[#allocation6_spill] sm:$0xff] %v17441_v19  ;;  %v1649_v13 = vld [vmem:[#allocation2 + $0x50] sm:$0xff] }
  0x3b   : > { %14329 = vmatmul.mubr.f32.gmra.mrb[6].mxu1 %v667_v63  ;;  %14384 = vmatmul.mubr.f32.vlgmr.msra.gmra.mrb[0].mxu0 %v17324_v20  ;;  %v17446_v20 = vld [vmem:[%s20592_s2] sm:$0xff] }
  0x3c   : > { %14335 = vmatprep.mubr.f32.mxu1 %v17335_v28  ;;  %14386 = vmatprep.mubr.f32.mxu0 %v17326_v21  ;;  %v1441_v21 = vld [vmem:[#allocation2 + $0x7] sm:$0xff]  ;;  %v17493_v35 = vrot.slane %v17446_v20, %v17449_v22  ;;  %v17505_v44 = vrot.slane %v17446_v20, %v17461_v26  ;;  %v17540_v61 = vrot.slane %v17446_v20, %v17508_v45 }
  0x3d   : > { %v1427_v28 = vld [vmem:[%s20604_s14 + $0x20] sm:$0xff]  ;;  %v1449_v40 = vsel %vm17465_vm2, %v1441_v21, 0.0  ;;  %v17544_v62 = vrot.slane %v17446_v20, %v17511_v46 }
  0x3e   : > { %v1461_v52 = vmul.f32 %v17493_v35, %v1449_v40 }
  0x3f   : > { %14336 = vmatmul.mubr.f32.vlgmr.msra.gmra.mrb[0].mxu1 %v17338_v29  ;;  %14387 = vmatmul.mubr.f32.gmra.mrb[2].mxu0 %v17330_v24  ;;  %v1425_v24 = vld [vmem:[%s20604_s14 + $0x10] sm:$0xff]  ;;  %v1428_v29 = vld [vmem:[%s20604_s14 + $0x28] sm:$0xff] }
  0x40   : > { %14338 = vmatprep.mubr.f32.mxu1 %v17341_v30  ;;  %14389 = vmatprep.mubr.f32.mxu0 %v17343_v31  ;;  %v1429_v30 = vld [vmem:[%s20604_s14 + $0x30] sm:$0xff]  ;;  %v17480_v31 = vrot.slane %v17446_v20, %v17441_v19  ;;  %v1722_v38 = vsel %vm20716_vm1, %v1425_v24, 0  ;;  %v1731_v42 = vsel %vm20716_vm1, %v1428_v29, 0  ;;  %v17585_v24 = vsub.s32 5, %v17437_v17 }
  0x41   : > { %v17517_v50 = vand.u32 4294901760, %v1722_v38  ;;  %v17524_v54 = vand.u32 4294901760, %v1731_v42 }
  0x42   : > { %v1489_v48 = vmul.f32 %v17480_v31, %v1477_v36  ;;  %20829 = vst [vmem:[#allocation27_spill] sm:$0xff] %v17585_v24 }
  0x43   : > { %14339 = vmatmul.mubr.f32.gmra.mrb[2].mxu1 %v17346_v32  ;;  %14390 = vmatmul.mubr.f32.gmra.mrb[4].mxu0 %v17348_v33  ;;  %v17483_v32 = vadd.s32 8, %v17437_v17  ;;  %v17486_v33 = vadd.s32 16, %v17437_v17  ;;  %20815 = vst [vmem:[#allocation13_spill] sm:$0xff] %v17517_v50  ;;  %20818 = vst [vmem:[#allocation16_spill] sm:$0xff] %v17524_v54  ;;  %v17556_v3 = vsub.f32 %v1722_v38, %v17517_v50  ;;  %v17606_v38 = vld [vmem:[%s20594_s4] sm:$0xff] }
  0x44   : > { %14341 = vmatprep.mubr.f32.mxu1 %v17356_v39  ;;  %14392 = vmatprep.mubr.f32.mxu0 %v17362_v43  ;;  %v1725_v39 = vsel %vm20716_vm1, %v1426_v25, 0  ;;  %v1734_v43 = vsel %vm20716_vm1, %v1429_v30, 0  ;;  %v17561_v7 = vadd.f32 %v1489_v48, %v1461_v52  ;;  %v17567_v4 = vsub.f32 %v1731_v42, %v17524_v54  ;;  %v2673_v52 = vld [vmem:[#allocation2 + $0x7] sm:$0xff] }
  0x45   : > { %v17526_v55 = vand.u32 4294901760, %v1734_v43  ;;  %v1322_v56 = vand.u32 7, %v17483_v32  ;;  %20823 = vst [vmem:[#allocation21_spill] sm:$0xff] %v17556_v3  ;;  %v17588_v25 = vsub.s32 6, %v17437_v17  ;;  %v17592_v32 = vrot.slane %v17446_v20, %v17550_v1 }
  0x46   : > { %20826 = vst [vmem:[#allocation24_spill] sm:$0xff] %v17567_v4  ;;  %v17598_v36 = vand.u32 4294901760, %v17556_v3  ;;  %v17618_v47 = vand.u32 4294901760, %v17567_v4  ;;  %v17664_v10 = vrot.slane %v17606_v38, %v17441_v19  ;;  %v2681_v12 = vsel %vm17465_vm2, %v2673_v52, 0.0  ;;  %v2709_v19 = vld [vmem:[#allocation2 + $0x8] sm:$0xff] }
  0x47   : > { %14342 = vmatmul.mubr.f32.gmra.mrb[4].mxu1 %v17360_v41  ;;  %14393 = vmatmul.mubr.f32.gmra.mrb[6].mxu0 %v667_v63  ;;  %v1728_v41 = vsel %vm20716_vm1, %v1427_v28, 0  ;;  %20819 = vst [vmem:[#allocation17_spill] sm:$0xff] %v17526_v55  ;;  %v17547_v63 = vadd.s32 32, %v17437_v17  ;;  %v17570_v9 = vsub.f32 %v1734_v43, %v17526_v55  ;;  %20830 = vst [vmem:[#allocation28_spill] sm:$0xff] %v17588_v25  ;;  %v1670_v28 = vld [vmem:[#allocation2 + $0x51] sm:$0xff]  ;;  %vm17610_vm3 = vcmp.gt.s32.totalorder %v1322_v56, 0 }
  0x48   : > { %14344 = vmatprep.mubr.f32.mxu1 %v17371_v51  ;;  %14579 = vmatprep.mubr.f32.mxu0 %v1816_v15  ;;  %v17519_v51 = vand.u32 4294901760, %v1725_v39  ;;  %v17522_v53 = vand.u32 4294901760, %v1728_v41  ;;  %20832 = vst [vmem:[#allocation30_spill] sm:$0xff] %v17598_v36  ;;  %20839 = vst [vmem:[#allocation35_spill] sm:$0xff] %v17618_v47  ;;  %vm17631_vm5 = vcmp.lt.s32.totalorder %v1322_v56, 7  ;;  %v20852_v17 = vand.u32 7, %v17486_v33 }
  0x49   : > { %20827 = vst [vmem:[#allocation25_spill] sm:$0xff] %v17570_v9  ;;  %v17621_v48 = vand.u32 4294901760, %v17570_v9  ;;  %20858 = vst [vmem:[#allocation45_spill] sm:$0xff] %v17664_v10  ;;  %v20862_v52 = vmov 0 }
  0x4a   : > { %20816 = vst [vmem:[#allocation14_spill] sm:$0xff] %v17519_v51  ;;  %20817 = vst [vmem:[#allocation15_spill] sm:$0xff] %v17522_v53  ;;  %v17559_v5 = vsub.f32 %v1725_v39, %v17519_v51  ;;  %v17564_v8 = vsub.f32 %v1728_v41, %v17522_v53  ;;  %v20835_v41 = vmov 0  ;;  %vm17649_vm7 = vcmp.gt.s32.totalorder %v20852_v17, 0 }
  0x4b   : > { %14345 = vmatmul.mubr.f32.gmra.mrb[6].mxu1 %v668_v2  ;;  %v17553_v2 = vsub.f32 %v1719_v37, %v17515_v49  ;;  %v20836_v41 = vsel %vm17610_vm3, 4294967295, %v20835_v41  ;;  %20840 = vst [vmem:[#allocation36_spill] sm:$0xff] %v17621_v48  ;;  %v20854_v18 = vsel %vm17649_vm7, 4294967295, %v20853_v18 }
  0x4c   : > { %14411 = vmatprep.mubr.f32.mxu1 %v1816_v15  ;;  %20824 = vst [vmem:[#allocation22_spill] sm:$0xff] %v17559_v5  ;;  %20825 = vst [vmem:[#allocation23_spill] sm:$0xff] %v17564_v8  ;;  %v20606_v15 = vand.u32 7, %v17533_v58  ;;  %v17601_v37 = vand.u32 4294901760, %v17559_v5  ;;  %v17615_v43 = vand.u32 4294901760, %v17564_v8 }
  0x4d   : > { %20822 = vst [vmem:[#allocation20_spill] sm:$0xff] %v17553_v2  ;;  %v17595_v34 = vand.u32 4294901760, %v17553_v2  ;;  %20837 = vst [vmem:[#allocation33_spill] sm:$0xff] %v20836_v41 }
  0x4e   : > { %20833 = vst [vmem:[#allocation31_spill] sm:$0xff] %v17601_v37  ;;  %20838 = vst [vmem:[#allocation34_spill] sm:$0xff] %v17615_v43  ;;  %vm17638_vm6 = vcmp.lt.s32.totalorder %v20606_v15, 7  ;;  %v17660_v15 = vrot.slane %v17606_v38, %v17449_v22  ;;  %v1845_v22 = vsub.f32 %v17559_v5, %v17601_v37  ;;  %v1855_v54 = vsub.f32 %v17564_v8, %v17615_v43 }
  0x4f   : > { %20831 = vst [vmem:[#allocation29_spill] sm:$0xff] %v17595_v34  ;;  %v20849_v60 = vsel %vm17638_vm6, 4294967295, %v20848_v60  ;;  %20855 = vst [vmem:[#allocation42_spill] sm:$0xff] %v20854_v18  ;;  %v1825_v56 = vsub.f32 %v17553_v2, %v17595_v34  ;;  %v1865_v34 = vsub.f32 %v17567_v4, %v17618_v47  ;;  %v20861_v37 = vand.u32 7, %v17530_v57 }
  0x50   : > { %20850 = vst [vmem:[#allocation40_spill] sm:$0xff] %v20849_v60  ;;  %20857 = vst [vmem:[#allocation44_spill] sm:$0xff] %v17660_v15  ;;  %v2721_v47 = vmul.f32 %v17664_v10, %v2709_v19  ;;  %v17730_v4 = vand.u32 4294901760, %v1845_v22  ;;  %v20875_v19 = vand.u32 7, %v17574_v14  ;;  %v20876_v8 = vmov 0 }
  0x51   : > { %vm17688_vm8 = vcmp.gt.s32.totalorder %v20861_v37, 0  ;;  %v17709_v37 = vld [vmem:[%s20592_s2 + $0x8] ss:$0 sm:$0xff]  ;;  %v17748_v22 = vand.u32 4294901760, %v1865_v34  ;;  %v17758_v2 = vrot.slane %v17606_v38, %v17508_v45  ;;  %v20907_v10 = vmov 0 }
  0x52   : > { %v20863_v52 = vsel %vm17688_vm8, 4294967295, %v20862_v52  ;;  %20873 = vst [vmem:[#allocation54_spill] sm:$0xff] %v17730_v4  ;;  %vm17736_vm10 = vcmp.gt.s32.totalorder %v20875_v19, 0 }
  0x53   : > { %20864 = vst [vmem:[#allocation48_spill] sm:$0xff] %v20863_v52  ;;  %v20877_v8 = vsel %vm17736_vm10, 4294967295, %v20876_v8  ;;  %20884 = vst [vmem:[#allocation59_spill] sm:$0xff] %v17748_v22 }
  0x54   : > { %20878 = vst [vmem:[#allocation56_spill] sm:$0xff] %v20877_v8  ;;  %20888 = vst [vmem:[#allocation63_spill] sm:$0xff] %v17758_v2  ;;  %v20906_v2 = vand.u32 7, %v17486_v33 }
  0x56   : > { %vm17901_vm14 = vcmp.lt.s32.totalorder %v20906_v2, 7 }
  0x57   : > { %v20908_v10 = vsel %vm17901_vm14, 4294967295, %v20907_v10 }
  0x58   : > { %20909 = vst [vmem:[#allocation75_spill] sm:$0xff] %v20908_v10 }
 0x10e   : > { %v14385_v0 = vpop.f32.mrb[0].mxu0 }
 0x10f   : > { %v1244_v6 = vpop.f32.mrb[1].mxu0 }
 0x112   : > { %v14337_v29 = vpop.f32.mrb[0].mxu1  ;;  %v14388_v30 = vpop.f32.mrb[2].mxu0 }
 0x113   : > { %v17608_v39 = vadd.f32 %v14385_v0, %v14337_v29  ;;  %v872_v40 = vpop.f32.mrb[1].mxu1  ;;  %v1256_v42 = vpop.f32.mrb[3].mxu0  ;;  %v20842_v0 = vmov 0  ;;  %v20845_v29 = vmov 0 }
 0x114   : > { %v17623_v21 = vadd.f32 %v1244_v6, %v872_v40  ;;  %v20843_v0 = vsel %vm17627_vm4, 4294967295, %v20842_v0  ;;  %v20846_v29 = vsel %vm17631_vm5, 4294967295, %v20845_v29  ;;  %v17643_v6 = vand.u32 4294901760, %v17578_v16 }
 0x115   : > { %20834 = vst [vmem:[#allocation32_spill] sm:$0xff] %v17608_v39  ;;  %20844 = vst [vmem:[#allocation38_spill] sm:$0xff] %v20843_v0  ;;  %v17656_v40 = vsel %vm17638_vm6, %v1670_v28, 0.0  ;;  %v1835_v28 = vsub.f32 %v17556_v3, %v17598_v36  ;;  %v1875_v36 = vsub.f32 %v17570_v9, %v17621_v48  ;;  %v20865_v48 = vand.u32 7, %v17547_v63 }
 0x116   : > { %20841 = vst [vmem:[#allocation37_spill] sm:$0xff] %v17623_v21  ;;  %20847 = vst [vmem:[#allocation39_spill] sm:$0xff] %v20846_v29  ;;  %v14340_v17 = vpop.f32.mrb[2].mxu1  ;;  %v17726_v9 = vand.u32 4294901760, %v1825_v56 }
 0x117   : > { %20851 = vst [vmem:[#allocation41_spill] sm:$0xff] %v17643_v6  ;;  %1432 = vst.msk [vmem:[#allocation2 + $0x18] sm:$0xff] %vm20717_vm0, %v17608_v39  ;;  %v14391_v39 = vpop.f32.mrb[4].mxu0  ;;  %v17676_v59 = vadd.f32 %v14388_v30, %v14340_v17  ;;  %v886_v55 = vpop.f32.mrb[3].mxu1  ;;  %v17694_v30 = vrot.slane %v17446_v20, %v17585_v24  ;;  %v1885_v17 = vsub.f32 %v17578_v16, %v17643_v6  ;;  %vm17702_vm9 = vcmp.gt.s32.totalorder %v20865_v48, 0 }
 0x118   : > { %20856 = vst [vmem:[#allocation43_spill] sm:$0xff] %v17656_v40  ;;  %1431 = vst.msk [vmem:[#allocation2 + $0x10] sm:$0xff] %vm20717_vm0, %v17623_v21  ;;  %v1268_v21 = vpop.f32.mrb[5].mxu0  ;;  %v17684_v3 = vadd.f32 %v1256_v42, %v886_v55  ;;  %v20866_v55 = vmov 0  ;;  %v17713_v42 = vrot.slane %v17446_v20, %v17588_v25  ;;  %v17716_v6 = vmul.f32 %v17592_v32, %v1649_v13 }
 0x119   : > { %20859 = vst [vmem:[#allocation46_spill] sm:$0xff] %v17676_v59  ;;  %1434 = vst.msk [vmem:[#allocation2 + $0x28] sm:$0xff] %vm20717_vm0, %v17676_v59  ;;  %v20867_v55 = vsel %vm17702_vm9, 4294967295, %v20866_v55  ;;  %v2693_v59 = vmul.f32 %v17660_v15, %v2681_v12  ;;  %v17724_v16 = vmul.f32 %v17709_v37, %v17656_v40  ;;  %v17728_v20 = vand.u32 4294901760, %v1835_v28 }
 0x11a   : > { %20860 = vst [vmem:[#allocation47_spill] sm:$0xff] %v17684_v3  ;;  %20868 = vst [vmem:[#allocation49_spill] sm:$0xff] %v20867_v55  ;;  %v14343_v48 = vpop.f32.mrb[4].mxu1  ;;  %v14394_v43 = vpop.f32.mrb[6].mxu0  ;;  %v20880_v40 = vmov 0  ;;  %v17746_v28 = vand.u32 4294901760, %v1855_v54 }
 0x11b   : > { %20869 = vst [vmem:[#allocation50_spill] sm:$0xff] %v17716_v6  ;;  %1433 = vst.msk [vmem:[#allocation2 + $0x20] sm:$0xff] %vm20717_vm0, %v17684_v3  ;;  %v17732_v13 = vadd.f32 %v14391_v39, %v14343_v48  ;;  %v900_v12 = vpop.f32.mrb[5].mxu1  ;;  %v20879_v3 = vand.u32 7, %v17582_v23  ;;  %v1280_v56 = vpop.f32.mrb[7].mxu0  ;;  %v17750_v39 = vand.u32 4294901760, %v1875_v36  ;;  %v17768_v36 = vadd.f32 %v2721_v47, %v2693_v59 }
 0x11c   : > { %20870 = vst [vmem:[#allocation51_spill] sm:$0xff] %v17724_v16  ;;  %20871 = vst [vmem:[#allocation52_spill] sm:$0xff] %v17726_v9  ;;  %v17752_v5 = vadd.f32 %v1268_v21, %v900_v12  ;;  %v17754_v19 = vand.u32 4294901760, %v1885_v17  ;;  %v17772_v21 = vrot.slane %v17606_v38, %v17511_v46  ;;  %v17776_v17 = vrot.slane %v17606_v38, %v17585_v24 }
 0x11d   : > { %20872 = vst [vmem:[#allocation53_spill] sm:$0xff] %v17728_v20  ;;  %20874 = vst [vmem:[#allocation55_spill] sm:$0xff] %v17732_v13  ;;  %vm17742_vm11 = vcmp.gt.s32.totalorder %v20879_v3, 0  ;;  %v17762_v3 = vrot.slane %v17606_v38, %v17461_v26  ;;  %v17780_v12 = vrot.slane %v17606_v38, %v17550_v1  ;;  %v17791_v24 = vrot.slane %v17606_v38, %v17588_v25 }
 0x11e   : > { %v20881_v40 = vsel %vm17742_vm11, 4294967295, %v20880_v40  ;;  %20883 = vst [vmem:[#allocation58_spill] sm:$0xff] %v17746_v28  ;;  %20885 = vst [vmem:[#allocation60_spill] sm:$0xff] %v17750_v39  ;;  %v1479_v48 = vld [vmem:[#allocation2 + $0x18] sm:$0xff]  ;;  %v14346_v46 = vpop.f32.mrb[6].mxu1 }
 0x11f   : > { %20882 = vst [vmem:[#allocation57_spill] sm:$0xff] %v20881_v40  ;;  %20886 = vst [vmem:[#allocation61_spill] sm:$0xff] %v17752_v5  ;;  %v1442_v53 = vld [vmem:[#allocation2 + $0xf] sm:$0xff]  ;;  %v17764_v54 = vld [vmem:[#allocation2 + $0x17] sm:$0xff]  ;;  %v17794_v1 = vmul.f32 %v17480_v31, %v1479_v48  ;;  %v1576_v11 = vmul.f32 %v17505_v44, %v1479_v48 }
 0x120   : > { %20887 = vst [vmem:[#allocation62_spill] sm:$0xff] %v17754_v19  ;;  %20889 = vst [vmem:[#allocation64_spill] sm:$0xff] %v17762_v3  ;;  %v1478_v34 = vld [vmem:[#allocation2 + $0x10] sm:$0xff]  ;;  %v1450_v45 = vsel %vm17610_vm3, %v1442_v53, 0.0  ;;  %v1542_v47 = vsel %vm17465_vm2, %v1442_v53, 0.0  ;;  %v914_v53 = vpop.f32.mrb[7].mxu1 }
 0x121   : > { %1436 = vst.msk [vmem:[#allocation2 + $0x38] sm:$0xff] %vm20717_vm0, %v17732_v13  ;;  %20890 = vst [vmem:[#allocation65_spill] sm:$0xff] %v17768_v36  ;;  %v1490_v26 = vmul.f32 %v17480_v31, %v1478_v34  ;;  %v1505_v13 = vld [vmem:[#allocation2 + $0x9] sm:$0xff]  ;;  %v1506_v59 = vld [vmem:[#allocation2 + $0x11] sm:$0xff]  ;;  %v1462_v51 = vmul.f32 %v17493_v35, %v1450_v45  ;;  %v20895_v19 = vand.u32 7, %v17533_v58  ;;  %v20896_v45 = vmov 0 }
 0x122   : > { %20891 = vst [vmem:[#allocation66_spill] sm:$0xff] %v17772_v21  ;;  %20892 = vst [vmem:[#allocation67_spill] sm:$0xff] %v17776_v17  ;;  %v1513_v50 = vsel %vm17627_vm4, %v1505_v13, 0.0  ;;  %v1514_v49 = vsel %vm17631_vm5, %v1506_v59, 0.0  ;;  %v17806_v25 = vld [vmem:[#allocation2 + $0x28] sm:$0xff]  ;;  %v17815_v13 = vmul.f32 %v17592_v32, %v1479_v48  ;;  %v1554_v28 = vmul.f32 %v17544_v62, %v1542_v47  ;;  %v17819_v4 = vld [vmem:[#allocation2 + $0x1f] sm:$0xff] }
 0x123   : > { %20893 = vst [vmem:[#allocation68_spill] sm:$0xff] %v17780_v12  ;;  %1435 = vst.msk [vmem:[#allocation2 + $0x30] sm:$0xff] %vm20717_vm0, %v17752_v5  ;;  %v1525_v38 = vmul.f32 %v17540_v61, %v1513_v50  ;;  %vm17810_vm12 = vcmp.gt.s32.totalorder %v20895_v19, 0  ;;  %v1498_v39 = vadd.f32 %v1490_v26, %v1462_v51  ;;  %v1526_v22 = vmul.f32 %v17540_v61, %v1514_v49  ;;  %v17821_v5 = vld [vmem:[#allocation2 + $0x27] sm:$0xff] }
 0x124   : > { %20894 = vst [vmem:[#allocation69_spill] sm:$0xff] %v17791_v24  ;;  %v20897_v45 = vsel %vm17810_vm12, 4294967295, %v20896_v45  ;;  %v1480_v50 = vld [vmem:[#allocation2 + $0x20] sm:$0xff]  ;;  %v17823_v12 = vadd.f32 %v14394_v43, %v14346_v46  ;;  %v20900_v58 = vand.u32 7, %v17582_v23  ;;  %v20901_v19 = vmov 0 }
 0x125   : > { %20898 = vst [vmem:[#allocation70_spill] sm:$0xff] %v20897_v45  ;;  %v1533_v48 = vadd.f32 %v1525_v38, %v17561_v7  ;;  %v1575_v26 = vmul.f32 %v17505_v44, %v1478_v34  ;;  %v1452_v49 = vsel %vm17688_vm8, %v17819_v4, 0.0  ;;  %v1492_v51 = vmul.f32 %v17480_v31, %v1480_v50  ;;  %v17851_v34 = vld [vmem:[#allocation2 + $0x19] sm:$0xff] }
 0x126   : > { %20899 = vst [vmem:[#allocation71_spill] sm:$0xff] %v17823_v12  ;;  %vm17827_vm13 = vcmp.lt.s32.totalorder %v20900_v58, 7  ;;  %v1534_v47 = vadd.f32 %v1526_v22, %v1498_v39  ;;  %v17839_v46 = vmul.f32 %v17480_v31, %v17806_v25  ;;  %v17843_v23 = vmul.f32 %v17505_v44, %v17806_v25  ;;  %1438 = vst.msk [vmem:[#allocation2 + $0x48] sm:$0xff] %vm20717_vm0, %v17823_v12 }
 0x127   : > { %v20902_v19 = vsel %vm17827_vm13, 4294967295, %v20901_v19  ;;  %v1464_v43 = vmul.f32 %v17493_v35, %v1452_v49  ;;  %v17855_v39 = vadd.f32 %v1280_v56, %v914_v53  ;;  %v1543_v38 = vsel %vm17610_vm3, %v17764_v54, 0.0 }
 0x128   : > { %20903 = vst [vmem:[#allocation72_spill] sm:$0xff] %v20902_v19  ;;  %v17853_v22 = vld [vmem:[#allocation2 + $0x38] sm:$0xff]  ;;  %v1562_v58 = vadd.f32 %v1554_v28, %v1533_v48  ;;  %v17863_v49 = vmul.f32 %v17505_v44, %v1480_v50  ;;  %v1555_v20 = vmul.f32 %v17544_v62, %v1543_v38  ;;  %v1592_v56 = vsel %vm17627_vm4, %v1506_v59, 0.0 }
 0x129   : > { %20904 = vst [vmem:[#allocation73_spill] sm:$0xff] %v17853_v22  ;;  %20905 = vst [vmem:[#allocation74_spill] sm:$0xff] %v17855_v39  ;;  %v17860_v24 = vadd.f32 %v1492_v51, %v1464_v43  ;;  %v1495_v53 = vmul.f32 %v17480_v31, %v17853_v22  ;;  %v17888_v59 = vmul.f32 %v17505_v44, %v17853_v22  ;;  %v1593_v21 = vsel %vm17631_vm5, %v17851_v34, 0.0 }
 0x12a   : > { %v17865_v12 = vld [vmem:[#allocation2 + $0x2f] sm:$0xff]  ;;  %v17867_v17 = vld [vmem:[#allocation2 + $0x37] sm:$0xff]  ;;  %1437 = vst.msk [vmem:[#allocation2 + $0x40] sm:$0xff] %vm20717_vm0, %v17855_v39  ;;  %v1563_v9 = vadd.f32 %v1555_v20, %v1534_v47  ;;  %v1583_v3 = vadd.f32 %v1575_v26, %v1562_v58  ;;  %v1604_v36 = vmul.f32 %v17694_v30, %v1592_v56  ;;  %v1621_v39 = vsel %vm17465_vm2, %v17764_v54, 0.0 }
 0x12b   : > { %v17869_v7 = vld [vmem:[#allocation2 + $0x30] sm:$0xff]  ;;  %v1454_v28 = vsel %vm17736_vm10, %v17865_v12, 0.0  ;;  %v1455_v48 = vsel %vm17742_vm11, %v17867_v17, 0.0  ;;  %v20911_v20 = vmov 0  ;;  %v1605_v27 = vmul.f32 %v17694_v30, %v1593_v21 }
 0x12c   : > { %v1494_v51 = vmul.f32 %v17480_v31, %v17869_v7  ;;  %v1466_v43 = vmul.f32 %v17493_v35, %v1454_v28  ;;  %v1467_v38 = vmul.f32 %v17493_v35, %v1455_v48  ;;  %v20910_v28 = vand.u32 7, %v17530_v57 }
 0x12d   : > { %v17915_v47 = vmul.f32 %v17505_v44, %v17869_v7  ;;  %v1584_v56 = vadd.f32 %v1576_v11, %v1563_v9  ;;  %v1570_v48 = vld [vmem:[#allocation2 + $0x48] sm:$0xff]  ;;  %v1612_v57 = vadd.f32 %v1604_v36, %v1583_v3  ;;  %v1655_v21 = vmul.f32 %v17592_v32, %v1480_v50 }
 0x12e   : > { %vm17907_vm15 = vcmp.lt.s32.totalorder %v20910_v28, 7  ;;  %v17911_v26 = vadd.f32 %v1494_v51, %v1466_v43  ;;  %v1503_v58 = vadd.f32 %v1495_v53, %v1467_v38  ;;  %v17917_v33 = vld [vmem:[#allocation2 + $0x49] sm:$0xff]  ;;  %v1622_v28 = vsel %vm17610_vm3, %v17819_v4, 0.0  ;;  %v1508_v3 = vld [vmem:[#allocation2 + $0x21] sm:$0xff] }
 0x12f   : > { %v20912_v20 = vsel %vm17907_vm15, 4294967295, %v20911_v20  ;;  %20914 = vst [vmem:[#allocation77_spill] sm:$0xff] %v17917_v33  ;;  %v17919_v2 = vld [vmem:[#allocation2 + $0x4f] sm:$0xff]  ;;  %v1633_v51 = vmul.f32 %v17713_v42, %v1621_v39  ;;  %v17927_v43 = vmul.f32 %v17505_v44, %v1570_v48  ;;  %v17937_v36 = vmul.f32 %v17592_v32, %v1570_v48 }
 0x130   : > { %20913 = vst [vmem:[#allocation76_spill] sm:$0xff] %v20912_v20  ;;  %20915 = vst [vmem:[#allocation78_spill] sm:$0xff] %v17919_v2  ;;  %v1677_v39 = vsel %vm17827_vm13, %v17917_v33, 0.0  ;;  %v1613_v53 = vadd.f32 %v1605_v27, %v1584_v56  ;;  %v1634_v50 = vmul.f32 %v17713_v42, %v1622_v28  ;;  %v1671_v48 = vsel %vm17627_vm4, %v17851_v34, 0.0 }
 0x131   : > { %20916 = vst [vmem:[#allocation79_spill] sm:$0xff] %v17927_v43  ;;  %v1641_v38 = vadd.f32 %v1633_v51, %v1612_v57  ;;  %v17943_v15 = vmul.f32 %v17709_v37, %v1677_v39  ;;  %v17945_v11 = vld [vmem:[#allocation2 + $0x3f] sm:$0xff]  ;;  %v20917_v27 = vsel %vm17649_vm7, %v17764_v54, 0.0  ;;  %v17970_v0 = vld [vmem:[#allocation2 + $0x47] sm:$0xff]  ;;  %v1683_v22 = vmul.f32 %v17709_v37, %v1671_v48 }
 0x132   : > { %v17947_v41 = vld [vmem:[#allocation2 + $0x40] sm:$0xff]  ;;  %v1463_v56 = vmul.f32 %v17493_v35, %v20917_v27  ;;  %v1456_v57 = vsel %vm17810_vm12, %v17945_v11, 0.0  ;;  %v1548_v54 = vsel %vm17742_vm11, %v17945_v11, 0.0  ;;  %v1642_v33 = vadd.f32 %v1634_v50, %v1613_v53 }
 0x133   : > { %v17949_v9 = vld [vmem:[#allocation2 + $0x39] sm:$0xff]  ;;  %v1496_v51 = vmul.f32 %v17480_v31, %v17947_v41  ;;  %v17965_v39 = vld [vmem:[#allocation2 + $0x41] sm:$0xff]  ;;  %v1468_v27 = vmul.f32 %v17493_v35, %v1456_v57  ;;  %v1560_v6 = vmul.f32 %v17544_v62, %v1548_v54  ;;  %v1672_v31 = vsel %vm17631_vm5, %v1508_v3, 0.0 }
 0x134   : > { %20918 = vst [vmem:[#allocation80_spill] sm:$0xff] %v17965_v39  ;;  %v1519_v28 = vsel %vm17827_vm13, %v17949_v9, 0.0  ;;  %v1581_v43 = vmul.f32 %v17505_v44, %v17947_v41  ;;  %v1598_v2 = vsel %vm17827_vm13, %v17965_v39, 0.0  ;;  %v1662_v45 = vadd.f32 %v17815_v13, %v1641_v38  ;;  %v17998_v13 = vld [vmem:[%s20593_s3] ss:$0 sm:$0xff] }
 0x135   : > { %v1531_v16 = vmul.f32 %v17540_v61, %v1519_v28  ;;  %v17986_v60 = vadd.f32 %v1496_v51, %v1468_v27  ;;  %v1610_v28 = vmul.f32 %v17694_v30, %v1598_v2  ;;  %v1627_v54 = vsel %vm17742_vm11, %v17970_v0, 0.0  ;;  %v18008_v2 = vld [vmem:[#allocation2 + $0x29] sm:$0xff] }
 0x136   : > { %v1663_v29 = vadd.f32 %v1655_v21, %v1642_v33  ;;  %v1684_v44 = vmul.f32 %v17709_v37, %v1672_v31  ;;  %v1499_v19 = vadd.f32 %v17794_v1, %v1463_v56  ;;  %v1544_v33 = vsel %vm17649_vm7, %v17819_v4, 0.0 }
 0x137   : > { %v1539_v57 = vadd.f32 %v1531_v16, %v1503_v58  ;;  %v1515_v16 = vsel %vm17901_vm14, %v17851_v34, 0.0  ;;  %v1516_v58 = vsel %vm17907_vm15, %v1508_v3, 0.0  ;;  %v1691_v1 = vadd.f32 %v1683_v22, %v1662_v45 }
 0x138   : > { %v1527_v21 = vmul.f32 %v17540_v61, %v1515_v16  ;;  %v1528_v53 = vmul.f32 %v17540_v61, %v1516_v58  ;;  %v1639_v50 = vmul.f32 %v17713_v42, %v1627_v54  ;;  %v1545_v34 = vsel %vm17688_vm8, %v17821_v5, 0.0 }
 0x139   : > { %v1568_v39 = vadd.f32 %v1560_v6, %v1539_v57  ;;  %v1692_v6 = vadd.f32 %v1684_v44, %v1663_v29  ;;  %v1594_v48 = vsel %vm17901_vm14, %v1508_v3, 0.0  ;;  %v18019_v4 = vadd.f32 %v17998_v13, %v1691_v1 }
 0x13a   : > { %v1535_v29 = vadd.f32 %v1527_v21, %v1499_v19  ;;  %v1536_v22 = vadd.f32 %v1528_v53, %v17860_v24  ;;  %v1557_v51 = vmul.f32 %v17544_v62, %v1545_v34  ;;  %v1606_v19 = vmul.f32 %v17694_v30, %v1594_v48 }
 0x13b   : > { %v1589_v38 = vadd.f32 %v1581_v43, %v1568_v39  ;;  %v18022_v45 = vadd.f32 %v17998_v13, %v1692_v6  ;;  %v1556_v43 = vmul.f32 %v17544_v62, %v1544_v33  ;;  %v1595_v39 = vsel %vm17907_vm15, %v18008_v2, 0.0 }
 0x13c   : > { %v1740_v3 = vand.u32 4294901760, %v18019_v4  ;;  %v18033_v31 = vmul.f32 0.5, %v18019_v4  ;;  %v20919_v24 = vand.u32 7, %v17547_v63  ;;  %v20920_v57 = vmov 0 }
 0x13d   : > { %v1618_v56 = vadd.f32 %v1610_v28, %v1589_v38  ;;  %v1743_v27 = vand.u32 4294901760, %v18022_v45  ;;  %v2599_v54 = vmul.f32 0.044715, %v18019_v4  ;;  %v2600_v44 = vmul.f32 0.044715, %v18022_v45 }
 0x13e   : > { %vm18038_vm1 = vcmp.lt.s32.totalorder %v20919_v24, 7  ;;  %v1564_v16 = vadd.f32 %v1556_v43, %v1535_v29  ;;  %v20923_v58 = vand.u32 7, %v17574_v14  ;;  %v20924_v33 = vmov 0 }
 0x13f   : > { %v20921_v57 = vsel %vm18038_vm1, 4294967295, %v20920_v57  ;;  %v1647_v28 = vadd.f32 %v1639_v50, %v1618_v56  ;;  %v18054_v63 = vpack.c.bf16 %v1743_v27, %v1740_v3  ;;  %v18057_v1 = vmul.f32 0.5, %v18022_v45  ;;  %v18073_v56 = vld [vmem:[#allocation2 + $0x31] sm:$0xff] }
 0x140   : > { %20922 = vst [vmem:[#allocation81_spill] sm:$0xff] %v20921_v57  ;;  %vm18046_vm0 = vcmp.lt.s32.totalorder %v20923_v58, 7  ;;  %v1565_v6 = vadd.f32 %v1557_v51, %v1536_v22  ;;  %v1623_v21 = vsel %vm17649_vm7, %v17821_v5, 0.0  ;;  %v2607_v53 = vmul.f32 %v2599_v54, %v18019_v4  ;;  %v20984_v57 = vld [vmem:[#allocation72_spill] sm:$0xff] }
 0x141   : > { %v20925_v33 = vsel %vm18046_vm0, 4294967295, %v20924_v33  ;;  %v1668_v14 = vadd.f32 %v17937_v36, %v1647_v28  ;;  %v2608_v38 = vmul.f32 %v2600_v44, %v18022_v45  ;;  %v1585_v50 = vadd.f32 %v17863_v49, %v1564_v16  ;;  %15860 = vmatprep.subr.bf16.mxu1 %v18054_v63 }
 0x142   : > { %20926 = vst [vmem:[#allocation82_spill] sm:$0xff] %v20925_v33  ;;  %v1586_v34 = vadd.f32 %v17843_v23, %v1565_v6  ;;  %v1607_v48 = vmul.f32 %v17694_v30, %v1595_v39  ;;  %v1624_v29 = vsel %vm17688_vm8, %v17865_v12, 0.0  ;;  %v1635_v22 = vmul.f32 %v17713_v42, %v1623_v21  ;;  %15862 = vmatpush3.bf16.msra.mxu1 %v18054_v63  ;;  %v20983_v33 = vld [vmem:[#allocation21_spill] sm:$0xff] }
 0x143   : > { %v1697_v36 = vadd.f32 %v17943_v15, %v1668_v14  ;;  %v2615_v43 = vmul.f32 %v2607_v53, %v18019_v4  ;;  %v2616_v49 = vmul.f32 %v2608_v38, %v18022_v45  ;;  %v1614_v51 = vadd.f32 %v1606_v19, %v1585_v50 }
 0x144   : > { %v1615_v23 = vadd.f32 %v1607_v48, %v1586_v34  ;;  %v1636_v39 = vmul.f32 %v17713_v42, %v1624_v29  ;;  %v1656_v24 = vmul.f32 %v17592_v32, %v17806_v25  ;;  %v1673_v28 = vsel %vm17901_vm14, %v18008_v2, 0.0 }
 0x145   : > { %v18086_v54 = vadd.f32 %v17998_v13, %v1697_v36  ;;  %v2623_v15 = vadd.f32 %v2615_v43, %v18019_v4  ;;  %v2624_v44 = vadd.f32 %v2616_v49, %v18022_v45  ;;  %v1643_v16 = vadd.f32 %v1635_v22, %v1614_v51 }
 0x146   : > { %v1644_v58 = vadd.f32 %v1636_v39, %v1615_v23  ;;  %v1657_v19 = vmul.f32 %v17592_v32, %v17869_v7  ;;  %v1674_v25 = vsel %vm17907_vm15, %v18073_v56, 0.0  ;;  %v20927_v6 = vsel %vm17702_vm9, %v17821_v5, 0.0 }
 0x147   : > { %v1465_v21 = vmul.f32 %v17493_v35, %v20927_v6  ;;  %v2605_v14 = vmul.f32 0.044715, %v18086_v54  ;;  %v2631_v53 = vmul.f32 0.7978846, %v2623_v15  ;;  %v1664_v38 = vadd.f32 %v1656_v24, %v1643_v16 }
 0x148   : > { %v1685_v50 = vmul.f32 %v17709_v37, %v1673_v28  ;;  %v2632_v34 = vmul.f32 0.7978846, %v2624_v44  ;;  %v1665_v48 = vadd.f32 %v1657_v19, %v1644_v58  ;;  %v1686_v7 = vmul.f32 %v17709_v37, %v1674_v25 }
 0x149   : > { %v1501_v29 = vadd.f32 %v17839_v46, %v1465_v21  ;;  %v2613_v22 = vmul.f32 %v2605_v14, %v18086_v54  ;;  %17115 = vtanh.f32 %v2631_v53  ;;  %v1517_v35 = vsel %vm18038_vm1, %v18008_v2, 0.0 }
 0x14a   : > { %v1693_v36 = vadd.f32 %v1685_v50, %v1664_v38  ;;  %17117 = vtanh.f32 %v2632_v34  ;;  %v1694_v5 = vadd.f32 %v1686_v7, %v1665_v48  ;;  %v1518_v43 = vsel %vm18046_vm0, %v18073_v56, 0.0 }
 0x14b   : > { %v1529_v49 = vmul.f32 %v17540_v61, %v1517_v35  ;;  %v18113_v51 = vmul.f32 0.5, %v18086_v54  ;;  %v2621_v46 = vmul.f32 %v2613_v22, %v18086_v54  ;;  %v1546_v2 = vsel %vm17702_vm9, %v17865_v12, 0.0 }
 0x14c   : > { %v18117_v23 = vadd.f32 %v17998_v13, %v1693_v36  ;;  %v18123_v39 = vadd.f32 %v17998_v13, %v1694_v5  ;;  %v1530_v24 = vmul.f32 %v17540_v61, %v1518_v43  ;;  %v1547_v15 = vsel %vm17736_vm10, %v17867_v17, 0.0 }
 0x14d   : > { %v1537_v28 = vadd.f32 %v1529_v49, %v1501_v29  ;;  %v2629_v44 = vadd.f32 %v2621_v46, %v18086_v54  ;;  %v1558_v19 = vmul.f32 %v17544_v62, %v1546_v2  ;;  %v1559_v38 = vmul.f32 %v17544_v62, %v1547_v15 }
 0x14e   : > { %v1746_v16 = vand.u32 4294901760, %v18117_v23  ;;  %v2601_v58 = vmul.f32 0.044715, %v18117_v23  ;;  %v1749_v12 = vand.u32 4294901760, %v18123_v39  ;;  %v18135_v25 = vmul.f32 0.5, %v18117_v23 }
 0x14f   : > { %v2602_v6 = vmul.f32 0.044715, %v18123_v39  ;;  %v1538_v21 = vadd.f32 %v1530_v24, %v17911_v26  ;;  %v2637_v14 = vmul.f32 0.7978846, %v2629_v44  ;;  %v1566_v50 = vadd.f32 %v1558_v19, %v1537_v28 }
 0x150   : > { %v2609_v53 = vmul.f32 %v2601_v58, %v18117_v23  ;;  %v18145_v34 = vpack.c.bf16 %v1749_v12, %v1746_v16  ;;  %v1596_v7 = vsel %vm18038_vm1, %v18073_v56, 0.0  ;;  %v1597_v26 = vsel %vm18046_vm0, %v17949_v9, 0.0 }
 0x151   : > { %v2610_v48 = vmul.f32 %v2602_v6, %v18123_v39  ;;  %17119 = vtanh.f32 %v2637_v14  ;;  %v1567_v22 = vadd.f32 %v1559_v38, %v1538_v21  ;;  %v1587_v36 = vadd.f32 %v17915_v47, %v1566_v50  ;;  %v20928_v14 = vld [vmem:[#allocation73_spill] sm:$0xff] }
 0x152   : > { %v2617_v29 = vmul.f32 %v2609_v53, %v18117_v23  ;;  %15864 = vmatprep.subr.bf16.mxu1 %v18145_v34  ;;  %v1608_v5 = vmul.f32 %v17694_v30, %v1596_v7  ;;  %v1609_v43 = vmul.f32 %v17694_v30, %v1597_v26  ;;  %v1625_v56 = vsel %vm17702_vm9, %v17867_v17, 0.0 }
 0x153   : > { %v2618_v35 = vmul.f32 %v2610_v48, %v18123_v39  ;;  %v17116_v49 = vpop.eup %17115  ;;  %15866 = vmatpush3.bf16.msra.mxu1 %v18145_v34  ;;  %v1588_v2 = vadd.f32 %v17888_v59, %v1567_v22  ;;  %v1626_v47 = vsel %vm17736_vm10, %v17945_v11, 0.0  ;;  %v1637_v24 = vmul.f32 %v17713_v42, %v1625_v56  ;;  %v20930_v22 = vld [vmem:[#allocation80_spill] sm:$0xff] }
 0x154   : > { %v2625_v46 = vadd.f32 %v2617_v29, %v18117_v23  ;;  %v17118_v28 = vpop.eup %17117  ;;  %v2647_v15 = vadd.f32 1.0, %v17116_v49  ;;  %v1616_v58 = vadd.f32 %v1608_v5, %v1587_v36  ;;  %v1638_v17 = vmul.f32 %v17713_v42, %v1626_v47 }
 0x155   : > { %v2626_v44 = vadd.f32 %v2618_v35, %v18123_v39  ;;  %v2648_v19 = vadd.f32 1.0, %v17118_v28  ;;  %v1617_v21 = vadd.f32 %v1609_v43, %v1588_v2  ;;  %v1658_v53 = vmul.f32 %v17592_v32, %v20928_v14 }
 0x156   : > { %v2633_v6 = vmul.f32 0.7978846, %v2625_v46  ;;  %v2655_v59 = vmul.f32 %v2647_v15, %v18033_v31  ;;  %v1645_v50 = vadd.f32 %v1637_v24, %v1616_v58  ;;  %v1659_v11 = vmul.f32 %v17592_v32, %v17947_v41  ;;  %v20936_v15 = vld [vmem:[#allocation78_spill] sm:$0xff] }
 0x157   : > { %v2634_v38 = vmul.f32 0.7978846, %v2626_v44  ;;  %v2656_v48 = vmul.f32 %v2648_v19, %v18057_v1  ;;  %v1646_v7 = vadd.f32 %v1638_v17, %v1617_v21  ;;  %v1675_v26 = vsel %vm18038_vm1, %v17949_v9, 0.0 }
 0x158   : > { %17121 = vtanh.f32 %v2633_v6  ;;  %vm20929_vm13 = vcmask 130048   ;;  %v1666_v29 = vadd.f32 %v1658_v53, %v1645_v50  ;;  %v1676_v31 = vsel %vm18046_vm0, %v20930_v22, 0.0 }
 0x159   : > { %2663 = vst.msk [vmem:[#allocation2 + $0x10] sm:$0xff] %vm20929_vm13, %v2655_v59  ;;  %17123 = vtanh.f32 %v2634_v38  ;;  %v1687_v36 = vmul.f32 %v17709_v37, %v1675_v26  ;;  %vm20931_vm11 = vmmov %vm20929_vm13  ;;  %v1667_v32 = vadd.f32 %v1659_v11, %v1646_v7  ;;  %v1688_v41 = vmul.f32 %v17709_v37, %v1676_v31  ;;  %v20934_v37 = vld [vmem:[#allocation77_spill] sm:$0xff]  ;;  %v20941_v11 = vld [vmem:[#allocation79_spill] sm:$0xff] }
 0x15a   : > { %2664 = vst.msk [vmem:[#allocation2 + $0x18] sm:$0xff] %vm20931_vm11, %v2656_v48  ;;  %v1520_v35 = vsel %vm17638_vm6, %v20930_v22, 0.0  ;;  %v1549_v5 = vsel %vm17810_vm12, %v17970_v0, 0.0  ;;  %v2594_v43 = vmul.f32 0.5, %v18123_v39  ;;  %v20935_v24 = vsel %vm17638_vm6, %v20934_v37, 0.0  ;;  %vm20942_vm13 = vmmov %vm20931_vm11 }
 0x15b   : > { %v1695_v56 = vadd.f32 %v1687_v36, %v1666_v29  ;;  %v1532_v49 = vmul.f32 %v17540_v61, %v1520_v35  ;;  %v1561_v46 = vmul.f32 %v17544_v62, %v1549_v5  ;;  %v17120_v2 = vpop.eup %17119  ;;  %v1696_v47 = vadd.f32 %v1688_v41, %v1667_v32 }
 0x15c   : > { %v1611_v28 = vmul.f32 %v17694_v30, %v20935_v24  ;;  %v20937_v44 = vsel %vm17810_vm12, %v20936_v15, 0.0  ;;  %v18210_v61 = vsub.f32 %v18019_v4, %v1740_v3  ;;  %v2653_v62 = vadd.f32 1.0, %v17120_v2 }
 0x15d   : > { %v1640_v0 = vmul.f32 %v17713_v42, %v20937_v44  ;;  %v1710_v58 = vadd.f32 %v17998_v13, %v1695_v56  ;;  %v1540_v17 = vadd.f32 %v1532_v49, %v17986_v60  ;;  %v18217_v30 = vsub.f32 %v18022_v45, %v1743_v27 }
 0x15e   : > { %v1711_v19 = vadd.f32 %v17998_v13, %v1696_v47  ;;  %v20728_v6 = vand.u32 4294901760, %v18210_v61  ;;  %v18224_v42 = vsub.f32 %v18117_v23, %v1746_v16  ;;  %v18229_v4 = vsub.f32 %v18123_v39, %v1749_v12 }
 0x15f   : > { %20938 = vst [vmem:[#allocation73_spill] sm:$0xff] %v18217_v30  ;;  %v2661_v60 = vmul.f32 %v2653_v62, %v18113_v51  ;;  %v1752_v3 = vand.u32 4294901760, %v1710_v58  ;;  %v2603_v21 = vmul.f32 0.044715, %v1710_v58  ;;  %v1758_v45 = vand.u32 4294901760, %v18086_v54 }
 0x160   : > { %20939 = vst [vmem:[#allocation80_spill] sm:$0xff] %v18224_v42  ;;  %20940 = vst [vmem:[#allocation77_spill] sm:$0xff] %v18229_v4  ;;  %v1755_v27 = vand.u32 4294901760, %v1711_v19  ;;  %v18233_v14 = vmul.f32 0.5, %v1710_v58  ;;  %v2604_v53 = vmul.f32 0.044715, %v1711_v19  ;;  %v1569_v59 = vadd.f32 %v1561_v46, %v1540_v17 }
 0x161   : > { %2669 = vst.msk [vmem:[#allocation2 + $0x40] sm:$0xff] %vm20931_vm11, %v2661_v60  ;;  %v2611_v23 = vmul.f32 %v2603_v21, %v1710_v58  ;;  %v1896_v16 = vsub.f32 %v18210_v61, %v20728_v6  ;;  %v20727_v39 = vand.u32 4294901760, %v18217_v30  ;;  %v20726_v51 = vand.u32 4294901760, %v18224_v42  ;;  %v20944_v60 = vld [vmem:[#allocation50_spill] sm:$0xff] }
 0x162   : > { %v17122_v12 = vpop.eup %17121  ;;  %v18241_v38 = vpack.c.bf16 %v1755_v27, %v1752_v3  ;;  %v2612_v50 = vmul.f32 %v2604_v53, %v1711_v19  ;;  %v1590_v48 = vadd.f32 %v20941_v11, %v1569_v59  ;;  %v20725_v7 = vand.u32 4294901760, %v18229_v4 }
 0x163   : > { %v17124_v26 = vpop.eup %17123  ;;  %v2649_v29 = vadd.f32 1.0, %v17122_v12  ;;  %v18245_v22 = vmul.f32 0.5, %v1711_v19  ;;  %v2619_v31 = vmul.f32 %v2611_v23, %v1710_v58  ;;  %v1903_v36 = vsub.f32 %v18217_v30, %v20727_v39 }
 0x164   : > { %v2650_v32 = vadd.f32 1.0, %v17124_v26  ;;  %15868 = vmatprep.subr.bf16.mxu1 %v18241_v38  ;;  %v2620_v41 = vmul.f32 %v2612_v50, %v1711_v19  ;;  %v1619_v35 = vadd.f32 %v1611_v28, %v1590_v48  ;;  %v1910_v5 = vsub.f32 %v18224_v42, %v20726_v51  ;;  %v2737_v50 = vld [vmem:[#allocation2 + $0x9] sm:$0xff] }
 0x165   : > { %v2657_v56 = vmul.f32 %v2649_v29, %v18135_v25  ;;  %v2627_v49 = vadd.f32 %v2619_v31, %v1710_v58  ;;  %15870 = vmatpush3.bf16.msra.mxu1 %v18241_v38  ;;  %v1904_v46 = vand.u32 4294901760, %v1903_v36  ;;  %v1917_v2 = vsub.f32 %v18229_v4, %v20725_v7  ;;  %v18292_v36 = vld [vmem:[#allocation2 + $0x18] sm:$0xff] }
 0x166   : > { %v2658_v47 = vmul.f32 %v2650_v32, %v2594_v43  ;;  %v2628_v37 = vadd.f32 %v2620_v41, %v1711_v19  ;;  %v1648_v24 = vadd.f32 %v1640_v0, %v1619_v35  ;;  %v1897_v15 = vand.u32 4294901760, %v1896_v16  ;;  %v2674_v0 = vld [vmem:[#allocation2 + $0xf] sm:$0xff] }
 0x167   : > { %2665 = vst.msk [vmem:[#allocation2 + $0x20] sm:$0xff] %vm20942_vm13, %v2657_v56  ;;  %v2635_v28 = vmul.f32 0.7978846, %v2627_v49  ;;  %v1911_v44 = vand.u32 4294901760, %v1910_v5  ;;  %v1918_v62 = vand.u32 4294901760, %v1917_v2  ;;  %v18260_v17 = vsub.f32 %v1710_v58, %v1752_v3  ;;  %v20946_v3 = vld [vmem:[#allocation51_spill] sm:$0xff]  ;;  %vm20960_vm13 = vmmov %vm20931_vm11 }
 0x168   : > { %2666 = vst.msk [vmem:[#allocation2 + $0x28] sm:$0xff] %vm20931_vm11, %v2658_v47  ;;  %v2636_v25 = vmul.f32 0.7978846, %v2628_v37  ;;  %v1669_v21 = vadd.f32 %v20944_v60, %v1648_v24  ;;  %v18264_v53 = vsub.f32 %v1711_v19, %v1755_v27  ;;  %v18269_v43 = vsub.f32 %v18086_v54, %v1758_v45  ;;  %v2710_v27 = vld [vmem:[#allocation2 + $0x10] sm:$0xff]  ;;  %v20948_v5 = vld [vmem:[#allocation44_spill] sm:$0xff] }
 0x169   : > { %20943 = vst [vmem:[#allocation78_spill] sm:$0xff] %v18260_v17  ;;  %17125 = vtanh.f32 %v2635_v28  ;;  %v18271_v59 = vpack.c.bf16 %v1904_v46, %v1897_v15  ;;  %v18273_v23 = vpack.c.bf16 %v1918_v62, %v1911_v44  ;;  %v20724_v58 = vand.u32 4294901760, %v18260_v17  ;;  %v18304_v49 = vld [vmem:[#allocation2 + $0x11] sm:$0xff] }
 0x16a   : > { %20945 = vst [vmem:[#allocation79_spill] sm:$0xff] %v18264_v53  ;;  %17127 = vtanh.f32 %v2636_v25  ;;  %v1698_v16 = vadd.f32 %v20946_v3, %v1669_v21  ;;  %v20723_v12 = vand.u32 4294901760, %v18264_v53  ;;  %v20722_v19 = vand.u32 4294901760, %v18269_v43  ;;  %v20949_v47 = vld [vmem:[#allocation45_spill] sm:$0xff] }
 0x16b   : > { %v1924_v11 = vsub.f32 %v18260_v17, %v20724_v58  ;;  %v18284_v48 = vpack.c.bf16 %v18217_v30, %v18210_v61  ;;  %v18288_v26 = vpack.c.bf16 %v18229_v4, %v18224_v42  ;;  %v2682_v31 = vsel %vm17610_vm3, %v2674_v0, 0.0  ;;  %v18319_v60 = vld [vmem:[#allocation2 + $0x17] sm:$0xff] }
 0x16c   : > { %v1713_v32 = vadd.f32 %v17998_v13, %v1698_v16  ;;  %v1931_v41 = vsub.f32 %v18264_v53, %v20723_v12  ;;  %v18301_v35 = vsub.f32 %v18269_v43, %v20722_v19  ;;  %v2694_v56 = vmul.f32 %v20948_v5, %v2682_v31  ;;  %v20952_v31 = vld [vmem:[#allocation63_spill] sm:$0xff] }
 0x16d   : > { %v1925_v46 = vand.u32 4294901760, %v1924_v11  ;;  %v18308_v2 = vpack.c.bf16 %v18264_v53, %v18260_v17  ;;  %v2722_v13 = vmul.f32 %v20949_v47, %v2710_v27  ;;  %v2745_v24 = vsel %vm17627_vm4, %v2737_v50, 0.0 }
 0x16e   : > { %v1761_v15 = vand.u32 4294901760, %v1713_v32  ;;  %v2606_v28 = vmul.f32 0.044715, %v1713_v32  ;;  %v1932_v44 = vand.u32 4294901760, %v1931_v41  ;;  %v18315_v62 = vmul.f32 %v20949_v47, %v18292_v36  ;;  %v18321_v21 = vld [vmem:[#allocation2 + $0x20] sm:$0xff] }
 0x16f   : > { %v18317_v25 = vmul.f32 0.5, %v1713_v32  ;;  %v2730_v3 = vadd.f32 %v2722_v13, %v2694_v56  ;;  %v2746_v11 = vsel %vm17631_vm5, %v18304_v49, 0.0  ;;  %v2757_v50 = vmul.f32 %v20952_v31, %v2745_v24  ;;  %v20953_v56 = vld [vmem:[#allocation65_spill] sm:$0xff]  ;;  %v18424_v29 = vld [vmem:[#allocation2 + $0x28] sm:$0xff] }
 0x170   : > { %v18329_v41 = vpack.c.bf16 %v1761_v15, %v1758_v45  ;;  %v2614_v19 = vmul.f32 %v2606_v28, %v1713_v32  ;;  %v1939_v12 = vand.u32 4294901760, %v18301_v35  ;;  %v18332_v58 = vsub.f32 %v1713_v32, %v1761_v15  ;;  %v18350_v15 = vld [vmem:[#allocation2 + $0x19] sm:$0xff] }
 0x171   : > { %v18334_v7 = vpack.c.bf16 %v1932_v44, %v1925_v46  ;;  %v2758_v51 = vmul.f32 %v20952_v31, %v2746_v11  ;;  %v2765_v13 = vadd.f32 %v2757_v50, %v20953_v56  ;;  %v2774_v6 = vsel %vm17465_vm2, %v2674_v0, 0.0  ;;  %v20955_v0 = vld [vmem:[#allocation66_spill] sm:$0xff]  ;;  %v20956_v11 = vld [vmem:[#allocation64_spill] sm:$0xff] }
 0x172   : > { %15872 = vmatprep.subr.bf16.mxu1 %v18329_v41  ;;  %v2622_v24 = vmul.f32 %v2614_v19, %v1713_v32  ;;  %v18344_v45 = vmul.f32 %v20949_v47, %v18321_v21  ;;  %v2775_v35 = vsel %vm17610_vm3, %v18319_v60, 0.0  ;;  %v2786_v44 = vmul.f32 %v20955_v0, %v2774_v6 }
 0x173   : > { %v17126_v46 = vpop.eup %17125  ;;  %15874 = vmatpush3.bf16.msra.mxu1 %v18329_v41  ;;  %v2766_v28 = vadd.f32 %v2758_v51, %v2730_v3  ;;  %v2787_v19 = vmul.f32 %v20955_v0, %v2775_v35  ;;  %v2807_v50 = vmul.f32 %v20956_v11, %v2710_v27  ;;  %v20957_v17 = vand.u32 4294901760, %v18332_v58 }
 0x174   : > { %v17128_v56 = vpop.eup %17127  ;;  %v2651_v54 = vadd.f32 1.0, %v17126_v46  ;;  %v2630_v53 = vadd.f32 %v2622_v24, %v1713_v32  ;;  %15876 = vmatprep.subr.bf16.mxu1 %v18271_v59  ;;  %v2808_v42 = vmul.f32 %v20956_v11, %v18292_v36  ;;  %v2794_v51 = vadd.f32 %v2786_v44, %v2765_v13  ;;  %v20958_v32 = vld [vmem:[#allocation52_spill] sm:$0xff]  ;;  %v18366_v46 = vld [vmem:[#allocation2 + $0x1f] sm:$0xff]  ;;  %v20959_v13 = vld [vmem:[#allocation53_spill] sm:$0xff] }
 0x175   : > { %v1945_v4 = vsub.f32 %v18332_v58, %v20957_v17  ;;  %v2652_v30 = vadd.f32 1.0, %v17128_v56  ;;  %v2795_v3 = vadd.f32 %v2787_v19, %v2766_v28  ;;  %v2824_v6 = vsel %vm17627_vm4, %v18304_v49, 0.0  ;;  %v20962_v19 = vld [vmem:[#allocation69_spill] sm:$0xff] }
 0x176   : > { %v2659_v27 = vmul.f32 %v2651_v54, %v18233_v14  ;;  %v2638_v35 = vmul.f32 0.7978846, %v2630_v53  ;;  %14412 = vmatmul.mubr.f32.vlgmr.msra.gmra.mrb[8].mxu1 %v20958_v32  ;;  %v2825_v17 = vsel %vm17631_vm5, %v18350_v15, 0.0  ;;  %v2815_v28 = vadd.f32 %v2807_v50, %v2794_v51  ;;  %v18391_v54 = vld [vmem:[%s20594_s4 + $0x8] ss:$0 sm:$0xff] }
 0x177   : > { %v1946_v24 = vand.u32 4294901760, %v1945_v4  ;;  %v2660_v56 = vmul.f32 %v2652_v30, %v18245_v22  ;;  %15878 = vmatpush3.bf16.msra.mxu1 %v18271_v59  ;;  %14414 = vmatprep.mubr.f32.mxu1 %v20959_v13  ;;  %v2816_v49 = vadd.f32 %v2808_v42, %v2795_v3  ;;  %v2853_v14 = vsel %vm17465_vm2, %v18319_v60, 0.0  ;;  %v18383_v30 = vld [vmem:[#allocation2 + $0x21] sm:$0xff] }
 0x178   : > { %2667 = vst.msk [vmem:[#allocation2 + $0x30] sm:$0xff] %vm20960_vm13, %v2659_v27  ;;  %17129 = vtanh.f32 %v2638_v35  ;;  %15880 = vmatprep.subr.bf16.mxu1 %v18273_v23  ;;  %v18381_v4 = vpack.c.bf16 %v18332_v58, %v18269_v43  ;;  %v20961_v22 = vld [vmem:[#allocation67_spill] sm:$0xff]  ;;  %v2854_v44 = vsel %vm17610_vm3, %v18366_v46, 0.0  ;;  %v2865_v50 = vmul.f32 %v20962_v19, %v2853_v14  ;;  %v20963_v51 = vld [vmem:[#allocation68_spill] sm:$0xff]  ;;  %vm20972_vm13 = vmmov %vm20931_vm11 }
 0x179   : > { %v2836_v53 = vmul.f32 %v20961_v22, %v2824_v6  ;;  %v2837_v59 = vmul.f32 %v20961_v22, %v2825_v17  ;;  %2668 = vst.msk [vmem:[#allocation2 + $0x38] sm:$0xff] %vm20931_vm11, %v2660_v56  ;;  %v15887_v42 = vpack.c.bf16 %v1946_v24, %v1939_v12  ;;  %v2886_v3 = vmul.f32 %v20963_v51, %v18292_v36  ;;  %v20964_v6 = vld [vmem:[#allocation54_spill] sm:$0xff] }
 0x17a   : > { %14415 = vmatmul.mubr.f32.gmra.mrb[10].mxu1 %v20964_v6  ;;  %v2866_v12 = vmul.f32 %v20962_v19, %v2854_v44  ;;  %v2903_v24 = vsel %vm17627_vm4, %v18350_v15, 0.0  ;;  %v20965_v17 = vld [vmem:[#allocation58_spill] sm:$0xff]  ;;  %v2887_v56 = vmul.f32 %v20963_v51, %v18321_v21  ;;  %v2904_v36 = vsel %vm17631_vm5, %v18383_v30, 0.0 }
 0x17b   : > { %v2844_v27 = vadd.f32 %v2836_v53, %v2815_v28  ;;  %v2845_v35 = vadd.f32 %v2837_v59, %v2816_v49  ;;  %15882 = vmatpush3.bf16.msra.mxu1 %v18273_v23  ;;  %14417 = vmatprep.mubr.f32.mxu1 %v20965_v17  ;;  %v2683_v28 = vsel %vm17649_vm7, %v18319_v60, 0.0  ;;  %v2684_v49 = vsel %vm17688_vm8, %v18366_v46, 0.0  ;;  %v18419_v59 = vld [vmem:[#allocation2 + $0x27] sm:$0xff] }
 0x17c   : > { %15884 = vmatprep.subr.bf16.mxu1 %v18334_v7  ;;  %v2915_v53 = vmul.f32 %v18391_v54, %v2903_v24  ;;  %v2695_v44 = vmul.f32 %v20948_v5, %v2683_v28  ;;  %v2916_v16 = vmul.f32 %v18391_v54, %v2904_v36  ;;  %v2696_v37 = vmul.f32 %v20948_v5, %v2684_v49  ;;  %v20967_v28 = vld [vmem:[#allocation60_spill] sm:$0xff] }
 0x17d   : > { %v2873_v23 = vadd.f32 %v2865_v50, %v2844_v27  ;;  %v2874_v14 = vadd.f32 %v2866_v12, %v2845_v35  ;;  %v2747_v60 = vsel %vm17901_vm14, %v18350_v15, 0.0  ;;  %v2748_v50 = vsel %vm17907_vm15, %v18383_v30, 0.0  ;;  %v20966_v27 = vld [vmem:[#allocation59_spill] sm:$0xff] }
 0x17e   : > { %14418 = vmatmul.mubr.f32.gmra.mrb[12].mxu1 %v20966_v27  ;;  %v2731_v24 = vadd.f32 %v18315_v62, %v2695_v44  ;;  %v2759_v36 = vmul.f32 %v20952_v31, %v2747_v60  ;;  %v18440_v15 = vld [vmem:[%s20595_s5] ss:$0 sm:$0xff]  ;;  %v2732_v49 = vadd.f32 %v18344_v45, %v2696_v37  ;;  %v2760_v39 = vmul.f32 %v20952_v31, %v2748_v50 }
 0x17f   : > { %v2894_v35 = vadd.f32 %v2886_v3, %v2873_v23  ;;  %v2895_v12 = vadd.f32 %v2887_v56, %v2874_v14  ;;  %15886 = vmatpush3.bf16.msra.mxu1 %v18334_v7  ;;  %14420 = vmatprep.mubr.f32.mxu1 %v20967_v28  ;;  %v2776_v3 = vsel %vm17649_vm7, %v18366_v46, 0.0  ;;  %v2777_v62 = vsel %vm17688_vm8, %v18419_v59, 0.0  ;;  %v18454_v14 = vld [vmem:[#allocation2 + $0x29] sm:$0xff]  ;;  %v20968_v28 = vld [vmem:[#allocation62_spill] sm:$0xff] }
 0x180   : > { %15888 = vmatprep.subr.bf16.mxu1 %v15887_v42  ;;  %v18452_v23 = vmul.f32 %v20949_v47, %v18424_v29  ;;  %v2767_v37 = vadd.f32 %v2759_v36, %v2731_v24  ;;  %v2768_v45 = vadd.f32 %v2760_v39, %v2732_v49  ;;  %v2788_v44 = vmul.f32 %v20955_v0, %v2776_v3  ;;  %v20969_v24 = vld [vmem:[#allocation3_spill] sm:$0xff]  ;;  %v18475_v36 = vld [vmem:[#allocation2 + $0x30] sm:$0xff] }
 0x181   : > { %v2923_v7 = vadd.f32 %v2915_v53, %v2894_v35  ;;  %v2924_v56 = vadd.f32 %v2916_v16, %v2895_v12  ;;  %v2789_v60 = vmul.f32 %v20955_v0, %v2777_v62  ;;  %v2809_v46 = vmul.f32 %v20956_v11, %v18321_v21  ;;  %v18473_v21 = vld [vmem:[#allocation2 + $0x2f] sm:$0xff]  ;;  %v18532_v52 = vld [vmem:[#allocation2 + $0x37] sm:$0xff] }
 0x182   : > { %v17130_v50 = vpop.eup %17129  ;;  %14421 = vmatmul.mubr.f32.gmra.mrb[14].mxu1 %v20968_v28  ;;  %v2810_v35 = vmul.f32 %v20956_v11, %v18424_v29  ;;  %v2826_v39 = vsel %vm17901_vm14, %v18383_v30, 0.0  ;;  %v2796_v49 = vadd.f32 %v2788_v44, %v2767_v37  ;;  %v2827_v62 = vsel %vm17907_vm15, %v18454_v14, 0.0  ;;  %v18486_v28 = vld [vmem:[#allocation2 + $0x31] sm:$0xff] }
 0x183   : > { %v18462_v16 = vadd.f32 %v18440_v15, %v2923_v7  ;;  %v18465_v53 = vadd.f32 %v18440_v15, %v2924_v56  ;;  %v2654_v12 = vadd.f32 1.0, %v17130_v50  ;;  %15890 = vmatpush3.bf16.msra.mxu1 %v15887_v42  ;;  %14439 = vmatprep.mubr.f32.mxu1 %v20969_v24  ;;  %v2797_v3 = vadd.f32 %v2789_v60, %v2768_v45  ;;  %v20970_v60 = vld [vmem:[#allocation12_spill] sm:$0xff] }
 0x184   : > { %15892 = vmatprep.subr.bf16.mxu1 %v18284_v48  ;;  %v2838_v42 = vmul.f32 %v20961_v22, %v2826_v39  ;;  %v2839_v56 = vmul.f32 %v20961_v22, %v2827_v62  ;;  %v2817_v37 = vadd.f32 %v2809_v46, %v2796_v49  ;;  %v2855_v44 = vsel %vm17649_vm7, %v18419_v59, 0.0 }
 0x185   : > { %v20739_v7 = vand.u32 4294901760, %v18462_v16  ;;  %v20738_v30 = vand.u32 4294901760, %v18465_v53  ;;  %v2662_v50 = vmul.f32 %v2654_v12, %v18317_v25  ;;  %v2818_v45 = vadd.f32 %v2810_v35, %v2797_v3  ;;  %v20973_v35 = vld [vmem:[#allocation13_spill] sm:$0xff] }
 0x186   : > { %14440 = vmatmul.mubr.f32.vlgmr.msra.gmra.mrb[8].mxu1 %v20970_v60  ;;  %v2726_v39 = vmul.f32 %v20949_v47, %v18475_v36  ;;  %v2856_v25 = vsel %vm17688_vm8, %v18473_v21, 0.0  ;;  %v2867_v46 = vmul.f32 %v20962_v19, %v2855_v44  ;;  %v2846_v12 = vadd.f32 %v2838_v42, %v2817_v37 }
 0x187   : > { %v18496_v27 = vpack.c.bf16 %v20738_v30, %v20739_v7  ;;  %2670 = vst.msk [vmem:[#allocation2 + $0x48] sm:$0xff] %vm20972_vm13, %v2662_v50  ;;  %15894 = vmatpush3.bf16.msra.mxu1 %v18284_v48  ;;  %14442 = vmatprep.mubr.f32.mxu1 %v20973_v35  ;;  %v2847_v49 = vadd.f32 %v2839_v56, %v2818_v45  ;;  %v2905_v62 = vsel %vm17901_vm14, %v18454_v14, 0.0  ;;  %v18511_v30 = vld [vmem:[#allocation2 + $0x38] sm:$0xff]  ;;  %v2906_v42 = vsel %vm17907_vm15, %v18486_v28, 0.0 }
 0x188   : > { %v2868_v3 = vmul.f32 %v20962_v19, %v2856_v25  ;;  %15896 = vmatprep.subr.bf16.mxu1 %v18288_v26  ;;  %v2888_v50 = vmul.f32 %v20963_v51, %v18424_v29  ;;  %v2889_v48 = vmul.f32 %v20963_v51, %v18475_v36  ;;  %v2685_v56 = vsel %vm17702_vm9, %v18419_v59, 0.0  ;;  %v20974_v25 = vld [vmem:[#allocation14_spill] sm:$0xff] }
 0x189   : > { %20971 = vst [vmem:[#allocation50_spill] sm:$0xff] %v18496_v27  ;;  %15956 = vmatprep.subr.bf16.mxu0 %v18496_v27  ;;  %v2875_v37 = vadd.f32 %v2867_v46, %v2846_v12  ;;  %v2917_v44 = vmul.f32 %v18391_v54, %v2905_v62  ;;  %v2686_v29 = vsel %vm17736_vm10, %v18473_v21, 0.0  ;;  %v2918_v7 = vmul.f32 %v18391_v54, %v2906_v42  ;;  %v20975_v12 = vld [vmem:[#allocation15_spill] sm:$0xff] }
 0x18a   : > { %15958 = vmatpush3.bf16.msra.mxu0 %v18496_v27  ;;  %v2876_v45 = vadd.f32 %v2868_v3, %v2847_v49  ;;  %14443 = vmatmul.mubr.f32.gmra.mrb[10].mxu1 %v20974_v25  ;;  %v2697_v20 = vmul.f32 %v20948_v5, %v2685_v56  ;;  %v2698_v59 = vmul.f32 %v20948_v5, %v2686_v29  ;;  %v2749_v62 = vsel %vm18038_vm1, %v18454_v14, 0.0 }
 0x18b   : > { %v18538_v46 = vmul.f32 %v20949_v47, %v18511_v30  ;;  %15898 = vmatpush3.bf16.msra.mxu1 %v18288_v26  ;;  %14445 = vmatprep.mubr.f32.mxu1 %v20975_v12  ;;  %v2896_v49 = vadd.f32 %v2888_v50, %v2875_v37  ;;  %v2750_v42 = vsel %vm18046_vm0, %v18486_v28, 0.0  ;;  %v2761_v10 = vmul.f32 %v20952_v31, %v2749_v62  ;;  %v18577_v62 = vld [vmem:[#allocation2 + $0x40] sm:$0xff] }
 0x18c   : > { %v2897_v3 = vadd.f32 %v2889_v48, %v2876_v45  ;;  %15900 = vmatprep.subr.bf16.mxu1 %v18308_v2  ;;  %v2733_v56 = vadd.f32 %v18452_v23, %v2697_v20  ;;  %v2734_v29 = vadd.f32 %v2726_v39, %v2698_v59  ;;  %v2762_v26 = vmul.f32 %v20952_v31, %v2750_v42  ;;  %v18552_v48 = vld [vmem:[#allocation2 + $0x39] sm:$0xff]  ;;  %v20976_v45 = vld [vmem:[#allocation16_spill] sm:$0xff] }
 0x18d   : > { %v2925_v18 = vadd.f32 %v2917_v44, %v2896_v49  ;;  %v2778_v14 = vsel %vm17702_vm9, %v18473_v21, 0.0  ;;  %v2779_v37 = vsel %vm17736_vm10, %v18532_v52, 0.0  ;;  %v2680_v49 = vld [vmem:[#allocation2 + $0x3f] sm:$0xff]  ;;  %v2890_v8 = vmul.f32 %v20963_v51, %v18511_v30 }
 0x18e   : > { %v2926_v50 = vadd.f32 %v2918_v7, %v2897_v3  ;;  %14446 = vmatmul.mubr.f32.gmra.mrb[12].mxu1 %v20976_v45  ;;  %v2769_v20 = vadd.f32 %v2761_v10, %v2733_v56  ;;  %v2770_v23 = vadd.f32 %v2762_v26, %v2734_v29  ;;  %v2790_v39 = vmul.f32 %v20955_v0, %v2778_v14  ;;  %v20977_v7 = vld [vmem:[#allocation17_spill] sm:$0xff]  ;;  %v18589_v14 = vld [vmem:[#allocation2 + $0x41] sm:$0xff] }
 0x18f   : > { %v2791_v59 = vmul.f32 %v20955_v0, %v2779_v37  ;;  %15902 = vmatpush3.bf16.msra.mxu1 %v18308_v2  ;;  %14448 = vmatprep.mubr.f32.mxu1 %v20977_v7  ;;  %v18566_v44 = vadd.f32 %v18440_v15, %v2925_v18  ;;  %v2811_v3 = vmul.f32 %v20956_v11, %v18475_v36  ;;  %v2828_v10 = vsel %vm18038_vm1, %v18486_v28, 0.0 }
 0x190   : > { %v18569_v21 = vadd.f32 %v18440_v15, %v2926_v50  ;;  %15904 = vmatprep.subr.bf16.mxu1 %v18381_v4  ;;  %v2798_v2 = vadd.f32 %v2790_v39, %v2769_v20  ;;  %v2812_v18 = vmul.f32 %v20956_v11, %v18511_v30  ;;  %v2829_v56 = vsel %vm18046_vm0, %v18552_v48, 0.0  ;;  %v20978_v50 = vld [vmem:[#allocation18_spill] sm:$0xff] }
 0x191   : > { %v2799_v42 = vadd.f32 %v2791_v59, %v2770_v23  ;;  %v20750_v29 = vand.u32 4294901760, %v18566_v44  ;;  %v2840_v26 = vmul.f32 %v20961_v22, %v2828_v10  ;;  %v2841_v28 = vmul.f32 %v20961_v22, %v2829_v56  ;;  %v20979_v59 = vld [vmem:[#allocation4_spill] sm:$0xff] }
 0x192   : > { %v20751_v36 = vand.u32 4294901760, %v18569_v21  ;;  %14449 = vmatmul.mubr.f32.gmra.mrb[14].mxu1 %v20978_v50  ;;  %v2819_v37 = vadd.f32 %v2811_v3, %v2798_v2  ;;  %v2857_v23 = vsel %vm17702_vm9, %v18532_v52, 0.0  ;;  %v2858_v39 = vsel %vm17736_vm10, %v2680_v49, 0.0 }
 0x193   : > { %v2820_v20 = vadd.f32 %v2812_v18, %v2799_v42  ;;  %15906 = vmatpush3.bf16.msra.mxu1 %v18381_v4  ;;  %14467 = vmatprep.mubr.f32.mxu1 %v20979_v59  ;;  %v2728_v3 = vmul.f32 %v20949_v47, %v18577_v62  ;;  %v2869_v2 = vmul.f32 %v20962_v19, %v2857_v23  ;;  %v2907_v42 = vsel %vm18038_vm1, %v18552_v48, 0.0 }
 0x194   : > { %v18602_v10 = vpack.c.bf16 %v20751_v36, %v20750_v29  ;;  %15908 = vmatprep.subr.bf16.mxu1 %v18054_v63  ;;  %v2848_v4 = vadd.f32 %v2840_v26, %v2819_v37  ;;  %v2870_v56 = vmul.f32 %v20962_v19, %v2858_v39  ;;  %v2891_v47 = vmul.f32 %v20963_v51, %v18577_v62  ;;  %v2773_v36 = vld [vmem:[#allocation2 + $0x47] sm:$0xff] }
 0x195   : > { %v2849_v18 = vadd.f32 %v2841_v28, %v2820_v20  ;;  %v2908_v23 = vsel %vm18046_vm0, %v18589_v14, 0.0  ;;  %v2919_v29 = vmul.f32 %v18391_v54, %v2907_v42  ;;  %vm20981_vm11 = vnez %v20881_v40  ;;  %v20982_v28 = vld [vmem:[#allocation20_spill] sm:$0xff] }
 0x196   : > { %20980 = vst [vmem:[#allocation51_spill] sm:$0xff] %v18602_v10  ;;  %15960 = vmatprep.subr.bf16.mxu0 %v18602_v10  ;;  %v2687_v26 = vsel %vm20981_vm11, %v18532_v52, 0.0  ;;  %14468 = vmatmul.mubr.f32.vlgmr.msra.gmra.mrb[8].mxu1 %v20982_v28  ;;  %v2877_v30 = vadd.f32 %v2869_v2, %v2848_v4  ;;  %v2920_v20 = vmul.f32 %v18391_v54, %v2908_v23  ;;  %v2688_v39 = vsel %vm17810_vm12, %v2680_v49, 0.0 }
 0x197   : > { %15962 = vmatpush3.bf16.msra.mxu0 %v18602_v10  ;;  %v2878_v37 = vadd.f32 %v2870_v56, %v2849_v18  ;;  %15910 = vmatpush3.bf16.msra.mxu1 %v18054_v63  ;;  %v2699_v42 = vmul.f32 %v20948_v5, %v2687_v26  ;;  %v2700_v52 = vmul.f32 %v20948_v5, %v2688_v39  ;;  %v2752_v2 = vsel %vm17638_vm6, %v18589_v14, 0.0  ;;  %v2823_v39 = vld [vmem:[#allocation2 + $0x49] sm:$0xff] }
 0x198   : > { %14470 = vmatprep.mubr.f32.mxu1 %v20983_v33  ;;  %vm20985_vm13 = vnez %v20984_v57  ;;  %15912 = vmatprep.subr.bf16.mxu1 %v18145_v34  ;;  %v2898_v4 = vadd.f32 %v2890_v8, %v2877_v30  ;;  %v2764_v23 = vmul.f32 %v20952_v31, %v2752_v2  ;;  %v2780_v5 = vsel %vm20981_vm11, %v2680_v49, 0.0  ;;  %v20986_v33 = vld [vmem:[#allocation22_spill] sm:$0xff]  ;;  %v2852_v30 = vld [vmem:[#allocation2 + $0x4f] sm:$0xff] }
 0x199   : > { %v2751_v55 = vsel %vm20985_vm13, %v18552_v48, 0.0  ;;  %v2899_v18 = vadd.f32 %v2891_v47, %v2878_v37  ;;  %v2735_v26 = vadd.f32 %v18538_v46, %v2699_v42  ;;  %v2736_v10 = vadd.f32 %v2728_v3, %v2700_v52  ;;  %v2802_v47 = vld [vmem:[#allocation2 + $0x48] sm:$0xff] }
 0x19a   : > { %v2763_v56 = vmul.f32 %v20952_v31, %v2751_v55  ;;  %v2781_v48 = vsel %vm17810_vm12, %v2773_v36, 0.0  ;;  %14471 = vmatmul.mubr.f32.gmra.mrb[10].mxu1 %v20986_v33  ;;  %v2927_v28 = vadd.f32 %v2919_v29, %v2898_v4  ;;  %v2792_v8 = vmul.f32 %v20955_v0, %v2780_v5  ;;  %v20987_v55 = vld [vmem:[#allocation23_spill] sm:$0xff]  ;;  %v20988_v2 = vld [vmem:[#allocation24_spill] sm:$0xff] }
 0x19b   : > { %v2928_v27 = vadd.f32 %v2920_v20, %v2899_v18  ;;  %15914 = vmatpush3.bf16.msra.mxu1 %v18145_v34  ;;  %14473 = vmatprep.mubr.f32.mxu1 %v20987_v55  ;;  %v2772_v46 = vadd.f32 %v2764_v23, %v2736_v10  ;;  %v2793_v3 = vmul.f32 %v20955_v0, %v2781_v48  ;;  %v2830_v49 = vsel %vm20985_vm13, %v18589_v14, 0.0  ;;  %v20989_v18 = vld [vmem:[#allocation25_spill] sm:$0xff] }
 0x19c   : > { %v2771_v31 = vadd.f32 %v2763_v56, %v2735_v26  ;;  %15916 = vmatprep.subr.bf16.mxu1 %v18241_v38  ;;  %v18657_v29 = vadd.f32 %v18440_v15, %v2927_v28  ;;  %v2813_v20 = vmul.f32 %v20956_v11, %v18577_v62  ;;  %v2831_v10 = vsel %vm17638_vm6, %v2823_v39, 0.0  ;;  %v20991_v48 = vld [vmem:[#allocation73_spill] sm:$0xff] }
 0x19d   : > { %v18660_v37 = vadd.f32 %v18440_v15, %v2928_v27  ;;  %v2801_v42 = vadd.f32 %v2793_v3, %v2772_v46  ;;  %v2814_v52 = vmul.f32 %v20956_v11, %v2802_v47  ;;  %v2842_v14 = vmul.f32 %v20961_v22, %v2830_v49 }
 0x19e   : > { %v2800_v0 = vadd.f32 %v2792_v8, %v2771_v31  ;;  %14474 = vmatmul.mubr.f32.gmra.mrb[12].mxu1 %v20988_v2  ;;  %v2959_v28 = vand.u32 4294901760, %v18657_v29  ;;  %v2859_v27 = vsel %vm20981_vm11, %v2773_v36, 0.0  ;;  %v2860_v62 = vsel %vm17810_vm12, %v2852_v30, 0.0  ;;  %v17179_v30 = vld [vmem:[#allocation2 + $0x50] sm:$0xff] }
 0x19f   : > { %v2962_v4 = vand.u32 4294901760, %v18660_v37  ;;  %15918 = vmatpush3.bf16.msra.mxu1 %v18241_v38  ;;  %14476 = vmatprep.mubr.f32.mxu1 %v20989_v18  ;;  %v2822_v11 = vadd.f32 %v2814_v52, %v2801_v42  ;;  %v2843_v23 = vmul.f32 %v20961_v22, %v2831_v10  ;;  %v20990_v5 = vand.u32 4294901760, %v18210_v61 }
 0x1a0   : > { %v2821_v56 = vadd.f32 %v2813_v20, %v2800_v0  ;;  %15920 = vmatprep.subr.bf16.mxu1 %v18329_v41  ;;  %v20992_v8 = vand.u32 4294901760, %v20991_v48  ;;  %v2871_v31 = vmul.f32 %v20962_v19, %v2859_v27  ;;  %v2872_v49 = vmul.f32 %v20962_v19, %v2860_v62  ;;  %v20993_v0 = vld [vmem:[#allocation26_spill] sm:$0xff] }
 0x1a1   : > { %v18679_v26 = vpack.c.bf16 %v2962_v4, %v2959_v28  ;;  %v2851_v3 = vadd.f32 %v2843_v23, %v2822_v11  ;;  %v2893_v20 = vmul.f32 %v17179_v30, %v20963_v51  ;;  %v2892_v22 = vmul.f32 %v20963_v51, %v2802_v47  ;;  %v20996_v51 = vld [vmem:[#allocation43_spill] sm:$0xff] }
 0x1a2   : > { %v15923_v36 = vpack.c.bf16 %v20992_v8, %v20990_v5  ;;  %v2850_v46 = vadd.f32 %v2842_v14, %v2821_v56  ;;  %14477 = vmatmul.mubr.f32.gmra.mrb[14].mxu1 %v20993_v0  ;;  %v2909_v61 = vsel %vm20985_vm13, %v2823_v39, 0.0  ;;  %v20994_v10 = vand.u32 4294901760, %v18462_v16  ;;  %v20997_v39 = vld [vmem:[#allocation5_spill] sm:$0xff] }
 0x1a3   : > { %15964 = vmatprep.subr.bf16.mxu0 %v18679_v26  ;;  %v20995_v52 = vand.u32 4294901760, %v18465_v53  ;;  %15922 = vmatpush3.bf16.msra.mxu1 %v18329_v41  ;;  %v2880_v27 = vadd.f32 %v2872_v49, %v2851_v3  ;;  %v2922_v47 = vmul.f32 %v18391_v54, %v20996_v51  ;;  %v20998_v11 = vand.u32 4294901760, %v18569_v21  ;;  %v21000_v3 = vld [vmem:[#allocation29_spill] sm:$0xff]  ;;  %v21001_v49 = vld [vmem:[#allocation80_spill] sm:$0xff] }
 0x1a4   : > { %v18696_v42 = vsub.f32 %v18462_v16, %v20994_v10  ;;  %15966 = vmatpush3.bf16.msra.mxu0 %v18679_v26  ;;  %v2879_v14 = vadd.f32 %v2871_v31, %v2850_v46  ;;  %15924 = vmatprep.subr.bf16.mxu1 %v15923_v36  ;;  %v2921_v8 = vmul.f32 %v18391_v54, %v2909_v61  ;;  %v20999_v31 = vand.u32 4294901760, %v18566_v44  ;;  %v21003_v10 = vld [vmem:[#allocation77_spill] sm:$0xff]  ;;  %v21005_v54 = vld [vmem:[#allocation30_spill] sm:$0xff] }
 0x1a5   : > { %v18701_v19 = vsub.f32 %v18465_v53, %v20995_v52  ;;  %14495 = vmatprep.mubr.f32.mxu1 %v20997_v39  ;;  %v18713_v23 = vsub.f32 %v18569_v21, %v20998_v11  ;;  %v2901_v48 = vadd.f32 %v2893_v20, %v2880_v27  ;;  %v21002_v30 = vand.u32 4294901760, %v21001_v49 }
 0x1a6   : > { %v20763_v62 = vand.u32 4294901760, %v18696_v42  ;;  %v2900_v5 = vadd.f32 %v2892_v22, %v2879_v14  ;;  %v18719_v46 = vsub.f32 %v18566_v44, %v20999_v31  ;;  %14496 = vmatmul.mubr.f32.vlgmr.msra.gmra.mrb[8].mxu1 %v21000_v3  ;;  %v21004_v52 = vand.u32 4294901760, %v21003_v10 }
 0x1a7   : > { %v20762_v56 = vand.u32 4294901760, %v18701_v19  ;;  %v2930_v20 = vadd.f32 %v2922_v47, %v2901_v48  ;;  %15926 = vmatpush3.bf16.msra.mxu1 %v15923_v36  ;;  %14498 = vmatprep.mubr.f32.mxu1 %v21005_v54  ;;  %v20764_v61 = vand.u32 4294901760, %v18713_v23  ;;  %v18732_v14 = vsub.f32 %v18660_v37, %v2962_v4  ;;  %v21006_v48 = vld [vmem:[#allocation31_spill] sm:$0xff]  ;;  %v21007_v4 = vld [vmem:[#allocation78_spill] sm:$0xff] }
 0x1a8   : > { %v15927_v51 = vpack.c.bf16 %v21004_v52, %v21002_v30  ;;  %v2929_v22 = vadd.f32 %v2921_v8, %v2900_v5  ;;  %v3103_v27 = vsub.f32 %v18696_v42, %v20763_v62  ;;  %v18738_v31 = vsub.f32 %v18657_v29, %v2959_v28  ;;  %v21009_v30 = vld [vmem:[#allocation79_spill] sm:$0xff] }
 0x1a9   : > { %v3110_v11 = vsub.f32 %v18701_v19, %v20762_v56  ;;  %v18744_v36 = vadd.f32 %v18440_v15, %v2930_v20  ;;  %v20766_v47 = vand.u32 4294901760, %v18719_v46  ;;  %v21008_v8 = vand.u32 4294901760, %v21007_v4 }
 0x1aa   : > { %15928 = vmatprep.subr.bf16.mxu1 %v15927_v51  ;;  %v18741_v49 = vadd.f32 %v18440_v15, %v2929_v22  ;;  %14499 = vmatmul.mubr.f32.gmra.mrb[10].mxu1 %v21006_v48  ;;  %v21010_v10 = vand.u32 4294901760, %v21009_v30  ;;  %v3124_v15 = vsub.f32 %v18713_v23, %v20764_v61  ;;  %v21011_v22 = vld [vmem:[#allocation34_spill] sm:$0xff]  ;;  %v3104_v20 = vand.u32 4294901760, %v3103_v27 }
 0x1ab   : > { %v3111_v5 = vand.u32 4294901760, %v3110_v11  ;;  %v2968_v28 = vand.u32 4294901760, %v18744_v36  ;;  %15930 = vmatpush3.bf16.msra.mxu1 %v15927_v51  ;;  %14501 = vmatprep.mubr.f32.mxu1 %v21011_v22  ;;  %v21015_v61 = vand.u32 4294901760, %v18269_v43  ;;  %v21016_v27 = vand.u32 4294901760, %v18332_v58 }
 0x1ac   : > { %v15931_v52 = vpack.c.bf16 %v21010_v10, %v21008_v8  ;;  %v2965_v56 = vand.u32 4294901760, %v18741_v49  ;;  %v3117_v8 = vsub.f32 %v18719_v46, %v20766_v47  ;;  %v21014_v10 = vld [vmem:[#allocation35_spill] sm:$0xff]  ;;  %v3125_v9 = vand.u32 4294901760, %v3124_v15 }
 0x1ad   : > { %v18769_v30 = vsub.f32 %v18744_v36, %v2968_v28  ;;  %v15935_v11 = vpack.c.bf16 %v21016_v27, %v21015_v61  ;;  %v15971_v4 = vpack.c.bf16 %v3111_v5, %v3104_v20  ;;  %v21017_v47 = vand.u32 4294901760, %v18732_v14  ;;  %v21019_v61 = vld [vmem:[#allocation36_spill] sm:$0xff] }
 0x1ae   : > { %15932 = vmatprep.subr.bf16.mxu1 %v15931_v52  ;;  %v18760_v62 = vpack.c.bf16 %v2968_v28, %v2965_v56  ;;  %v18766_v51 = vsub.f32 %v18741_v49, %v2965_v56  ;;  %14502 = vmatmul.mubr.f32.gmra.mrb[12].mxu1 %v21014_v10  ;;  %v3118_v28 = vand.u32 4294901760, %v3117_v8  ;;  %v21018_v43 = vand.u32 4294901760, %v18738_v31 }
 0x1af   : > { %21013 = vst [vmem:[#allocation45_spill] sm:$0xff] %v18769_v30  ;;  %15934 = vmatpush3.bf16.msra.mxu1 %v15931_v52  ;;  %v3138_v56 = vsub.f32 %v18732_v14, %v21017_v47  ;;  %v20768_v1 = vand.u32 4294901760, %v18769_v30  ;;  %14504 = vmatprep.mubr.f32.mxu1 %v21019_v61  ;;  %v21020_v52 = vld [vmem:[#allocation41_spill] sm:$0xff]  ;;  %vm21030_vm12 = vcmask 130048   ;;  %vm21107_vm13 = vcmask 64512  }
 0x1b0   : > { %21012 = vst [vmem:[#allocation44_spill] sm:$0xff] %v18766_v51  ;;  %15968 = vmatprep.subr.bf16.mxu0 %v18760_v62  ;;  %15936 = vmatprep.subr.bf16.mxu1 %v15935_v11  ;;  %v3131_v58 = vsub.f32 %v18738_v31, %v21018_v43  ;;  %v20769_v5 = vand.u32 4294901760, %v18766_v51  ;;  %v15975_v47 = vpack.c.bf16 %v3125_v9, %v3118_v28  ;;  %v3798_v9 = vld [vmem:[%s20596_s6] sm:$0xff]  ;;  %vm21031_vm6 = vmmov %vm21030_vm12 }
 0x1b1   : > { %15970 = vmatpush3.bf16.msra.mxu0 %v18760_v62  ;;  %v3139_v15 = vand.u32 4294901760, %v3138_v56  ;;  %v3152_v20 = vsub.f32 %v18769_v30, %v20768_v1 }
 0x1b2   : > { %15972 = vmatprep.subr.bf16.mxu0 %v15971_v4  ;;  %14505 = vmatmul.mubr.f32.gmra.mrb[14].mxu1 %v21020_v52  ;;  %v3132_v8 = vand.u32 4294901760, %v3131_v58  ;;  %v3145_v27 = vsub.f32 %v18766_v51, %v20769_v5  ;;  %v21021_v58 = vld [vmem:[#allocation59_spill] sm:$0xff]  ;;  %v15987_v5 = vpack.c.bf16 %v18701_v19, %v18696_v42 }
 0x1b3   : > { %15938 = vmatpush3.bf16.msra.mxu1 %v15935_v11  ;;  %14523 = vmatprep.mubr.f32.mxu1 %v20969_v24  ;;  %v3153_v11 = vand.u32 4294901760, %v3152_v20  ;;  %v21023_v20 = vld [vmem:[#allocation37_spill] sm:$0xff] }
 0x1b4   : > { %14580 = vmatmul.mubr.f32.vlgmr.msra.gmra.mrb[8].mxu0 %v20958_v32  ;;  %15940 = vmatprep.subr.bf16.mxu1 %v18054_v63  ;;  %v3799_v32 = vld [vmem:[%s20596_s6 + $0x8] sm:$0xff]  ;;  %v3146_v28 = vand.u32 4294901760, %v3145_v27  ;;  %v21024_v27 = vld [vmem:[#allocation61_spill] sm:$0xff] }
 0x1b5   : > { %15974 = vmatpush3.bf16.msra.mxu0 %v15971_v4  ;;  %14582 = vmatprep.mubr.f32.mxu0 %v20959_v13  ;;  %v15979_v13 = vpack.c.bf16 %v3139_v15, %v3132_v8  ;;  %v3832_v4 = vand.u32 4294901760, %v3798_v9  ;;  %v3835_v56 = vand.u32 4294901760, %v3799_v32  ;;  %v3808_v8 = vsel %vm21030_vm12, %v18462_v16, 0  ;;  %vm21034_vm12 = vmmov %vm21031_vm6 }
 0x1b6   : > { %15976 = vmatprep.subr.bf16.mxu0 %v15975_v47  ;;  %14524 = vmatmul.mubr.f32.vlgmr.msra.gmra.mrb[8].mxu1 %v20970_v60  ;;  %v15983_v15 = vpack.c.bf16 %v3153_v11, %v3146_v28  ;;  %v18843_v28 = vpack.c.bf16 %v18732_v14, %v18738_v31  ;;  %v21033_v57 = vand.u32 4294901760, %v21024_v27  ;;  %v3814_v16 = vsel %vm21034_vm12, %v18566_v44, 0  ;;  %vm21041_vm12 = vmmov %vm21031_vm6 }
 0x1b7   : > { %15942 = vmatpush3.bf16.msra.mxu1 %v18054_v63  ;;  %14526 = vmatprep.mubr.f32.mxu1 %v20973_v35  ;;  %v18810_v43 = vsub.f32 %v3798_v9, %v3832_v4  ;;  %v21025_v9 = vld [vmem:[#allocation32_spill] sm:$0xff]  ;;  %v3817_v44 = vsel %vm21031_vm6, %v18569_v21, 0 }
 0x1b8   : > { %14583 = vmatmul.mubr.f32.gmra.mrb[10].mxu0 %v20964_v6  ;;  %15944 = vmatprep.subr.bf16.mxu1 %v18145_v34  ;;  %v18812_v6 = vsub.f32 %v3799_v32, %v3835_v56  ;;  %v21029_v32 = vld [vmem:[#allocation74_spill] sm:$0xff]  ;;  %v5862_v40 = vsub.f32 %v21024_v27, %v21033_v57 }
 0x1b9   : > { %15978 = vmatpush3.bf16.msra.mxu0 %v15975_v47  ;;  %14585 = vmatprep.mubr.f32.mxu0 %v20965_v17  ;;  %v21022_v17 = vld [vmem:[#allocation60_spill] sm:$0xff]  ;;  %v20772_v47 = vand.u32 4294901760, %v18810_v43 }
 0x1ba   : > { %15980 = vmatprep.subr.bf16.mxu0 %v15979_v13  ;;  %14527 = vmatmul.mubr.f32.gmra.mrb[10].mxu1 %v20974_v25  ;;  %v20775_v63 = vand.u32 4294901760, %v18812_v6  ;;  %v5863_v52 = vand.u32 4294901760, %v5862_v40 }
 0x1bb   : > { %15946 = vmatpush3.bf16.msra.mxu1 %v18145_v34  ;;  %14529 = vmatprep.mubr.f32.mxu1 %v20975_v12  ;;  %v3982_v34 = vsub.f32 %v18810_v43, %v20772_v47  ;;  %v18848_v47 = vpack.c.bf16 %v3835_v56, %v3832_v4 }
 0x1bc   : > { %14586 = vmatmul.mubr.f32.gmra.mrb[12].mxu0 %v21021_v58  ;;  %v21026_v58 = vld [vmem:[#allocation55_spill] sm:$0xff]  ;;  %15948 = vmatprep.subr.bf16.mxu1 %v18241_v38  ;;  %v3989_v11 = vsub.f32 %v18812_v6, %v20775_v63  ;;  %v21032_v63 = vand.u32 4294901760, %v21023_v20 }
 0x1bd   : > { %15982 = vmatpush3.bf16.msra.mxu0 %v15979_v13  ;;  %14588 = vmatprep.mubr.f32.mxu0 %v21022_v17  ;;  %v21027_v13 = vld [vmem:[#allocation71_spill] sm:$0xff]  ;;  %v21028_v17 = vld [vmem:[#allocation62_spill] sm:$0xff]  ;;  %v21036_v56 = vand.u32 4294901760, %v21026_v58  ;;  %v3983_v27 = vand.u32 4294901760, %v3982_v34 }
 0x1be   : > { %15984 = vmatprep.subr.bf16.mxu0 %v15983_v15  ;;  %14530 = vmatmul.mubr.f32.gmra.mrb[12].mxu1 %v20976_v45  ;;  %v18855_v1 = vsub.f32 %v21023_v20, %v21032_v63  ;;  %v18878_v63 = vand.u32 4294901760, %v3808_v8  ;;  %v3990_v20 = vand.u32 4294901760, %v3989_v11 }
 0x1bf   : > { %15950 = vmatpush3.bf16.msra.mxu1 %v18241_v38  ;;  %14532 = vmatprep.mubr.f32.mxu1 %v20977_v7  ;;  %v18864_v38 = vpack.c.bf16 %v18769_v30, %v18766_v51  ;;  %v5869_v57 = vsub.f32 %v21026_v58, %v21036_v56  ;;  %v21038_v58 = vand.u32 4294901760, %v21027_v13  ;;  %v5864_v30 = vsub.f32 %v5862_v40, %v5863_v52 }
 0x1c0   : > { %14589 = vmatmul.mubr.f32.gmra.mrb[14].mxu0 %v21028_v17  ;;  %v15991_v17 = vpack.c.bf16 %v18713_v23, %v18719_v46  ;;  %15952 = vmatprep.subr.bf16.mxu1 %v18329_v41 }
 0x1c1   : > { %15986 = vmatpush3.bf16.msra.mxu0 %v15983_v15  ;;  %14607 = vmatprep.mubr.f32.mxu0 %v20969_v24  ;;  %v3811_v15 = vsel %vm21031_vm6, %v18465_v53, 0  ;;  %v21035_v53 = vand.u32 4294901760, %v21025_v9  ;;  %v5883_v61 = vsub.f32 %v21027_v13, %v21038_v58  ;;  %v18899_v58 = vand.u32 4294901760, %v3817_v44 }
 0x1c2   : > { %15988 = vmatprep.subr.bf16.mxu0 %v15987_v5  ;;  %14533 = vmatmul.mubr.f32.gmra.mrb[14].mxu1 %v20978_v50  ;;  %v18890_v11 = vand.u32 4294901760, %v3811_v15  ;;  %v5865_v13 = vand.u32 4294901760, %v5864_v30  ;;  %v3820_v30 = vsel %vm21041_vm12, %v18657_v29, 0  ;;  %vm21044_vm12 = vmmov %vm21031_vm6 }
 0x1c3   : > { %v18871_v4 = vsub.f32 %v21025_v9, %v21035_v53  ;;  %v5870_v53 = vand.u32 4294901760, %v5869_v57  ;;  %v21037_v9 = vand.u32 4294901760, %v21029_v32  ;;  %15954 = vmatpush3.bf16.msra.mxu1 %v18329_v41  ;;  %14551 = vmatprep.mubr.f32.mxu1 %v20969_v24  ;;  %v5884_v51 = vand.u32 4294901760, %v5883_v61 }
 0x1c4   : > { %14608 = vmatmul.mubr.f32.vlgmr.msra.gmra.mrb[8].mxu0 %v20970_v60  ;;  %21039 = vst [vmem:[#allocation63_spill] sm:$0xff] %v18890_v11  ;;  %16052 = vmatprep.subr.bf16.mxu1 %v18848_v47  ;;  %v18901_v41 = vpack.c.bf16 %v3990_v20, %v3983_v27  ;;  %v18909_v24 = vsub.f32 %v3808_v8, %v18878_v63 }
 0x1c5   : > { %15990 = vmatpush3.bf16.msra.mxu0 %v15987_v5  ;;  %14610 = vmatprep.mubr.f32.mxu0 %v20973_v35  ;;  %v5876_v56 = vsub.f32 %v21029_v32, %v21037_v9  ;;  %v18892_v5 = vand.u32 4294901760, %v3814_v16  ;;  %v5871_v9 = vsub.f32 %v5869_v57, %v5870_v53  ;;  %v18905_v34 = vpack.c.bf16 %v18871_v4, %v18855_v1 }
 0x1c6   : > { %15992 = vmatprep.subr.bf16.mxu0 %v15991_v17  ;;  %v5885_v22 = vsub.f32 %v5883_v61, %v5884_v51  ;;  %14552 = vmatmul.mubr.f32.vlgmr.msra.gmra.mrb[8].mxu1 %v20970_v60  ;;  %v18914_v20 = vsub.f32 %v3811_v15, %v18890_v11  ;;  %v18918_v27 = vpack.c.bf16 %v5869_v57, %v5862_v40  ;;  %v21042_v60 = vand.u32 4294901760, %v18855_v1 }
 0x1c7   : > { %v5877_v32 = vand.u32 4294901760, %v5876_v56  ;;  %21040 = vst [vmem:[#allocation65_spill] sm:$0xff] %v18905_v34  ;;  %v5872_v21 = vand.u32 4294901760, %v5871_v9  ;;  %14554 = vmatprep.mubr.f32.mxu1 %v20973_v35  ;;  %16054 = vmatpush3.bf16.msra.mxu1 %v18848_v47  ;;  %v21043_v15 = vand.u32 4294901760, %v18871_v4  ;;  %v18934_v40 = vsub.f32 %v3814_v16, %v18892_v5 }
 0x1c8   : > { %14611 = vmatmul.mubr.f32.gmra.mrb[10].mxu0 %v20974_v25  ;;  %v5886_v34 = vand.u32 4294901760, %v5885_v22  ;;  %16056 = vmatprep.subr.bf16.mxu1 %v18901_v41  ;;  %v18937_v29 = vpack.c.bf16 %v5870_v53, %v5863_v52  ;;  %v3900_v22 = vand.u32 4294901760, %v18909_v24  ;;  %v18956_v52 = vsub.f32 %v3817_v44, %v18899_v58  ;;  %v21045_v53 = vld [vmem:[#allocation50_spill] sm:$0xff] }
 0x1c9   : > { %15994 = vmatpush3.bf16.msra.mxu0 %v15991_v17  ;;  %14613 = vmatprep.mubr.f32.mxu0 %v20975_v12  ;;  %v5878_v10 = vsub.f32 %v5876_v56, %v5877_v32  ;;  %v18920_v17 = vpack.c.bf16 %v5883_v61, %v5876_v56  ;;  %v18924_v8 = vpack.c.bf16 %v5872_v21, %v5865_v13  ;;  %v3829_v44 = vsel %vm21031_vm6, %v18744_v36, 0  ;;  %v21047_v36 = vld [vmem:[#allocation21_spill] sm:$0xff] }
 0x1ca   : > { %15996 = vmatprep.subr.bf16.mxu0 %v18843_v28  ;;  %v18930_v11 = vpack.c.bf16 %v21043_v15, %v21042_v60  ;;  %v18939_v61 = vpack.c.bf16 %v5884_v51, %v5877_v32  ;;  %v3823_v60 = vsel %vm21031_vm6, %v18660_v37, 0  ;;  %14555 = vmatmul.mubr.f32.gmra.mrb[10].mxu1 %v20974_v25  ;;  %v3826_v51 = vsel %vm21044_vm12, %v18741_v49, 0 }
 0x1cb   : > { %v5879_v9 = vand.u32 4294901760, %v5878_v10  ;;  %v18944_v10 = vand.u32 4294901760, %v3820_v30  ;;  %14557 = vmatprep.mubr.f32.mxu1 %v20975_v12  ;;  %v20792_v32 = vand.u32 4294901760, %v18914_v20  ;;  %v20793_v37 = vand.u32 4294901760, %v18934_v40 }
 0x1cc   : > { %14614 = vmatmul.mubr.f32.gmra.mrb[12].mxu0 %v20976_v45  ;;  %v3901_v49 = vsub.f32 %v18909_v24, %v3900_v22  ;;  %v18971_v57 = vand.u32 4294901760, %v3826_v51  ;;  %v18986_v21 = vand.u32 4294901760, %v3829_v44  ;;  %vm20796_vm12 = vcmask 31744  }
 0x1cd   : > { %15998 = vmatpush3.bf16.msra.mxu0 %v18843_v28  ;;  %14616 = vmatprep.mubr.f32.mxu0 %v20977_v7  ;;  %v18948_v13 = vpack.c.bf16 %v5886_v34, %v5879_v9  ;;  %v18961_v28 = vand.u32 4294901760, %v3823_v60  ;;  %v18969_v16 = vsub.f32 %v3820_v30, %v18944_v10  ;;  %v3911_v56 = vsub.f32 %v18914_v20, %v20792_v32  ;;  %v21048_v32 = vld [vmem:[#allocation51_spill] sm:$0xff] }
 0x1ce   : > { %16000 = vmatprep.subr.bf16.mxu0 %v18864_v38  ;;  %14558 = vmatmul.mubr.f32.gmra.mrb[12].mxu1 %v20976_v45  ;;  %v3902_v30 = vand.u32 4294901760, %v3901_v49  ;;  %v3921_v9 = vsub.f32 %v18934_v40, %v20793_v37  ;;  %v19005_v37 = vsub.f32 %v3829_v44, %v18986_v21  ;;  %vm20795_vm6 = vcmask 64512  }
 0x1cf   : > { %14560 = vmatprep.mubr.f32.mxu1 %v20977_v7  ;;  %v18984_v34 = vsub.f32 %v3823_v60, %v18961_v28  ;;  %v3940_v15 = vand.u32 4294901760, %v18969_v16  ;;  %v3912_v49 = vand.u32 4294901760, %v3911_v56 }
 0x1d0   : > { %14617 = vmatmul.mubr.f32.gmra.mrb[14].mxu0 %v20978_v50  ;;  %v3970_v56 = vand.u32 4294901760, %v19005_v37 }
 0x1d1   : > { %16002 = vmatpush3.bf16.msra.mxu0 %v18864_v38  ;;  %14635 = vmatprep.mubr.f32.mxu0 %v20979_v59  ;;  %v20794_v59 = vand.u32 4294901760, %v18956_v52  ;;  %v21046_v38 = vld [vmem:[#allocation20_spill] sm:$0xff] }
 0x1d2   : > { %16004 = vmatprep.subr.bf16.mxu0 %v21045_v53  ;;  %14561 = vmatmul.mubr.f32.gmra.mrb[14].mxu1 %v20978_v50 }
 0x1d3   : > { %14735 = vmatprep.mubr.f32.mxu1 %v3902_v30  ;;  %v3931_v60 = vsub.f32 %v18956_v52, %v20794_v59  ;;  %v3922_v30 = vand.u32 4294901760, %v3921_v9  ;;  %v3941_v59 = vsub.f32 %v18969_v16, %v3940_v15 }
 0x1d4   : > { %14636 = vmatmul.mubr.f32.vlgmr.msra.gmra.mrb[8].mxu0 %v21046_v38  ;;  %v18995_v38 = vsub.f32 %v3826_v51, %v18971_v57  ;;  %v16059_v51 = vpack.c.bf16 %v18812_v6, %v18810_v43 }
 0x1d5   : > { %16006 = vmatpush3.bf16.msra.mxu0 %v21045_v53  ;;  %14638 = vmatprep.mubr.f32.mxu0 %v21047_v36  ;;  %v3950_v36 = vand.u32 4294901760, %v18984_v34  ;;  %v3932_v44 = vand.u32 4294901760, %v3931_v60  ;;  %v3942_v9 = vand.u32 4294901760, %v3941_v59 }
 0x1d6   : > { %16008 = vmatprep.subr.bf16.mxu0 %v21048_v32  ;;  %14736 = vmatmul.mubr.f32.vlgmr.msra.gmra.mrb[16].mxu1 %v3912_v49 }
 0x1d7   : > { %14738 = vmatprep.mubr.f32.mxu1 %v3922_v30  ;;  %16058 = vmatpush3.bf16.msra.mxu1 %v18901_v41  ;;  %v21050_v41 = vand.u32 4294901760, %v18701_v19 }
 0x1d8   : > { %14639 = vmatmul.mubr.f32.gmra.mrb[10].mxu0 %v20986_v33  ;;  %v3960_v33 = vand.u32 4294901760, %v18995_v38  ;;  %16060 = vmatprep.subr.bf16.mxu1 %v16059_v51 }
 0x1d9   : > { %16010 = vmatpush3.bf16.msra.mxu0 %v21048_v32  ;;  %14641 = vmatprep.mubr.f32.mxu0 %v20987_v55  ;;  %v3951_v55 = vsub.f32 %v18984_v34, %v3950_v36 }
 0x1da   : > { %16012 = vmatprep.subr.bf16.mxu0 %v18679_v26  ;;  %v3961_v49 = vsub.f32 %v18995_v38, %v3960_v33  ;;  %14739 = vmatmul.mubr.f32.gmra.mrb[18].mxu1 %v3932_v44 }
 0x1db   : > { %14741 = vmatprep.mubr.f32.mxu1 %v3942_v9  ;;  %v3952_v30 = vand.u32 4294901760, %v3951_v55  ;;  %v21054_v55 = vand.u32 4294901760, %v18732_v14  ;;  %v21058_v9 = vld [vmem:[#allocation44_spill] sm:$0xff] }
 0x1dc   : > { %14642 = vmatmul.mubr.f32.gmra.mrb[12].mxu0 %v20988_v2  ;;  %v21049_v2 = vand.u32 4294901760, %v18696_v42  ;;  %v3962_v59 = vand.u32 4294901760, %v3961_v49  ;;  %v21052_v42 = vand.u32 4294901760, %v18713_v23  ;;  %v21056_v23 = vld [vmem:[#allocation63_spill] sm:$0xff]  ;;  %v21059_v49 = vand.u32 4294901760, %v21058_v9  ;;  %v21062_v14 = vld [vmem:[#allocation36_spill] sm:$0xff] }
 0x1dd   : > { %16014 = vmatpush3.bf16.msra.mxu0 %v18679_v26  ;;  %14644 = vmatprep.mubr.f32.mxu0 %v20989_v18  ;;  %v3971_v18 = vsub.f32 %v19005_v37, %v3970_v56 }
 0x1de   : > { %16016 = vmatprep.subr.bf16.mxu0 %v18760_v62  ;;  %v16019_v60 = vpack.c.bf16 %v21050_v41, %v21049_v2  ;;  %14742 = vmatmul.mubr.f32.gmra.mrb[20].mxu1 %v3952_v30  ;;  %v21060_v2 = vld [vmem:[#allocation45_spill] sm:$0xff]  ;;  %v21066_v30 = vand.u32 4294901760, %v18810_v43 }
 0x1df   : > { %14744 = vmatprep.mubr.f32.mxu1 %v3962_v59  ;;  %v3972_v44 = vand.u32 4294901760, %v3971_v18  ;;  %v21067_v18 = vand.u32 4294901760, %v18812_v6 }
 0x1e0   : > { %14645 = vmatmul.mubr.f32.gmra.mrb[14].mxu0 %v20993_v0  ;;  %v21051_v0 = vand.u32 4294901760, %v18719_v46  ;;  %v21055_v46 = vld [vmem:[#allocation34_spill] sm:$0xff] }
 0x1e1   : > { %16018 = vmatpush3.bf16.msra.mxu0 %v18760_v62  ;;  %14663 = vmatprep.mubr.f32.mxu0 %v20997_v39  ;;  %v21053_v39 = vand.u32 4294901760, %v18738_v31  ;;  %v21063_v31 = vld [vmem:[#allocation41_spill] sm:$0xff]  ;;  %v16067_v59 = vpack.c.bf16 %v21067_v18, %v21066_v30 }
 0x1e2   : > { %16020 = vmatprep.subr.bf16.mxu0 %v16019_v60  ;;  %v16023_v19 = vpack.c.bf16 %v21052_v42, %v21051_v0  ;;  %14745 = vmatmul.mubr.f32.gmra.mrb[22].mxu1 %v3972_v44 }
 0x1e3   : > { %14751 = vmatprep.mubr.f32.mxu1 %v18878_v63 }
 0x1e4   : > { %14664 = vmatmul.mubr.f32.vlgmr.msra.gmra.mrb[8].mxu0 %v21000_v3  ;;  %v16027_v3 = vpack.c.bf16 %v21054_v55, %v21053_v39 }
 0x1e5   : > { %16022 = vmatpush3.bf16.msra.mxu0 %v16019_v60  ;;  %14666 = vmatprep.mubr.f32.mxu0 %v21005_v54  ;;  %v21057_v54 = vld [vmem:[#allocation35_spill] sm:$0xff]  ;;  %v21065_v60 = vld [vmem:[#allocation12_spill] sm:$0xff] }
 0x1e6   : > { %16024 = vmatprep.subr.bf16.mxu0 %v16023_v19  ;;  %14752 = vmatmul.mubr.f32.vlgmr.msra.gmra.mrb[16].mxu1 %v21056_v23 }
 0x1e7   : > { %14754 = vmatprep.mubr.f32.mxu1 %v18892_v5  ;;  %16062 = vmatpush3.bf16.msra.mxu1 %v16059_v51  ;;  %v21064_v51 = vld [vmem:[#allocation3_spill] sm:$0xff] }
 0x1e8   : > { %14667 = vmatmul.mubr.f32.gmra.mrb[10].mxu0 %v21006_v48  ;;  %v21061_v48 = vand.u32 4294901760, %v21060_v2  ;;  %16064 = vmatprep.subr.bf16.mxu1 %v18848_v47 }
 0x1e9   : > { %16026 = vmatpush3.bf16.msra.mxu0 %v16023_v19  ;;  %14669 = vmatprep.mubr.f32.mxu0 %v21055_v46 }
 0x1ea   : > { %16028 = vmatprep.subr.bf16.mxu0 %v16027_v3  ;;  %v16031_v41 = vpack.c.bf16 %v21061_v48, %v21059_v49  ;;  %14755 = vmatmul.mubr.f32.gmra.mrb[18].mxu1 %v18899_v58 }
 0x1eb   : > { %14757 = vmatprep.mubr.f32.mxu1 %v18944_v10 }
 0x1ec   : > { %14670 = vmatmul.mubr.f32.gmra.mrb[12].mxu0 %v21057_v54 }
 0x1ed   : > { %16030 = vmatpush3.bf16.msra.mxu0 %v16027_v3  ;;  %14672 = vmatprep.mubr.f32.mxu0 %v21062_v14 }
 0x1ee   : > { %16032 = vmatprep.subr.bf16.mxu0 %v16031_v41  ;;  %14758 = vmatmul.mubr.f32.gmra.mrb[20].mxu1 %v18961_v28 }
 0x1ef   : > { %14760 = vmatprep.mubr.f32.mxu1 %v18971_v57 }
 0x1f0   : > { %14673 = vmatmul.mubr.f32.gmra.mrb[14].mxu0 %v21063_v31 }
 0x1f1   : > { %16034 = vmatpush3.bf16.msra.mxu0 %v16031_v41  ;;  %14691 = vmatprep.mubr.f32.mxu0 %v21064_v51 }
 0x1f2   : > { %16036 = vmatprep.subr.bf16.mxu0 %v21045_v53  ;;  %14761 = vmatmul.mubr.f32.gmra.mrb[22].mxu1 %v18986_v21 }
 0x1f3   : > { %14767 = vmatprep.mubr.f32.mxu1 %v18909_v24  ;;  %v21070_v24 = vand.u32 4294901760, %v18956_v52 }
 0x1f4   : > { %14692 = vmatmul.mubr.f32.vlgmr.msra.gmra.mrb[8].mxu0 %v21065_v60 }
 0x1f5   : > { %16038 = vmatpush3.bf16.msra.mxu0 %v21045_v53  ;;  %14694 = vmatprep.mubr.f32.mxu0 %v20973_v35 }
 0x1f6   : > { %16040 = vmatprep.subr.bf16.mxu0 %v21048_v32  ;;  %14768 = vmatmul.mubr.f32.vlgmr.msra.gmra.mrb[16].mxu1 %v18914_v20 }
 0x1f7   : > { %14770 = vmatprep.mubr.f32.mxu1 %v18934_v40  ;;  %16066 = vmatpush3.bf16.msra.mxu1 %v18848_v47 }
 0x1f8   : > { %14695 = vmatmul.mubr.f32.gmra.mrb[10].mxu0 %v20974_v25  ;;  %16068 = vmatprep.subr.bf16.mxu1 %v16067_v59 }
 0x1f9   : > { %16042 = vmatpush3.bf16.msra.mxu0 %v21048_v32  ;;  %14697 = vmatprep.mubr.f32.mxu0 %v20975_v12 }
 0x1fa   : > { %16044 = vmatprep.subr.bf16.mxu0 %v18679_v26  ;;  %14771 = vmatmul.mubr.f32.gmra.mrb[18].mxu1 %v18956_v52 }
 0x1fb   : > { %14773 = vmatprep.mubr.f32.mxu1 %v18969_v16 }
 0x1fc   : > { %14698 = vmatmul.mubr.f32.gmra.mrb[12].mxu0 %v20976_v45 }
 0x1fd   : > { %16046 = vmatpush3.bf16.msra.mxu0 %v18679_v26  ;;  %14700 = vmatprep.mubr.f32.mxu0 %v20977_v7  ;;  %v21068_v26 = vand.u32 4294901760, %v18914_v20 }
 0x1fe   : > { %16048 = vmatprep.subr.bf16.mxu0 %v18760_v62  ;;  %14774 = vmatmul.mubr.f32.gmra.mrb[20].mxu1 %v18984_v34 }
 0x1ff   : > { %14776 = vmatprep.mubr.f32.mxu1 %v18995_v38 }
 0x200   : > { %14701 = vmatmul.mubr.f32.gmra.mrb[14].mxu0 %v20978_v50 }
 0x201   : > { %16050 = vmatpush3.bf16.msra.mxu0 %v18760_v62  ;;  %14719 = vmatprep.mubr.f32.mxu0 %v21064_v51  ;;  %v21069_v62 = vand.u32 4294901760, %v18934_v40 }
 0x202   : > { %14777 = vmatmul.mubr.f32.gmra.mrb[22].mxu1 %v19005_v37 }
 0x203   : > { %14783 = vmatprep.mubr.f32.mxu1 %v3900_v22 }
 0x204   : > { %14720 = vmatmul.mubr.f32.vlgmr.msra.gmra.mrb[8].mxu0 %v21065_v60 }
 0x205   : > { %14722 = vmatprep.mubr.f32.mxu0 %v20973_v35 }
 0x206   : > { %14784 = vmatmul.mubr.f32.vlgmr.msra.gmra.mrb[16].mxu1 %v21068_v26 }
 0x207   : > { %14786 = vmatprep.mubr.f32.mxu1 %v21069_v62  ;;  %16070 = vmatpush3.bf16.msra.mxu1 %v16067_v59 }
 0x208   : > { %14723 = vmatmul.mubr.f32.gmra.mrb[10].mxu0 %v20974_v25  ;;  %16072 = vmatprep.subr.bf16.mxu1 %v18848_v47 }
 0x209   : > { %14725 = vmatprep.mubr.f32.mxu0 %v20975_v12 }
 0x20a   : > { %14787 = vmatmul.mubr.f32.gmra.mrb[18].mxu1 %v21070_v24 }
 0x20b   : > { %14789 = vmatprep.mubr.f32.mxu1 %v3940_v15 }
 0x20c   : > { %14726 = vmatmul.mubr.f32.gmra.mrb[12].mxu0 %v20976_v45 }
 0x20d   : > { %14728 = vmatprep.mubr.f32.mxu0 %v20977_v7 }
 0x20e   : > { %14790 = vmatmul.mubr.f32.gmra.mrb[20].mxu1 %v3950_v36 }
 0x20f   : > { %14792 = vmatprep.mubr.f32.mxu1 %v3960_v33 }
 0x210   : > { %14729 = vmatmul.mubr.f32.gmra.mrb[14].mxu0 %v20978_v50 }
 0x212   : > { %14793 = vmatmul.mubr.f32.gmra.mrb[22].mxu1 %v3970_v56 }
 0x213   : > { %14799 = vmatprep.mubr.f32.mxu1 %v18878_v63 }
 0x216   : > { %14800 = vmatmul.mubr.f32.vlgmr.msra.gmra.mrb[16].mxu1 %v21056_v23 }
 0x217   : > { %14802 = vmatprep.mubr.f32.mxu1 %v18892_v5  ;;  %16074 = vmatpush3.bf16.msra.mxu1 %v18848_v47 }
 0x21a   : > { %14803 = vmatmul.mubr.f32.gmra.mrb[18].mxu1 %v18899_v58 }
 0x21b   : > { %14805 = vmatprep.mubr.f32.mxu1 %v18944_v10 }
 0x21e   : > { %14806 = vmatmul.mubr.f32.gmra.mrb[20].mxu1 %v18961_v28 }
 0x21f   : > { %14808 = vmatprep.mubr.f32.mxu1 %v18971_v57 }
 0x222   : > { %14809 = vmatmul.mubr.f32.gmra.mrb[22].mxu1 %v18986_v21 }
 0x223   : > { %14815 = vmatprep.mubr.f32.mxu1 %v18878_v63 }
 0x226   : > { %14816 = vmatmul.mubr.f32.vlgmr.msra.gmra.mrb[16].mxu1 %v21056_v23 }
 0x227   : > { %14818 = vmatprep.mubr.f32.mxu1 %v18892_v5 }
 0x22a   : > { %14819 = vmatmul.mubr.f32.gmra.mrb[18].mxu1 %v18899_v58 }
 0x22b   : > { %14821 = vmatprep.mubr.f32.mxu1 %v18944_v10 }
 0x22e   : > { %14822 = vmatmul.mubr.f32.gmra.mrb[20].mxu1 %v18961_v28 }
 0x22f   : > { %14824 = vmatprep.mubr.f32.mxu1 %v18971_v57 }
 0x232   : > { %14825 = vmatmul.mubr.f32.gmra.mrb[22].mxu1 %v18986_v21 }
 0x299   : > { %v14553_v35 = vpop.f32.mrb[8].mxu1 }
 0x29a   : > { %v2531_v25 = vpop.f32.mrb[9].mxu1 }
 0x29d   : > { %v14556_v12 = vpop.f32.mrb[10].mxu1 }
 0x29e   : > { %v2578_v45 = vadd.f32 %v14556_v12, %v14553_v35  ;;  %v2580_v7 = vmax.f32 %v14553_v35, %v14556_v12  ;;  %v2543_v50 = vpop.f32.mrb[11].mxu1 }
 0x29f   : > { %v2577_v43 = vadd.f32 %v2543_v50, %v2531_v25  ;;  %v2579_v6 = vmax.f32 %v2531_v25, %v2543_v50 }
 0x2a1   : > { %v14559_v47 = vpop.f32.mrb[12].mxu1 }
 0x2a2   : > { %v2582_v63 = vadd.f32 %v14559_v47, %v2578_v45  ;;  %v2584_v5 = vmax.f32 %v2580_v7, %v14559_v47  ;;  %v2555_v58 = vpop.f32.mrb[13].mxu1 }
 0x2a3   : > { %v2581_v20 = vadd.f32 %v2577_v43, %v2555_v58  ;;  %v2583_v40 = vmax.f32 %v2579_v6, %v2555_v58 }
 0x2a5   : > { %v14562_v22 = vpop.f32.mrb[14].mxu1 }
 0x2a6   : > { %v2586_v10 = vadd.f32 %v14562_v22, %v2582_v63  ;;  %v19137_v52 = vmax.f32 %v2584_v5, %v14562_v22  ;;  %v2567_v32 = vpop.f32.mrb[15].mxu1 }
 0x2a7   : > { %v2585_v37 = vadd.f32 %v2581_v20, %v2567_v32  ;;  %v19139_v28 = vmax.f32 %v2583_v40, %v2567_v32 }
 0x2a8   : > { %v19155_v49 = vmul.f32 0.25, %v2586_v10 }
 0x2a9   : > { %4667 = vrot.lane.b32.xlu1 %v19139_v28, %s17189_s23  ;;  %v19165_v48 = vmul.f32 0.25, %v2585_v37 }
 0x2ad   : > { %4669 = vrot.lane.b32.xlu1 %v19137_v52, %s17189_s23 }
 0x2d7   : > { %v14721_v16 = vpop.f32.mrb[8].mxu0 }
 0x2d8   : > { %v3738_v57 = vpop.f32.mrb[9].mxu0 }
 0x2db   : > { %v14724_v53 = vpop.f32.mrb[10].mxu0 }
 0x2dc   : > { %v3785_v34 = vadd.f32 %v14724_v53, %v14721_v16  ;;  %v3787_v21 = vmax.f32 %v14721_v16, %v14724_v53  ;;  %v3750_v15 = vpop.f32.mrb[11].mxu0 }
 0x2dd   : > { %v3784_v38 = vadd.f32 %v3750_v15, %v3738_v57  ;;  %v3786_v36 = vmax.f32 %v3738_v57, %v3750_v15 }
 0x2df   : > { %v14727_v33 = vpop.f32.mrb[12].mxu0 }
 0x2e0   : > { %v3789_v56 = vadd.f32 %v14727_v33, %v3785_v34  ;;  %v3791_v0 = vmax.f32 %v3787_v21, %v14727_v33  ;;  %v3762_v42 = vpop.f32.mrb[13].mxu0 }
 0x2e1   : > { %v3788_v19 = vadd.f32 %v3784_v38, %v3762_v42  ;;  %v3790_v44 = vmax.f32 %v3786_v36, %v3762_v42 }
 0x2e3   : > { %v14730_v39 = vpop.f32.mrb[14].mxu0 }
 0x2e4   : > { %v3793_v55 = vadd.f32 %v14730_v39, %v3789_v56  ;;  %v19145_v3 = vmax.f32 %v3791_v0, %v14730_v39  ;;  %v3774_v46 = vpop.f32.mrb[15].mxu0 }
 0x2e5   : > { %v3792_v23 = vadd.f32 %v3788_v19, %v3774_v46  ;;  %v19147_v54 = vmax.f32 %v3790_v44, %v3774_v46 }
 0x2e6   : > { %v19149_v9 = vmul.f32 0.25, %v3793_v55 }
 0x2e7   : > { %4678 = vrot.lane.b32.xlu0 %v19147_v54, %s17189_s23  ;;  %v19161_v2 = vmul.f32 0.25, %v3792_v23 }
 0x2e8   : > { %6333 = vrot.lane.b32.xlu1 %v19149_v9, %s17190_s25 }
 0x2eb   : > { %4680 = vrot.lane.b32.xlu0 %v19145_v3, %s17189_s23 }
 0x2ec   : > { %6323 = vrot.lane.b32.xlu1 %v19155_v49, %s17190_s25 }
 0x2ef   : > { %6331 = vrot.lane.b32.xlu0 %v19161_v2, %s17190_s25 }
 0x2f3   : > { %6321 = vrot.lane.b32.xlu0 %v19165_v48, %s17190_s25 }
 0x2f9   : > { %v19169_v41 = vpop.f32.mrb[16].mxu1 }
 0x2fa   : > { %v19171_v14 = vpop.f32.mrb[17].mxu1 }
 0x2fd   : > { %v19173_v31 = vpop.f32.mrb[18].mxu1 }
 0x2fe   : > { %21071 = vst [vmem:[#allocation66_spill] sm:$0xff] %v19173_v31  ;;  %v19175_v51 = vpop.f32.mrb[19].mxu1 }
 0x301   : > { %v19177_v60 = vpop.f32.mrb[20].mxu1 }
 0x302   : > { %21072 = vst [vmem:[#allocation64_spill] sm:$0xff] %v19177_v60  ;;  %v19179_v30 = vpop.f32.mrb[21].mxu1 }
 0x303   : > { %21073 = vst [vmem:[#allocation52_spill] sm:$0xff] %v19179_v30 }
 0x305   : > { %v19181_v18 = vpop.f32.mrb[22].mxu1 }
 0x306   : > { %21074 = vst [vmem:[#allocation53_spill] sm:$0xff] %v19181_v18  ;;  %v19183_v59 = vpop.f32.mrb[23].mxu1 }
 0x307   : > { %21075 = vst [vmem:[#allocation67_spill] sm:$0xff] %v19183_v59 }
 0x31b   : > { %v4668_v26 = vpop.permute.xlu1 %4667 }
 0x31c   : > { %v4674_v62 = vsel %vm20796_vm12, %v19165_v48, %v4668_v26 }
 0x31d   : > { %v4688_v24 = vsel %vm20795_vm6, %v4674_v62, 0 }
 0x31e   : > { %v19188_v35 = vand.u32 4294901760, %v4688_v24 }
 0x31f   : > { %v4670_v50 = vpop.permute.xlu1 %4669 }
 0x320   : > { %v4767_v25 = vsub.f32 %v4688_v24, %v19188_v35  ;;  %v4675_v43 = vsel %vm20796_vm12, %v19155_v49, %v4670_v50 }
 0x321   : > { %v4691_v6 = vsel %vm20795_vm6, %v4675_v43, 0 }
 0x322   : > { %v4768_v12 = vand.u32 4294901760, %v4767_v25  ;;  %v19194_v63 = vand.u32 4294901760, %v4691_v6 }
 0x324   : > { %v4769_v45 = vsub.f32 %v4767_v25, %v4768_v12  ;;  %v4777_v22 = vsub.f32 %v4691_v6, %v19194_v63 }
 0x326   : > { %v4770_v7 = vand.u32 4294901760, %v4769_v45  ;;  %v4778_v53 = vand.u32 4294901760, %v4777_v22 }
 0x328   : > { %14831 = vmatprep.mubr.f32.mxu0 %v4770_v7  ;;  %v4779_v36 = vsub.f32 %v4777_v22, %v4778_v53 }
 0x32a   : > { %v4780_v42 = vand.u32 4294901760, %v4779_v36 }
 0x359   : > { %v4679_v47 = vpop.permute.xlu0 %4678 }
 0x35a   : > { %v4684_v5 = vsel %vm20796_vm12, %v19161_v2, %v4679_v47  ;;  %v6334_v55 = vpop.permute.xlu1 %6333 }
 0x35b   : > { %v4694_v58 = vsel %vm20795_vm6, %v4684_v5, 0  ;;  %v6338_v26 = vsel %vm20796_vm12, %v6334_v55, %v19145_v3 }
 0x35c   : > { %v4700_v20 = vand.u32 4294901760, %v4694_v58 }
 0x35d   : > { %v4681_v40 = vpop.permute.xlu0 %4680 }
 0x35e   : > { %v4788_v10 = vsub.f32 %v4694_v58, %v4700_v20  ;;  %v4685_v32 = vsel %vm20796_vm12, %v19149_v9, %v4681_v40  ;;  %v6324_v43 = vpop.permute.xlu1 %6323 }
 0x35f   : > { %v4697_v37 = vsel %vm20795_vm6, %v4685_v32, 0  ;;  %v6328_v5 = vsel %vm20796_vm12, %v6324_v43, %v19137_v52 }
 0x360   : > { %v4789_v16 = vand.u32 4294901760, %v4788_v10  ;;  %v4703_v57 = vand.u32 4294901760, %v4697_v37 }
 0x361   : > { %v6332_v39 = vpop.permute.xlu0 %6331 }
 0x362   : > { %v16075_v34 = vpack.c.bf16 %v4703_v57, %v4700_v20  ;;  %v4795_v21 = vsub.f32 %v4697_v37, %v4703_v57  ;;  %v4790_v38 = vsub.f32 %v4788_v10, %v4789_v16  ;;  %v6337_v46 = vsel %vm20796_vm12, %v6332_v39, %v19147_v54 }
 0x363   : > { %v6346_v24 = vsel %vm20795_vm6, %v6337_v46, 0 }
 0x364   : > { %v4796_v15 = vand.u32 4294901760, %v4795_v21  ;;  %16076 = vmatprep.subr.bf16.mxu0 %v16075_v34  ;;  %v4791_v56 = vand.u32 4294901760, %v4790_v38  ;;  %v16083_v44 = vpack.c.bf16 %v4795_v21, %v4788_v10  ;;  %v6352_v7 = vand.u32 4294901760, %v6346_v24 }
 0x365   : > { %16078 = vmatpush3.bf16.xpose.msra.mxu0 %v16075_v34  ;;  %v6322_v23 = vpop.permute.xlu0 %6321 }
 0x366   : > { %v4797_v33 = vsub.f32 %v4795_v21, %v4796_v15  ;;  %v16091_v62 = vpack.c.bf16 %v4796_v15, %v4789_v16  ;;  %v6327_v45 = vsel %vm20796_vm12, %v6322_v23, %v19139_v28  ;;  %v6440_v58 = vsub.f32 %v6346_v24, %v6352_v7 }
 0x367   : > { %v6340_v50 = vsel %vm20795_vm6, %v6327_v45, 0 }
 0x368   : > { %v4798_v0 = vand.u32 4294901760, %v4797_v33  ;;  %v6418_v47 = vand.u32 4294901760, %v6340_v50 }
 0x36a   : > { %v16079_v19 = vpack.c.bf16 %v4798_v0, %v4791_v56  ;;  %v6419_v40 = vsub.f32 %v6340_v50, %v6418_v47 }
 0x36c   : > { %14832 = vmatmul.mubr.f32.vlgmr.msra.gmra.mrb[16].mxu0 %v4780_v42  ;;  %16080 = vmatprep.subr.bf16.mxu0 %v16079_v19  ;;  %v6420_v37 = vand.u32 4294901760, %v6419_v40 }
 0x36d   : > { %16082 = vmatpush3.bf16.xpose.msra.mxu0 %v16079_v19  ;;  %14838 = vmatprep.mubr.f32.mxu0 %v19188_v35 }
 0x36e   : > { %16084 = vmatprep.subr.bf16.mxu0 %v16083_v44  ;;  %v6421_v15 = vsub.f32 %v6419_v40, %v6420_v37 }
 0x370   : > { %v6422_v56 = vand.u32 4294901760, %v6421_v15 }
 0x374   : > { %14839 = vmatmul.mubr.f32.vlgmr.msra.gmra.mrb[16].mxu0 %v19194_v63 }
 0x375   : > { %16086 = vmatpush3.bf16.xpose.msra.mxu0 %v16083_v44  ;;  %14845 = vmatprep.mubr.f32.mxu0 %v4767_v25  ;;  %v6349_v25 = vsel %vm20795_vm6, %v6338_v26, 0  ;;  %v4664_v44 = vld [vmem:[%s20602_s12 + $0x8] sm:$0xff] }
 0x376   : > { %16088 = vmatprep.subr.bf16.mxu0 %v16075_v34  ;;  %v6355_v6 = vand.u32 4294901760, %v6349_v25  ;;  %v5211_v55 = vand.u32 4294901760, %v4664_v44 }
 0x378   : > { %v6447_v20 = vsub.f32 %v6349_v25, %v6355_v6  ;;  %v16219_v16 = vpack.c.bf16 %v6355_v6, %v6352_v7  ;;  %v5303_v26 = vsub.f32 %v4664_v44, %v5211_v55  ;;  %v21084_v44 = vld [vmem:[#allocation47_spill] sm:$0xff] }
 0x37a   : > { %v6448_v10 = vand.u32 4294901760, %v6447_v20  ;;  %v5304_v24 = vand.u32 4294901760, %v5303_v26 }
 0x37c   : > { %14846 = vmatmul.mubr.f32.vlgmr.msra.gmra.mrb[16].mxu0 %v4777_v22  ;;  %v6441_v22 = vand.u32 4294901760, %v6440_v58  ;;  %v6449_v21 = vsub.f32 %v6447_v20, %v6448_v10  ;;  %v5305_v25 = vsub.f32 %v5303_v26, %v5304_v24 }
 0x37d   : > { %16090 = vmatpush3.bf16.xpose.msra.mxu0 %v16075_v34  ;;  %14852 = vmatprep.mubr.f32.mxu0 %v4768_v12  ;;  %v6343_v12 = vsel %vm20795_vm6, %v6328_v5, 0  ;;  %vm21076_vm6 = vcmask 130048  }
 0x37e   : > { %16092 = vmatprep.subr.bf16.mxu0 %v16091_v62  ;;  %v6428_v32 = vand.u32 4294901760, %v6343_v12  ;;  %v6442_v57 = vsub.f32 %v6440_v58, %v6441_v22  ;;  %v6450_v33 = vand.u32 4294901760, %v6449_v21  ;;  %v5306_v50 = vand.u32 4294901760, %v5305_v25  ;;  %vm21077_vm12 = vmmov %vm21076_vm6 }
 0x380   : > { %v6443_v38 = vand.u32 4294901760, %v6442_v57 }
 0x382   : > { %v16223_v0 = vpack.c.bf16 %v6450_v33, %v6443_v38  ;;  %v21078_v38 = vld [vmem:[#allocation37_spill] sm:$0xff]  ;;  %v21080_v33 = vld [vmem:[#allocation32_spill] sm:$0xff] }
 0x384   : > { %14853 = vmatmul.mubr.f32.vlgmr.msra.gmra.mrb[16].mxu0 %v4778_v53  ;;  %v6429_v53 = vsub.f32 %v6343_v12, %v6428_v32 }
 0x385   : > { %16094 = vmatpush3.bf16.xpose.msra.mxu0 %v16091_v62  ;;  %14859 = vmatprep.mubr.f32.mxu0 %v19188_v35 }
 0x386   : > { %16096 = vmatprep.subr.bf16.mxu0 %v16075_v34  ;;  %v6430_v36 = vand.u32 4294901760, %v6429_v53 }
 0x388   : > { %v6431_v42 = vsub.f32 %v6429_v53, %v6430_v36 }
 0x38a   : > { %v6432_v19 = vand.u32 4294901760, %v6431_v42 }
 0x38c   : > { %14860 = vmatmul.mubr.f32.vlgmr.msra.gmra.mrb[16].mxu0 %v19194_v63 }
 0x38d   : > { %16098 = vmatpush3.bf16.xpose.msra.mxu0 %v16075_v34  ;;  %14866 = vmatprep.mubr.f32.mxu0 %v19188_v35  ;;  %v16227_v34 = vpack.c.bf16 %v6447_v20, %v6440_v58  ;;  %v16235_v35 = vpack.c.bf16 %v6448_v10, %v6441_v22 }
 0x38e   : > { %16220 = vmatprep.subr.bf16.mxu0 %v16219_v16 }
 0x394   : > { %14867 = vmatmul.mubr.f32.vlgmr.msra.gmra.mrb[16].mxu0 %v19194_v63  ;;  %v4663_v63 = vld [vmem:[%s20602_s12] sm:$0xff] }
 0x395   : > { %16222 = vmatpush3.bf16.xpose.msra.mxu0 %v16219_v16  ;;  %15029 = vmatprep.mubr.f32.mxu0 %v6422_v56  ;;  %v5208_v39 = vand.u32 4294901760, %v4663_v63  ;;  %v21081_v56 = vand.u32 4294901760, %v21080_v33 }
 0x396   : > { %16224 = vmatprep.subr.bf16.mxu0 %v16223_v0 }
 0x397   : > { %v19227_v46 = vpack.c.bf16 %v5211_v55, %v5208_v39  ;;  %v5296_v23 = vsub.f32 %v4663_v63, %v5208_v39  ;;  %v20798_v39 = vand.u32 4294901760, %v21084_v44 }
 0x399   : > { %16100 = vmatprep.subr.bf16.mxu1 %v19227_v46  ;;  %v5297_v62 = vand.u32 4294901760, %v5296_v23  ;;  %v19235_v6 = vpack.c.bf16 %v5303_v26, %v5296_v23 }
 0x39a   : > { %16102 = vmatpush3.bf16.msra.mxu1 %v19227_v46 }
 0x39b   : > { %v5298_v45 = vsub.f32 %v5296_v23, %v5297_v62 }
 0x39c   : > { %15030 = vmatmul.mubr.f32.vlgmr.msra.gmra.mrb[18].mxu0 %v6432_v19 }
 0x39d   : > { %16226 = vmatpush3.bf16.xpose.msra.mxu0 %v16223_v0  ;;  %15036 = vmatprep.mubr.f32.mxu0 %v6418_v47  ;;  %v5299_v7 = vand.u32 4294901760, %v5298_v45 }
 0x39e   : > { %16228 = vmatprep.subr.bf16.mxu0 %v16227_v34 }
 0x39f   : > { %v19233_v43 = vpack.c.bf16 %v5306_v50, %v5299_v7 }
 0x3a1   : > { %16104 = vmatprep.subr.bf16.mxu1 %v19233_v43 }
 0x3a4   : > { %15037 = vmatmul.mubr.f32.vlgmr.msra.gmra.mrb[18].mxu0 %v6428_v32 }
 0x3a5   : > { %16230 = vmatpush3.bf16.xpose.msra.mxu0 %v16227_v34  ;;  %15043 = vmatprep.mubr.f32.mxu0 %v6419_v40 }
 0x3a6   : > { %16232 = vmatprep.subr.bf16.mxu0 %v16219_v16 }
 0x3ac   : > { %15044 = vmatmul.mubr.f32.vlgmr.msra.gmra.mrb[18].mxu0 %v6429_v53 }
 0x3ad   : > { %16234 = vmatpush3.bf16.xpose.msra.mxu0 %v16219_v16  ;;  %15050 = vmatprep.mubr.f32.mxu0 %v6420_v37 }
 0x3ae   : > { %16236 = vmatprep.subr.bf16.mxu0 %v16235_v35 }
 0x3b4   : > { %15051 = vmatmul.mubr.f32.vlgmr.msra.gmra.mrb[18].mxu0 %v6430_v36  ;;  %v21079_v36 = vand.u32 4294901760, %v21078_v38 }
 0x3b5   : > { %16238 = vmatpush3.bf16.xpose.msra.mxu0 %v16235_v35  ;;  %15057 = vmatprep.mubr.f32.mxu0 %v6418_v47  ;;  %v21083_v35 = vld [vmem:[#allocation46_spill] sm:$0xff] }
 0x3b6   : > { %16240 = vmatprep.subr.bf16.mxu0 %v16219_v16  ;;  %v19255_v0 = vpack.c.bf16 %v21081_v56, %v21079_v36  ;;  %v20797_v63 = vand.u32 4294901760, %v21083_v35  ;;  %v21093_v36 = vld [vmem:[#allocation71_spill] sm:$0xff] }
 0x3b7   : > { %v21094_v56 = vand.u32 4294901760, %v21093_v36 }
 0x3b8   : > { %v19267_v25 = vpack.c.bf16 %v20797_v63, %v20798_v39 }
 0x3bc   : > { %15058 = vmatmul.mubr.f32.vlgmr.msra.gmra.mrb[18].mxu0 %v6428_v32 }
 0x3bd   : > { %16242 = vmatpush3.bf16.xpose.msra.mxu0 %v16219_v16  ;;  %15064 = vmatprep.mubr.f32.mxu0 %v6418_v47  ;;  %v19239_v47 = vpack.c.bf16 %v5304_v24, %v5297_v62 }
 0x3be   : > { %16244 = vmatprep.subr.bf16.mxu0 %v19227_v46 }
 0x3c4   : > { %15065 = vmatmul.mubr.f32.vlgmr.msra.gmra.mrb[18].mxu0 %v6428_v32 }
 0x3c5   : > { %16246 = vmatpush3.bf16.msra.mxu0 %v19227_v46 }
 0x3c6   : > { %16248 = vmatprep.subr.bf16.mxu0 %v19233_v43 }
 0x467   : > { %v14868_v5 = vpop.f32.mrb[16].mxu0 }
 0x468   : > { %v5205_v58 = vsel %vm21076_vm6, %v14868_v5, 0  ;;  %v5191_v20 = vpop.f32.mrb[17].mxu0 }
 0x469   : > { %v5284_v12 = vand.u32 4294901760, %v5205_v58  ;;  %v5202_v40 = vsel %vm21077_vm12, %v5191_v20, 0  ;;  %vm21082_vm12 = vmmov %vm21076_vm6 }
 0x46a   : > { %v5274_v22 = vand.u32 4294901760, %v5202_v40 }
 0x46b   : > { %v5285_v10 = vsub.f32 %v5205_v58, %v5284_v12  ;;  %v21085_v58 = vld [vmem:[#allocation61_spill] sm:$0xff] }
 0x46c   : > { %v5275_v32 = vsub.f32 %v5202_v40, %v5274_v22  ;;  %v21086_v20 = vand.u32 4294901760, %v21085_v58  ;;  %v21087_v40 = vld [vmem:[#allocation55_spill] sm:$0xff] }
 0x46d   : > { %v5286_v37 = vand.u32 4294901760, %v5285_v10 }
 0x46e   : > { %v5276_v16 = vand.u32 4294901760, %v5275_v32 }
 0x46f   : > { %v5287_v57 = vsub.f32 %v5285_v10, %v5286_v37 }
 0x470   : > { %v5277_v53 = vsub.f32 %v5275_v32, %v5276_v16 }
 0x471   : > { %v5288_v15 = vand.u32 4294901760, %v5287_v57 }
 0x472   : > { %v5278_v21 = vand.u32 4294901760, %v5277_v53 }
 0x474   : > { %14873 = vmatprep.mubr.f32.mxu1 %v5278_v21  ;;  %v21091_v21 = vld [vmem:[#allocation74_spill] sm:$0xff] }
 0x475   : > { %14874 = vmatmul.mubr.f32.vlgmr.msra.gmra.mrb[24].mxu1 %v5288_v15  ;;  %v21092_v15 = vand.u32 4294901760, %v21091_v21 }
 0x476   : > { %14880 = vmatprep.mubr.f32.mxu1 %v5274_v22  ;;  %16106 = vmatpush3.bf16.msra.mxu1 %v19233_v43 }
 0x477   : > { %16108 = vmatprep.subr.bf16.mxu1 %v19235_v6 }
 0x47d   : > { %14881 = vmatmul.mubr.f32.vlgmr.msra.gmra.mrb[24].mxu1 %v5284_v12 }
 0x47e   : > { %14887 = vmatprep.mubr.f32.mxu1 %v5275_v32  ;;  %16110 = vmatpush3.bf16.msra.mxu1 %v19235_v6 }
 0x47f   : > { %16112 = vmatprep.subr.bf16.mxu1 %v19227_v46 }
 0x485   : > { %14888 = vmatmul.mubr.f32.vlgmr.msra.gmra.mrb[24].mxu1 %v5285_v10 }
 0x486   : > { %14894 = vmatprep.mubr.f32.mxu1 %v5276_v16  ;;  %16114 = vmatpush3.bf16.msra.mxu1 %v19227_v46 }
 0x487   : > { %16116 = vmatprep.subr.bf16.mxu1 %v19239_v47 }
 0x48d   : > { %14895 = vmatmul.mubr.f32.vlgmr.msra.gmra.mrb[24].mxu1 %v5286_v37  ;;  %v21090_v37 = vand.u32 4294901760, %v18871_v4 }
 0x48e   : > { %14901 = vmatprep.mubr.f32.mxu1 %v5274_v22  ;;  %16118 = vmatpush3.bf16.msra.mxu1 %v19239_v47 }
 0x48f   : > { %16120 = vmatprep.subr.bf16.mxu1 %v19227_v46  ;;  %v5843_v16 = vsub.f32 %v18871_v4, %v21090_v37 }
 0x495   : > { %14902 = vmatmul.mubr.f32.vlgmr.msra.gmra.mrb[24].mxu1 %v5284_v12 }
 0x496   : > { %16122 = vmatpush3.bf16.msra.mxu1 %v19227_v46  ;;  %14908 = vmatprep.mubr.f32.mxu1 %v5274_v22  ;;  %v21088_v22 = vand.u32 4294901760, %v21087_v40 }
 0x497   : > { %16124 = vmatprep.subr.bf16.mxu1 %v19255_v0  ;;  %v15066_v42 = vpop.f32.mrb[18].mxu0 }
 0x498   : > { %v6857_v19 = vsel %vm21082_vm12, %v15066_v42, 0  ;;  %v6843_v34 = vpop.f32.mrb[19].mxu0  ;;  %v19275_v10 = vpack.c.bf16 %v21088_v22, %v21086_v20  ;;  %v19289_v42 = vpack.c.bf16 %v21094_v56, %v21092_v15  ;;  %vm21095_vm12 = vcmask 523264  }
 0x499   : > { %v6936_v55 = vand.u32 4294901760, %v6857_v19  ;;  %v6854_v23 = vsel %vm21076_vm6, %v6843_v34, 0  ;;  %vm21096_vm6 = vmmov %vm21095_vm12 }
 0x49a   : > { %v6926_v26 = vand.u32 4294901760, %v6854_v23 }
 0x49b   : > { %v6937_v62 = vsub.f32 %v6857_v19, %v6936_v55 }
 0x49c   : > { %v6927_v24 = vsub.f32 %v6854_v23, %v6926_v26 }
 0x49d   : > { %v6938_v45 = vand.u32 4294901760, %v6937_v62  ;;  %14909 = vmatmul.mubr.f32.vlgmr.msra.gmra.mrb[24].mxu1 %v5284_v12  ;;  %v21089_v12 = vand.u32 4294901760, %v18855_v1 }
 0x49e   : > { %v6928_v7 = vand.u32 4294901760, %v6927_v24  ;;  %16126 = vmatpush3.bf16.msra.mxu1 %v19255_v0 }
 0x49f   : > { %v6939_v50 = vsub.f32 %v6937_v62, %v6938_v45  ;;  %16128 = vmatprep.subr.bf16.mxu1 %v19267_v25  ;;  %v5836_v32 = vsub.f32 %v18855_v1, %v21089_v12  ;;  %v5844_v1 = vand.u32 4294901760, %v5843_v16 }
 0x4a0   : > { %v6929_v5 = vsub.f32 %v6927_v24, %v6928_v7 }
 0x4a1   : > { %v6940_v53 = vand.u32 4294901760, %v6939_v50  ;;  %v5837_v19 = vand.u32 4294901760, %v5836_v32 }
 0x4a2   : > { %16130 = vmatpush3.bf16.msra.mxu1 %v19267_v25  ;;  %v6930_v57 = vand.u32 4294901760, %v6929_v5 }
 0x4a3   : > { %16132 = vmatprep.subr.bf16.mxu1 %v19275_v10  ;;  %v19295_v4 = vpack.c.bf16 %v5844_v1, %v5837_v19 }
 0x4a4   : > { %15071 = vmatprep.mubr.f32.mxu0 %v6930_v57 }
 0x4a5   : > { %15072 = vmatmul.mubr.f32.vlgmr.msra.gmra.mrb[20].mxu0 %v6940_v53 }
 0x4a6   : > { %16134 = vmatpush3.bf16.msra.mxu1 %v19275_v10  ;;  %15078 = vmatprep.mubr.f32.mxu0 %v6926_v26 }
 0x4a7   : > { %16136 = vmatprep.subr.bf16.mxu1 %v19289_v42  ;;  %16250 = vmatpush3.bf16.msra.mxu0 %v19233_v43 }
 0x4a8   : > { %16252 = vmatprep.subr.bf16.mxu0 %v19235_v6 }
 0x4aa   : > { %16138 = vmatpush3.bf16.msra.mxu1 %v19289_v42 }
 0x4ab   : > { %16140 = vmatprep.subr.bf16.mxu1 %v19295_v4 }
 0x4ad   : > { %15079 = vmatmul.mubr.f32.vlgmr.msra.gmra.mrb[20].mxu0 %v6936_v55 }
 0x4ae   : > { %15085 = vmatprep.mubr.f32.mxu0 %v6927_v24  ;;  %16254 = vmatpush3.bf16.msra.mxu0 %v19235_v6 }
 0x4af   : > { %16256 = vmatprep.subr.bf16.mxu0 %v19227_v46 }
 0x4b5   : > { %15086 = vmatmul.mubr.f32.vlgmr.msra.gmra.mrb[20].mxu0 %v6937_v62 }
 0x4b6   : > { %15092 = vmatprep.mubr.f32.mxu0 %v6928_v7  ;;  %16258 = vmatpush3.bf16.msra.mxu0 %v19227_v46 }
 0x4b7   : > { %16260 = vmatprep.subr.bf16.mxu0 %v19239_v47 }
 0x4bd   : > { %15093 = vmatmul.mubr.f32.vlgmr.msra.gmra.mrb[20].mxu0 %v6938_v45 }
 0x4be   : > { %15099 = vmatprep.mubr.f32.mxu0 %v6926_v26  ;;  %16262 = vmatpush3.bf16.msra.mxu0 %v19239_v47 }
 0x4bf   : > { %16264 = vmatprep.subr.bf16.mxu0 %v19227_v46 }
 0x4c5   : > { %15100 = vmatmul.mubr.f32.vlgmr.msra.gmra.mrb[20].mxu0 %v6936_v55 }
 0x4c6   : > { %15106 = vmatprep.mubr.f32.mxu0 %v6926_v26  ;;  %16266 = vmatpush3.bf16.msra.mxu0 %v19227_v46 }
 0x4cd   : > { %15107 = vmatmul.mubr.f32.vlgmr.msra.gmra.mrb[20].mxu0 %v6936_v55 }
 0x570   : > { %v14910_v34 = vpop.f32.mrb[24].mxu1 }
 0x571   : > { %v5710_v23 = vmul.f32 0.17677669, %v14910_v34  ;;  %v5699_v24 = vpop.f32.mrb[25].mxu1 }
 0x572   : > { %v5709_v62 = vmul.f32 0.17677669, %v5699_v24 }
 0x573   : > { %v5714_v7 = vsel %vm21095_vm12, %v5710_v23, -inf  ;;  %vm21097_vm12 = vmmov %vm21096_vm6 }
 0x574   : > { %5715 = vmax.xlane.f32.xlu1 %v5714_v7  ;;  %v5711_v50 = vsel %vm21096_vm6, %v5709_v62, -inf }
 0x575   : > { %5712 = vmax.xlane.f32.xlu0 %v5711_v50 }
 0x585   : > { %7393 = vrot.lane.b32.xlu1 %v21078_v38, %s17190_s25 }
 0x589   : > { %7397 = vrot.lane.b32.xlu1 %v21084_v44, %s17190_s25 }
 0x58d   : > { %7399 = vrot.lane.b32.xlu1 %v21083_v35, %s17190_s25 }
 0x591   : > { %7403 = vrot.lane.b32.xlu1 %v21087_v40, %s17190_s25 }
 0x5a0   : > { %v15108_v55 = vpop.f32.mrb[20].mxu0 }
 0x5a1   : > { %v7351_v26 = vpop.f32.mrb[21].mxu0  ;;  %v7362_v5 = vmul.f32 0.17677669, %v15108_v55 }
 0x5a2   : > { %v7361_v45 = vmul.f32 0.17677669, %v7351_v26 }
 0x5a3   : > { %v7366_v22 = vsel %vm21096_vm6, %v7362_v5, -inf }
 0x5a4   : > { %v7363_v20 = vsel %vm21097_vm12, %v7361_v45, -inf  ;;  %vm21098_vm12 = vmmov %vm21096_vm6 }
 0x5a5   : > { %7364 = vmax.xlane.f32.xlu0 %v7363_v20 }
 0x5a9   : > { %7367 = vmax.xlane.f32.xlu0 %v7366_v22 }
 0x5bf   : > { %7395 = vrot.lane.b32.xlu0 %v21080_v33, %s17190_s25 }
 0x5c3   : > { %7401 = vrot.lane.b32.xlu0 %v21085_v58, %s17190_s25 }
 0x601   : > { %v5716_v12 = vpop.xlane.xlu1 %5715 }
 0x602   : > { %v5718_v32 = vsub.f32 %v5710_v23, %v5716_v12  ;;  %v5713_v37 = vpop.xlane.xlu0 %5712 }
 0x603   : > { %v5717_v16 = vsub.f32 %v5709_v62, %v5713_v37 }
 0x604   : > { %v5721_v57 = vmul.f32 1.442695, %v5718_v32 }
 0x605   : > { %v5719_v53 = vmul.f32 1.442695, %v5717_v16  ;;  %v7394_v15 = vpop.permute.xlu1 %7393 }
 0x606   : > { %17131 = vpow2.f32 %v5721_v57  ;;  %v7424_v56 = vand.u32 4294901760, %v7394_v15 }
 0x607   : > { %17133 = vpow2.f32 %v5719_v53 }
 0x608   : > { %v7518_v19 = vsub.f32 %v7394_v15, %v7424_v56 }
 0x609   : > { %v7398_v1 = vpop.permute.xlu1 %7397 }
 0x60a   : > { %v7430_v34 = vand.u32 4294901760, %v7398_v1  ;;  %v7519_v31 = vand.u32 4294901760, %v7518_v19 }
 0x60c   : > { %v7532_v24 = vsub.f32 %v7398_v1, %v7430_v34 }
 0x60d   : > { %v7400_v7 = vpop.permute.xlu1 %7399 }
 0x60e   : > { %v7533_v50 = vand.u32 4294901760, %v7532_v24  ;;  %v7433_v55 = vand.u32 4294901760, %v7400_v7 }
 0x610   : > { %v19322_v26 = vpop.eup %17131  ;;  %v7539_v20 = vsub.f32 %v7400_v7, %v7433_v55  ;;  %v7534_v62 = vsub.f32 %v7532_v24, %v7533_v50 }
 0x611   : > { %v19324_v22 = vpop.eup %17133  ;;  %v5726_v23 = vsel %vm21098_vm12, %v19322_v26, 0.0  ;;  %v7404_v63 = vpop.permute.xlu1 %7403  ;;  %vm21099_vm12 = vmmov %vm21096_vm6 }
 0x612   : > { %v7540_v12 = vand.u32 4294901760, %v7539_v20  ;;  %5727 = vadd.xlane.f32.xlu0 %v5726_v23  ;;  %v5723_v32 = vsel %vm21096_vm6, %v19324_v22, 0.0  ;;  %v19330_v37 = vpack.c.bf16 %v7539_v20, %v7532_v24  ;;  %v7535_v53 = vand.u32 4294901760, %v7534_v62 }
 0x613   : > { %5724 = vadd.xlane.f32.xlu1 %v5723_v32  ;;  %v7439_v59 = vand.u32 4294901760, %v7404_v63 }
 0x614   : > { %v7541_v16 = vsub.f32 %v7539_v20, %v7540_v12  ;;  %v19332_v57 = vpack.c.bf16 %v7540_v12, %v7533_v50  ;;  %v7520_v12 = vsub.f32 %v7518_v19, %v7519_v31 }
 0x615   : > { %v7553_v32 = vsub.f32 %v7404_v63, %v7439_v59 }
 0x616   : > { %v7542_v15 = vand.u32 4294901760, %v7541_v16 }
 0x617   : > { %v7554_v16 = vand.u32 4294901760, %v7553_v32 }
 0x618   : > { %v19334_v1 = vpack.c.bf16 %v7542_v15, %v7535_v53  ;;  %v19338_v15 = vpack.c.bf16 %v7433_v55, %v7430_v34  ;;  %v7521_v55 = vand.u32 4294901760, %v7520_v12 }
 0x632   : > { %v7365_v7 = vpop.xlane.xlu0 %7364 }
 0x633   : > { %v7369_v39 = vsub.f32 %v7361_v45, %v7365_v7 }
 0x635   : > { %v7371_v18 = vmul.f32 1.442695, %v7369_v39 }
 0x636   : > { %v7368_v60 = vpop.xlane.xlu0 %7367 }
 0x637   : > { %17135 = vpow2.f32 %v7371_v18  ;;  %v7370_v23 = vsub.f32 %v7362_v5, %v7368_v60 }
 0x639   : > { %v7373_v30 = vmul.f32 1.442695, %v7370_v23 }
 0x63a   : > { %v7396_v24 = vpop.permute.xlu0 %7395 }
 0x63b   : > { %17137 = vpow2.f32 %v7373_v30  ;;  %v7427_v20 = vand.u32 4294901760, %v7396_v24 }
 0x63d   : > { %v19336_v50 = vpack.c.bf16 %v7427_v20, %v7424_v56  ;;  %v7525_v62 = vsub.f32 %v7396_v24, %v7427_v20  ;;  %v7555_v56 = vsub.f32 %v7553_v32, %v7554_v16 }
 0x63e   : > { %v7402_v53 = vpop.permute.xlu0 %7401 }
 0x63f   : > { %v7526_v45 = vand.u32 4294901760, %v7525_v62  ;;  %v7436_v39 = vand.u32 4294901760, %v7402_v53  ;;  %16268 = vmatprep.subr.bf16.mxu0 %v19336_v50  ;;  %v19341_v18 = vpack.c.bf16 %v7525_v62, %v7518_v19 }
 0x640   : > { %16270 = vmatpush3.bf16.msra.mxu0 %v19336_v50 }
 0x641   : > { %v19344_v60 = vpop.eup %17135  ;;  %v7527_v30 = vsub.f32 %v7525_v62, %v7526_v45  ;;  %v7546_v63 = vsub.f32 %v7402_v53, %v7436_v39  ;;  %16272 = vmatprep.subr.bf16.mxu0 %v19338_v15  ;;  %v19347_v5 = vpack.c.bf16 %v7526_v45, %v7519_v31  ;;  %v19351_v7 = vpack.c.bf16 %v7439_v59, %v7436_v39 }
 0x642   : > { %v7375_v34 = vsel %vm21099_vm12, %v19344_v60, 0.0  ;;  %v7556_v45 = vand.u32 4294901760, %v7555_v56  ;;  %vm21102_vm12 = vmmov %vm21096_vm6 }
 0x643   : > { %v7547_v23 = vand.u32 4294901760, %v7546_v63  ;;  %7376 = vadd.xlane.f32.xlu1 %v7375_v34  ;;  %v7528_v19 = vand.u32 4294901760, %v7527_v30  ;;  %v19353_v24 = vpack.c.bf16 %v7553_v32, %v7546_v63 }
 0x644   : > { %16274 = vmatpush3.bf16.msra.mxu0 %v19338_v15 }
 0x645   : > { %v19356_v20 = vpop.eup %17137  ;;  %v7548_v62 = vsub.f32 %v7546_v63, %v7547_v23  ;;  %16276 = vmatprep.subr.bf16.mxu0 %v19351_v7  ;;  %v19359_v31 = vpack.c.bf16 %v7528_v19, %v7521_v55  ;;  %v19361_v53 = vpack.c.bf16 %v7554_v16, %v7547_v23 }
 0x646   : > { %v7378_v59 = vsel %vm21096_vm6, %v19356_v20, 0.0 }
 0x647   : > { %7379 = vadd.xlane.f32.xlu0 %v7378_v59  ;;  %v7549_v12 = vand.u32 4294901760, %v7548_v62 }
 0x648   : > { %16278 = vmatpush3.bf16.msra.mxu0 %v19351_v7 }
 0x649   : > { %v19366_v32 = vpack.c.bf16 %v7556_v45, %v7549_v12 }
 0x654   : > { %7407 = vrot.lane.b32.xlu1 %v21093_v36, %s17190_s25 }
 0x658   : > { %8019 = vrot.lane.b32.xlu1 %v19149_v9, %s17191_s30 }
 0x65c   : > { %8025 = vrot.lane.b32.xlu1 %v19145_v3, %s17190_s25 }
 0x65d   : > { %7405 = vrot.lane.b32.xlu0 %v21091_v21, %s17190_s25 }
 0x660   : > { %8009 = vrot.lane.b32.xlu1 %v19139_v28, %s17190_s25 }
 0x661   : > { %8017 = vrot.lane.b32.xlu0 %v19161_v2, %s17191_s30 }
 0x664   : > { %9703 = vrot.lane.b32.xlu1 %v19149_v9, %s17192_s16 }
 0x665   : > { %8023 = vrot.lane.b32.xlu0 %v19147_v54, %s17190_s25 }
 0x668   : > { %9709 = vrot.lane.b32.xlu1 %v19145_v3, %s17191_s30 }
 0x669   : > { %8003 = vrot.lane.b32.xlu0 %v19165_v48, %s17191_s30 }
 0x66c   : > { %8011 = vrot.lane.b32.xlu1 %v19137_v52, %s17190_s25 }
 0x66d   : > { %9701 = vrot.lane.b32.xlu0 %v19161_v2, %s17192_s16  ;;  %v21100_v2 = vand.u32 4294901760, %v21084_v44 }
 0x670   : > { %9693 = vrot.lane.b32.xlu1 %v19139_v28, %s17191_s30 }
 0x671   : > { %9707 = vrot.lane.b32.xlu0 %v19147_v54, %s17191_s30  ;;  %v19407_v54 = vsub.f32 %v21084_v44, %v21100_v2 }
 0x673   : > { %v5849_v34 = vand.u32 4294901760, %v19407_v54 }
 0x674   : > { %9695 = vrot.lane.b32.xlu1 %v19137_v52, %s17191_s30  ;;  %v21101_v52 = vand.u32 4294901760, %v21083_v35 }
 0x675   : > { %8005 = vrot.lane.b32.xlu0 %v19155_v49, %s17191_s30 }
 0x676   : > { %v19412_v16 = vsub.f32 %v21083_v35, %v21101_v52 }
 0x678   : > { %v5856_v55 = vand.u32 4294901760, %v19412_v16 }
 0x679   : > { %9687 = vrot.lane.b32.xlu0 %v19165_v48, %s17192_s16 }
 0x67a   : > { %v5857_v59 = vsub.f32 %v19412_v16, %v5856_v55 }
 0x67d   : > { %9689 = vrot.lane.b32.xlu0 %v19155_v49, %s17192_s16 }
 0x69f   : > { %v5728_v3 = vpop.xlane.xlu0 %5727 }
 0x6a0   : > { %17139 = vrcp.f32 %v5728_v3  ;;  %v5725_v9 = vpop.xlane.xlu1 %5724 }
 0x6a1   : > { %17141 = vrcp.f32 %v5725_v9 }
 0x6aa   : > { %v17140_v28 = vpop.eup %17139 }
 0x6ab   : > { %v17142_v39 = vpop.eup %17141  ;;  %v5732_v48 = vmul.f32 %v17140_v28, %v19322_v26  ;;  %v5858_v28 = vand.u32 4294901760, %v5857_v59 }
 0x6ac   : > { %v5730_v49 = vmul.f32 %v17142_v39, %v19324_v22  ;;  %v5850_v22 = vsub.f32 %v19407_v54, %v5849_v34 }
 0x6ad   : > { %v5737_v30 = vsel %vm21102_vm12, %v5732_v48, 0  ;;  %v21103_v48 = vld [vmem:[#allocation65_spill] sm:$0xff]  ;;  %vm21104_vm12 = vmmov %vm21096_vm6 }
 0x6ae   : > { %v5734_v63 = vsel %vm21096_vm6, %v5730_v49, 0  ;;  %v19418_v56 = vand.u32 4294901760, %v5737_v30  ;;  %v5851_v9 = vand.u32 4294901760, %v5850_v22  ;;  %v16159_v49 = vpack.c.bf16 %v19412_v16, %v19407_v54 }
 0x6af   : > { %v19422_v23 = vand.u32 4294901760, %v5734_v63 }
 0x6b0   : > { %v19425_v19 = vsub.f32 %v5737_v30, %v19418_v56  ;;  %v16143_v39 = vpack.c.bf16 %v5858_v28, %v5851_v9 }
 0x6b1   : > { %v5813_v62 = vsub.f32 %v5734_v63, %v19422_v23 }
 0x6b2   : > { %v5824_v26 = vand.u32 4294901760, %v19425_v19 }
 0x6b3   : > { %v5814_v12 = vand.u32 4294901760, %v5813_v62 }
 0x6b4   : > { %v5825_v45 = vsub.f32 %v19425_v19, %v5824_v26 }
 0x6b5   : > { %v5815_v3 = vsub.f32 %v5813_v62, %v5814_v12 }
 0x6b6   : > { %v5826_v52 = vand.u32 4294901760, %v5825_v45 }
 0x6b7   : > { %v5816_v2 = vand.u32 4294901760, %v5815_v3 }
 0x6b9   : > { %14927 = vmatprep.mubr.f32.mxu1 %v5816_v2 }
 0x6ba   : > { %14928 = vmatmul.mubr.f32.vlgmr.msra.gmra.mrb[26].mxu1 %v5826_v52 }
 0x6bb   : > { %16142 = vmatpush3.bf16.msra.mxu1 %v19295_v4  ;;  %14946 = vmatprep.mubr.f32.mxu1 %v19422_v23 }
 0x6bc   : > { %16144 = vmatprep.subr.bf16.mxu1 %v16143_v39 }
 0x6bf   : > { %16146 = vmatpush3.bf16.msra.mxu1 %v16143_v39 }
 0x6c0   : > { %16148 = vmatprep.subr.bf16.mxu1 %v18924_v8 }
 0x6c3   : > { %16150 = vmatpush3.bf16.msra.mxu1 %v18924_v8 }
 0x6c4   : > { %16152 = vmatprep.subr.bf16.mxu1 %v18948_v13 }
 0x6c7   : > { %16154 = vmatpush3.bf16.msra.mxu1 %v18948_v13 }
 0x6c8   : > { %16156 = vmatprep.subr.bf16.mxu1 %v21103_v48 }
 0x6ca   : > { %14947 = vmatmul.mubr.f32.vlgmr.msra.gmra.mrb[26].mxu1 %v19418_v56 }
 0x6cb   : > { %16158 = vmatpush3.bf16.msra.mxu1 %v21103_v48  ;;  %14965 = vmatprep.mubr.f32.mxu1 %v5813_v62 }
 0x6cc   : > { %16160 = vmatprep.subr.bf16.mxu1 %v16159_v49 }
 0x6cf   : > { %16162 = vmatpush3.bf16.msra.mxu1 %v16159_v49 }
 0x6d0   : > { %16164 = vmatprep.subr.bf16.mxu1 %v18918_v27  ;;  %v7377_v4 = vpop.xlane.xlu1 %7376 }
 0x6d1   : > { %17143 = vrcp.f32 %v7377_v4 }
 0x6d3   : > { %16166 = vmatpush3.bf16.msra.mxu1 %v18918_v27 }
 0x6d4   : > { %16168 = vmatprep.subr.bf16.mxu1 %v18920_v17  ;;  %v7380_v8 = vpop.xlane.xlu0 %7379  ;;  %v7408_v13 = vpop.permute.xlu1 %7407 }
 0x6d5   : > { %17145 = vrcp.f32 %v7380_v8  ;;  %v7445_v63 = vand.u32 4294901760, %v7408_v13 }
 0x6d7   : > { %16170 = vmatpush3.bf16.msra.mxu1 %v18920_v17 }
 0x6d8   : > { %16172 = vmatprep.subr.bf16.mxu1 %v19255_v0  ;;  %v7406_v30 = vpop.permute.xlu0 %7405 }
 0x6d9   : > { %v7442_v62 = vand.u32 4294901760, %v7406_v30 }
 0x6da   : > { %14966 = vmatmul.mubr.f32.vlgmr.msra.gmra.mrb[26].mxu1 %v19425_v19 }
 0x6db   : > { %v17144_v22 = vpop.eup %17143  ;;  %v19455_v59 = vpack.c.bf16 %v7445_v63, %v7442_v62  ;;  %16174 = vmatpush3.bf16.msra.mxu1 %v19255_v0  ;;  %14984 = vmatprep.mubr.f32.mxu1 %v5814_v12  ;;  %v19481_v49 = vsub.f32 %v7406_v30, %v7442_v62  ;;  %v16191_v30 = vpack.c.bf16 %v5856_v55, %v5849_v34 }
 0x6dc   : > { %v7382_v27 = vmul.f32 %v17144_v22, %v19344_v60  ;;  %16176 = vmatprep.subr.bf16.mxu1 %v19267_v25  ;;  %v8018_v3 = vpop.permute.xlu0 %8017  ;;  %v8020_v60 = vpop.permute.xlu1 %8019 }
 0x6dd   : > { %16280 = vmatprep.subr.bf16.mxu0 %v19455_v59 }
 0x6de   : > { %16282 = vmatpush3.bf16.msra.mxu0 %v19455_v59  ;;  %v7418_v17 = vsel %vm21104_vm12, %v7382_v27, 0  ;;  %v19487_v27 = vsub.f32 %v7408_v13, %v7445_v63  ;;  %vm21105_vm12 = vcmask 31744  }
 0x6df   : > { %v17146_v45 = vpop.eup %17145  ;;  %16178 = vmatpush3.bf16.msra.mxu1 %v19267_v25  ;;  %16284 = vmatprep.subr.bf16.mxu0 %v19359_v31  ;;  %v19465_v9 = vand.u32 4294901760, %v7418_v17 }
 0x6e0   : > { %v7384_v12 = vmul.f32 %v17146_v45, %v19356_v20  ;;  %16180 = vmatprep.subr.bf16.mxu1 %v19275_v10  ;;  %v8024_v48 = vpop.permute.xlu0 %8023  ;;  %v8026_v8 = vpop.permute.xlu1 %8025  ;;  %v7561_v45 = vand.u32 4294901760, %v19481_v49  ;;  %v7568_v62 = vand.u32 4294901760, %v19487_v27 }
 0x6e1   : > { %v19470_v28 = vsub.f32 %v7418_v17, %v19465_v9 }
 0x6e2   : > { %v7421_v2 = vsel %vm21096_vm6, %v7384_v12, 0  ;;  %v7562_v54 = vsub.f32 %v19481_v49, %v7561_v45  ;;  %v7569_v16 = vsub.f32 %v19487_v27, %v7568_v62  ;;  %vm21106_vm6 = vmmov %vm21105_vm12 }
 0x6e3   : > { %16182 = vmatpush3.bf16.msra.mxu1 %v19275_v10  ;;  %v7498_v52 = vand.u32 4294901760, %v19470_v28  ;;  %v19475_v39 = vand.u32 4294901760, %v7421_v2  ;;  %vm21108_vm11 = vmmov %vm21106_vm6 }
 0x6e4   : > { %16184 = vmatprep.subr.bf16.mxu1 %v19289_v42  ;;  %v8004_v63 = vpop.permute.xlu0 %8003  ;;  %v8010_v19 = vpop.permute.xlu1 %8009  ;;  %v7563_v34 = vand.u32 4294901760, %v7562_v54 }
 0x6e5   : > { %v7499_v20 = vsub.f32 %v19470_v28, %v7498_v52  ;;  %v19484_v4 = vsub.f32 %v7421_v2, %v19475_v39  ;;  %v8029_v2 = vsel %vm21106_vm6, %v8018_v3, %v8024_v48 }
 0x6e7   : > { %16186 = vmatpush3.bf16.msra.mxu1 %v19289_v42  ;;  %v7500_v22 = vand.u32 4294901760, %v7499_v20  ;;  %v7508_v17 = vand.u32 4294901760, %v19484_v4 }
 0x6e8   : > { %16188 = vmatprep.subr.bf16.mxu1 %v18930_v11  ;;  %v19516_v55 = vpop.permute.xlu1 %9703 }
 0x6e9   : > { %15125 = vmatprep.mubr.f32.mxu0 %v7500_v22  ;;  %v7509_v13 = vsub.f32 %v19484_v4, %v7508_v17 }
 0x6ea   : > { %14985 = vmatmul.mubr.f32.vlgmr.msra.gmra.mrb[26].mxu1 %v5824_v26  ;;  %v7570_v26 = vand.u32 4294901760, %v7569_v16 }
 0x6eb   : > { %16190 = vmatpush3.bf16.msra.mxu1 %v18930_v11  ;;  %15003 = vmatprep.mubr.f32.mxu1 %v19422_v23  ;;  %v7510_v12 = vand.u32 4294901760, %v7509_v13  ;;  %v19513_v11 = vpop.permute.xlu0 %9701 }
 0x6ec   : > { %16192 = vmatprep.subr.bf16.mxu1 %v16191_v30  ;;  %v16295_v20 = vpack.c.bf16 %v7570_v26, %v7563_v34  ;;  %v19532_v13 = vpop.permute.xlu1 %9709  ;;  %v16311_v34 = vpack.c.bf16 %v19487_v27, %v19481_v49 }
 0x6ed   : > { %15126 = vmatmul.mubr.f32.vlgmr.msra.gmra.mrb[22].mxu0 %v7510_v12 }
 0x6ee   : > { %16286 = vmatpush3.bf16.msra.mxu0 %v19359_v31  ;;  %15144 = vmatprep.mubr.f32.mxu0 %v19465_v9  ;;  %v8015_v31 = vsel %vm21105_vm12, %v8004_v63, %v8010_v19  ;;  %vm21109_vm12 = vmmov %vm21107_vm13 }
 0x6ef   : > { %16194 = vmatpush3.bf16.msra.mxu1 %v16191_v30  ;;  %16288 = vmatprep.subr.bf16.mxu0 %v19334_v1  ;;  %v8032_v22 = vsel %vm21107_vm13, %v8015_v31, 0  ;;  %v19525_v30 = vpop.permute.xlu0 %9707  ;;  %vm21110_vm13 = vmmov %vm21109_vm12 }
 0x6f0   : > { %16196 = vmatprep.subr.bf16.mxu1 %v18937_v29  ;;  %v19534_v63 = vand.u32 4294901760, %v8032_v22 }
 0x6f2   : > { %16290 = vmatpush3.bf16.msra.mxu0 %v19334_v1  ;;  %v8038_v1 = vsel %vm21109_vm12, %v8029_v2, 0  ;;  %v19543_v48 = vsub.f32 %v8032_v22, %v19534_v63 }
 0x6f3   : > { %16198 = vmatpush3.bf16.msra.mxu1 %v18937_v29  ;;  %16292 = vmatprep.subr.bf16.mxu0 %v19366_v32  ;;  %v8030_v29 = vsel %vm21108_vm11, %v8020_v60, %v8026_v8  ;;  %v8012_v8 = vpop.permute.xlu1 %8011  ;;  %vm21111_vm11 = vmmov %vm21106_vm6 }
 0x6f4   : > { %16200 = vmatprep.subr.bf16.mxu1 %v18939_v61  ;;  %v8041_v3 = vsel %vm21110_vm13, %v8030_v29, 0  ;;  %v8112_v19 = vand.u32 4294901760, %v19543_v48  ;;  %vm21112_vm6 = vmmov %vm21109_vm12 }
 0x6f5   : > { %v8047_v60 = vand.u32 4294901760, %v8041_v3  ;;  %vm21113_vm12 = vmmov %vm21111_vm11 }
 0x6f6   : > { %16294 = vmatpush3.bf16.msra.mxu0 %v19366_v32  ;;  %v8044_v32 = vand.u32 4294901760, %v8038_v1  ;;  %v8113_v31 = vsub.f32 %v19543_v48, %v8112_v19  ;;  %vm21114_vm13 = vmmov %vm21111_vm11 }
 0x6f7   : > { %16202 = vmatpush3.bf16.msra.mxu1 %v18939_v61  ;;  %16296 = vmatprep.subr.bf16.mxu0 %v16295_v20  ;;  %v8006_v61 = vpop.permute.xlu0 %8005  ;;  %v19554_v12 = vsub.f32 %v8041_v3, %v8047_v60 }
 0x6f8   : > { %16204 = vmatprep.subr.bf16.mxu1 %v19255_v0  ;;  %v8114_v2 = vand.u32 4294901760, %v8113_v31 }
 0x6fa   : > { %15004 = vmatmul.mubr.f32.vlgmr.msra.gmra.mrb[26].mxu1 %v19418_v56  ;;  %16298 = vmatpush3.bf16.msra.mxu0 %v16295_v20 }
 0x6fb   : > { %16206 = vmatpush3.bf16.msra.mxu1 %v19255_v0  ;;  %15022 = vmatprep.mubr.f32.mxu1 %v19422_v23  ;;  %v19548_v0 = vsub.f32 %v8038_v1, %v8044_v32  ;;  %v8016_v23 = vsel %vm21111_vm11, %v8006_v61, %v8012_v8  ;;  %vm21115_vm11 = vmmov %vm21112_vm6 }
 0x6fc   : > { %16300 = vmatprep.subr.bf16.mxu0 %v19341_v18  ;;  %16208 = vmatprep.subr.bf16.mxu1 %v19267_v25  ;;  %v8035_v54 = vsel %vm21112_vm6, %v8016_v23, 0  ;;  %vm21116_vm6 = vmmov %vm21113_vm12 }
 0x6fd   : > { %15145 = vmatmul.mubr.f32.vlgmr.msra.gmra.mrb[22].mxu0 %v19475_v39  ;;  %v19564_v16 = vand.u32 4294901760, %v8035_v54 }
 0x6fe   : > { %16302 = vmatpush3.bf16.msra.mxu0 %v19341_v18  ;;  %15163 = vmatprep.mubr.f32.mxu0 %v19470_v28  ;;  %v8133_v18 = vand.u32 4294901760, %v19548_v0  ;;  %v16371_v28 = vpack.c.bf16 %v19554_v12, %v19548_v0 }
 0x6ff   : > { %16210 = vmatpush3.bf16.msra.mxu1 %v19267_v25  ;;  %16304 = vmatprep.subr.bf16.mxu0 %v19330_v37  ;;  %v8140_v25 = vand.u32 4294901760, %v19554_v12  ;;  %v19578_v26 = vsub.f32 %v8035_v54, %v19564_v16 }
 0x700   : > { %16212 = vmatprep.subr.bf16.mxu1 %v19275_v10 }
 0x701   : > { %v8141_v20 = vsub.f32 %v19554_v12, %v8140_v25  ;;  %v16379_v3 = vpack.c.bf16 %v8140_v25, %v8133_v18 }
 0x702   : > { %16306 = vmatpush3.bf16.msra.mxu0 %v19330_v37  ;;  %v19571_v37 = vpack.c.bf16 %v8047_v60, %v8044_v32 }
 0x703   : > { %16214 = vmatpush3.bf16.msra.mxu1 %v19275_v10  ;;  %16308 = vmatprep.subr.bf16.mxu0 %v19353_v24  ;;  %v8134_v10 = vsub.f32 %v19548_v0, %v8133_v18  ;;  %v8142_v22 = vand.u32 4294901760, %v8141_v20 }
 0x704   : > { %16216 = vmatprep.subr.bf16.mxu1 %v19289_v42 }
 0x706   : > { %16310 = vmatpush3.bf16.msra.mxu0 %v19353_v24  ;;  %v8135_v24 = vand.u32 4294901760, %v8134_v10 }
 0x707   : > { %16218 = vmatpush3.bf16.msra.mxu1 %v19289_v42  ;;  %16312 = vmatprep.subr.bf16.mxu0 %v16311_v34  ;;  %v8122_v42 = vand.u32 4294901760, %v19578_v26 }
 0x708   : > { %16364 = vmatprep.subr.bf16.mxu1 %v19571_v37  ;;  %v16367_v29 = vpack.c.bf16 %v8142_v22, %v8135_v24 }
 0x70a   : > { %15023 = vmatmul.mubr.f32.vlgmr.msra.gmra.mrb[26].mxu1 %v19418_v56  ;;  %16314 = vmatpush3.bf16.msra.mxu0 %v16311_v34  ;;  %v8123_v56 = vsub.f32 %v19578_v26, %v8122_v42 }
 0x70b   : > { %16316 = vmatprep.subr.bf16.mxu0 %v19336_v50  ;;  %15227 = vmatprep.mubr.f32.mxu1 %v8114_v2 }
 0x70c   : > { %v8124_v1 = vand.u32 4294901760, %v8123_v56 }
 0x70d   : > { %15164 = vmatmul.mubr.f32.vlgmr.msra.gmra.mrb[22].mxu0 %v19484_v4  ;;  %v9694_v4 = vpop.permute.xlu1 %9693 }
 0x70e   : > { %16318 = vmatpush3.bf16.msra.mxu0 %v19336_v50  ;;  %15182 = vmatprep.mubr.f32.mxu0 %v7498_v52  ;;  %v9688_v52 = vpop.permute.xlu0 %9687 }
 0x70f   : > { %16320 = vmatprep.subr.bf16.mxu0 %v19338_v15 }
 0x710   : > { %16366 = vmatpush3.bf16.xpose.msra.mxu1 %v19571_v37 }
 0x711   : > { %16368 = vmatprep.subr.bf16.mxu1 %v16367_v29  ;;  %v9696_v32 = vpop.permute.xlu1 %9695 }
 0x712   : > { %16322 = vmatpush3.bf16.msra.mxu0 %v19338_v15 }
 0x713   : > { %16324 = vmatprep.subr.bf16.mxu0 %v19351_v7 }
 0x716   : > { %16326 = vmatpush3.bf16.msra.mxu0 %v19351_v7 }
 0x717   : > { %16328 = vmatprep.subr.bf16.mxu0 %v19455_v59  ;;  %15228 = vmatmul.mubr.f32.vlgmr.msra.gmra.mrb[28].mxu1 %v8124_v1 }
 0x718   : > { %16370 = vmatpush3.bf16.xpose.msra.mxu1 %v16367_v29  ;;  %15234 = vmatprep.mubr.f32.mxu1 %v19534_v63 }
 0x719   : > { %16372 = vmatprep.subr.bf16.mxu1 %v16371_v28 }
 0x71a   : > { %16330 = vmatpush3.bf16.msra.mxu0 %v19455_v59 }
 0x71b   : > { %16332 = vmatprep.subr.bf16.mxu0 %v19347_v5 }
 0x71d   : > { %15183 = vmatmul.mubr.f32.vlgmr.msra.gmra.mrb[22].mxu0 %v7508_v17  ;;  %v9699_v17 = vsel %vm21113_vm12, %v9688_v52, %v9694_v4  ;;  %vm21117_vm12 = vmmov %vm21115_vm11 }
 0x71e   : > { %16334 = vmatpush3.bf16.msra.mxu0 %v19347_v5  ;;  %15201 = vmatprep.mubr.f32.mxu0 %v19465_v9  ;;  %v16343_v5 = vpack.c.bf16 %v7568_v62, %v7561_v45  ;;  %v9716_v49 = vsel %vm21115_vm11, %v9699_v17, 0 }
 0x71f   : > { %16336 = vmatprep.subr.bf16.mxu0 %v19332_v57  ;;  %15235 = vmatmul.mubr.f32.vlgmr.msra.gmra.mrb[28].mxu1 %v19564_v16  ;;  %v19629_v45 = vand.u32 4294901760, %v9716_v49 }
 0x720   : > { %16374 = vmatpush3.bf16.xpose.msra.mxu1 %v16371_v28  ;;  %15241 = vmatprep.mubr.f32.mxu1 %v19543_v48 }
 0x721   : > { %16376 = vmatprep.subr.bf16.mxu1 %v19571_v37 }
 0x722   : > { %16338 = vmatpush3.bf16.msra.mxu0 %v19332_v57  ;;  %v9713_v57 = vsel %vm21114_vm13, %v19513_v11, %v19525_v30  ;;  %vm21118_vm13 = vmmov %vm21115_vm11  ;;  %v9690_v30 = vpop.permute.xlu0 %9689 }
 0x723   : > { %16340 = vmatprep.subr.bf16.mxu0 %v19361_v53  ;;  %v9722_v27 = vsel %vm21117_vm12, %v9713_v57, 0  ;;  %vm21119_vm11 = vmmov %vm21116_vm6 }
 0x724   : > { %v9728_v11 = vand.u32 4294901760, %v9722_v27  ;;  %v9700_v60 = vsel %vm21119_vm11, %v9690_v30, %v9696_v32 }
 0x726   : > { %16342 = vmatpush3.bf16.msra.mxu0 %v19361_v53  ;;  %v9714_v53 = vsel %vm21116_vm6, %v19516_v55, %v19532_v13  ;;  %v9795_v13 = vsub.f32 %v9716_v49, %v19629_v45  ;;  %v9816_v61 = vsub.f32 %v9722_v27, %v9728_v11  ;;  %vm21120_vm6 = vmmov %vm21117_vm12  ;;  %vm21121_vm12 = vcmask 130048  }
 0x727   : > { %16344 = vmatprep.subr.bf16.mxu0 %v16343_v5  ;;  %15242 = vmatmul.mubr.f32.vlgmr.msra.gmra.mrb[28].mxu1 %v19578_v26  ;;  %v9725_v62 = vsel %vm21118_vm13, %v9714_v53, 0  ;;  %v9719_v48 = vsel %vm21120_vm6, %v9700_v60, 0  ;;  %vm21122_vm13 = vmmov %vm21121_vm12 }
 0x728   : > { %16378 = vmatpush3.bf16.xpose.msra.mxu1 %v19571_v37  ;;  %15248 = vmatprep.mubr.f32.mxu1 %v8112_v19  ;;  %v9731_v55 = vand.u32 4294901760, %v9725_v62  ;;  %v9817_v8 = vand.u32 4294901760, %v9816_v61  ;;  %v9804_v23 = vand.u32 4294901760, %v9719_v48  ;;  %vm21123_vm11 = vmmov %vm21121_vm12 }
 0x729   : > { %16380 = vmatprep.subr.bf16.mxu1 %v16379_v3  ;;  %vm21124_vm6 = vmmov %vm21123_vm11 }
 0x72a   : > { %16346 = vmatpush3.bf16.msra.mxu0 %v16343_v5  ;;  %v16507_v12 = vpack.c.bf16 %v9731_v55, %v9728_v11  ;;  %v9818_v19 = vsub.f32 %v9816_v61, %v9817_v8  ;;  %v9805_v54 = vsub.f32 %v9719_v48, %v9804_v23 }
 0x72b   : > { %16348 = vmatprep.subr.bf16.mxu0 %v19336_v50 }
 0x72c   : > { %v9819_v25 = vand.u32 4294901760, %v9818_v19  ;;  %v9806_v34 = vand.u32 4294901760, %v9805_v54 }
 0x72d   : > { %15202 = vmatmul.mubr.f32.vlgmr.msra.gmra.mrb[22].mxu0 %v19475_v39 }
 0x72e   : > { %16350 = vmatpush3.bf16.msra.mxu0 %v19336_v50  ;;  %15220 = vmatprep.mubr.f32.mxu0 %v19465_v9  ;;  %v9823_v50 = vsub.f32 %v9725_v62, %v9731_v55  ;;  %v9796_v9 = vand.u32 4294901760, %v9795_v13 }
 0x72f   : > { %16352 = vmatprep.subr.bf16.mxu0 %v19338_v15  ;;  %15249 = vmatmul.mubr.f32.vlgmr.msra.gmra.mrb[28].mxu1 %v8122_v42 }
 0x730   : > { %16382 = vmatpush3.bf16.xpose.msra.mxu1 %v16379_v3  ;;  %15255 = vmatprep.mubr.f32.mxu1 %v19534_v63  ;;  %v9824_v0 = vand.u32 4294901760, %v9823_v50  ;;  %v16515_v10 = vpack.c.bf16 %v9823_v50, %v9816_v61 }
 0x731   : > { %16384 = vmatprep.subr.bf16.mxu1 %v19571_v37 }
 0x732   : > { %16354 = vmatpush3.bf16.msra.mxu0 %v19338_v15  ;;  %v9797_v15 = vsub.f32 %v9795_v13, %v9796_v9  ;;  %v9825_v18 = vsub.f32 %v9823_v50, %v9824_v0 }
 0x733   : > { %16356 = vmatprep.subr.bf16.mxu0 %v19351_v7 }
 0x734   : > { %v9826_v31 = vand.u32 4294901760, %v9825_v18 }
 0x736   : > { %16358 = vmatpush3.bf16.msra.mxu0 %v19351_v7  ;;  %v9798_v7 = vand.u32 4294901760, %v9797_v15 }
 0x737   : > { %16360 = vmatprep.subr.bf16.mxu0 %v19455_v59  ;;  %15256 = vmatmul.mubr.f32.vlgmr.msra.gmra.mrb[28].mxu1 %v19564_v16 }
 0x738   : > { %16386 = vmatpush3.bf16.xpose.msra.mxu1 %v19571_v37  ;;  %15262 = vmatprep.mubr.f32.mxu1 %v19534_v63  ;;  %v16511_v63 = vpack.c.bf16 %v9826_v31, %v9819_v25 }
 0x739   : > { %16388 = vmatprep.subr.bf16.mxu1 %v19227_v46 }
 0x73a   : > { %16362 = vmatpush3.bf16.msra.mxu0 %v19455_v59  ;;  %v9807_v59 = vsub.f32 %v9805_v54, %v9806_v34 }
 0x73b   : > { %16508 = vmatprep.subr.bf16.mxu0 %v16507_v12 }
 0x73c   : > { %v9808_v37 = vand.u32 4294901760, %v9807_v59 }
 0x73d   : > { %15221 = vmatmul.mubr.f32.vlgmr.msra.gmra.mrb[22].mxu0 %v19475_v39  ;;  %v16523_v39 = vpack.c.bf16 %v9824_v0, %v9817_v8 }
 0x73e   : > { %15425 = vmatprep.mubr.f32.mxu0 %v9798_v7 }
 0x73f   : > { %15263 = vmatmul.mubr.f32.vlgmr.msra.gmra.mrb[28].mxu1 %v19564_v16 }
 0x740   : > { %16390 = vmatpush3.bf16.msra.mxu1 %v19227_v46 }
 0x741   : > { %16392 = vmatprep.subr.bf16.mxu1 %v19233_v43 }
 0x743   : > { %16510 = vmatpush3.bf16.xpose.msra.mxu0 %v16507_v12 }
 0x744   : > { %16512 = vmatprep.subr.bf16.mxu0 %v16511_v63 }
 0x74a   : > { %15426 = vmatmul.mubr.f32.vlgmr.msra.gmra.mrb[24].mxu0 %v9808_v37 }
 0x74b   : > { %16514 = vmatpush3.bf16.xpose.msra.mxu0 %v16511_v63  ;;  %15432 = vmatprep.mubr.f32.mxu0 %v19629_v45 }
 0x74c   : > { %16516 = vmatprep.subr.bf16.mxu0 %v16515_v10 }
 0x752   : > { %15433 = vmatmul.mubr.f32.vlgmr.msra.gmra.mrb[24].mxu0 %v9804_v23 }
 0x753   : > { %16518 = vmatpush3.bf16.xpose.msra.mxu0 %v16515_v10  ;;  %15439 = vmatprep.mubr.f32.mxu0 %v9795_v13 }
 0x754   : > { %16520 = vmatprep.subr.bf16.mxu0 %v16507_v12 }
 0x75a   : > { %15440 = vmatmul.mubr.f32.vlgmr.msra.gmra.mrb[24].mxu0 %v9805_v54 }
 0x75b   : > { %16522 = vmatpush3.bf16.xpose.msra.mxu0 %v16507_v12  ;;  %15446 = vmatprep.mubr.f32.mxu0 %v9796_v9 }
 0x75c   : > { %16524 = vmatprep.subr.bf16.mxu0 %v16523_v39 }
 0x762   : > { %15447 = vmatmul.mubr.f32.vlgmr.msra.gmra.mrb[24].mxu0 %v9806_v34 }
 0x763   : > { %16526 = vmatpush3.bf16.xpose.msra.mxu0 %v16523_v39  ;;  %15453 = vmatprep.mubr.f32.mxu0 %v19629_v45 }
 0x764   : > { %16528 = vmatprep.subr.bf16.mxu0 %v16507_v12 }
 0x76a   : > { %15454 = vmatmul.mubr.f32.vlgmr.msra.gmra.mrb[24].mxu0 %v9804_v23 }
 0x76b   : > { %16530 = vmatpush3.bf16.xpose.msra.mxu0 %v16507_v12  ;;  %15460 = vmatprep.mubr.f32.mxu0 %v19629_v45 }
 0x76c   : > { %16532 = vmatprep.subr.bf16.mxu0 %v19227_v46 }
 0x772   : > { %15461 = vmatmul.mubr.f32.vlgmr.msra.gmra.mrb[24].mxu0 %v9804_v23 }
 0x773   : > { %16534 = vmatpush3.bf16.msra.mxu0 %v19227_v46 }
 0x774   : > { %16536 = vmatprep.subr.bf16.mxu0 %v19233_v43 }
 0x7dd   : > { %v19660_v16 = vpop.f32.mrb[26].mxu1 }
 0x7de   : > { %v19662_v26 = vpop.f32.mrb[27].mxu1 }
 0x810   : > { %v19664_v2 = vpop.f32.mrb[22].mxu0 }
 0x811   : > { %v19666_v20 = vpop.f32.mrb[23].mxu0 }
 0x812   : > { %v15264_v24 = vpop.f32.mrb[28].mxu1 }
 0x813   : > { %v8549_v42 = vsel %vm21121_vm12, %v15264_v24, 0  ;;  %v8535_v22 = vpop.f32.mrb[29].mxu1  ;;  %vm21125_vm12 = vcmask 523264  }
 0x814   : > { %v8628_v29 = vand.u32 4294901760, %v8549_v42  ;;  %v8546_v56 = vsel %vm21122_vm13, %v8535_v22, 0  ;;  %vm21126_vm13 = vmmov %vm21125_vm12 }
 0x815   : > { %v8618_v1 = vand.u32 4294901760, %v8546_v56 }
 0x816   : > { %v8629_v28 = vsub.f32 %v8549_v42, %v8628_v29 }
 0x817   : > { %v8619_v52 = vsub.f32 %v8546_v56, %v8618_v1 }
 0x818   : > { %v8630_v4 = vand.u32 4294901760, %v8629_v28 }
 0x819   : > { %v8620_v5 = vand.u32 4294901760, %v8619_v52 }
 0x81a   : > { %v8631_v17 = vsub.f32 %v8629_v28, %v8630_v4 }
 0x81b   : > { %v8621_v3 = vsub.f32 %v8619_v52, %v8620_v5 }
 0x81c   : > { %v8632_v49 = vand.u32 4294901760, %v8631_v17 }
 0x81d   : > { %v8622_v57 = vand.u32 4294901760, %v8621_v3 }
 0x81f   : > { %15269 = vmatprep.mubr.f32.mxu1 %v8622_v57 }
 0x820   : > { %15270 = vmatmul.mubr.f32.vlgmr.msra.gmra.mrb[30].mxu1 %v8632_v49 }
 0x821   : > { %15276 = vmatprep.mubr.f32.mxu1 %v8618_v1  ;;  %16394 = vmatpush3.bf16.msra.mxu1 %v19233_v43 }
 0x822   : > { %16396 = vmatprep.subr.bf16.mxu1 %v19235_v6 }
 0x828   : > { %15277 = vmatmul.mubr.f32.vlgmr.msra.gmra.mrb[30].mxu1 %v8628_v29 }
 0x829   : > { %15283 = vmatprep.mubr.f32.mxu1 %v8619_v52  ;;  %16398 = vmatpush3.bf16.msra.mxu1 %v19235_v6 }
 0x82a   : > { %16400 = vmatprep.subr.bf16.mxu1 %v19227_v46 }
 0x830   : > { %15284 = vmatmul.mubr.f32.vlgmr.msra.gmra.mrb[30].mxu1 %v8629_v28 }
 0x831   : > { %15290 = vmatprep.mubr.f32.mxu1 %v8620_v5  ;;  %16402 = vmatpush3.bf16.msra.mxu1 %v19227_v46 }
 0x832   : > { %16404 = vmatprep.subr.bf16.mxu1 %v19239_v47 }
 0x838   : > { %15291 = vmatmul.mubr.f32.vlgmr.msra.gmra.mrb[30].mxu1 %v8630_v4 }
 0x839   : > { %15297 = vmatprep.mubr.f32.mxu1 %v8618_v1  ;;  %16406 = vmatpush3.bf16.msra.mxu1 %v19239_v47 }
 0x83a   : > { %16408 = vmatprep.subr.bf16.mxu1 %v19227_v46 }
 0x840   : > { %15298 = vmatmul.mubr.f32.vlgmr.msra.gmra.mrb[30].mxu1 %v8628_v29 }
 0x841   : > { %15304 = vmatprep.mubr.f32.mxu1 %v8618_v1  ;;  %16410 = vmatpush3.bf16.msra.mxu1 %v19227_v46 }
 0x845   : > { %v15462_v53 = vpop.f32.mrb[24].mxu0 }
 0x846   : > { %v10233_v27 = vsel %vm21123_vm11, %v15462_v53, 0  ;;  %v10219_v45 = vpop.f32.mrb[25].mxu0  ;;  %vm21127_vm11 = vmmov %vm21125_vm12 }
 0x847   : > { %v10312_v62 = vand.u32 4294901760, %v10233_v27  ;;  %v10230_v11 = vsel %vm21124_vm6, %v10219_v45, 0  ;;  %vm21128_vm6 = vmmov %vm21127_vm11 }
 0x848   : > { %v10302_v30 = vand.u32 4294901760, %v10230_v11  ;;  %15305 = vmatmul.mubr.f32.vlgmr.msra.gmra.mrb[30].mxu1 %v8628_v29 }
 0x849   : > { %v10313_v55 = vsub.f32 %v10233_v27, %v10312_v62 }
 0x84a   : > { %v10303_v13 = vsub.f32 %v10230_v11, %v10302_v30 }
 0x84b   : > { %v10314_v32 = vand.u32 4294901760, %v10313_v55 }
 0x84c   : > { %v10304_v61 = vand.u32 4294901760, %v10303_v13 }
 0x84d   : > { %v10315_v60 = vsub.f32 %v10313_v55, %v10314_v32 }
 0x84e   : > { %v10305_v50 = vsub.f32 %v10303_v13, %v10304_v61 }
 0x84f   : > { %v10316_v48 = vand.u32 4294901760, %v10315_v60 }
 0x850   : > { %v10306_v9 = vand.u32 4294901760, %v10305_v50 }
 0x852   : > { %15467 = vmatprep.mubr.f32.mxu0 %v10306_v9 }
 0x853   : > { %15468 = vmatmul.mubr.f32.vlgmr.msra.gmra.mrb[26].mxu0 %v10316_v48 }
 0x854   : > { %15474 = vmatprep.mubr.f32.mxu0 %v10302_v30  ;;  %16538 = vmatpush3.bf16.msra.mxu0 %v19233_v43 }
 0x855   : > { %16540 = vmatprep.subr.bf16.mxu0 %v19235_v6 }
 0x85b   : > { %15475 = vmatmul.mubr.f32.vlgmr.msra.gmra.mrb[26].mxu0 %v10312_v62 }
 0x85c   : > { %15481 = vmatprep.mubr.f32.mxu0 %v10303_v13  ;;  %16542 = vmatpush3.bf16.msra.mxu0 %v19235_v6 }
 0x85d   : > { %16544 = vmatprep.subr.bf16.mxu0 %v19227_v46 }
 0x863   : > { %15482 = vmatmul.mubr.f32.vlgmr.msra.gmra.mrb[26].mxu0 %v10313_v55 }
 0x864   : > { %15488 = vmatprep.mubr.f32.mxu0 %v10304_v61  ;;  %16546 = vmatpush3.bf16.msra.mxu0 %v19227_v46 }
 0x865   : > { %16548 = vmatprep.subr.bf16.mxu0 %v19239_v47 }
 0x86b   : > { %15489 = vmatmul.mubr.f32.vlgmr.msra.gmra.mrb[26].mxu0 %v10314_v32 }
 0x86c   : > { %15495 = vmatprep.mubr.f32.mxu0 %v10302_v30  ;;  %16550 = vmatpush3.bf16.msra.mxu0 %v19239_v47 }
 0x86d   : > { %16552 = vmatprep.subr.bf16.mxu0 %v19227_v46 }
 0x873   : > { %15496 = vmatmul.mubr.f32.vlgmr.msra.gmra.mrb[26].mxu0 %v10312_v62 }
 0x874   : > { %15502 = vmatprep.mubr.f32.mxu0 %v10302_v30  ;;  %16554 = vmatpush3.bf16.msra.mxu0 %v19227_v46 }
 0x87b   : > { %15503 = vmatmul.mubr.f32.vlgmr.msra.gmra.mrb[26].mxu0 %v10312_v62 }
 0x91b   : > { %v15306_v43 = vpop.f32.mrb[30].mxu1 }
 0x91c   : > { %v9054_v6 = vmul.f32 0.17677669, %v15306_v43  ;;  %v9043_v8 = vpop.f32.mrb[31].mxu1 }
 0x91d   : > { %v9053_v0 = vmul.f32 0.17677669, %v9043_v8 }
 0x91e   : > { %v9058_v23 = vsel %vm21125_vm12, %v9054_v6, -inf  ;;  %vm21129_vm12 = vmmov %vm21128_vm6 }
 0x91f   : > { %9059 = vmax.xlane.f32.xlu1 %v9058_v23  ;;  %v9055_v15 = vsel %vm21126_vm13, %v9053_v0, -inf  ;;  %vm21130_vm13 = vmmov %vm21128_vm6 }
 0x920   : > { %9056 = vmax.xlane.f32.xlu0 %v9055_v15 }
 0x930   : > { %9077 = vrot.lane.b32.xlu1 %v21078_v38, %s17191_s30 }
 0x934   : > { %10761 = vrot.lane.b32.xlu1 %v21078_v38, %s17192_s16 }
 0x938   : > { %10763 = vrot.lane.b32.xlu1 %v21080_v33, %s17192_s16 }
 0x93c   : > { %9083 = vrot.lane.b32.xlu1 %v21083_v35, %s17191_s30 }
 0x940   : > { %10767 = vrot.lane.b32.xlu1 %v21083_v35, %s17192_s16 }
 0x944   : > { %9087 = vrot.lane.b32.xlu1 %v21087_v40, %s17191_s30 }
 0x948   : > { %10771 = vrot.lane.b32.xlu1 %v21087_v40, %s17192_s16 }
 0x94c   : > { %9091 = vrot.lane.b32.xlu1 %v21093_v36, %s17191_s30 }
 0x94e   : > { %v15504_v46 = vpop.f32.mrb[26].mxu0 }
 0x94f   : > { %v10727_v47 = vpop.f32.mrb[27].mxu0  ;;  %v19708_v12 = vmul.f32 0.17677669, %v15504_v46 }
 0x950   : > { %v10737_v38 = vmul.f32 0.17677669, %v10727_v47 }
 0x951   : > { %v10742_v35 = vsel %vm21128_vm6, %v19708_v12, -inf }
 0x952   : > { %v10739_v19 = vsel %vm21127_vm11, %v10737_v38, -inf  ;;  %vm21131_vm11 = vmmov %vm21128_vm6 }
 0x953   : > { %10740 = vmax.xlane.f32.xlu0 %v10739_v19 }
 0x957   : > { %10743 = vmax.xlane.f32.xlu0 %v10742_v35 }
 0x96d   : > { %9079 = vrot.lane.b32.xlu0 %v21080_v33, %s17191_s30 }
 0x971   : > { %9081 = vrot.lane.b32.xlu0 %v21084_v44, %s17191_s30 }
 0x975   : > { %10765 = vrot.lane.b32.xlu0 %v21084_v44, %s17192_s16 }
 0x979   : > { %9085 = vrot.lane.b32.xlu0 %v21085_v58, %s17191_s30 }
 0x97d   : > { %10769 = vrot.lane.b32.xlu0 %v21085_v58, %s17192_s16 }
 0x981   : > { %9089 = vrot.lane.b32.xlu0 %v21091_v21, %s17191_s30 }
 0x9ac   : > { %v9060_v40 = vpop.xlane.xlu1 %9059 }
 0x9ad   : > { %v9062_v54 = vsub.f32 %v9054_v6, %v9060_v40  ;;  %v9057_v7 = vpop.xlane.xlu0 %9056 }
 0x9ae   : > { %v9061_v18 = vsub.f32 %v9053_v0, %v9057_v7 }
 0x9af   : > { %v9065_v33 = vmul.f32 1.442695, %v9062_v54 }
 0x9b0   : > { %v9063_v25 = vmul.f32 1.442695, %v9061_v18  ;;  %v9078_v34 = vpop.permute.xlu1 %9077 }
 0x9b1   : > { %17147 = vpow2.f32 %v9065_v33  ;;  %v9108_v43 = vand.u32 4294901760, %v9078_v34 }
 0x9b2   : > { %17149 = vpow2.f32 %v9063_v25 }
 0x9b3   : > { %v9202_v23 = vsub.f32 %v9078_v34, %v9108_v43 }
 0x9b4   : > { %v10762_v31 = vpop.permute.xlu1 %10761 }
 0x9b5   : > { %v10792_v44 = vand.u32 4294901760, %v10762_v31  ;;  %v9203_v40 = vand.u32 4294901760, %v9202_v23 }
 0x9b7   : > { %v10886_v63 = vsub.f32 %v10762_v31, %v10792_v44 }
 0x9b8   : > { %v10764_v59 = vpop.permute.xlu1 %10763 }
 0x9b9   : > { %v10887_v37 = vand.u32 4294901760, %v10886_v63  ;;  %v10795_v10 = vand.u32 4294901760, %v10764_v59 }
 0x9bb   : > { %v19725_v39 = vpop.eup %17147  ;;  %v19727_v58 = vpack.c.bf16 %v10795_v10, %v10792_v44  ;;  %v10893_v24 = vsub.f32 %v10764_v59, %v10795_v10  ;;  %v10888_v56 = vsub.f32 %v10886_v63, %v10887_v37 }
 0x9bc   : > { %v19729_v42 = vpop.eup %17149  ;;  %v9084_v22 = vpop.permute.xlu1 %9083  ;;  %v9070_v29 = vsel %vm21129_vm12, %v19725_v39, 0.0  ;;  %vm21132_vm12 = vmmov %vm21128_vm6 }
 0x9bd   : > { %v10894_v1 = vand.u32 4294901760, %v10893_v24  ;;  %v9117_v28 = vand.u32 4294901760, %v9084_v22  ;;  %16556 = vmatprep.subr.bf16.mxu0 %v19727_v58  ;;  %9071 = vadd.xlane.f32.xlu0 %v9070_v29  ;;  %v9067_v52 = vsel %vm21130_vm13, %v19729_v42, 0.0  ;;  %v19737_v4 = vpack.c.bf16 %v10893_v24, %v10886_v63  ;;  %vm21133_vm13 = vmmov %vm21128_vm6 }
 0x9be   : > { %16558 = vmatpush3.bf16.msra.mxu0 %v19727_v58  ;;  %9068 = vadd.xlane.f32.xlu1 %v9067_v52  ;;  %v10889_v53 = vand.u32 4294901760, %v10888_v56 }
 0x9bf   : > { %v10895_v5 = vsub.f32 %v10893_v24, %v10894_v1  ;;  %v9223_v17 = vsub.f32 %v9084_v22, %v9117_v28  ;;  %v19739_v3 = vpack.c.bf16 %v10894_v1, %v10887_v37 }
 0x9c0   : > { %v10768_v57 = vpop.permute.xlu1 %10767 }
 0x9c1   : > { %v10801_v49 = vand.u32 4294901760, %v10768_v57  ;;  %v10896_v27 = vand.u32 4294901760, %v10895_v5  ;;  %v9224_v19 = vand.u32 4294901760, %v9223_v17 }
 0x9c3   : > { %v19741_v45 = vsub.f32 %v10768_v57, %v10801_v49  ;;  %v19743_v62 = vpack.c.bf16 %v10896_v27, %v10889_v53  ;;  %v9225_v34 = vsub.f32 %v9223_v17, %v9224_v19 }
 0x9c4   : > { %v19745_v11 = vpop.permute.xlu1 %9087 }
 0x9c5   : > { %v9123_v30 = vand.u32 4294901760, %v19745_v11  ;;  %v10908_v24 = vand.u32 4294901760, %v19741_v45 }
 0x9c7   : > { %v19749_v55 = vsub.f32 %v19745_v11, %v9123_v30 }
 0x9c8   : > { %v19751_v13 = vpop.permute.xlu1 %10771 }
 0x9c9   : > { %v10807_v32 = vand.u32 4294901760, %v19751_v13  ;;  %v9238_v22 = vand.u32 4294901760, %v19749_v55 }
 0x9cb   : > { %v19757_v61 = vsub.f32 %v19751_v13, %v10807_v32 }
 0x9cc   : > { %v19774_v63 = vpop.permute.xlu1 %9091 }
 0x9cd   : > { %v9129_v52 = vand.u32 4294901760, %v19774_v63 }
 0x9e0   : > { %v10741_v60 = vpop.xlane.xlu0 %10740 }
 0x9e1   : > { %v10745_v50 = vsub.f32 %v10737_v38, %v10741_v60 }
 0x9e3   : > { %v10747_v9 = vmul.f32 1.442695, %v10745_v50 }
 0x9e4   : > { %v10744_v48 = vpop.xlane.xlu0 %10743 }
 0x9e5   : > { %17151 = vpow2.f32 %v10747_v9  ;;  %v10746_v6 = vsub.f32 %v19708_v12, %v10744_v48  ;;  %v9239_v9 = vsub.f32 %v19749_v55, %v9238_v22 }
 0x9e7   : > { %v10749_v8 = vmul.f32 1.442695, %v10746_v6 }
 0x9e8   : > { %v9080_v0 = vpop.permute.xlu0 %9079 }
 0x9e9   : > { %17153 = vpow2.f32 %v10749_v8  ;;  %v9111_v15 = vand.u32 4294901760, %v9080_v0 }
 0x9eb   : > { %v19760_v46 = vpack.c.bf16 %v9111_v15, %v9108_v43  ;;  %v9209_v47 = vsub.f32 %v9080_v0, %v9111_v15  ;;  %v10922_v0 = vand.u32 4294901760, %v19757_v61  ;;  %v9251_v15 = vsub.f32 %v19774_v63, %v9129_v52 }
 0x9ec   : > { %v9082_v35 = vpop.permute.xlu0 %9081 }
 0x9ed   : > { %v9210_v54 = vand.u32 4294901760, %v9209_v47  ;;  %v9114_v7 = vand.u32 4294901760, %v9082_v35  ;;  %16412 = vmatprep.subr.bf16.mxu1 %v19760_v46  ;;  %v19763_v38 = vpack.c.bf16 %v9209_v47, %v9202_v23 }
 0x9ee   : > { %16414 = vmatpush3.bf16.msra.mxu1 %v19760_v46 }
 0x9ef   : > { %v19766_v12 = vpop.eup %17151  ;;  %v19768_v18 = vpack.c.bf16 %v9117_v28, %v9114_v7  ;;  %v9216_v33 = vsub.f32 %v9082_v35, %v9114_v7  ;;  %v19770_v25 = vpack.c.bf16 %v9210_v54, %v9203_v40 }
 0x9f0   : > { %v10766_v31 = vpop.permute.xlu0 %10765  ;;  %v10751_v44 = vsel %vm21131_vm11, %v19766_v12, 0.0  ;;  %vm21134_vm11 = vmmov %vm21128_vm6 }
 0x9f1   : > { %v9217_v59 = vand.u32 4294901760, %v9216_v33  ;;  %v10798_v37 = vand.u32 4294901760, %v10766_v31  ;;  %10752 = vadd.xlane.f32.xlu1 %v10751_v44  ;;  %16416 = vmatprep.subr.bf16.mxu1 %v19768_v18  ;;  %v19777_v10 = vpack.c.bf16 %v9223_v17, %v9216_v33  ;;  %v9226_v17 = vand.u32 4294901760, %v9225_v34 }
 0x9f2   : > { %16418 = vmatpush3.bf16.msra.mxu1 %v19768_v18  ;;  %v9240_v44 = vand.u32 4294901760, %v9239_v9 }
 0x9f3   : > { %v19782_v29 = vpop.eup %17153  ;;  %v9218_v56 = vsub.f32 %v9216_v33, %v9217_v59  ;;  %v19784_v1 = vpack.c.bf16 %v10801_v49, %v10798_v37  ;;  %v10900_v28 = vsub.f32 %v10766_v31, %v10798_v37  ;;  %v19789_v53 = vpack.c.bf16 %v9224_v19, %v9217_v59 }
 0x9f4   : > { %v9086_v5 = vpop.permute.xlu0 %9085  ;;  %v10754_v57 = vsel %vm21128_vm6, %v19782_v29, 0.0  ;;  %v10909_v49 = vsub.f32 %v19741_v45, %v10908_v24  ;;  %v9211_v19 = vsub.f32 %v9209_v47, %v9210_v54  ;;  %v9204_v31 = vsub.f32 %v9202_v23, %v9203_v40 }
 0x9f5   : > { %v10901_v27 = vand.u32 4294901760, %v10900_v28  ;;  %v9120_v11 = vand.u32 4294901760, %v9086_v5  ;;  %10755 = vadd.xlane.f32.xlu0 %v10754_v57  ;;  %16560 = vmatprep.subr.bf16.mxu0 %v19784_v1  ;;  %v9219_v60 = vand.u32 4294901760, %v9218_v56  ;;  %v19793_v50 = vpack.c.bf16 %v19741_v45, %v10900_v28 }
 0x9f6   : > { %16562 = vmatpush3.bf16.msra.mxu0 %v19784_v1  ;;  %v10910_v59 = vand.u32 4294901760, %v10909_v49  ;;  %v9252_v56 = vand.u32 4294901760, %v9251_v15  ;;  %v9205_v13 = vand.u32 4294901760, %v9204_v31 }
 0x9f7   : > { %v10902_v48 = vsub.f32 %v10900_v28, %v10901_v27  ;;  %v19798_v43 = vpack.c.bf16 %v9123_v30, %v9120_v11  ;;  %v9230_v6 = vsub.f32 %v9086_v5, %v9120_v11  ;;  %v19800_v8 = vpack.c.bf16 %v9226_v17, %v9219_v60 }
 0x9f8   : > { %v10770_v35 = vpop.permute.xlu0 %10769  ;;  %v19804_v7 = vpack.c.bf16 %v10908_v24, %v10901_v27  ;;  %v10923_v24 = vsub.f32 %v19757_v61, %v10922_v0  ;;  %v9253_v60 = vsub.f32 %v9251_v15, %v9252_v56 }
 0x9f9   : > { %v9231_v33 = vand.u32 4294901760, %v9230_v6  ;;  %v10804_v45 = vand.u32 4294901760, %v10770_v35  ;;  %16420 = vmatprep.subr.bf16.mxu1 %v19798_v43  ;;  %v19808_v34 = vpack.c.bf16 %v19749_v55, %v9230_v6  ;;  %v10903_v30 = vand.u32 4294901760, %v10902_v48 }
 0x9fa   : > { %16422 = vmatpush3.bf16.msra.mxu1 %v19798_v43  ;;  %v9212_v55 = vand.u32 4294901760, %v9211_v19  ;;  %v10924_v49 = vand.u32 4294901760, %v10923_v24 }
 0x9fb   : > { %v9232_v37 = vsub.f32 %v9230_v6, %v9231_v33  ;;  %v19813_v47 = vpack.c.bf16 %v10807_v32, %v10804_v45  ;;  %v10914_v54 = vsub.f32 %v10770_v35, %v10804_v45  ;;  %v19815_v63 = vpack.c.bf16 %v9238_v22, %v9231_v33 }
 0x9fc   : > { %v9090_v28 = vpop.permute.xlu0 %9089  ;;  %v19818_v5 = vpack.c.bf16 %v10910_v59, %v10903_v30  ;;  %v16427_v6 = vpack.c.bf16 %v9212_v55, %v9205_v13 }
 0x9fd   : > { %v10915_v23 = vand.u32 4294901760, %v10914_v54  ;;  %v9126_v40 = vand.u32 4294901760, %v9090_v28  ;;  %16564 = vmatprep.subr.bf16.mxu0 %v19813_v47  ;;  %v9233_v57 = vand.u32 4294901760, %v9232_v37  ;;  %v19822_v17 = vpack.c.bf16 %v19757_v61, %v10914_v54 }
 0x9fe   : > { %16566 = vmatpush3.bf16.msra.mxu0 %v19813_v47 }
 0x9ff   : > { %v10916_v32 = vsub.f32 %v10914_v54, %v10915_v23  ;;  %v19825_v22 = vpack.c.bf16 %v9129_v52, %v9126_v40  ;;  %v9244_v27 = vsub.f32 %v9090_v28, %v9126_v40  ;;  %v16435_v11 = vpack.c.bf16 %v9240_v44, %v9233_v57 }
 0xa00   : > { %v19827_v9 = vpack.c.bf16 %v10922_v0, %v10915_v23  ;;  %v9254_v0 = vand.u32 4294901760, %v9253_v60 }
 0xa01   : > { %v9245_v48 = vand.u32 4294901760, %v9244_v27  ;;  %16424 = vmatprep.subr.bf16.mxu1 %v19825_v22  ;;  %v16455_v19 = vpack.c.bf16 %v9251_v15, %v9244_v27  ;;  %v10917_v35 = vand.u32 4294901760, %v10916_v32 }
 0xa02   : > { %10775 = vrot.lane.b32.xlu1 %v21093_v36, %s17192_s16  ;;  %16426 = vmatpush3.bf16.msra.mxu1 %v19825_v22 }
 0xa03   : > { %v9246_v61 = vsub.f32 %v9244_v27, %v9245_v48  ;;  %16428 = vmatprep.subr.bf16.mxu1 %v16427_v6  ;;  %v19833_v52 = vpack.c.bf16 %v9252_v56, %v9245_v48  ;;  %v19835_v33 = vpack.c.bf16 %v10924_v49, %v10917_v35 }
 0xa05   : > { %v9247_v45 = vand.u32 4294901760, %v9246_v61 }
 0xa06   : > { %11375 = vrot.lane.b32.xlu1 %v19664_v2, %s17189_s23 }
 0xa07   : > { %v16439_v30 = vpack.c.bf16 %v9254_v0, %v9247_v45 }
 0xa0b   : > { %10773 = vrot.lane.b32.xlu0 %v21091_v21, %s17192_s16 }
 0xa0f   : > { %11373 = vrot.lane.b32.xlu0 %v19666_v20, %s17189_s23 }
 0xa4a   : > { %v9072_v36 = vpop.xlane.xlu0 %9071 }
 0xa4b   : > { %17155 = vrcp.f32 %v9072_v36  ;;  %v9069_v15 = vpop.xlane.xlu1 %9068 }
 0xa4c   : > { %17157 = vrcp.f32 %v9069_v15 }
 0xa55   : > { %v17156_v31 = vpop.eup %17155 }
 0xa56   : > { %v17158_v44 = vpop.eup %17157  ;;  %v9076_v59 = vmul.f32 %v17156_v31, %v19725_v39 }
 0xa57   : > { %v9074_v37 = vmul.f32 %v17158_v44, %v19729_v42 }
 0xa58   : > { %v9105_v54 = vsel %vm21132_vm12, %v9076_v59, 0  ;;  %vm21135_vm12 = vcmask 130048  }
 0xa59   : > { %v9102_v2 = vsel %vm21133_vm13, %v9074_v37, 0  ;;  %v19847_v24 = vand.u32 4294901760, %v9105_v54  ;;  %vm21136_vm13 = vmmov %vm21135_vm12 }
 0xa5a   : > { %v19849_v21 = vand.u32 4294901760, %v9102_v2 }
 0xa5b   : > { %v19852_v20 = vsub.f32 %v9105_v54, %v19847_v24 }
 0xa5c   : > { %v9181_v56 = vsub.f32 %v9102_v2, %v19849_v21 }
 0xa5d   : > { %v9192_v28 = vand.u32 4294901760, %v19852_v20 }
 0xa5e   : > { %v9182_v55 = vand.u32 4294901760, %v9181_v56 }
 0xa5f   : > { %v9193_v39 = vsub.f32 %v19852_v20, %v9192_v28 }
 0xa60   : > { %v9183_v42 = vsub.f32 %v9181_v56, %v9182_v55 }
 0xa61   : > { %v9194_v40 = vand.u32 4294901760, %v9193_v39 }
 0xa62   : > { %v9184_v23 = vand.u32 4294901760, %v9183_v42 }
 0xa64   : > { %15323 = vmatprep.mubr.f32.mxu1 %v9184_v23  ;;  %v11407_v23 = vld [vmem:[%s20603_s13 + $0x28] sm:$0xff] }
 0xa65   : > { %15324 = vmatmul.mubr.f32.vlgmr.msra.gmra.mrb[32].mxu1 %v9194_v40 }
 0xa66   : > { %16430 = vmatpush3.bf16.msra.mxu1 %v16427_v6  ;;  %15342 = vmatprep.mubr.f32.mxu1 %v19849_v21 }
 0xa67   : > { %16432 = vmatprep.subr.bf16.mxu1 %v19800_v8 }
 0xa6a   : > { %16434 = vmatpush3.bf16.msra.mxu1 %v19800_v8 }
 0xa6b   : > { %16436 = vmatprep.subr.bf16.mxu1 %v16435_v11 }
 0xa6e   : > { %16438 = vmatpush3.bf16.msra.mxu1 %v16435_v11 }
 0xa6f   : > { %16440 = vmatprep.subr.bf16.mxu1 %v16439_v30 }
 0xa72   : > { %16442 = vmatpush3.bf16.msra.mxu1 %v16439_v30 }
 0xa73   : > { %16444 = vmatprep.subr.bf16.mxu1 %v19763_v38 }
 0xa75   : > { %15343 = vmatmul.mubr.f32.vlgmr.msra.gmra.mrb[32].mxu1 %v19847_v24 }
 0xa76   : > { %16446 = vmatpush3.bf16.msra.mxu1 %v19763_v38  ;;  %15361 = vmatprep.mubr.f32.mxu1 %v9181_v56 }
 0xa77   : > { %16448 = vmatprep.subr.bf16.mxu1 %v19777_v10 }
 0xa7a   : > { %16450 = vmatpush3.bf16.msra.mxu1 %v19777_v10 }
 0xa7b   : > { %16452 = vmatprep.subr.bf16.mxu1 %v19808_v34 }
 0xa7e   : > { %16454 = vmatpush3.bf16.msra.mxu1 %v19808_v34  ;;  %v10753_v8 = vpop.xlane.xlu1 %10752 }
 0xa7f   : > { %17159 = vrcp.f32 %v10753_v8  ;;  %16456 = vmatprep.subr.bf16.mxu1 %v16455_v19 }
 0xa82   : > { %16458 = vmatpush3.bf16.msra.mxu1 %v16455_v19  ;;  %v10756_v57 = vpop.xlane.xlu0 %10755  ;;  %v10776_v13 = vpop.permute.xlu1 %10775 }
 0xa83   : > { %16460 = vmatprep.subr.bf16.mxu1 %v19760_v46  ;;  %17161 = vrcp.f32 %v10756_v57  ;;  %v10813_v10 = vand.u32 4294901760, %v10776_v13  ;;  %v11408_v57 = vld [vmem:[%s20603_s13 + $0x30] sm:$0xff] }
 0xa85   : > { %15362 = vmatmul.mubr.f32.vlgmr.msra.gmra.mrb[32].mxu1 %v19852_v20  ;;  %v19902_v30 = vsub.f32 %v10776_v13, %v10813_v10  ;;  %v11406_v20 = vld [vmem:[%s20603_s13 + $0x20] sm:$0xff] }
 0xa86   : > { %16462 = vmatpush3.bf16.msra.mxu1 %v19760_v46  ;;  %15380 = vmatprep.mubr.f32.mxu1 %v9182_v55  ;;  %v10774_v38 = vpop.permute.xlu0 %10773  ;;  %v11376_v55 = vpop.permute.xlu1 %11375 }
 0xa87   : > { %16464 = vmatprep.subr.bf16.mxu1 %v19768_v18  ;;  %v10810_v32 = vand.u32 4294901760, %v10774_v38  ;;  %v10936_v59 = vand.u32 4294901760, %v19902_v30 }
 0xa89   : > { %v17160_v34 = vpop.eup %17159  ;;  %v19873_v27 = vpack.c.bf16 %v10813_v10, %v10810_v32  ;;  %v19895_v45 = vsub.f32 %v10774_v38, %v10810_v32 }
 0xa8a   : > { %v10758_v11 = vmul.f32 %v17160_v34, %v19766_v12  ;;  %16466 = vmatpush3.bf16.msra.mxu1 %v19768_v18  ;;  %v11374_v39 = vpop.permute.xlu0 %11373 }
 0xa8b   : > { %16468 = vmatprep.subr.bf16.mxu1 %v19798_v43  ;;  %16568 = vmatprep.subr.bf16.mxu0 %v19873_v27  ;;  %v10929_v31 = vand.u32 4294901760, %v19895_v45 }
 0xa8c   : > { %16570 = vmatpush3.bf16.msra.mxu0 %v19873_v27  ;;  %v10786_v60 = vsel %vm21134_vm11, %v10758_v11, 0  ;;  %vm21137_vm11 = vmmov %vm21135_vm12  ;;  %v11409_v11 = vld [vmem:[%s20603_s13 + $0x38] sm:$0xff] }
 0xa8d   : > { %v17162_v49 = vpop.eup %17161  ;;  %16572 = vmatprep.subr.bf16.mxu0 %v19743_v62  ;;  %v19882_v48 = vand.u32 4294901760, %v10786_v60  ;;  %v10930_v54 = vsub.f32 %v19895_v45, %v10929_v31 }
 0xa8e   : > { %v10760_v6 = vmul.f32 %v17162_v49, %v19782_v29  ;;  %16470 = vmatpush3.bf16.msra.mxu1 %v19798_v43 }
 0xa8f   : > { %16472 = vmatprep.subr.bf16.mxu1 %v19825_v22  ;;  %v19888_v12 = vsub.f32 %v10786_v60, %v19882_v48 }
 0xa90   : > { %v10789_v19 = vsel %vm21128_vm6, %v10760_v6, 0  ;;  %vm21138_vm6 = vmmov %vm21137_vm11 }
 0xa91   : > { %v10866_v35 = vand.u32 4294901760, %v19888_v12  ;;  %v19892_v61 = vand.u32 4294901760, %v10789_v19 }
 0xa92   : > { %16474 = vmatpush3.bf16.msra.mxu1 %v19825_v22 }
 0xa93   : > { %16476 = vmatprep.subr.bf16.mxu1 %v19770_v25  ;;  %v10867_v29 = vsub.f32 %v19888_v12, %v10866_v35  ;;  %v19900_v0 = vsub.f32 %v10789_v19, %v19892_v61 }
 0xa95   : > { %15381 = vmatmul.mubr.f32.vlgmr.msra.gmra.mrb[32].mxu1 %v9192_v28  ;;  %v10868_v36 = vand.u32 4294901760, %v10867_v29  ;;  %v10876_v15 = vand.u32 4294901760, %v19900_v0 }
 0xa96   : > { %16478 = vmatpush3.bf16.msra.mxu1 %v19770_v25  ;;  %15399 = vmatprep.mubr.f32.mxu1 %v19849_v21  ;;  %v10937_v25 = vsub.f32 %v19902_v30, %v10936_v59 }
 0xa97   : > { %16480 = vmatprep.subr.bf16.mxu1 %v19789_v53  ;;  %15521 = vmatprep.mubr.f32.mxu0 %v10868_v36  ;;  %v10877_v44 = vsub.f32 %v19900_v0, %v10876_v15 }
 0xa98   : > { %v10938_v2 = vand.u32 4294901760, %v10937_v25 }
 0xa99   : > { %v10878_v37 = vand.u32 4294901760, %v10877_v44 }
 0xa9a   : > { %16482 = vmatpush3.bf16.msra.mxu1 %v19789_v53  ;;  %v10931_v53 = vand.u32 4294901760, %v10930_v54 }
 0xa9b   : > { %16484 = vmatprep.subr.bf16.mxu1 %v19815_v63  ;;  %15522 = vmatmul.mubr.f32.vlgmr.msra.gmra.mrb[28].mxu0 %v10878_v37 }
 0xa9c   : > { %16574 = vmatpush3.bf16.msra.mxu0 %v19743_v62  ;;  %15540 = vmatprep.mubr.f32.mxu0 %v19882_v48  ;;  %v16583_v62 = vpack.c.bf16 %v10938_v2, %v10931_v53 }
 0xa9d   : > { %16576 = vmatprep.subr.bf16.mxu0 %v19818_v5 }
 0xa9e   : > { %16486 = vmatpush3.bf16.msra.mxu1 %v19815_v63 }
 0xa9f   : > { %16488 = vmatprep.subr.bf16.mxu1 %v19833_v52 }
 0xaa0   : > { %16578 = vmatpush3.bf16.msra.mxu0 %v19818_v5 }
 0xaa1   : > { %16580 = vmatprep.subr.bf16.mxu0 %v19835_v33 }
 0xaa2   : > { %16490 = vmatpush3.bf16.msra.mxu1 %v19833_v52 }
 0xaa3   : > { %16492 = vmatprep.subr.bf16.mxu1 %v19760_v46 }
 0xaa4   : > { %16582 = vmatpush3.bf16.msra.mxu0 %v19835_v33 }
 0xaa5   : > { %15400 = vmatmul.mubr.f32.vlgmr.msra.gmra.mrb[32].mxu1 %v19847_v24  ;;  %16584 = vmatprep.subr.bf16.mxu0 %v16583_v62 }
 0xaa6   : > { %16494 = vmatpush3.bf16.msra.mxu1 %v19760_v46  ;;  %15418 = vmatprep.mubr.f32.mxu1 %v19849_v21  ;;  %v16599_v46 = vpack.c.bf16 %v19902_v30, %v19895_v45 }
 0xaa7   : > { %16496 = vmatprep.subr.bf16.mxu1 %v19768_v18 }
 0xaa8   : > { %16586 = vmatpush3.bf16.msra.mxu0 %v16583_v62 }
 0xaa9   : > { %16588 = vmatprep.subr.bf16.mxu0 %v19737_v4 }
 0xaaa   : > { %16498 = vmatpush3.bf16.msra.mxu1 %v19768_v18  ;;  %v11402_v18 = vld [vmem:[%s20603_s13] sm:$0xff] }
 0xaab   : > { %16500 = vmatprep.subr.bf16.mxu1 %v19798_v43  ;;  %15541 = vmatmul.mubr.f32.vlgmr.msra.gmra.mrb[28].mxu0 %v19892_v61 }
 0xaac   : > { %16590 = vmatpush3.bf16.msra.mxu0 %v19737_v4  ;;  %15559 = vmatprep.mubr.f32.mxu0 %v19888_v12  ;;  %v16631_v4 = vpack.c.bf16 %v10936_v59, %v10929_v31 }
 0xaad   : > { %16592 = vmatprep.subr.bf16.mxu0 %v19793_v50 }
 0xaae   : > { %16502 = vmatpush3.bf16.msra.mxu1 %v19798_v43 }
 0xaaf   : > { %16504 = vmatprep.subr.bf16.mxu1 %v19825_v22 }
 0xab0   : > { %16594 = vmatpush3.bf16.msra.mxu0 %v19793_v50 }
 0xab1   : > { %16596 = vmatprep.subr.bf16.mxu0 %v19822_v17 }
 0xab2   : > { %16506 = vmatpush3.bf16.msra.mxu1 %v19825_v22  ;;  %v11403_v22 = vld [vmem:[%s20603_s13 + $0x8] sm:$0xff] }
 0xab3   : > { %v11414_v52 = vsel %vm21136_vm13, %v11403_v22, 0  ;;  %vm21140_vm13 = vmmov %vm21138_vm6 }
 0xab4   : > { %16598 = vmatpush3.bf16.msra.mxu0 %v19822_v17  ;;  %v20002_v21 = vand.u32 4294901760, %v11414_v52  ;;  %v11426_v32 = vsel %vm21140_vm13, %v11407_v23, 0  ;;  %vm21144_vm13 = vcmask 64512  }
 0xab5   : > { %15419 = vmatmul.mubr.f32.vlgmr.msra.gmra.mrb[32].mxu1 %v19847_v24  ;;  %16600 = vmatprep.subr.bf16.mxu0 %v16599_v46  ;;  %v11405_v24 = vld [vmem:[%s20603_s13 + $0x18] sm:$0xff]  ;;  %v20041_v19 = vand.u32 4294901760, %v11426_v32 }
 0xab6   : > { %v11420_v28 = vsel %vm21138_vm6, %v11405_v24, 0  ;;  %v20015_v40 = vsub.f32 %v11414_v52, %v20002_v21 }
 0xab7   : > { %v20017_v8 = vand.u32 4294901760, %v11420_v28  ;;  %v20058_v37 = vsub.f32 %v11426_v32, %v20041_v19 }
 0xab8   : > { %16602 = vmatpush3.bf16.msra.mxu0 %v16599_v46  ;;  %v11513_v60 = vand.u32 4294901760, %v20015_v40 }
 0xab9   : > { %16604 = vmatprep.subr.bf16.mxu0 %v19727_v58  ;;  %v20034_v49 = vsub.f32 %v11420_v28, %v20017_v8 }
 0xaba   : > { %v11514_v31 = vsub.f32 %v20015_v40, %v11513_v60 }
 0xabb   : > { %15560 = vmatmul.mubr.f32.vlgmr.msra.gmra.mrb[28].mxu0 %v19900_v0  ;;  %v11533_v44 = vand.u32 4294901760, %v20034_v49 }
 0xabc   : > { %16606 = vmatpush3.bf16.msra.mxu0 %v19727_v58  ;;  %15578 = vmatprep.mubr.f32.mxu0 %v10866_v35 }
 0xabd   : > { %16608 = vmatprep.subr.bf16.mxu0 %v19784_v1 }
 0xac0   : > { %16610 = vmatpush3.bf16.msra.mxu0 %v19784_v1 }
 0xac1   : > { %16612 = vmatprep.subr.bf16.mxu0 %v19813_v47 }
 0xac4   : > { %16614 = vmatpush3.bf16.msra.mxu0 %v19813_v47 }
 0xac5   : > { %16616 = vmatprep.subr.bf16.mxu0 %v19873_v27 }
 0xac8   : > { %16618 = vmatpush3.bf16.msra.mxu0 %v19873_v27 }
 0xac9   : > { %16620 = vmatprep.subr.bf16.mxu0 %v19739_v3 }
 0xacb   : > { %15579 = vmatmul.mubr.f32.vlgmr.msra.gmra.mrb[28].mxu0 %v10876_v15 }
 0xacc   : > { %16622 = vmatpush3.bf16.msra.mxu0 %v19739_v3  ;;  %15597 = vmatprep.mubr.f32.mxu0 %v19882_v48 }
 0xacd   : > { %16624 = vmatprep.subr.bf16.mxu0 %v19804_v7 }
 0xad0   : > { %16626 = vmatpush3.bf16.msra.mxu0 %v19804_v7 }
 0xad1   : > { %16628 = vmatprep.subr.bf16.mxu0 %v19827_v9 }
 0xad4   : > { %16630 = vmatpush3.bf16.msra.mxu0 %v19827_v9  ;;  %v11404_v9 = vld [vmem:[%s20603_s13 + $0x10] sm:$0xff] }
 0xad5   : > { %16632 = vmatprep.subr.bf16.mxu0 %v16631_v4  ;;  %v11417_v33 = vsel %vm21137_vm11, %v11404_v9, 0  ;;  %vm21141_vm11 = vmmov %vm21138_vm6 }
 0xad6   : > { %v20007_v56 = vand.u32 4294901760, %v11417_v33 }
 0xad8   : > { %16634 = vmatpush3.bf16.msra.mxu0 %v16631_v4  ;;  %v20023_v13 = vsub.f32 %v11417_v33, %v20007_v56 }
 0xad9   : > { %16636 = vmatprep.subr.bf16.mxu0 %v19727_v58 }
 0xada   : > { %v11523_v12 = vand.u32 4294901760, %v20023_v13 }
 0xadb   : > { %15598 = vmatmul.mubr.f32.vlgmr.msra.gmra.mrb[28].mxu0 %v19892_v61 }
 0xadc   : > { %16638 = vmatpush3.bf16.msra.mxu0 %v19727_v58  ;;  %15616 = vmatprep.mubr.f32.mxu0 %v19882_v48  ;;  %v11524_v53 = vsub.f32 %v20023_v13, %v11523_v12 }
 0xadd   : > { %16640 = vmatprep.subr.bf16.mxu0 %v19784_v1 }
 0xae0   : > { %16642 = vmatpush3.bf16.msra.mxu0 %v19784_v1  ;;  %v11411_v1 = vsel %vm21135_vm12, %v11402_v18, 0  ;;  %vm21139_vm12 = vmmov %vm21138_vm6  ;;  %v11534_v18 = vsub.f32 %v20034_v49, %v11533_v44 }
 0xae1   : > { %16644 = vmatprep.subr.bf16.mxu0 %v19813_v47  ;;  %v19982_v50 = vand.u32 4294901760, %v11411_v1  ;;  %v11423_v42 = vsel %vm21139_vm12, %v11406_v20, 0  ;;  %vm21142_vm12 = vcmask 31744  }
 0xae2   : > { %v20025_v10 = vand.u32 4294901760, %v11423_v42  ;;  %v11396_v48 = vsel %vm21142_vm12, %v19660_v16, %v11376_v55  ;;  %vm21143_vm10 = vmmov %vm21142_vm12  ;;  %vm21147_vm12 = vcmask 97280   ;;  %v11535_v28 = vand.u32 4294901760, %v11534_v18 }
 0xae3   : > { %v19985_v43 = vsub.f32 %v11411_v1, %v19982_v50  ;;  %v11395_v6 = vsel %vm21143_vm10, %v19662_v26, %v11374_v39  ;;  %vm21148_vm10 = vmmov %vm21147_vm12 }
 0xae4   : > { %16646 = vmatpush3.bf16.msra.mxu0 %v19813_v47  ;;  %v20045_v45 = vsub.f32 %v11423_v42, %v20025_v10 }
 0xae5   : > { %16648 = vmatprep.subr.bf16.mxu0 %v19873_v27  ;;  %v11503_v63 = vand.u32 4294901760, %v19985_v43 }
 0xae6   : > { %v11543_v2 = vand.u32 4294901760, %v20045_v45 }
 0xae7   : > { %v11504_v5 = vsub.f32 %v19985_v43, %v11503_v63 }
 0xae8   : > { %16650 = vmatpush3.bf16.msra.mxu0 %v19873_v27  ;;  %v11429_v27 = vsel %vm21141_vm11, %v11408_v57, 0  ;;  %vm21145_vm11 = vmmov %vm21138_vm6  ;;  %v11544_v9 = vsub.f32 %v20045_v45, %v11543_v2 }
 0xae9   : > { %v11505_v17 = vand.u32 4294901760, %v11504_v5  ;;  %v20047_v29 = vand.u32 4294901760, %v11429_v27  ;;  %v11432_v0 = vsel %vm21145_vm11, %v11409_v11, 0  ;;  %vm21146_vm6 = vmmov %vm21144_vm13 }
 0xaea   : > { %v20060_v54 = vand.u32 4294901760, %v11432_v0  ;;  %v11545_v23 = vand.u32 4294901760, %v11544_v9 }
 0xaeb   : > { %15617 = vmatmul.mubr.f32.vlgmr.msra.gmra.mrb[28].mxu0 %v19892_v61  ;;  %15623 = vmatprep.mubr.f32.mxu1 %v11505_v17  ;;  %v20067_v62 = vsub.f32 %v11429_v27, %v20047_v29  ;;  %v11525_v17 = vand.u32 4294901760, %v11524_v53  ;;  %v21161_v53 = vld [vmem:[#allocation27_spill] sm:$0xff] }
 0xaec   : > { %v11572_v5 = vsub.f32 %v11432_v0, %v20060_v54 }
 0xaed   : > { %v11563_v52 = vand.u32 4294901760, %v20067_v62 }
 0xaee   : > { %v11573_v42 = vand.u32 4294901760, %v11572_v5 }
 0xaef   : > { %v11564_v57 = vsub.f32 %v20067_v62, %v11563_v52 }
 0xaf1   : > { %v11565_v27 = vand.u32 4294901760, %v11564_v57 }
 0xb88   : > { %v15420_v3 = vpop.f32.mrb[32].mxu1 }
 0xb89   : > { %11383 = vrot.lane.b32.xlu1 %v15420_v3, %s17193_s17  ;;  %v9677_v58 = vpop.f32.mrb[33].mxu1 }
 0xb8a   : > { %11381 = vrot.lane.b32.xlu0 %v9677_v58, %s17193_s17  ;;  %v11515_v58 = vand.u32 4294901760, %v11514_v31  ;;  %s17195_s17 = smov 16  }
 0xbbe   : > { %v15618_v7 = vpop.f32.mrb[28].mxu0 }
 0xbbf   : > { %11391 = vrot.lane.b32.xlu1 %v15618_v7, %s17194_s22  ;;  %v11361_v47 = vpop.f32.mrb[29].mxu0 }
 0xbc0   : > { %11389 = vrot.lane.b32.xlu0 %v11361_v47, %s17194_s22  ;;  %v11553_v47 = vand.u32 4294901760, %v20058_v37  ;;  %s494_s22 = scalar_lea.vmem %s20605_s15, %s13421_s24 }
 0xbc2   : > { %v11554_v39 = vsub.f32 %v20058_v37, %v11553_v47 }
 0xbc4   : > { %v11555_v32 = vand.u32 4294901760, %v11554_v39 }
 0xbfb   : > { %v11384_v38 = vpop.permute.xlu1 %11383 }
 0xbfc   : > { %v11382_v34 = vpop.permute.xlu0 %11381  ;;  %v11398_v35 = vsel %vm21144_vm13, %v11396_v48, %v11384_v38 }
 0xbfd   : > { %v11397_v30 = vsel %vm21146_vm6, %v11395_v6, %v11382_v34  ;;  %v11574_v34 = vsub.f32 %v11572_v5, %v11573_v42  ;;  %vm21149_vm6 = vmmov %vm21145_vm11 }
 0xbfe   : > { %vm21152_vm13 = vmmov %vm21149_vm6 }
 0xbff   : > { %v11575_v11 = vand.u32 4294901760, %v11574_v34  ;;  %vm21154_vm11 = vmmov %vm21149_vm6 }
 0xc31   : > { %v11392_v61 = vpop.permute.xlu1 %11391 }
 0xc32   : > { %v11401_v16 = vsel %vm21147_vm12, %v11398_v35, %v11392_v61  ;;  %v11390_v36 = vpop.permute.xlu0 %11389  ;;  %vm21155_vm12 = vmmov %vm21149_vm6  ;;  %v21156_v35 = vld [vmem:[#allocation8_spill] sm:$0xff] }
 0xc33   : > { %v11438_v26 = vand.u32 4294901760, %v11401_v16  ;;  %v11400_v15 = vsel %vm21148_vm10, %v11397_v30, %v11390_v36  ;;  %v21158_v36 = vld [vmem:[#allocation10_spill] sm:$0xff]  ;;  %vm21160_vm10 = vmmov %vm21149_vm6 }
 0xc34   : > { %v11435_v59 = vand.u32 4294901760, %v11400_v15 }
 0xc35   : > { %v11590_v25 = vsub.f32 %v11401_v16, %v11438_v26 }
 0xc36   : > { %v20069_v46 = vpack.c.bf16 %v11438_v26, %v11435_v59  ;;  %v11583_v4 = vsub.f32 %v11400_v15, %v11435_v59  ;;  %v21159_v15 = vld [vmem:[#allocation11_spill] sm:$0xff] }
 0xc37   : > { %v11591_v3 = vand.u32 4294901760, %v11590_v25 }
 0xc38   : > { %v11584_v1 = vand.u32 4294901760, %v11583_v4  ;;  %16652 = vmatprep.subr.bf16.mxu1 %v20069_v46  ;;  %v16659_v7 = vpack.c.bf16 %v11590_v25, %v11583_v4 }
 0xc39   : > { %16654 = vmatpush3.bf16.msra.mxu1 %v20069_v46  ;;  %v11592_v22 = vsub.f32 %v11590_v25, %v11591_v3 }
 0xc3a   : > { %v11585_v33 = vsub.f32 %v11583_v4, %v11584_v1  ;;  %v16667_v24 = vpack.c.bf16 %v11591_v3, %v11584_v1 }
 0xc3b   : > { %v11593_v20 = vand.u32 4294901760, %v11592_v22 }
 0xc3c   : > { %15624 = vmatmul.mubr.f32.vlgmr.msra.gmra.mrb[34].mxu1 %v11515_v58  ;;  %v11586_v55 = vand.u32 4294901760, %v11585_v33 }
 0xc3d   : > { %15626 = vmatprep.mubr.f32.mxu1 %v11525_v17 }
 0xc3e   : > { %v16655_v38 = vpack.c.bf16 %v11593_v20, %v11586_v55 }
 0xc40   : > { %15627 = vmatmul.mubr.f32.gmra.mrb[36].mxu1 %v11535_v28  ;;  %16656 = vmatprep.subr.bf16.mxu1 %v16655_v38 }
 0xc41   : > { %16658 = vmatpush3.bf16.msra.mxu1 %v16655_v38  ;;  %15629 = vmatprep.mubr.f32.mxu1 %v11545_v23 }
 0xc42   : > { %16660 = vmatprep.subr.bf16.mxu1 %v16659_v7 }
 0xc44   : > { %15630 = vmatmul.mubr.f32.gmra.mrb[38].mxu1 %v11555_v32 }
 0xc45   : > { %15632 = vmatprep.mubr.f32.mxu1 %v11565_v27 }
 0xc48   : > { %15633 = vmatmul.mubr.f32.gmra.mrb[40].mxu1 %v11575_v11 }
 0xc49   : > { %15639 = vmatprep.mubr.f32.mxu1 %v19982_v50 }
 0xc4c   : > { %15640 = vmatmul.mubr.f32.vlgmr.msra.gmra.mrb[34].mxu1 %v20002_v21 }
 0xc4d   : > { %16662 = vmatpush3.bf16.msra.mxu1 %v16659_v7  ;;  %15642 = vmatprep.mubr.f32.mxu1 %v20007_v56 }
 0xc4e   : > { %16664 = vmatprep.subr.bf16.mxu1 %v20069_v46 }
 0xc50   : > { %15643 = vmatmul.mubr.f32.gmra.mrb[36].mxu1 %v20017_v8 }
 0xc51   : > { %15645 = vmatprep.mubr.f32.mxu1 %v20025_v10 }
 0xc54   : > { %15646 = vmatmul.mubr.f32.gmra.mrb[38].mxu1 %v20041_v19 }
 0xc55   : > { %15648 = vmatprep.mubr.f32.mxu1 %v20047_v29 }
 0xc58   : > { %15649 = vmatmul.mubr.f32.gmra.mrb[40].mxu1 %v20060_v54 }
 0xc59   : > { %15655 = vmatprep.mubr.f32.mxu1 %v19985_v43  ;;  %v12202_v43 = vld [vmem:[%s20598_s8] sm:$0xff] }
 0xc5a   : > { %v20147_v61 = vrot.slane %v12202_v43, %v21156_v35  ;;  %v20153_v26 = vrot.slane %v12202_v43, %v21158_v36  ;;  %v20156_v31 = vrot.slane %v12202_v43, %v21159_v15 }
 0xc5c   : > { %15656 = vmatmul.mubr.f32.vlgmr.msra.gmra.mrb[34].mxu1 %v20015_v40 }
 0xc5d   : > { %16666 = vmatpush3.bf16.msra.mxu1 %v20069_v46  ;;  %15658 = vmatprep.mubr.f32.mxu1 %v20023_v13 }
 0xc5e   : > { %16668 = vmatprep.subr.bf16.mxu1 %v16667_v24 }
 0xc60   : > { %15659 = vmatmul.mubr.f32.gmra.mrb[36].mxu1 %v20034_v49  ;;  %v12240_v49 = vld [vmem:[#allocation2 + $0x8] sm:$0xff] }
 0xc61   : > { %15661 = vmatprep.mubr.f32.mxu1 %v20045_v45  ;;  %v12412_v45 = vld [vmem:[#allocation2 + $0x50] sm:$0xff] }
 0xc64   : > { %15662 = vmatmul.mubr.f32.gmra.mrb[38].mxu1 %v20058_v37 }
 0xc65   : > { %15664 = vmatprep.mubr.f32.mxu1 %v20067_v62  ;;  %v21162_v62 = vld [vmem:[#allocation28_spill] sm:$0xff] }
 0xc68   : > { %15665 = vmatmul.mubr.f32.gmra.mrb[40].mxu1 %v11572_v5 }
 0xc69   : > { %15671 = vmatprep.mubr.f32.mxu1 %v11503_v63  ;;  %v12204_v63 = vld [vmem:[#allocation2 + $0x7] sm:$0xff] }
 0xc6c   : > { %15672 = vmatmul.mubr.f32.vlgmr.msra.gmra.mrb[34].mxu1 %v11513_v60  ;;  %v12212_v60 = vsel %vm17465_vm2, %v12204_v63, 0.0 }
 0xc6d   : > { %16670 = vmatpush3.bf16.msra.mxu1 %v16667_v24  ;;  %15674 = vmatprep.mubr.f32.mxu1 %v11523_v12 }
 0xc6e   : > { %16672 = vmatprep.subr.bf16.mxu1 %v20069_v46 }
 0xc70   : > { %15675 = vmatmul.mubr.f32.gmra.mrb[36].mxu1 %v11533_v44 }
 0xc71   : > { %15677 = vmatprep.mubr.f32.mxu1 %v11543_v2  ;;  %v20160_v2 = vrot.slane %v12202_v43, %v21161_v53 }
 0xc74   : > { %15678 = vmatmul.mubr.f32.gmra.mrb[38].mxu1 %v11553_v47 }
 0xc75   : > { %15680 = vmatprep.mubr.f32.mxu1 %v11563_v52 }
 0xc78   : > { %15681 = vmatmul.mubr.f32.gmra.mrb[40].mxu1 %v11573_v42 }
 0xc79   : > { %15687 = vmatprep.mubr.f32.mxu1 %v19982_v50 }
 0xc7c   : > { %15688 = vmatmul.mubr.f32.vlgmr.msra.gmra.mrb[34].mxu1 %v20002_v21 }
 0xc7d   : > { %16674 = vmatpush3.bf16.msra.mxu1 %v20069_v46  ;;  %15690 = vmatprep.mubr.f32.mxu1 %v20007_v56  ;;  %v20163_v46 = vrot.slane %v12202_v43, %v21162_v62 }
 0xc80   : > { %15691 = vmatmul.mubr.f32.gmra.mrb[36].mxu1 %v20017_v8 }
 0xc81   : > { %15693 = vmatprep.mubr.f32.mxu1 %v20025_v10 }
 0xc84   : > { %15694 = vmatmul.mubr.f32.gmra.mrb[38].mxu1 %v20041_v19 }
 0xc85   : > { %15696 = vmatprep.mubr.f32.mxu1 %v20047_v29 }
 0xc88   : > { %15697 = vmatmul.mubr.f32.gmra.mrb[40].mxu1 %v20060_v54 }
 0xc89   : > { %15703 = vmatprep.mubr.f32.mxu1 %v19982_v50 }
 0xc8c   : > { %15704 = vmatmul.mubr.f32.vlgmr.msra.gmra.mrb[34].mxu1 %v20002_v21 }
 0xc8d   : > { %15706 = vmatprep.mubr.f32.mxu1 %v20007_v56  ;;  %v21150_v56 = vld [vmem:[#allocation7_spill] sm:$0xff] }
 0xc8e   : > { %v20134_v40 = vrot.slane %v12202_v43, %v21150_v56 }
 0xc90   : > { %15707 = vmatmul.mubr.f32.gmra.mrb[36].mxu1 %v20017_v8  ;;  %v21151_v8 = vld [vmem:[#allocation6_spill] sm:$0xff]  ;;  %v12224_v12 = vmul.f32 %v20134_v40, %v12212_v60 }
 0xc91   : > { %15709 = vmatprep.mubr.f32.mxu1 %v20025_v10  ;;  %v20137_v13 = vrot.slane %v12202_v43, %v21151_v8 }
 0xc94   : > { %15710 = vmatmul.mubr.f32.gmra.mrb[38].mxu1 %v20041_v19  ;;  %v12252_v19 = vmul.f32 %v20137_v13, %v12240_v49 }
 0xc95   : > { %15712 = vmatprep.mubr.f32.mxu1 %v20047_v29  ;;  %v21157_v29 = vld [vmem:[#allocation19_spill] sm:$0xff] }
 0xc96   : > { %v20150_v0 = vrot.slane %v12202_v43, %v21157_v29  ;;  %v12260_v25 = vadd.f32 %v12252_v19, %v12224_v12  ;;  %v20198_v43 = vld [vmem:[%s20598_s8 + $0x8] ss:$0 sm:$0xff] }
 0xc98   : > { %15713 = vmatmul.mubr.f32.gmra.mrb[40].mxu1 %v20060_v54  ;;  %v20166_v4 = vmul.f32 %v20150_v0, %v12412_v45 }
 0xd5f   : > { %v15705_v50 = vpop.f32.mrb[34].mxu1 }
 0xd60   : > { %12195 = vst.msk [vmem:[#allocation2 + $0x18] sm:$0xff] %vm21149_vm6, %v15705_v50  ;;  %v12148_v21 = vpop.f32.mrb[35].mxu1 }
 0xd61   : > { %12194 = vst.msk [vmem:[#allocation2 + $0x10] sm:$0xff] %vm21152_vm13, %v12148_v21  ;;  %vm21167_vm13 = vmmov %vm21149_vm6 }
 0xd63   : > { %v15708_v48 = vpop.f32.mrb[36].mxu1 }
 0xd64   : > { %12197 = vst.msk [vmem:[#allocation2 + $0x28] sm:$0xff] %vm21154_vm11, %v15708_v48  ;;  %v12160_v6 = vpop.f32.mrb[37].mxu1  ;;  %vm21168_vm11 = vmmov %vm21149_vm6 }
 0xd65   : > { %12196 = vst.msk [vmem:[#allocation2 + $0x20] sm:$0xff] %vm21155_vm12, %v12160_v6  ;;  %vm21195_vm12 = vmmov %vm21149_vm6 }
 0xd67   : > { %v15711_v30 = vpop.f32.mrb[38].mxu1  ;;  %v12242_v16 = vld [vmem:[#allocation2 + $0x18] sm:$0xff] }
 0xd68   : > { %12199 = vst.msk [vmem:[#allocation2 + $0x38] sm:$0xff] %vm21160_vm10, %v15711_v30  ;;  %v12172_v44 = vpop.f32.mrb[39].mxu1  ;;  %v12205_v59 = vld [vmem:[#allocation2 + $0xf] sm:$0xff]  ;;  %v12206_v37 = vld [vmem:[#allocation2 + $0x17] sm:$0xff]  ;;  %v12254_v7 = vmul.f32 %v20137_v13, %v12242_v16  ;;  %v12339_v17 = vmul.f32 %v20147_v61, %v12242_v16  ;;  %v12417_v23 = vmul.f32 %v20150_v0, %v12242_v16  ;;  %vm21196_vm10 = vmmov %vm21149_vm6 }
 0xd69   : > { %v12241_v54 = vld [vmem:[#allocation2 + $0x10] sm:$0xff]  ;;  %12198 = vst.msk [vmem:[#allocation2 + $0x30] sm:$0xff] %vm21149_vm6, %v12172_v44  ;;  %v12213_v58 = vsel %vm17610_vm3, %v12205_v59, 0.0  ;;  %v12214_v1 = vsel %vm17649_vm7, %v12206_v37, 0.0  ;;  %v12305_v20 = vsel %vm17465_vm2, %v12205_v59, 0.0  ;;  %v12306_v42 = vsel %vm17610_vm3, %v12206_v37, 0.0 }
 0xd6a   : > { %v12268_v47 = vld [vmem:[#allocation2 + $0x9] sm:$0xff]  ;;  %v12269_v5 = vld [vmem:[#allocation2 + $0x11] sm:$0xff]  ;;  %v12226_v22 = vmul.f32 %v20134_v40, %v12214_v1  ;;  %v12253_v55 = vmul.f32 %v20137_v13, %v12241_v54  ;;  %v12384_v27 = vsel %vm17465_vm2, %v12206_v37, 0.0  ;;  %v12225_v11 = vmul.f32 %v20134_v40, %v12213_v58 }
 0xd6b   : > { %v12276_v52 = vsel %vm17627_vm4, %v12268_v47, 0.0  ;;  %v12277_v24 = vsel %vm17631_vm5, %v12269_v5, 0.0  ;;  %v15714_v28 = vpop.f32.mrb[40].mxu1  ;;  %v12355_v34 = vsel %vm17627_vm4, %v12269_v5, 0.0  ;;  %v12317_v50 = vmul.f32 %v20156_v31, %v12305_v20  ;;  %v12244_v20 = vld [vmem:[#allocation2 + $0x28] sm:$0xff] }
 0xd6c   : > { %v12288_v39 = vmul.f32 %v20153_v26, %v12276_v52  ;;  %12201 = vst.msk [vmem:[#allocation2 + $0x48] sm:$0xff] %vm21167_vm13, %v15714_v28  ;;  %v12184_v57 = vpop.f32.mrb[41].mxu1  ;;  %v12270_v38 = vld [vmem:[#allocation2 + $0x19] sm:$0xff]  ;;  %v12289_v32 = vmul.f32 %v20153_v26, %v12277_v24  ;;  %v12338_v21 = vmul.f32 %v20147_v61, %v12241_v54  ;;  %v12271_v10 = vld [vmem:[#allocation2 + $0x21] sm:$0xff]  ;;  %v12262_v60 = vadd.f32 %v12254_v7, %v12226_v22 }
 0xd6d   : > { %12200 = vst.msk [vmem:[#allocation2 + $0x40] sm:$0xff] %vm21168_vm11, %v12184_v57  ;;  %v12434_v56 = vsel %vm17627_vm4, %v12270_v38, 0.0  ;;  %v12243_v8 = vld [vmem:[#allocation2 + $0x20] sm:$0xff]  ;;  %v12367_v49 = vmul.f32 %v20160_v2, %v12355_v34  ;;  %v12396_v48 = vmul.f32 %v20163_v46, %v12384_v27  ;;  %v12278_v12 = vsel %vm17901_vm14, %v12270_v38, 0.0 }
 0xd6e   : > { %v12296_v63 = vadd.f32 %v12288_v39, %v12260_v25  ;;  %v12290_v35 = vmul.f32 %v20153_v26, %v12278_v12  ;;  %v12207_v45 = vld [vmem:[#allocation2 + $0x1f] sm:$0xff]  ;;  %v12261_v29 = vadd.f32 %v12253_v55, %v12225_v11  ;;  %v12279_v16 = vsel %vm17907_vm15, %v12271_v10, 0.0  ;;  %v12208_v62 = vld [vmem:[#allocation2 + $0x27] sm:$0xff] }
 0xd6f   : > { %v12446_v36 = vmul.f32 %v20198_v43, %v12434_v56  ;;  %v12356_v15 = vsel %vm17631_vm5, %v12270_v38, 0.0  ;;  %v12255_v44 = vmul.f32 %v20137_v13, %v12243_v8  ;;  %v12291_v59 = vmul.f32 %v20153_v26, %v12279_v16  ;;  %v12246_v47 = vld [vmem:[#allocation2 + $0x38] sm:$0xff] }
 0xd70   : > { %v12325_v19 = vadd.f32 %v12317_v50, %v12296_v63  ;;  %v12297_v54 = vadd.f32 %v12289_v32, %v12261_v29  ;;  %v12318_v25 = vmul.f32 %v20156_v31, %v12306_v42  ;;  %v12340_v53 = vmul.f32 %v20147_v61, %v12243_v8  ;;  %v12272_v63 = vld [vmem:[#allocation2 + $0x29] sm:$0xff] }
 0xd71   : > { %v12298_v58 = vadd.f32 %v12290_v35, %v12262_v60  ;;  %v12357_v1 = vsel %vm17901_vm14, %v12271_v10, 0.0  ;;  %v12385_v7 = vsel %vm17610_vm3, %v12207_v45, 0.0  ;;  %v12215_v5 = vsel %vm17688_vm8, %v12207_v45, 0.0 }
 0xd72   : > { %v12346_v37 = vadd.f32 %v12338_v21, %v12325_v19  ;;  %v12326_v9 = vadd.f32 %v12318_v25, %v12297_v54  ;;  %v12368_v52 = vmul.f32 %v20160_v2, %v12356_v15  ;;  %v12435_v24 = vsel %vm17631_vm5, %v12271_v10, 0.0  ;;  %v20245_v10 = vld [vmem:[%s20599_s9] ss:$0 sm:$0xff]  ;;  %v12273_v19 = vld [vmem:[#allocation2 + $0x31] sm:$0xff] }
 0xd73   : > { %v12418_v28 = vmul.f32 %v20150_v0, %v12243_v8  ;;  %v12227_v55 = vmul.f32 %v20134_v40, %v12215_v5  ;;  %v12307_v39 = vsel %vm17649_vm7, %v12207_v45, 0.0  ;;  %v12216_v42 = vsel %vm17702_vm9, %v12208_v62, 0.0  ;;  %v12245_v54 = vld [vmem:[#allocation2 + $0x30] sm:$0xff] }
 0xd74   : > { %v12375_v22 = vadd.f32 %v12367_v49, %v12346_v37  ;;  %v12347_v38 = vadd.f32 %v12339_v17, %v12326_v9  ;;  %v12397_v32 = vmul.f32 %v20163_v46, %v12385_v7  ;;  %v12228_v34 = vmul.f32 %v20134_v40, %v12216_v42  ;;  %v12210_v42 = vld [vmem:[#allocation2 + $0x37] sm:$0xff] }
 0xd75   : > { %v12447_v33 = vmul.f32 %v20198_v43, %v12435_v24  ;;  %v12263_v27 = vadd.f32 %v12255_v44, %v12227_v55  ;;  %v12256_v11 = vmul.f32 %v20137_v13, %v12244_v20  ;;  %v12319_v50 = vmul.f32 %v20156_v31, %v12307_v39 }
 0xd76   : > { %v12404_v57 = vadd.f32 %v12396_v48, %v12375_v22  ;;  %v12376_v56 = vadd.f32 %v12368_v52, %v12347_v38  ;;  %v12308_v8 = vsel %vm17688_vm8, %v12208_v62, 0.0  ;;  %v12386_v17 = vsel %vm17649_vm7, %v12208_v62, 0.0  ;;  %vm21190_vm7 = vmmov %vm21149_vm6 }
 0xd77   : > { %v12264_v60 = vadd.f32 %v12256_v11, %v12228_v34  ;;  %v12327_v49 = vadd.f32 %v12319_v50, %v12298_v58  ;;  %v12341_v48 = vmul.f32 %v20147_v61, %v12244_v20  ;;  %v12369_v12 = vmul.f32 %v20160_v2, %v12357_v1  ;;  %v21175_v34 = vld [vmem:[#allocation56_spill] sm:$0xff] }
 0xd78   : > { %v12425_v21 = vadd.f32 %v12417_v23, %v12404_v57  ;;  %v12405_v35 = vadd.f32 %v12397_v32, %v12376_v56  ;;  %v12436_v45 = vsel %vm17901_vm14, %v12272_v63, 0.0  ;;  %v12280_v18 = vsel %vm18038_vm1, %v12272_v63, 0.0  ;;  %vm21193_vm14 = vmmov %vm21149_vm6 }
 0xd79   : > { %v12299_v16 = vadd.f32 %v12291_v59, %v12263_v27  ;;  %v12348_v15 = vadd.f32 %v12340_v53, %v12327_v49  ;;  %v12398_v44 = vmul.f32 %v20163_v46, %v12386_v17  ;;  %v12292_v37 = vmul.f32 %v20153_v26, %v12280_v18  ;;  %v21177_v17 = vld [vmem:[#allocation57_spill] sm:$0xff] }
 0xd7a   : > { %v12454_v23 = vadd.f32 %v12446_v36, %v12425_v21  ;;  %v12426_v62 = vadd.f32 %v12418_v28, %v12405_v35  ;;  %v12419_v58 = vmul.f32 %v20150_v0, %v12244_v20  ;;  %v12209_v36 = vld [vmem:[#allocation2 + $0x2f] sm:$0xff]  ;;  %v12281_v6 = vsel %vm18046_vm0, %v12273_v19, 0.0 }
 0xd7b   : > { %v12377_v7 = vadd.f32 %v12369_v12, %v12348_v15  ;;  %v12448_v5 = vmul.f32 %v20198_v43, %v12436_v45  ;;  %v12358_v59 = vsel %vm17907_vm15, %v12272_v63, 0.0  ;;  %v12320_v53 = vmul.f32 %v20156_v31, %v12308_v8 }
 0xd7c   : > { %v12469_v25 = vadd.f32 %v20245_v10, %v12454_v23  ;;  %v12455_v22 = vadd.f32 %v12447_v33, %v12426_v62  ;;  %v12300_v9 = vadd.f32 %v12292_v37, %v12264_v60  ;;  %v12257_v52 = vmul.f32 %v20137_v13, %v12245_v54 }
 0xd7d   : > { %v12293_v24 = vmul.f32 %v20153_v26, %v12281_v6  ;;  %v12406_v20 = vadd.f32 %v12398_v44, %v12377_v7  ;;  %v12328_v28 = vadd.f32 %v12320_v53, %v12299_v16  ;;  %v12342_v55 = vmul.f32 %v20147_v61, %v12245_v54  ;;  %v12247_v53 = vld [vmem:[#allocation2 + $0x40] sm:$0xff] }
 0xd7e   : > { %12485 = vrot.lane.b32.xlu0 %v12469_v25, %s17195_s17  ;;  %v12387_v39 = vsel %vm17688_vm8, %v12209_v36, 0.0  ;;  %v12470_v57 = vadd.f32 %v20245_v10, %v12455_v22  ;;  %v12359_v38 = vsel %vm18038_vm1, %v12273_v19, 0.0  ;;  %v12370_v32 = vmul.f32 %v20160_v2, %v12358_v59  ;;  %vm21191_vm8 = vmmov %vm21149_vm6 }
 0xd7f   : > { %vm21176_vm2 = vnez %v21175_v34  ;;  %v12427_v27 = vadd.f32 %v12419_v58, %v12406_v20  ;;  %v12349_v11 = vadd.f32 %v12341_v48, %v12328_v28  ;;  %v12437_v63 = vsel %vm17907_vm15, %v12273_v19, 0.0  ;;  %v12274_v19 = vld [vmem:[#allocation2 + $0x39] sm:$0xff]  ;;  %vm21194_vm15 = vmmov %vm21149_vm6 }
 0xd80   : > { %v12217_v33 = vsel %vm21176_vm2, %v12209_v36, 0.0  ;;  %12487 = vrot.lane.b32.xlu1 %v12470_v57, %s17195_s17  ;;  %v12399_v21 = vmul.f32 %v20163_v46, %v12387_v39  ;;  %v12420_v56 = vmul.f32 %v20150_v0, %v12245_v54  ;;  %v12309_v8 = vsel %vm17702_vm9, %v12209_v36, 0.0  ;;  %v12275_v54 = vld [vmem:[#allocation2 + $0x41] sm:$0xff] }
 0xd81   : > { %v12229_v50 = vmul.f32 %v20134_v40, %v12217_v33  ;;  %vm21178_vm3 = vnez %v21177_v17  ;;  %v12456_v49 = vadd.f32 %v12448_v5, %v12427_v27  ;;  %v12378_v48 = vadd.f32 %v12370_v32, %v12349_v11  ;;  %v21179_v5 = vld [vmem:[#allocation72_spill] sm:$0xff]  ;;  %v12520_v17 = vld [vmem:[%s20600_s10 + $0x18] sm:$0xff] }
 0xd82   : > { %v12218_v60 = vsel %vm21178_vm3, %v12210_v42, 0.0  ;;  %v12449_v23 = vmul.f32 %v20198_v43, %v12437_v63  ;;  %v12258_v35 = vmul.f32 %v20137_v13, %v12246_v47  ;;  %v12321_v45 = vmul.f32 %v20156_v31, %v12309_v8 }
 0xd83   : > { %v12265_v12 = vadd.f32 %v12257_v52, %v12229_v50  ;;  %v12230_v30 = vmul.f32 %v20134_v40, %v12218_v60  ;;  %v12388_v18 = vsel %vm17702_vm9, %v12210_v42, 0.0  ;;  %v12471_v16 = vadd.f32 %v20245_v10, %v12456_v49  ;;  %v21183_v60 = vld [vmem:[#allocation70_spill] sm:$0xff]  ;;  %vm21192_vm9 = vmmov %vm21149_vm6 }
 0xd84   : > { %v12407_v15 = vadd.f32 %v12399_v21, %v12378_v48  ;;  %v12310_v44 = vsel %vm21176_vm2, %v12210_v42, 0.0  ;;  %v12343_v37 = vmul.f32 %v20147_v61, %v12246_v47  ;;  %v12329_v62 = vadd.f32 %v12321_v45, %v12300_v9  ;;  %v12211_v42 = vld [vmem:[#allocation2 + $0x3f] sm:$0xff] }
 0xd85   : > { %v12301_v25 = vadd.f32 %v12293_v24, %v12265_v12  ;;  %v12371_v58 = vmul.f32 %v20160_v2, %v12359_v38  ;;  %v12438_v36 = vsel %vm18038_vm1, %v12274_v19, 0.0  ;;  %12489 = vrot.lane.b32.xlu0 %v12471_v16, %s17195_s17  ;;  %v12266_v6 = vadd.f32 %v12258_v35, %v12230_v30  ;;  %v21181_v24 = vld [vmem:[#allocation40_spill] sm:$0xff] }
 0xd86   : > { %v12428_v3 = vadd.f32 %v12420_v56, %v12407_v15  ;;  %v12400_v7 = vmul.f32 %v20163_v46, %v12388_v18  ;;  %vm21180_vm4 = vnez %v21179_v5  ;;  %v12350_v22 = vadd.f32 %v12342_v55, %v12329_v62 }
 0xd87   : > { %v12282_v59 = vsel %vm21180_vm4, %v12274_v19, 0.0  ;;  %v12421_v52 = vmul.f32 %v20150_v0, %v12246_v47  ;;  %vm21182_vm5 = vnez %v21181_v24  ;;  %v12450_v28 = vmul.f32 %v20198_v43, %v12438_v36  ;;  %v12304_v47 = vld [vmem:[#allocation2 + $0x47] sm:$0xff] }
 0xd88   : > { %v12294_v9 = vmul.f32 %v20153_v26, %v12282_v59  ;;  %v12283_v20 = vsel %vm21182_vm5, %v12275_v54, 0.0  ;;  %v12457_v29 = vadd.f32 %v12449_v23, %v12428_v3  ;;  %v12360_v39 = vsel %vm18046_vm0, %v12274_v19, 0.0  ;;  %v12333_v19 = vld [vmem:[#allocation2 + $0x48] sm:$0xff] }
 0xd89   : > { %v12322_v57 = vmul.f32 %v20156_v31, %v12310_v44  ;;  %v12379_v38 = vadd.f32 %v12371_v58, %v12350_v22  ;;  %v12259_v32 = vmul.f32 %v20137_v13, %v12247_v53  ;;  %v12295_v55 = vmul.f32 %v20153_v26, %v12283_v20  ;;  %v12354_v26 = vld [vmem:[#allocation2 + $0x49] sm:$0xff] }
 0xd8a   : > { %v12344_v33 = vmul.f32 %v20147_v61, %v12247_v53  ;;  %v12472_v27 = vadd.f32 %v20245_v10, %v12457_v29  ;;  %v12302_v11 = vadd.f32 %v12294_v9, %v12266_v6  ;;  %v12361_v50 = vsel %vm21180_vm4, %v12275_v54, 0.0  ;;  %v12383_v3 = vld [vmem:[#allocation2 + $0x4f] sm:$0xff]  ;;  %v12517_v6 = vld [vmem:[%s20600_s10] sm:$0xff] }
 0xd8b   : > { %v12330_v63 = vadd.f32 %v12322_v57, %v12301_v25  ;;  %v12408_v21 = vadd.f32 %v12400_v7, %v12379_v38  ;;  %v12372_v56 = vmul.f32 %v20160_v2, %v12360_v39  ;;  %v12389_v8 = vsel %vm21176_vm2, %v12211_v42, 0.0  ;;  %v12518_v7 = vld [vmem:[%s20600_s10 + $0x8] sm:$0xff] }
 0xd8c   : > { %vm21184_vm1 = vnez %v21183_v60  ;;  %12491 = vrot.lane.b32.xlu1 %v12472_v27, %s17195_s17  ;;  %v12439_v48 = vsel %vm18046_vm0, %v12275_v54, 0.0  ;;  %v12311_v30 = vsel %vm21178_vm3, %v12211_v42, 0.0  ;;  %v12422_v34 = vmul.f32 %v20150_v0, %v12247_v53 }
 0xd8d   : > { %v12219_v13 = vsel %vm21184_vm1, %v12211_v42, 0.0  ;;  %v12351_v49 = vadd.f32 %v12343_v37, %v12330_v63  ;;  %v12429_v23 = vadd.f32 %v12421_v52, %v12408_v21  ;;  %v12312_v35 = vsel %vm21184_vm1, %v12304_v47, 0.0 }
 0xd8e   : > { %v12231_v12 = vmul.f32 %v20134_v40, %v12219_v13  ;;  %v12323_v45 = vmul.f32 %v20156_v31, %v12311_v30  ;;  %v12401_v16 = vmul.f32 %v20163_v46, %v12389_v8  ;;  %v12362_v1 = vsel %vm21182_vm5, %v12354_v26, 0.0 }
 0xd8f   : > { %v12380_v18 = vadd.f32 %v12372_v56, %v12351_v49  ;;  %v12458_v40 = vadd.f32 %v12450_v28, %v12429_v23  ;;  %v12451_v44 = vmul.f32 %v20198_v43, %v12439_v48  ;;  %v12345_v54 = vmul.f32 %v20147_v61, %v12333_v19  ;;  %v12433_v28 = vld [vmem:[#allocation2 + $0x51] sm:$0xff] }
 0xd90   : > { %v12267_v15 = vadd.f32 %v12259_v32, %v12231_v12  ;;  %v12331_v37 = vadd.f32 %v12323_v45, %v12302_v11  ;;  %v12324_v58 = vmul.f32 %v20156_v31, %v12312_v35  ;;  %v12390_v36 = vsel %vm21178_vm3, %v12304_v47, 0.0  ;;  %v12519_v31 = vld [vmem:[%s20600_s10 + $0x10] sm:$0xff] }
 0xd91   : > { %v12409_v25 = vadd.f32 %v12401_v16, %v12380_v18  ;;  %v12473_v59 = vadd.f32 %v20245_v10, %v12458_v40  ;;  %v12373_v61 = vmul.f32 %v20160_v2, %v12361_v50  ;;  %v12374_v22 = vmul.f32 %v20160_v2, %v12362_v1 }
 0xd92   : > { %v12303_v62 = vadd.f32 %v12295_v55, %v12267_v15  ;;  %v12352_v53 = vadd.f32 %v12344_v33, %v12331_v37  ;;  %v12402_v9 = vmul.f32 %v20163_v46, %v12390_v36  ;;  %v12440_v20 = vsel %vm21180_vm4, %v12354_v26, 0.0 }
 0xd93   : > { %v12430_v52 = vadd.f32 %v12422_v34, %v12409_v25  ;;  %12493 = vrot.lane.b32.xlu0 %v12473_v59, %s17195_s17  ;;  %v12391_v2 = vsel %vm21184_vm1, %v12383_v3, 0.0  ;;  %v12554_v42 = vand.u32 4294901760, %v12517_v6  ;;  %v12557_v57 = vand.u32 4294901760, %v12518_v7 }
 0xd94   : > { %v12332_v29 = vadd.f32 %v12324_v58, %v12303_v62  ;;  %v12381_v39 = vadd.f32 %v12373_v61, %v12352_v53  ;;  %v12560_v55 = vand.u32 4294901760, %v12519_v31  ;;  %v12563_v33 = vand.u32 4294901760, %v12520_v17 }
 0xd95   : > { %v12459_v38 = vadd.f32 %v12451_v44, %v12430_v52  ;;  %v12423_v11 = vmul.f32 %v20150_v0, %v12333_v19  ;;  %v12441_v5 = vsel %vm21182_vm5, %v12433_v28, 0.0  ;;  %v20363_v63 = vpack.c.bf16 %v12557_v57, %v12554_v42 }
 0xd96   : > { %v12353_v32 = vadd.f32 %v12345_v54, %v12332_v29  ;;  %v12410_v27 = vadd.f32 %v12402_v9, %v12381_v39  ;;  %v12403_v21 = vmul.f32 %v20163_v46, %v12391_v2  ;;  %v20367_v56 = vpack.c.bf16 %v12563_v33, %v12560_v55  ;;  %v21185_v9 = vld [vmem:[#allocation66_spill] sm:$0xff] }
 0xd97   : > { %v12474_v50 = vadd.f32 %v20245_v10, %v12459_v38  ;;  %v12452_v60 = vmul.f32 %v20198_v43, %v12440_v20  ;;  %16676 = vmatprep.subr.bf16.mxu0 %v20363_v63  ;;  %v12704_v13 = vsub.f32 %v12517_v6, %v12554_v42  ;;  %v12711_v26 = vsub.f32 %v12518_v7, %v12557_v57  ;;  %v21186_v42 = vld [vmem:[#allocation52_spill] sm:$0xff] }
 0xd98   : > { %v12382_v47 = vadd.f32 %v12374_v22, %v12353_v32  ;;  %v12431_v8 = vadd.f32 %v12423_v11, %v12410_v27  ;;  %v12453_v24 = vmul.f32 %v20198_v43, %v12441_v5  ;;  %16678 = vmatpush3.bf16.msra.mxu0 %v20363_v63  ;;  %v12718_v16 = vsub.f32 %v12519_v31, %v12560_v55  ;;  %v21187_v11 = vld [vmem:[#allocation64_spill] sm:$0xff] }
 0xd99   : > { %12495 = vrot.lane.b32.xlu1 %v12474_v50, %s17195_s17  ;;  %16680 = vmatprep.subr.bf16.mxu0 %v20367_v56  ;;  %v12705_v46 = vand.u32 4294901760, %v12704_v13  ;;  %v12712_v48 = vand.u32 4294901760, %v12711_v26  ;;  %v12725_v15 = vsub.f32 %v12520_v17, %v12563_v33  ;;  %v20386_v62 = vpack.c.bf16 %v12711_v26, %v12704_v13 }
 0xd9a   : > { %v12411_v0 = vadd.f32 %v12403_v21, %v12382_v47  ;;  %v12460_v49 = vadd.f32 %v12452_v60, %v12431_v8  ;;  %v21188_v60 = vld [vmem:[#allocation67_spill] sm:$0xff]  ;;  %vm12528_vm0 = vcmask 261120  }
 0xd9b   : > { %v12706_v19 = vsub.f32 %v12704_v13, %v12705_v46  ;;  %v12713_v23 = vsub.f32 %v12711_v26, %v12712_v48  ;;  %v12726_v1 = vand.u32 4294901760, %v12725_v15  ;;  %v20388_v58 = vpack.c.bf16 %v12725_v15, %v12718_v16 }
 0xd9c   : > { %v12432_v12 = vadd.f32 %v20166_v4, %v12411_v0  ;;  %v12475_v30 = vadd.f32 %v20245_v10, %v12460_v49  ;;  %16682 = vmatpush3.bf16.msra.mxu0 %v20367_v56  ;;  %v12719_v4 = vand.u32 4294901760, %v12718_v16  ;;  %v20394_v3 = vpack.c.bf16 %v12712_v48, %v12705_v46  ;;  %v21189_v49 = vld [vmem:[#allocation53_spill] sm:$0xff] }
 0xd9d   : > { %v12707_v35 = vand.u32 4294901760, %v12706_v19  ;;  %v12714_v43 = vand.u32 4294901760, %v12713_v23  ;;  %v12727_v44 = vsub.f32 %v12725_v15, %v12726_v1 }
 0xd9e   : > { %v12461_v34 = vadd.f32 %v12453_v24, %v12432_v12  ;;  %12497 = vrot.lane.b32.xlu0 %v12475_v30, %s17195_s17  ;;  %v12720_v40 = vsub.f32 %v12718_v16, %v12719_v4  ;;  %v20400_v22 = vpack.c.bf16 %v12726_v1, %v12719_v4 }
 0xd9f   : > { %v20380_v18 = vpack.c.bf16 %v12714_v43, %v12707_v35  ;;  %v12728_v54 = vand.u32 4294901760, %v12727_v44 }
 0xda0   : > { %v12476_v45 = vadd.f32 %v20245_v10, %v12461_v34  ;;  %v12721_v37 = vand.u32 4294901760, %v12720_v40  ;;  %v13415_v10 = vld [vmem:[%s20597_s7] ss:$0 sm:$0xff] }
 0xda1   : > { %16684 = vmatprep.subr.bf16.mxu0 %v20380_v18  ;;  %v16732_v36 = vadd.f32 %v13415_v10, %v19171_v14  ;;  %v16731_v6 = vadd.f32 %v19169_v41, %v13415_v10  ;;  %v20398_v61 = vadd.f32 %v13415_v10, %v19175_v51  ;;  %v20404_v20 = vadd.f32 %v21185_v9, %v13415_v10 }
 0xda2   : > { %12499 = vrot.lane.b32.xlu1 %v12476_v45, %s17195_s17  ;;  %v20384_v25 = vpack.c.bf16 %v12728_v54, %v12721_v37  ;;  %v20410_v57 = vadd.f32 %v13415_v10, %v21186_v42  ;;  %v20417_v5 = vadd.f32 %v21187_v11, %v13415_v10  ;;  %v20423_v13 = vadd.f32 %v13415_v10, %v21188_v60 }
 0xda3   : > { %v4599_v7 = vmul.f32 0.044715, %v16732_v36  ;;  %v4600_v59 = vmul.f32 0.044715, %v16731_v6  ;;  %v4601_v52 = vmul.f32 0.044715, %v20398_v61  ;;  %v20428_v46 = vadd.f32 %v21189_v49, %v13415_v10 }
 0xda4   : > { %v4602_v41 = vmul.f32 0.044715, %v20404_v20  ;;  %v4603_v33 = vmul.f32 0.044715, %v20410_v57  ;;  %v4604_v21 = vmul.f32 0.044715, %v20417_v5 }
 0xda5   : > { %v4607_v53 = vmul.f32 %v16732_v36, %v4599_v7  ;;  %v4608_v31 = vmul.f32 %v16731_v6, %v4600_v59  ;;  %v4609_v28 = vmul.f32 %v20398_v61, %v4601_v52  ;;  %v4605_v12 = vmul.f32 0.044715, %v20423_v13 }
 0xda6   : > { %v4610_v38 = vmul.f32 %v20404_v20, %v4602_v41  ;;  %v4611_v47 = vmul.f32 %v20410_v57, %v4603_v33  ;;  %v4612_v24 = vmul.f32 %v20417_v5, %v4604_v21  ;;  %v4606_v35 = vmul.f32 0.044715, %v20428_v46 }
 0xda7   : > { %v4615_v17 = vmul.f32 %v16732_v36, %v4607_v53  ;;  %v4616_v14 = vmul.f32 %v16731_v6, %v4608_v31  ;;  %v4617_v51 = vmul.f32 %v20398_v61, %v4609_v28  ;;  %v4591_v43 = vmul.f32 0.5, %v16732_v36 }
 0xda8   : > { %v4618_v27 = vmul.f32 %v20404_v20, %v4610_v38  ;;  %v4619_v0 = vmul.f32 %v20410_v57, %v4611_v47  ;;  %v4620_v34 = vmul.f32 %v20417_v5, %v4612_v24  ;;  %v4613_v45 = vmul.f32 %v20423_v13, %v4605_v12 }
 0xda9   : > { %v4623_v29 = vadd.f32 %v16732_v36, %v4615_v17  ;;  %v4624_v2 = vadd.f32 %v16731_v6, %v4616_v14  ;;  %v4625_v55 = vadd.f32 %v20398_v61, %v4617_v51  ;;  %v4614_v44 = vmul.f32 %v20428_v46, %v4606_v35 }
 0xdaa   : > { %v4626_v8 = vadd.f32 %v20404_v20, %v4618_v27  ;;  %v4627_v23 = vadd.f32 %v20410_v57, %v4619_v0  ;;  %v4592_v54 = vmul.f32 0.5, %v16731_v6  ;;  %v4628_v10 = vadd.f32 %v20417_v5, %v4620_v34 }
 0xdab   : > { %v4631_v39 = vmul.f32 0.7978846, %v4623_v29  ;;  %v4632_v32 = vmul.f32 0.7978846, %v4624_v2  ;;  %v4633_v50 = vmul.f32 0.7978846, %v4625_v55  ;;  %v4621_v7 = vmul.f32 %v20423_v13, %v4613_v45 }
 0xdac   : > { %v4634_v48 = vmul.f32 0.7978846, %v4626_v8  ;;  %v4635_v1 = vmul.f32 0.7978846, %v4627_v23  ;;  %v4622_v52 = vmul.f32 %v20428_v46, %v4614_v44  ;;  %v4636_v6 = vmul.f32 0.7978846, %v4628_v10 }
 0xdad   : > { %17163 = vtanh.f32 %v4631_v39  ;;  %v4593_v28 = vmul.f32 0.5, %v20398_v61  ;;  %v4629_v41 = vadd.f32 %v20423_v13, %v4621_v7  ;;  %v4594_v60 = vmul.f32 0.5, %v20404_v20 }
 0xdae   : > { %17165 = vtanh.f32 %v4632_v32  ;;  %v4630_v33 = vadd.f32 %v20428_v46, %v4622_v52  ;;  %v4596_v10 = vmul.f32 0.5, %v20417_v5  ;;  %v4597_v5 = vmul.f32 0.5, %v20423_v13 }
 0xdaf   : > { %17167 = vtanh.f32 %v4633_v50  ;;  %v4637_v11 = vmul.f32 0.7978846, %v4629_v41 }
 0xdb0   : > { %17169 = vtanh.f32 %v4634_v48 }
 0xdb1   : > { %17171 = vtanh.f32 %v4635_v1 }
 0xdb2   : > { %17173 = vtanh.f32 %v4636_v6 }
 0xdb3   : > { %17175 = vtanh.f32 %v4637_v11 }
 0xdb7   : > { %v17164_v26 = vpop.eup %17163 }
 0xdb8   : > { %v4647_v30 = vadd.f32 1.0, %v17164_v26  ;;  %v17166_v19 = vpop.eup %17165  ;;  %v4638_v26 = vmul.f32 0.7978846, %v4630_v33 }
 0xdb9   : > { %v4648_v15 = vadd.f32 1.0, %v17166_v19  ;;  %v17168_v40 = vpop.eup %17167 }
 0xdba   : > { %v4655_v16 = vmul.f32 %v4647_v30, %v4591_v43  ;;  %v4649_v17 = vadd.f32 1.0, %v17168_v40  ;;  %v17170_v39 = vpop.eup %17169  ;;  %17177 = vtanh.f32 %v4638_v26 }
 0xdbb   : > { %v4656_v53 = vmul.f32 %v4648_v15, %v4592_v54  ;;  %v4650_v27 = vadd.f32 1.0, %v17170_v39  ;;  %v17172_v24 = vpop.eup %17171 }
 0xdbc   : > { %v4657_v42 = vmul.f32 %v4649_v17, %v4593_v28  ;;  %v4651_v34 = vadd.f32 1.0, %v17172_v24  ;;  %v17174_v45 = vpop.eup %17173 }
 0xdbd   : > { %v4658_v48 = vmul.f32 %v4650_v27, %v4594_v60  ;;  %v4652_v44 = vadd.f32 1.0, %v17174_v45 }
 0xdf0   : > { %v12486_v4 = vpop.permute.xlu0 %12485 }
 0xdf1   : > { %v12509_v37 = vsel %vm21190_vm7, %v4655_v16, %v12486_v4  ;;  %v4595_v16 = vmul.f32 0.5, %v20410_v57 }
 0xdf2   : > { %v12530_v36 = vsel %vm12528_vm0, %v12509_v37, 0  ;;  %v12488_v31 = vpop.permute.xlu1 %12487 }
 0xdf3   : > { %v20440_v59 = vand.u32 4294901760, %v12530_v36  ;;  %v12510_v14 = vsel %vm21191_vm8, %v4656_v53, %v12488_v31  ;;  %v4659_v1 = vmul.f32 %v4651_v34, %v4595_v16  ;;  %v4660_v53 = vmul.f32 %v4652_v44, %v4596_v10 }
 0xdf4   : > { %v12533_v29 = vsel %vm12528_vm0, %v12510_v14, 0 }
 0xdf5   : > { %v20444_v9 = vsub.f32 %v12530_v36, %v20440_v59  ;;  %v20450_v2 = vand.u32 4294901760, %v12533_v29 }
 0xdf7   : > { %v12624_v51 = vand.u32 4294901760, %v20444_v9  ;;  %v20454_v38 = vsub.f32 %v12533_v29, %v20450_v2  ;;  %v12490_v32 = vpop.permute.xlu0 %12489 }
 0xdf8   : > { %v12511_v61 = vsel %vm21192_vm9, %v4657_v42, %v12490_v32 }
 0xdf9   : > { %v12625_v55 = vsub.f32 %v20444_v9, %v12624_v51  ;;  %v12634_v50 = vand.u32 4294901760, %v20454_v38  ;;  %v12536_v47 = vsel %vm12528_vm0, %v12511_v61, 0  ;;  %v4598_v61 = vmul.f32 0.5, %v20428_v46 }
 0xdfa   : > { %v20463_v8 = vand.u32 4294901760, %v12536_v47 }
 0xdfb   : > { %v12626_v21 = vand.u32 4294901760, %v12625_v55  ;;  %v12635_v0 = vsub.f32 %v20454_v38, %v12634_v50 }
 0xdfc   : > { %v20470_v49 = vsub.f32 %v12536_v47, %v20463_v8 }
 0xdfd   : > { %15723 = vmatprep.mubr.f32.mxu0 %v12626_v21  ;;  %v12636_v30 = vand.u32 4294901760, %v12635_v0 }
 0xdfe   : > { %v12492_v12 = vpop.permute.xlu1 %12491  ;;  %v12644_v23 = vand.u32 4294901760, %v20470_v49 }
 0xdff   : > { %v12512_v19 = vsel %vm21193_vm14, %v4658_v48, %v12492_v12  ;;  %15724 = vmatmul.mubr.f32.vlgmr.msra.gmra.mrb[30].mxu0 %v12636_v30 }
 0xe00   : > { %v12539_v20 = vsel %vm12528_vm0, %v12512_v19, 0  ;;  %v12645_v43 = vsub.f32 %v20470_v49, %v12644_v23  ;;  %16686 = vmatpush3.bf16.msra.mxu0 %v20380_v18  ;;  %v17176_v18 = vpop.eup %17175 }
 0xe01   : > { %v20475_v35 = vand.u32 4294901760, %v12539_v20  ;;  %16688 = vmatprep.subr.bf16.mxu0 %v20384_v25  ;;  %v17178_v17 = vpop.eup %17177  ;;  %v4653_v14 = vadd.f32 1.0, %v17176_v18 }
 0xe02   : > { %v12646_v4 = vand.u32 4294901760, %v12645_v43  ;;  %v4654_v39 = vadd.f32 1.0, %v17178_v17 }
 0xe03   : > { %v20484_v15 = vsub.f32 %v12539_v20, %v20475_v35  ;;  %v4661_v42 = vmul.f32 %v4653_v14, %v4597_v5 }
 0xe04   : > { %15726 = vmatprep.mubr.f32.mxu0 %v12646_v4  ;;  %16690 = vmatpush3.bf16.msra.mxu0 %v20384_v25  ;;  %v4662_v21 = vmul.f32 %v4654_v39, %v4598_v61 }
 0xe05   : > { %v12494_v40 = vpop.permute.xlu0 %12493  ;;  %v12654_v37 = vand.u32 4294901760, %v20484_v15  ;;  %16692 = vmatprep.subr.bf16.mxu0 %v20386_v62 }
 0xe06   : > { %v12513_v54 = vsel %vm21194_vm15, %v4659_v1, %v12494_v40 }
 0xe07   : > { %v12542_v57 = vsel %vm12528_vm0, %v12513_v54, 0  ;;  %v12655_v7 = vsub.f32 %v20484_v15, %v12654_v37 }
 0xe08   : > { %v20495_v36 = vand.u32 4294901760, %v12542_v57 }
 0xe09   : > { %v12656_v31 = vand.u32 4294901760, %v12655_v7 }
 0xe0a   : > { %v20498_v25 = vsub.f32 %v12542_v57, %v20495_v36 }
 0xe0b   : > { %v12496_v52 = vpop.permute.xlu1 %12495  ;;  %15727 = vmatmul.mubr.f32.gmra.mrb[32].mxu0 %v12656_v31 }
 0xe0c   : > { %v12514_v6 = vsel %vm21195_vm12, %v4660_v53, %v12496_v52  ;;  %v12664_v28 = vand.u32 4294901760, %v20498_v25 }
 0xe0d   : > { %v12545_v29 = vsel %vm12528_vm0, %v12514_v6, 0 }
 0xe0e   : > { %v20504_v41 = vand.u32 4294901760, %v12545_v29  ;;  %v12665_v32 = vsub.f32 %v20498_v25, %v12664_v28 }
 0xe10   : > { %v12673_v55 = vsub.f32 %v12545_v29, %v20504_v41  ;;  %v12498_v33 = vpop.permute.xlu0 %12497  ;;  %v12666_v11 = vand.u32 4294901760, %v12665_v32 }
 0xe11   : > { %v12515_v27 = vsel %vm21196_vm10, %v4661_v42, %v12498_v33 }
 0xe12   : > { %v12548_v47 = vsel %vm12528_vm0, %v12515_v27, 0  ;;  %v12674_v13 = vand.u32 4294901760, %v12673_v55  ;;  %15729 = vmatprep.mubr.f32.mxu0 %v12666_v11 }
 0xe13   : > { %v20511_v60 = vand.u32 4294901760, %v12548_v47 }
 0xe14   : > { %v12500_v26 = vpop.permute.xlu1 %12499  ;;  %v12675_v24 = vsub.f32 %v12673_v55, %v12674_v13 }
 0xe15   : > { %v12516_v0 = vsel %vm21149_vm6, %v4662_v21, %v12500_v26  ;;  %v12683_v48 = vsub.f32 %v12548_v47, %v20511_v60 }
 0xe16   : > { %v12551_v12 = vsel %vm12528_vm0, %v12516_v0, 0  ;;  %v12676_v46 = vand.u32 4294901760, %v12675_v24 }
 0xe17   : > { %v20516_v30 = vand.u32 4294901760, %v12551_v12  ;;  %v12684_v19 = vand.u32 4294901760, %v12683_v48 }
 0xe18   : > { %15730 = vmatmul.mubr.f32.gmra.mrb[34].mxu0 %v12676_v46 }
 0xe19   : > { %v12693_v20 = vsub.f32 %v12551_v12, %v20516_v30  ;;  %v12685_v34 = vsub.f32 %v12683_v48, %v12684_v19 }
 0xe1b   : > { %v12694_v43 = vand.u32 4294901760, %v12693_v20  ;;  %v12686_v45 = vand.u32 4294901760, %v12685_v34 }
 0xe1d   : > { %v12695_v16 = vsub.f32 %v12693_v20, %v12694_v43  ;;  %15732 = vmatprep.mubr.f32.mxu0 %v12686_v45 }
 0xe1f   : > { %v12696_v4 = vand.u32 4294901760, %v12695_v16 }
 0xe21   : > { %15733 = vmatmul.mubr.f32.gmra.mrb[36].mxu0 %v12696_v4 }
 0xe22   : > { %15743 = vmatprep.mubr.f32.mxu0 %v20440_v59 }
 0xe25   : > { %15744 = vmatmul.mubr.f32.vlgmr.msra.gmra.mrb[30].mxu0 %v20450_v2 }
 0xe26   : > { %15746 = vmatprep.mubr.f32.mxu0 %v20463_v8  ;;  %16694 = vmatpush3.bf16.msra.mxu0 %v20386_v62 }
 0xe27   : > { %16696 = vmatprep.subr.bf16.mxu0 %v20388_v58 }
 0xe29   : > { %15747 = vmatmul.mubr.f32.gmra.mrb[32].mxu0 %v20475_v35 }
 0xe2a   : > { %15749 = vmatprep.mubr.f32.mxu0 %v20495_v36  ;;  %16698 = vmatpush3.bf16.msra.mxu0 %v20388_v58 }
 0xe2b   : > { %16700 = vmatprep.subr.bf16.mxu0 %v20363_v63 }
 0xe2d   : > { %15750 = vmatmul.mubr.f32.gmra.mrb[34].mxu0 %v20504_v41 }
 0xe2e   : > { %15752 = vmatprep.mubr.f32.mxu0 %v20511_v60 }
 0xe31   : > { %15753 = vmatmul.mubr.f32.gmra.mrb[36].mxu0 %v20516_v30 }
 0xe32   : > { %15763 = vmatprep.mubr.f32.mxu0 %v20444_v9 }
 0xe35   : > { %15764 = vmatmul.mubr.f32.vlgmr.msra.gmra.mrb[30].mxu0 %v20454_v38 }
 0xe36   : > { %15766 = vmatprep.mubr.f32.mxu0 %v20470_v49  ;;  %16702 = vmatpush3.bf16.msra.mxu0 %v20363_v63 }
 0xe37   : > { %16704 = vmatprep.subr.bf16.mxu0 %v20367_v56 }
 0xe39   : > { %15767 = vmatmul.mubr.f32.gmra.mrb[32].mxu0 %v20484_v15 }
 0xe3a   : > { %15769 = vmatprep.mubr.f32.mxu0 %v20498_v25  ;;  %16706 = vmatpush3.bf16.msra.mxu0 %v20367_v56 }
 0xe3b   : > { %16708 = vmatprep.subr.bf16.mxu0 %v20394_v3 }
 0xe3d   : > { %15770 = vmatmul.mubr.f32.gmra.mrb[34].mxu0 %v12673_v55 }
 0xe3e   : > { %15772 = vmatprep.mubr.f32.mxu0 %v12683_v48 }
 0xe41   : > { %15773 = vmatmul.mubr.f32.gmra.mrb[36].mxu0 %v12693_v20 }
 0xe42   : > { %15783 = vmatprep.mubr.f32.mxu0 %v12624_v51 }
 0xe45   : > { %15784 = vmatmul.mubr.f32.vlgmr.msra.gmra.mrb[30].mxu0 %v12634_v50 }
 0xe46   : > { %15786 = vmatprep.mubr.f32.mxu0 %v12644_v23  ;;  %16710 = vmatpush3.bf16.msra.mxu0 %v20394_v3 }
 0xe47   : > { %16712 = vmatprep.subr.bf16.mxu0 %v20400_v22 }
 0xe49   : > { %15787 = vmatmul.mubr.f32.gmra.mrb[32].mxu0 %v12654_v37 }
 0xe4a   : > { %15789 = vmatprep.mubr.f32.mxu0 %v12664_v28  ;;  %16714 = vmatpush3.bf16.msra.mxu0 %v20400_v22 }
 0xe4b   : > { %16716 = vmatprep.subr.bf16.mxu0 %v20363_v63 }
 0xe4d   : > { %15790 = vmatmul.mubr.f32.gmra.mrb[34].mxu0 %v12674_v13 }
 0xe4e   : > { %15792 = vmatprep.mubr.f32.mxu0 %v12684_v19 }
 0xe51   : > { %15793 = vmatmul.mubr.f32.gmra.mrb[36].mxu0 %v12694_v43 }
 0xe52   : > { %15803 = vmatprep.mubr.f32.mxu0 %v20440_v59 }
 0xe55   : > { %15804 = vmatmul.mubr.f32.vlgmr.msra.gmra.mrb[30].mxu0 %v20450_v2 }
 0xe56   : > { %15806 = vmatprep.mubr.f32.mxu0 %v20463_v8  ;;  %16718 = vmatpush3.bf16.msra.mxu0 %v20363_v63  ;;  %v13418_v63 = vld [vmem:[%s20601_s11] ss:$0 sm:$0xff] }
 0xe57   : > { %16720 = vmatprep.subr.bf16.mxu0 %v20367_v56 }
 0xe59   : > { %15807 = vmatmul.mubr.f32.gmra.mrb[32].mxu0 %v20475_v35 }
 0xe5a   : > { %15809 = vmatprep.mubr.f32.mxu0 %v20495_v36  ;;  %16722 = vmatpush3.bf16.msra.mxu0 %v20367_v56 }
 0xe5d   : > { %15810 = vmatmul.mubr.f32.gmra.mrb[34].mxu0 %v20504_v41 }
 0xe5e   : > { %15812 = vmatprep.mubr.f32.mxu0 %v20511_v60 }
 0xe61   : > { %15813 = vmatmul.mubr.f32.gmra.mrb[36].mxu0 %v20516_v30 }
 0xe62   : > { %15823 = vmatprep.mubr.f32.mxu0 %v20440_v59 }
 0xe65   : > { %15824 = vmatmul.mubr.f32.vlgmr.msra.gmra.mrb[30].mxu0 %v20450_v2 }
 0xe66   : > { %15826 = vmatprep.mubr.f32.mxu0 %v20463_v8 }
 0xe69   : > { %15827 = vmatmul.mubr.f32.gmra.mrb[32].mxu0 %v20475_v35 }
 0xe6a   : > { %15829 = vmatprep.mubr.f32.mxu0 %v20495_v36 }
 0xe6d   : > { %15830 = vmatmul.mubr.f32.gmra.mrb[34].mxu0 %v20504_v41 }
 0xe6e   : > { %15832 = vmatprep.mubr.f32.mxu0 %v20511_v60 }
 0xe71   : > { %15833 = vmatmul.mubr.f32.gmra.mrb[36].mxu0 %v20516_v30 }
 0xf38   : > { %v15825_v56 = vpop.f32.mrb[30].mxu0 }
 0xf39   : > { %v16739_v62 = vadd.f32 %v15825_v56, %v13418_v63  ;;  %v13293_v58 = vpop.f32.mrb[31].mxu0 }
 0xf3a   : > { %v16740_v3 = vadd.f32 %v13418_v63, %v13293_v58 }
 0xf3b   : > { %13340 = vst.msk [vmem:[%s494_s22 + $0x8] sm:$0xff] %vm12528_vm0, %v16739_v62 }
 0xf3c   : > { %13339 = vst.msk [vmem:[%s494_s22] sm:$0xff] %vm12528_vm0, %v16740_v3  ;;  %v15828_v22 = vpop.f32.mrb[32].mxu0 }
 0xf3d   : > { %v16741_v59 = vadd.f32 %v15828_v22, %v13418_v63  ;;  %v13305_v9 = vpop.f32.mrb[33].mxu0 }
 0xf3e   : > { %v16742_v2 = vadd.f32 %v13418_v63, %v13305_v9 }
 0xf3f   : > { %13342 = vst.msk [vmem:[%s494_s22 + $0x18] sm:$0xff] %vm12528_vm0, %v16741_v59 }
 0xf40   : > { %13341 = vst.msk [vmem:[%s494_s22 + $0x10] sm:$0xff] %vm12528_vm0, %v16742_v2  ;;  %v15831_v51 = vpop.f32.mrb[34].mxu0 }
 0xf41   : > { %v16743_v38 = vadd.f32 %v15831_v51, %v13418_v63  ;;  %v13317_v50 = vpop.f32.mrb[35].mxu0 }
 0xf42   : > { %v16744_v8 = vadd.f32 %v13418_v63, %v13317_v50 }
 0xf43   : > { %13344 = vst.msk [vmem:[%s494_s22 + $0x28] sm:$0xff] %vm12528_vm0, %v16743_v38 }
 0xf44   : > { %13343 = vst.msk [vmem:[%s494_s22 + $0x20] sm:$0xff] %vm12528_vm0, %v16744_v8  ;;  %v15834_v49 = vpop.f32.mrb[36].mxu0 }
 0xf45   : > { %v16745_v23 = vadd.f32 %v15834_v49, %v13418_v63  ;;  %v13329_v35 = vpop.f32.mrb[37].mxu0 }
 0xf46   : > { %v16746_v15 = vadd.f32 %v13418_v63, %v13329_v35 }
 0xf47   : > { %13346 = vst.msk [vmem:[%s494_s22 + $0x38] sm:$0xff] %vm12528_vm0, %v16745_v23 }
 0xf48   : > { %13345 = vst.msk [vmem:[%s494_s22 + $0x30] sm:$0xff] %vm12528_vm0, %v16746_v15 }
 0xf49 PF: > { %s25_s18 = sadd.s32 1, %s17186_s18  }
 0xf4a   : > { %p22_p4 = scmp.ge.s32.totalorder %s25_s18, 4  }
 0xf4c   :  { %24 = sbr.rel (!%p22_p4) target bundleno = 1 (0x1), region = 110 }

</bundles_post_ra>
